<compile_context>
chip_gen: v6e
topology: v6e:2x2x1
jax: 0.10.0
libtpu: 0.0.40
codegen_flags: <defaults>
</compile_context>

<pallas_src>
import functools
import math

import jax
import jax.numpy as jnp
from jax.experimental import pallas as pl
from jax.experimental.pallas import tpu as pltpu


# ----------------------------- helpers ---------------------------------------

def _layernorm(x, w, b, eps=1e-5):
    """f32 LayerNorm over the last axis (matches nn.LayerNorm defaults)."""
    mu = jnp.mean(x, axis=-1, keepdims=True)
    xc = x - mu
    var = jnp.mean(xc * xc, axis=-1, keepdims=True)
    return xc * jax.lax.rsqrt(var + eps) * w + b


_ERF_P = 0.3275911
_ERF_A = (0.254829592, -0.284496736, 1.421413741, -1.453152027, 1.061405429)


def _erf(x):
    """erf via Abramowitz-Stegun 7.1.26 (|err| <= 1.5e-7); VPU/EUP ops only."""
    ax = jnp.abs(x)
    t = 1.0 / (1.0 + _ERF_P * ax)
    a1, a2, a3, a4, a5 = _ERF_A
    poly = t * (a1 + t * (a2 + t * (a3 + t * (a4 + t * a5))))
    y = 1.0 - poly * jnp.exp(-ax * ax)
    return jnp.where(x < 0.0, -y, y)


def _gelu_exact(x):
    """Exact (erf-based) GELU, matching the nn.GELU default to ~1e-7."""
    return 0.5 * x * (1.0 + _erf(x * (1.0 / math.sqrt(2.0))))


# ----------------------------- kernel ---------------------------------------

def block_kernel(x_ref,
                 n1w_ref, n1b_ref,
                 wq_ref, wk_ref, wv_ref,
                 wproj_ref, bproj_ref,
                 n2w_ref, n2b_ref,
                 wfc1_ref, bfc1_ref, wfc2_ref, bfc2_ref,
                 out_ref,
                 o_scr,            # VMEM scratch: (TB*N, C) in mxu_dtype
                 *, num_heads, mxu_dtype):
    tb, n_seq, c = x_ref.shape
    hd = c // num_heads
    scale = 1.0 / math.sqrt(hd)

    # (TB, N, C) -> (TB*N, C): merges leading/major dims only, lane-dense.
    x = x_ref[...].astype(jnp.float32).reshape(tb * n_seq, c)

    # ---- y = Attention(norm1(x)) ----
    xn = _layernorm(x, n1w_ref[...], n1b_ref[...])
    xn_m = xn.astype(mxu_dtype)

    # Full-width K=C projections (qkv_bias=False in the module).
    q = jnp.dot(xn_m, wq_ref[...], preferred_element_type=jnp.float32)
    k = jnp.dot(xn_m, wk_ref[...], preferred_element_type=jnp.float32)
    v = jnp.dot(xn_m, wv_ref[...], preferred_element_type=jnp.float32)

    q3 = q.astype(mxu_dtype).reshape(tb, n_seq, c)
    k3 = k.astype(mxu_dtype).reshape(tb, n_seq, c)
    v3 = v.astype(mxu_dtype).reshape(tb, n_seq, c)

    # Per-head score/softmax/PV, batched over TB with single-batch-dim einsums
    # (the batched dot_general pattern Mosaic supports).  Each head's output is
    # written into its channel slice of the VMEM scratch so the heads are
    # reassembled WITHOUT any K=32 projections or concatenates; the output
    # projection below is one full K=C matmul.
    for h in range(num_heads):                      # static, small unroll
        lo = h * hd
        qh = q3[:, :, lo:lo + hd]                   # (TB, N, hd)
        kh = k3[:, :, lo:lo + hd]
        vh = v3[:, :, lo:lo + hd]
        s = jnp.einsum('bqd,bkd->bqk', qh, kh,
                       preferred_element_type=jnp.float32) * scale   # (TB,N,N) f32
        s = s - jnp.max(s, axis=-1, keepdims=True)
        p = jnp.exp(s)
        p = p * pl.reciprocal(jnp.sum(p, axis=-1, keepdims=True), approx=True)
        oh = jnp.einsum('bqk,bkd->bqd', p.astype(mxu_dtype), vh,
                        preferred_element_type=jnp.float32)          # (TB,N,hd)
        o_scr[:, lo:lo + hd] = oh.reshape(tb * n_seq, hd).astype(mxu_dtype)

    # Single K=C output projection (bias added in f32).
    y = jnp.dot(o_scr[...], wproj_ref[...],
                preferred_element_type=jnp.float32) + bproj_ref[...]

    x1 = x + y                                      # residual 1 (f32)

    # ---- x1 + MLP(norm2(x1)) ----
    x1n = _layernorm(x1, n2w_ref[...], n2b_ref[...])
    h1 = jnp.dot(x1n.astype(mxu_dtype), wfc1_ref[...],
                 preferred_element_type=jnp.float32) + bfc1_ref[...]
    h1 = _gelu_exact(h1)                            # exact GELU (nn.GELU default)
    h2 = jnp.dot(h1.astype(mxu_dtype), wfc2_ref[...],
                 preferred_element_type=jnp.float32) + bfc2_ref[...]

    out_ref[...] = (x1 + h2).reshape(tb, n_seq, c).astype(out_ref.dtype)


# ----------------------------- wrapper ---------------------------------------

def _default_batch_tile(batch, seq_len, target_rows=512):
    """Largest batch tile whose (TB*N) slab is <= target rows, preferring an
    even grid length (v7x has 2 TensorCores sharing the 'parallel' axis)."""
    divisors = [d for d in range(1, batch + 1) if batch % d == 0]
    fitting = [d for d in divisors if d * seq_len <= target_rows]
    tb = max(fitting) if fitting else 1
    if (batch // tb) % 2 == 1:
        even = [d for d in divisors
                if d < tb and (batch // d) % 2 == 0 and 2 * d >= tb]
        if even:
            tb = max(even)
    return tb


def block_forward(x, params, *, num_heads, batch_tile=None,
                  mxu_dtype=jnp.bfloat16):
    B, N, C = x.shape
    assert C % num_heads == 0
    hidden = params["wfc1"].shape[1]
    hd = C // num_heads
    tb = batch_tile if batch_tile is not None else _default_batch_tile(B, N)
    assert B % tb == 0, "batch must be divisible by batch_tile"

    # MXU-fed weights in mxu_dtype (bf16 halves weight DMA + VMEM residency);
    # LayerNorm params and biases stay f32 (added on the VPU in f32).
    wq = params["wq"].astype(mxu_dtype)
    wk = params["wk"].astype(mxu_dtype)
    wv = params["wv"].astype(mxu_dtype)
    wproj = params["wproj"].astype(mxu_dtype)
    wfc1 = params["wfc1"].astype(mxu_dtype)
    wfc2 = params["wfc2"].astype(mxu_dtype)

    kernel = functools.partial(block_kernel, num_heads=num_heads,
                               mxu_dtype=mxu_dtype)

    def full(arr):
        nd = arr.ndim
        return pl.BlockSpec(arr.shape, lambda b, _nd=nd: (0,) * _nd)

    in_specs = [
        pl.BlockSpec((tb, N, C), lambda b: (b, 0, 0)),      # x, tiled over batch
        full(params["norm1_w"]), full(params["norm1_b"]),
        full(wq), full(wk), full(wv),
        full(wproj), full(params["bproj"]),
        full(params["norm2_w"]), full(params["norm2_b"]),
        full(wfc1), full(params["bfc1"]),
        full(wfc2), full(params["bfc2"]),
    ]

    # ---- advisory cost estimate + VMEM budget ----
    w_item = jnp.dtype(mxu_dtype).itemsize
    weight_bytes = (4 * C * C + 2 * C * hidden) * w_item + (6 * C + hidden) * 4
    slab = tb * N
    act_bytes = 4 * slab * (8 * C + 3 * hidden) + 4 * tb * num_heads * N * N
    vmem_est = 2 * (weight_bytes + 2 * tb * N * C * 4) + act_bytes + slab * C * w_item
    # >= default scoped limit, capped well under v7x's 64 MiB physical VMEM.
    vmem_limit = int(min(max(vmem_est, 32 * 1024 * 1024), 48 * 1024 * 1024))

    flops = (
        2 * B * N * C * (3 * C)                   # q / k / v projections
        + 2 * B * num_heads * N * N * hd * 2      # scores + p @ v
        + 2 * B * N * C * C                       # output projection
        + 2 * B * N * C * hidden * 2              # fc1 + fc2
    )
    transcendentals = B * num_heads * N * N + B * N * hidden
    bytes_accessed = 2 * B * N * C * 4 + weight_bytes

    return pl.pallas_call(
        kernel,
        out_shape=jax.ShapeDtypeStruct((B, N, C), x.dtype),
        grid=(B // tb,),
        in_specs=in_specs,
        out_specs=pl.BlockSpec((tb, N, C), lambda b: (b, 0, 0)),
        scratch_shapes=[pltpu.VMEM((tb * N, C), mxu_dtype)],
        compiler_params=pltpu.CompilerParams(
            dimension_semantics=("parallel",),
            vmem_limit_bytes=vmem_limit),
        cost_estimate=pl.CostEstimate(
            flops=flops,
            transcendentals=transcendentals,
            bytes_accessed=bytes_accessed),
    )(x,
      params["norm1_w"], params["norm1_b"],
      wq, wk, wv, wproj, params["bproj"],
      params["norm2_w"], params["norm2_b"],
      wfc1, params["bfc1"], wfc2, params["bfc2"])


# ------------------------- params & reference --------------------------------

def make_params(key, *, dim, mlp_ratio=4.0, init_std=0.02):
    """Synthetic deterministic params mirroring Block's shapes (f32).

    Linear weights stored pre-transposed as (in_features, out_features); the
    fused qkv weight is split into Wq / Wk / Wv (qkv_bias=False default)."""
    C = dim
    hidden = int(C * mlp_ratio)
    ks = jax.random.split(key, 12)

    def tn(k, shape, std=init_std):
        return jax.random.truncated_normal(k, -2.0, 2.0, shape, jnp.float32) * std

    return {
        "norm1_w": 1.0 + tn(ks[0], (1, C)),
        "norm1_b": tn(ks[1], (1, C)),
        "wq": tn(ks[2], (C, C)),
        "wk": tn(ks[3], (C, C)),
        "wv": tn(ks[4], (C, C)),
        "wproj": tn(ks[5], (C, C)),
        "bproj": tn(ks[6], (1, C)),
        "norm2_w": 1.0 + tn(ks[7], (1, C)),
        "norm2_b": tn(ks[8], (1, C)),
        "wfc1": tn(ks[9], (C, hidden)),
        "bfc1": tn(ks[10], (1, hidden)),
        "wfc2": tn(ks[11], (hidden, C)),
        "bfc2": jnp.zeros((1, C), jnp.float32),
    }


def reference(x, params, *, num_heads):
    """Pure-JAX f32 reference mirroring the PyTorch Block.forward (eval mode)."""
    B, N, C = x.shape
    hd = C // num_heads
    scale = 1.0 / math.sqrt(hd)

    def ln(z, w, b, eps=1e-5):
        mu = jnp.mean(z, -1, keepdims=True)
        var = jnp.mean((z - mu) ** 2, -1, keepdims=True)
        return (z - mu) / jnp.sqrt(var + eps) * w + b

    xn = ln(x, params["norm1_w"][0], params["norm1_b"][0])
    q = xn @ params["wq"]
    k = xn @ params["wk"]
    v = xn @ params["wv"]

    qh = q.reshape(B, N, num_heads, hd).transpose(0, 2, 1, 3)
    kh = k.reshape(B, N, num_heads, hd).transpose(0, 2, 1, 3)
    vh = v.reshape(B, N, num_heads, hd).transpose(0, 2, 1, 3)
    s = jnp.einsum("bhqd,bhkd->bhqk", qh, kh) * scale
    p = jax.nn.softmax(s, axis=-1)
    o = jnp.einsum("bhqk,bhkd->bhqd", p, vh).transpose(0, 2, 1, 3).reshape(B, N, C)

    y = o @ params["wproj"] + params["bproj"][0]
    x1 = x + y
    x1n = ln(x1, params["norm2_w"][0], params["norm2_b"][0])
    h = jax.nn.gelu(x1n @ params["wfc1"] + params["bfc1"][0], approximate=False)
    return x1 + h @ params["wfc2"] + params["bfc2"][0]


# --------------------------------- main --------------------------------------

if __name__ == "__main__":
    B, N, C = 16, 16, 128      # batch, sequence length, embed dim
    num_heads = 4              # head_dim = 32
    mlp_ratio = 4.0            # hidden = 512

    key = jax.random.PRNGKey(0)
    kx, kp = jax.random.split(key)
    x = jax.random.normal(kx, (B, N, C), jnp.float32)
    params = make_params(kp, dim=C, mlp_ratio=mlp_ratio)

    ref = reference(x, params, num_heads=num_heads)

    # 1) exact path (f32 MXU operands): tight check against the f32 reference.
    out_f32 = jax.block_until_ready(
        block_forward(x, params, num_heads=num_heads, mxu_dtype=jnp.float32))
    assert out_f32.shape == (B, N, C), out_f32.shape
    d32 = float(jnp.max(jnp.abs(out_f32 - ref)))
    assert jnp.allclose(out_f32, ref, rtol=2e-3, atol=2e-3), (
        f"f32 path mismatch vs reference, max|diff|={d32:.3e}")

    # 2) perf path (default): bf16 MXU operands, f32 accumulation/elementwise.
    out_bf16 = jax.block_until_ready(
        block_forward(x, params, num_heads=num_heads))       # mxu_dtype=bf16
    assert out_bf16.shape == (B, N, C), out_bf16.shape
    d16 = float(jnp.max(jnp.abs(out_bf16 - ref)))
    assert jnp.allclose(out_bf16, ref, rtol=1e-2, atol=1e-2), (
        f"bf16 path mismatch vs reference, max|diff|={d16:.3e}")

    print("KERNEL_OK")
</pallas_src>

<mosaic_0001>
module attributes {stable_mosaic.version = 11 : i64} {
  func.func @block_kernel(%arg0: i32, %arg1: memref<8x16x128xf32, #tpu.memory_space<vmem>>, %arg2: memref<1x128xf32, #tpu.memory_space<vmem>>, %arg3: memref<1x128xf32, #tpu.memory_space<vmem>>, %arg4: memref<128x128xf32, #tpu.memory_space<vmem>>, %arg5: memref<128x128xf32, #tpu.memory_space<vmem>>, %arg6: memref<128x128xf32, #tpu.memory_space<vmem>>, %arg7: memref<128x128xf32, #tpu.memory_space<vmem>>, %arg8: memref<1x128xf32, #tpu.memory_space<vmem>>, %arg9: memref<1x128xf32, #tpu.memory_space<vmem>>, %arg10: memref<1x128xf32, #tpu.memory_space<vmem>>, %arg11: memref<128x512xf32, #tpu.memory_space<vmem>>, %arg12: memref<1x512xf32, #tpu.memory_space<vmem>>, %arg13: memref<512x128xf32, #tpu.memory_space<vmem>>, %arg14: memref<1x128xf32, #tpu.memory_space<vmem>>, %arg15: memref<8x16x128xf32, #tpu.memory_space<vmem>>, %arg16: memref<128x128xf32, #tpu.memory_space<vmem>>) attributes {dimension_semantics = [#tpu.dimension_semantics<parallel>], iteration_bounds = array<i64: 2>, scalar_prefetch = 0 : i64, scratch_operands = 1 : i64, tpu.core_type = #tpu.core_type<tc>, window_params = [{transform_indices = @transform_0, window_bounds = array<i64: 8, 16, 128>}, {pipeline_mode = #tpu.pipeline_mode<synchronous>, transform_indices = @transform_1, window_bounds = array<i64: 1, 128>}, {pipeline_mode = #tpu.pipeline_mode<synchronous>, transform_indices = @transform_2, window_bounds = array<i64: 1, 128>}, {pipeline_mode = #tpu.pipeline_mode<synchronous>, transform_indices = @transform_3, window_bounds = array<i64: 128, 128>}, {pipeline_mode = #tpu.pipeline_mode<synchronous>, transform_indices = @transform_4, window_bounds = array<i64: 128, 128>}, {pipeline_mode = #tpu.pipeline_mode<synchronous>, transform_indices = @transform_5, window_bounds = array<i64: 128, 128>}, {pipeline_mode = #tpu.pipeline_mode<synchronous>, transform_indices = @transform_6, window_bounds = array<i64: 128, 128>}, {pipeline_mode = #tpu.pipeline_mode<synchronous>, transform_indices = @transform_7, window_bounds = array<i64: 1, 128>}, {pipeline_mode = #tpu.pipeline_mode<synchronous>, transform_indices = @transform_8, window_bounds = array<i64: 1, 128>}, {pipeline_mode = #tpu.pipeline_mode<synchronous>, transform_indices = @transform_9, window_bounds = array<i64: 1, 128>}, {pipeline_mode = #tpu.pipeline_mode<synchronous>, transform_indices = @transform_10, window_bounds = array<i64: 128, 512>}, {pipeline_mode = #tpu.pipeline_mode<synchronous>, transform_indices = @transform_11, window_bounds = array<i64: 1, 512>}, {pipeline_mode = #tpu.pipeline_mode<synchronous>, transform_indices = @transform_12, window_bounds = array<i64: 512, 128>}, {pipeline_mode = #tpu.pipeline_mode<synchronous>, transform_indices = @transform_13, window_bounds = array<i64: 1, 128>}, {transform_indices = @transform_14, window_bounds = array<i64: 8, 16, 128>}]} {
    %c0 = arith.constant 0 : index
    %c0_0 = arith.constant 0 : index
    %c0_1 = arith.constant 0 : index
    %0 = vector.load %arg1[%c0, %c0_0, %c0_1] : memref<8x16x128xf32, #tpu.memory_space<vmem>>, vector<8x16x128xf32>
    %1 = vector.shape_cast %0 : vector<8x16x128xf32> to vector<128x128xf32>
    %c0_2 = arith.constant 0 : index
    %c0_3 = arith.constant 0 : index
    %2 = vector.load %arg2[%c0_2, %c0_3] : memref<1x128xf32, #tpu.memory_space<vmem>>, vector<1x128xf32>
    %c0_4 = arith.constant 0 : index
    %c0_5 = arith.constant 0 : index
    %3 = vector.load %arg3[%c0_4, %c0_5] : memref<1x128xf32, #tpu.memory_space<vmem>>, vector<1x128xf32>
    %cst = arith.constant dense<0.000000e+00> : vector<128xf32>
    %4 = vector.multi_reduction <add>, %1, %cst [1] : vector<128x128xf32> to vector<128xf32>
    %5 = vector.shape_cast %4 : vector<128xf32> to vector<128x1xf32>
    %cst_6 = arith.constant 1.280000e+02 : f32
    %6 = vector.broadcast %cst_6 : f32 to vector<128x1xf32>
    %7 = arith.divf %5, %6 : vector<128x1xf32>
    %8 = vector.broadcast %7 : vector<128x1xf32> to vector<128x128xf32>
    %9 = arith.subf %1, %8 : vector<128x128xf32>
    %10 = arith.mulf %9, %9 : vector<128x128xf32>
    %cst_7 = arith.constant dense<0.000000e+00> : vector<128xf32>
    %11 = vector.multi_reduction <add>, %10, %cst_7 [1] : vector<128x128xf32> to vector<128xf32>
    %12 = vector.shape_cast %11 : vector<128xf32> to vector<128x1xf32>
    %cst_8 = arith.constant 1.280000e+02 : f32
    %13 = vector.broadcast %cst_8 : f32 to vector<128x1xf32>
    %14 = arith.divf %12, %13 : vector<128x1xf32>
    %cst_9 = arith.constant 9.99999974E-6 : f32
    %15 = vector.broadcast %cst_9 : f32 to vector<128x1xf32>
    %16 = arith.addf %14, %15 : vector<128x1xf32>
    %17 = math.rsqrt %16 : vector<128x1xf32>
    %18 = vector.broadcast %17 : vector<128x1xf32> to vector<128x128xf32>
    %19 = arith.mulf %9, %18 : vector<128x128xf32>
    %20 = vector.broadcast %2 : vector<1x128xf32> to vector<128x128xf32>
    %21 = arith.mulf %19, %20 : vector<128x128xf32>
    %22 = vector.broadcast %3 : vector<1x128xf32> to vector<128x128xf32>
    %23 = arith.addf %21, %22 : vector<128x128xf32>
    %c0_10 = arith.constant 0 : index
    %c0_11 = arith.constant 0 : index
    %24 = vector.load %arg4[%c0_10, %c0_11] : memref<128x128xf32, #tpu.memory_space<vmem>>, vector<128x128xf32>
    %cst_12 = arith.constant dense<0.000000e+00> : vector<128x128xf32>
    %25 = tpu.matmul %23, %24, %cst_12 {dimension_numbers = #tpu.dot_dimension_numbers<[1], [0], [0], [1], [0, 0, 1, 1], [], []>} : vector<128x128xf32>, vector<128x128xf32>, vector<128x128xf32> -> vector<128x128xf32>
    %c0_13 = arith.constant 0 : index
    %c0_14 = arith.constant 0 : index
    %26 = vector.load %arg5[%c0_13, %c0_14] : memref<128x128xf32, #tpu.memory_space<vmem>>, vector<128x128xf32>
    %cst_15 = arith.constant dense<0.000000e+00> : vector<128x128xf32>
    %27 = tpu.matmul %23, %26, %cst_15 {dimension_numbers = #tpu.dot_dimension_numbers<[1], [0], [0], [1], [0, 0, 1, 1], [], []>} : vector<128x128xf32>, vector<128x128xf32>, vector<128x128xf32> -> vector<128x128xf32>
    %c0_16 = arith.constant 0 : index
    %c0_17 = arith.constant 0 : index
    %28 = vector.load %arg6[%c0_16, %c0_17] : memref<128x128xf32, #tpu.memory_space<vmem>>, vector<128x128xf32>
    %cst_18 = arith.constant dense<0.000000e+00> : vector<128x128xf32>
    %29 = tpu.matmul %23, %28, %cst_18 {dimension_numbers = #tpu.dot_dimension_numbers<[1], [0], [0], [1], [0, 0, 1, 1], [], []>} : vector<128x128xf32>, vector<128x128xf32>, vector<128x128xf32> -> vector<128x128xf32>
    %30 = vector.shape_cast %25 : vector<128x128xf32> to vector<8x16x128xf32>
    %31 = vector.shape_cast %27 : vector<128x128xf32> to vector<8x16x128xf32>
    %32 = vector.shape_cast %29 : vector<128x128xf32> to vector<8x16x128xf32>
    %33 = vector.extract_strided_slice %30 {offsets = [0, 0, 0], sizes = [8, 16, 32], strides = [1, 1, 1]} : vector<8x16x128xf32> to vector<8x16x32xf32>
    %34 = vector.extract_strided_slice %31 {offsets = [0, 0, 0], sizes = [8, 16, 32], strides = [1, 1, 1]} : vector<8x16x128xf32> to vector<8x16x32xf32>
    %35 = vector.extract_strided_slice %32 {offsets = [0, 0, 0], sizes = [8, 16, 32], strides = [1, 1, 1]} : vector<8x16x128xf32> to vector<8x16x32xf32>
    "tpu.trace_start"() <{level = 10 : i32, message = "bqd,bkd->bqk"}> : () -> ()
    %cst_19 = arith.constant dense<0.000000e+00> : vector<8x16x16xf32>
    %36 = tpu.matmul %33, %34, %cst_19 {dimension_numbers = #tpu.dot_dimension_numbers<[2], [2], [1], [1], [0, 0, 0, 1, 1, 1], [0], [0]>} : vector<8x16x32xf32>, vector<8x16x32xf32>, vector<8x16x16xf32> -> vector<8x16x16xf32>
    "tpu.trace_stop"() : () -> ()
    %cst_20 = arith.constant 0.176776692 : f32
    %37 = vector.broadcast %cst_20 : f32 to vector<8x16x16xf32>
    %38 = arith.mulf %36, %37 : vector<8x16x16xf32>
    %cst_21 = arith.constant dense<0xFF800000> : vector<8x16xf32>
    %39 = vector.multi_reduction <maximumf>, %38, %cst_21 [2] : vector<8x16x16xf32> to vector<8x16xf32>
    %40 = vector.shape_cast %39 : vector<8x16xf32> to vector<8x16x1xf32>
    %41 = vector.broadcast %40 : vector<8x16x1xf32> to vector<8x16x16xf32>
    %42 = arith.subf %38, %41 : vector<8x16x16xf32>
    %43 = math.exp %42 : vector<8x16x16xf32>
    %cst_22 = arith.constant dense<0.000000e+00> : vector<8x16xf32>
    %44 = vector.multi_reduction <add>, %43, %cst_22 [2] : vector<8x16x16xf32> to vector<8x16xf32>
    %45 = vector.shape_cast %44 : vector<8x16xf32> to vector<8x16x1xf32>
    %46 = tpu.reciprocal %45 {approx = true} : vector<8x16x1xf32> -> vector<8x16x1xf32>
    %47 = vector.broadcast %46 : vector<8x16x1xf32> to vector<8x16x16xf32>
    %48 = arith.mulf %43, %47 : vector<8x16x16xf32>
    "tpu.trace_start"() <{level = 10 : i32, message = "bqk,bkd->bqd"}> : () -> ()
    %cst_23 = arith.constant dense<0.000000e+00> : vector<8x16x32xf32>
    %49 = tpu.matmul %48, %35, %cst_23 {dimension_numbers = #tpu.dot_dimension_numbers<[2], [1], [1], [2], [0, 0, 0, 1, 1, 2], [0], [0]>} : vector<8x16x16xf32>, vector<8x16x32xf32>, vector<8x16x32xf32> -> vector<8x16x32xf32>
    "tpu.trace_stop"() : () -> ()
    %50 = vector.shape_cast %49 : vector<8x16x32xf32> to vector<128x32xf32>
    %c0_24 = arith.constant 0 : index
    %c0_25 = arith.constant 0 : index
    %51 = vector.load %arg16[%c0_24, %c0_25] : memref<128x128xf32, #tpu.memory_space<vmem>>, vector<128x32xf32>
    tpu.vector_store %arg16[%c0_24, %c0_25], %50 {strides = array<i32>} : memref<128x128xf32, #tpu.memory_space<vmem>>, vector<128x32xf32>,
    %52 = vector.extract_strided_slice %30 {offsets = [0, 0, 32], sizes = [8, 16, 32], strides = [1, 1, 1]} : vector<8x16x128xf32> to vector<8x16x32xf32>
    %53 = vector.extract_strided_slice %31 {offsets = [0, 0, 32], sizes = [8, 16, 32], strides = [1, 1, 1]} : vector<8x16x128xf32> to vector<8x16x32xf32>
    %54 = vector.extract_strided_slice %32 {offsets = [0, 0, 32], sizes = [8, 16, 32], strides = [1, 1, 1]} : vector<8x16x128xf32> to vector<8x16x32xf32>
    "tpu.trace_start"() <{level = 10 : i32, message = "bqd,bkd->bqk"}> : () -> ()
    %cst_26 = arith.constant dense<0.000000e+00> : vector<8x16x16xf32>
    %55 = tpu.matmul %52, %53, %cst_26 {dimension_numbers = #tpu.dot_dimension_numbers<[2], [2], [1], [1], [0, 0, 0, 1, 1, 1], [0], [0]>} : vector<8x16x32xf32>, vector<8x16x32xf32>, vector<8x16x16xf32> -> vector<8x16x16xf32>
    "tpu.trace_stop"() : () -> ()
    %cst_27 = arith.constant 0.176776692 : f32
    %56 = vector.broadcast %cst_27 : f32 to vector<8x16x16xf32>
    %57 = arith.mulf %55, %56 : vector<8x16x16xf32>
    %cst_28 = arith.constant dense<0xFF800000> : vector<8x16xf32>
    %58 = vector.multi_reduction <maximumf>, %57, %cst_28 [2] : vector<8x16x16xf32> to vector<8x16xf32>
    %59 = vector.shape_cast %58 : vector<8x16xf32> to vector<8x16x1xf32>
    %60 = vector.broadcast %59 : vector<8x16x1xf32> to vector<8x16x16xf32>
    %61 = arith.subf %57, %60 : vector<8x16x16xf32>
    %62 = math.exp %61 : vector<8x16x16xf32>
    %cst_29 = arith.constant dense<0.000000e+00> : vector<8x16xf32>
    %63 = vector.multi_reduction <add>, %62, %cst_29 [2] : vector<8x16x16xf32> to vector<8x16xf32>
    %64 = vector.shape_cast %63 : vector<8x16xf32> to vector<8x16x1xf32>
    %65 = tpu.reciprocal %64 {approx = true} : vector<8x16x1xf32> -> vector<8x16x1xf32>
    %66 = vector.broadcast %65 : vector<8x16x1xf32> to vector<8x16x16xf32>
    %67 = arith.mulf %62, %66 : vector<8x16x16xf32>
    "tpu.trace_start"() <{level = 10 : i32, message = "bqk,bkd->bqd"}> : () -> ()
    %cst_30 = arith.constant dense<0.000000e+00> : vector<8x16x32xf32>
    %68 = tpu.matmul %67, %54, %cst_30 {dimension_numbers = #tpu.dot_dimension_numbers<[2], [1], [1], [2], [0, 0, 0, 1, 1, 2], [0], [0]>} : vector<8x16x16xf32>, vector<8x16x32xf32>, vector<8x16x32xf32> -> vector<8x16x32xf32>
    "tpu.trace_stop"() : () -> ()
    %69 = vector.shape_cast %68 : vector<8x16x32xf32> to vector<128x32xf32>
    %c0_31 = arith.constant 0 : index
    %c32 = arith.constant 32 : index
    %70 = vector.load %arg16[%c0_31, %c32] : memref<128x128xf32, #tpu.memory_space<vmem>>, vector<128x32xf32>
    tpu.vector_store %arg16[%c0_31, %c32], %69 {strides = array<i32>} : memref<128x128xf32, #tpu.memory_space<vmem>>, vector<128x32xf32>,
    %71 = vector.extract_strided_slice %30 {offsets = [0, 0, 64], sizes = [8, 16, 32], strides = [1, 1, 1]} : vector<8x16x128xf32> to vector<8x16x32xf32>
    %72 = vector.extract_strided_slice %31 {offsets = [0, 0, 64], sizes = [8, 16, 32], strides = [1, 1, 1]} : vector<8x16x128xf32> to vector<8x16x32xf32>
    %73 = vector.extract_strided_slice %32 {offsets = [0, 0, 64], sizes = [8, 16, 32], strides = [1, 1, 1]} : vector<8x16x128xf32> to vector<8x16x32xf32>
    "tpu.trace_start"() <{level = 10 : i32, message = "bqd,bkd->bqk"}> : () -> ()
    %cst_32 = arith.constant dense<0.000000e+00> : vector<8x16x16xf32>
    %74 = tpu.matmul %71, %72, %cst_32 {dimension_numbers = #tpu.dot_dimension_numbers<[2], [2], [1], [1], [0, 0, 0, 1, 1, 1], [0], [0]>} : vector<8x16x32xf32>, vector<8x16x32xf32>, vector<8x16x16xf32> -> vector<8x16x16xf32>
    "tpu.trace_stop"() : () -> ()
    %cst_33 = arith.constant 0.176776692 : f32
    %75 = vector.broadcast %cst_33 : f32 to vector<8x16x16xf32>
    %76 = arith.mulf %74, %75 : vector<8x16x16xf32>
    %cst_34 = arith.constant dense<0xFF800000> : vector<8x16xf32>
    %77 = vector.multi_reduction <maximumf>, %76, %cst_34 [2] : vector<8x16x16xf32> to vector<8x16xf32>
    %78 = vector.shape_cast %77 : vector<8x16xf32> to vector<8x16x1xf32>
    %79 = vector.broadcast %78 : vector<8x16x1xf32> to vector<8x16x16xf32>
    %80 = arith.subf %76, %79 : vector<8x16x16xf32>
    %81 = math.exp %80 : vector<8x16x16xf32>
    %cst_35 = arith.constant dense<0.000000e+00> : vector<8x16xf32>
    %82 = vector.multi_reduction <add>, %81, %cst_35 [2] : vector<8x16x16xf32> to vector<8x16xf32>
    %83 = vector.shape_cast %82 : vector<8x16xf32> to vector<8x16x1xf32>
    %84 = tpu.reciprocal %83 {approx = true} : vector<8x16x1xf32> -> vector<8x16x1xf32>
    %85 = vector.broadcast %84 : vector<8x16x1xf32> to vector<8x16x16xf32>
    %86 = arith.mulf %81, %85 : vector<8x16x16xf32>
    "tpu.trace_start"() <{level = 10 : i32, message = "bqk,bkd->bqd"}> : () -> ()
    %cst_36 = arith.constant dense<0.000000e+00> : vector<8x16x32xf32>
    %87 = tpu.matmul %86, %73, %cst_36 {dimension_numbers = #tpu.dot_dimension_numbers<[2], [1], [1], [2], [0, 0, 0, 1, 1, 2], [0], [0]>} : vector<8x16x16xf32>, vector<8x16x32xf32>, vector<8x16x32xf32> -> vector<8x16x32xf32>
    "tpu.trace_stop"() : () -> ()
    %88 = vector.shape_cast %87 : vector<8x16x32xf32> to vector<128x32xf32>
    %c0_37 = arith.constant 0 : index
    %c64 = arith.constant 64 : index
    %89 = vector.load %arg16[%c0_37, %c64] : memref<128x128xf32, #tpu.memory_space<vmem>>, vector<128x32xf32>
    tpu.vector_store %arg16[%c0_37, %c64], %88 {strides = array<i32>} : memref<128x128xf32, #tpu.memory_space<vmem>>, vector<128x32xf32>,
    %90 = vector.extract_strided_slice %30 {offsets = [0, 0, 96], sizes = [8, 16, 32], strides = [1, 1, 1]} : vector<8x16x128xf32> to vector<8x16x32xf32>
    %91 = vector.extract_strided_slice %31 {offsets = [0, 0, 96], sizes = [8, 16, 32], strides = [1, 1, 1]} : vector<8x16x128xf32> to vector<8x16x32xf32>
    %92 = vector.extract_strided_slice %32 {offsets = [0, 0, 96], sizes = [8, 16, 32], strides = [1, 1, 1]} : vector<8x16x128xf32> to vector<8x16x32xf32>
    "tpu.trace_start"() <{level = 10 : i32, message = "bqd,bkd->bqk"}> : () -> ()
    %cst_38 = arith.constant dense<0.000000e+00> : vector<8x16x16xf32>
    %93 = tpu.matmul %90, %91, %cst_38 {dimension_numbers = #tpu.dot_dimension_numbers<[2], [2], [1], [1], [0, 0, 0, 1, 1, 1], [0], [0]>} : vector<8x16x32xf32>, vector<8x16x32xf32>, vector<8x16x16xf32> -> vector<8x16x16xf32>
    "tpu.trace_stop"() : () -> ()
    %cst_39 = arith.constant 0.176776692 : f32
    %94 = vector.broadcast %cst_39 : f32 to vector<8x16x16xf32>
    %95 = arith.mulf %93, %94 : vector<8x16x16xf32>
    %cst_40 = arith.constant dense<0xFF800000> : vector<8x16xf32>
    %96 = vector.multi_reduction <maximumf>, %95, %cst_40 [2] : vector<8x16x16xf32> to vector<8x16xf32>
    %97 = vector.shape_cast %96 : vector<8x16xf32> to vector<8x16x1xf32>
    %98 = vector.broadcast %97 : vector<8x16x1xf32> to vector<8x16x16xf32>
    %99 = arith.subf %95, %98 : vector<8x16x16xf32>
    %100 = math.exp %99 : vector<8x16x16xf32>
    %cst_41 = arith.constant dense<0.000000e+00> : vector<8x16xf32>
    %101 = vector.multi_reduction <add>, %100, %cst_41 [2] : vector<8x16x16xf32> to vector<8x16xf32>
    %102 = vector.shape_cast %101 : vector<8x16xf32> to vector<8x16x1xf32>
    %103 = tpu.reciprocal %102 {approx = true} : vector<8x16x1xf32> -> vector<8x16x1xf32>
    %104 = vector.broadcast %103 : vector<8x16x1xf32> to vector<8x16x16xf32>
    %105 = arith.mulf %100, %104 : vector<8x16x16xf32>
    "tpu.trace_start"() <{level = 10 : i32, message = "bqk,bkd->bqd"}> : () -> ()
    %cst_42 = arith.constant dense<0.000000e+00> : vector<8x16x32xf32>
    %106 = tpu.matmul %105, %92, %cst_42 {dimension_numbers = #tpu.dot_dimension_numbers<[2], [1], [1], [2], [0, 0, 0, 1, 1, 2], [0], [0]>} : vector<8x16x16xf32>, vector<8x16x32xf32>, vector<8x16x32xf32> -> vector<8x16x32xf32>
    "tpu.trace_stop"() : () -> ()
    %107 = vector.shape_cast %106 : vector<8x16x32xf32> to vector<128x32xf32>
    %c0_43 = arith.constant 0 : index
    %c96 = arith.constant 96 : index
    %108 = vector.load %arg16[%c0_43, %c96] : memref<128x128xf32, #tpu.memory_space<vmem>>, vector<128x32xf32>
    tpu.vector_store %arg16[%c0_43, %c96], %107 {strides = array<i32>} : memref<128x128xf32, #tpu.memory_space<vmem>>, vector<128x32xf32>,
    %c0_44 = arith.constant 0 : index
    %c0_45 = arith.constant 0 : index
    %109 = vector.load %arg16[%c0_44, %c0_45] : memref<128x128xf32, #tpu.memory_space<vmem>>, vector<128x128xf32>
    %c0_46 = arith.constant 0 : index
    %c0_47 = arith.constant 0 : index
    %110 = vector.load %arg7[%c0_46, %c0_47] : memref<128x128xf32, #tpu.memory_space<vmem>>, vector<128x128xf32>
    %cst_48 = arith.constant dense<0.000000e+00> : vector<128x128xf32>
    %111 = tpu.matmul %109, %110, %cst_48 {dimension_numbers = #tpu.dot_dimension_numbers<[1], [0], [0], [1], [0, 0, 1, 1], [], []>} : vector<128x128xf32>, vector<128x128xf32>, vector<128x128xf32> -> vector<128x128xf32>
    %c0_49 = arith.constant 0 : index
    %c0_50 = arith.constant 0 : index
    %112 = vector.load %arg8[%c0_49, %c0_50] : memref<1x128xf32, #tpu.memory_space<vmem>>, vector<1x128xf32>
    %113 = vector.broadcast %112 : vector<1x128xf32> to vector<128x128xf32>
    %114 = arith.addf %111, %113 : vector<128x128xf32>
    %115 = arith.addf %1, %114 : vector<128x128xf32>
    %c0_51 = arith.constant 0 : index
    %c0_52 = arith.constant 0 : index
    %116 = vector.load %arg9[%c0_51, %c0_52] : memref<1x128xf32, #tpu.memory_space<vmem>>, vector<1x128xf32>
    %c0_53 = arith.constant 0 : index
    %c0_54 = arith.constant 0 : index
    %117 = vector.load %arg10[%c0_53, %c0_54] : memref<1x128xf32, #tpu.memory_space<vmem>>, vector<1x128xf32>
    %cst_55 = arith.constant dense<0.000000e+00> : vector<128xf32>
    %118 = vector.multi_reduction <add>, %115, %cst_55 [1] : vector<128x128xf32> to vector<128xf32>
    %119 = vector.shape_cast %118 : vector<128xf32> to vector<128x1xf32>
    %cst_56 = arith.constant 1.280000e+02 : f32
    %120 = vector.broadcast %cst_56 : f32 to vector<128x1xf32>
    %121 = arith.divf %119, %120 : vector<128x1xf32>
    %122 = vector.broadcast %121 : vector<128x1xf32> to vector<128x128xf32>
    %123 = arith.subf %115, %122 : vector<128x128xf32>
    %124 = arith.mulf %123, %123 : vector<128x128xf32>
    %cst_57 = arith.constant dense<0.000000e+00> : vector<128xf32>
    %125 = vector.multi_reduction <add>, %124, %cst_57 [1] : vector<128x128xf32> to vector<128xf32>
    %126 = vector.shape_cast %125 : vector<128xf32> to vector<128x1xf32>
    %cst_58 = arith.constant 1.280000e+02 : f32
    %127 = vector.broadcast %cst_58 : f32 to vector<128x1xf32>
    %128 = arith.divf %126, %127 : vector<128x1xf32>
    %cst_59 = arith.constant 9.99999974E-6 : f32
    %129 = vector.broadcast %cst_59 : f32 to vector<128x1xf32>
    %130 = arith.addf %128, %129 : vector<128x1xf32>
    %131 = math.rsqrt %130 : vector<128x1xf32>
    %132 = vector.broadcast %131 : vector<128x1xf32> to vector<128x128xf32>
    %133 = arith.mulf %123, %132 : vector<128x128xf32>
    %134 = vector.broadcast %116 : vector<1x128xf32> to vector<128x128xf32>
    %135 = arith.mulf %133, %134 : vector<128x128xf32>
    %136 = vector.broadcast %117 : vector<1x128xf32> to vector<128x128xf32>
    %137 = arith.addf %135, %136 : vector<128x128xf32>
    %c0_60 = arith.constant 0 : index
    %c0_61 = arith.constant 0 : index
    %138 = vector.load %arg11[%c0_60, %c0_61] : memref<128x512xf32, #tpu.memory_space<vmem>>, vector<128x512xf32>
    %cst_62 = arith.constant dense<0.000000e+00> : vector<128x512xf32>
    %139 = tpu.matmul %137, %138, %cst_62 {dimension_numbers = #tpu.dot_dimension_numbers<[1], [0], [0], [1], [0, 0, 1, 1], [], []>} : vector<128x128xf32>, vector<128x512xf32>, vector<128x512xf32> -> vector<128x512xf32>
    %c0_63 = arith.constant 0 : index
    %c0_64 = arith.constant 0 : index
    %140 = vector.load %arg12[%c0_63, %c0_64] : memref<1x512xf32, #tpu.memory_space<vmem>>, vector<1x512xf32>
    %141 = vector.broadcast %140 : vector<1x512xf32> to vector<128x512xf32>
    %142 = arith.addf %139, %141 : vector<128x512xf32>
    %cst_65 = arith.constant 5.000000e-01 : f32
    %143 = vector.broadcast %cst_65 : f32 to vector<128x512xf32>
    %144 = arith.mulf %143, %142 : vector<128x512xf32>
    %cst_66 = arith.constant 0.707106769 : f32
    %145 = vector.broadcast %cst_66 : f32 to vector<128x512xf32>
    %146 = arith.mulf %142, %145 : vector<128x512xf32>
    %147 = math.absf %146 : vector<128x512xf32>
    %cst_67 = arith.constant 0.327591091 : f32
    %148 = vector.broadcast %cst_67 : f32 to vector<128x512xf32>
    %149 = arith.mulf %148, %147 : vector<128x512xf32>
    %cst_68 = arith.constant 1.000000e+00 : f32
    %150 = vector.broadcast %cst_68 : f32 to vector<128x512xf32>
    %151 = arith.addf %150, %149 : vector<128x512xf32>
    %cst_69 = arith.constant 1.000000e+00 : f32
    %152 = vector.broadcast %cst_69 : f32 to vector<128x512xf32>
    %153 = arith.divf %152, %151 : vector<128x512xf32>
    %cst_70 = arith.constant 1.06140542 : f32
    %154 = vector.broadcast %cst_70 : f32 to vector<128x512xf32>
    %155 = arith.mulf %153, %154 : vector<128x512xf32>
    %cst_71 = arith.constant -1.45315206 : f32
    %156 = vector.broadcast %cst_71 : f32 to vector<128x512xf32>
    %157 = arith.addf %156, %155 : vector<128x512xf32>
    %158 = arith.mulf %153, %157 : vector<128x512xf32>
    %cst_72 = arith.constant 1.42141378 : f32
    %159 = vector.broadcast %cst_72 : f32 to vector<128x512xf32>
    %160 = arith.addf %159, %158 : vector<128x512xf32>
    %161 = arith.mulf %153, %160 : vector<128x512xf32>
    %cst_73 = arith.constant -0.284496725 : f32
    %162 = vector.broadcast %cst_73 : f32 to vector<128x512xf32>
    %163 = arith.addf %162, %161 : vector<128x512xf32>
    %164 = arith.mulf %153, %163 : vector<128x512xf32>
    %cst_74 = arith.constant 0.254829586 : f32
    %165 = vector.broadcast %cst_74 : f32 to vector<128x512xf32>
    %166 = arith.addf %165, %164 : vector<128x512xf32>
    %167 = arith.mulf %153, %166 : vector<128x512xf32>
    %cst_75 = arith.constant 0.000000e+00 : f32
    %168 = vector.broadcast %cst_75 : f32 to vector<128x512xf32>
    %169 = arith.subf %168, %147 : vector<128x512xf32>
    %170 = arith.mulf %169, %147 : vector<128x512xf32>
    %171 = math.exp %170 : vector<128x512xf32>
    %172 = arith.mulf %167, %171 : vector<128x512xf32>
    %cst_76 = arith.constant 1.000000e+00 : f32
    %173 = vector.broadcast %cst_76 : f32 to vector<128x512xf32>
    %174 = arith.subf %173, %172 : vector<128x512xf32>
    %cst_77 = arith.constant 0.000000e+00 : f32
    %175 = vector.broadcast %cst_77 : f32 to vector<128x512xf32>
    %176 = arith.cmpf olt, %146, %175 : vector<128x512xf32>
    %cst_78 = arith.constant 0.000000e+00 : f32
    %177 = vector.broadcast %cst_78 : f32 to vector<128x512xf32>
    %178 = arith.subf %177, %174 : vector<128x512xf32>
    %179 = arith.select %176, %178, %174 : vector<128x512xi1>, vector<128x512xf32>
    %cst_79 = arith.constant 1.000000e+00 : f32
    %180 = vector.broadcast %cst_79 : f32 to vector<128x512xf32>
    %181 = arith.addf %180, %179 : vector<128x512xf32>
    %182 = arith.mulf %144, %181 : vector<128x512xf32>
    %c0_80 = arith.constant 0 : index
    %c0_81 = arith.constant 0 : index
    %183 = vector.load %arg13[%c0_80, %c0_81] : memref<512x128xf32, #tpu.memory_space<vmem>>, vector<512x128xf32>
    %cst_82 = arith.constant dense<0.000000e+00> : vector<128x128xf32>
    %184 = tpu.matmul %182, %183, %cst_82 {dimension_numbers = #tpu.dot_dimension_numbers<[1], [0], [0], [1], [0, 0, 1, 1], [], []>} : vector<128x512xf32>, vector<512x128xf32>, vector<128x128xf32> -> vector<128x128xf32>
    %c0_83 = arith.constant 0 : index
    %c0_84 = arith.constant 0 : index
    %185 = vector.load %arg14[%c0_83, %c0_84] : memref<1x128xf32, #tpu.memory_space<vmem>>, vector<1x128xf32>
    %186 = vector.broadcast %185 : vector<1x128xf32> to vector<128x128xf32>
    %187 = arith.addf %184, %186 : vector<128x128xf32>
    %188 = arith.addf %115, %187 : vector<128x128xf32>
    %189 = vector.shape_cast %188 : vector<128x128xf32> to vector<8x16x128xf32>
    %c0_85 = arith.constant 0 : index
    %c0_86 = arith.constant 0 : index
    %c0_87 = arith.constant 0 : index
    %190 = vector.load %arg15[%c0_85, %c0_86, %c0_87] : memref<8x16x128xf32, #tpu.memory_space<vmem>>, vector<8x16x128xf32>
    tpu.vector_store %arg15[%c0_85, %c0_86, %c0_87], %189 {strides = array<i32>} : memref<8x16x128xf32, #tpu.memory_space<vmem>>, vector<8x16x128xf32>,
    return
  }
  func.func @transform_0(%arg0: i32) -> (i32, i32, i32) {
    %c0_i32 = arith.constant 0 : i32
    %c0_i32_0 = arith.constant 0 : i32
    %c0_i32_1 = arith.constant 0 : i32
    return %arg0, %c0_i32, %c0_i32_0 : i32, i32, i32
  }
  func.func @transform_1(%arg0: i32) -> (i32, i32) {
    %c0_i32 = arith.constant 0 : i32
    %c0_i32_0 = arith.constant 0 : i32
    %c0_i32_1 = arith.constant 0 : i32
    return %c0_i32, %c0_i32_0 : i32, i32
  }
  func.func @transform_2(%arg0: i32) -> (i32, i32) {
    %c0_i32 = arith.constant 0 : i32
    %c0_i32_0 = arith.constant 0 : i32
    %c0_i32_1 = arith.constant 0 : i32
    return %c0_i32, %c0_i32_0 : i32, i32
  }
  func.func @transform_3(%arg0: i32) -> (i32, i32) {
    %c0_i32 = arith.constant 0 : i32
    %c0_i32_0 = arith.constant 0 : i32
    %c0_i32_1 = arith.constant 0 : i32
    return %c0_i32, %c0_i32_0 : i32, i32
  }
  func.func @transform_4(%arg0: i32) -> (i32, i32) {
    %c0_i32 = arith.constant 0 : i32
    %c0_i32_0 = arith.constant 0 : i32
    %c0_i32_1 = arith.constant 0 : i32
    return %c0_i32, %c0_i32_0 : i32, i32
  }
  func.func @transform_5(%arg0: i32) -> (i32, i32) {
    %c0_i32 = arith.constant 0 : i32
    %c0_i32_0 = arith.constant 0 : i32
    %c0_i32_1 = arith.constant 0 : i32
    return %c0_i32, %c0_i32_0 : i32, i32
  }
  func.func @transform_6(%arg0: i32) -> (i32, i32) {
    %c0_i32 = arith.constant 0 : i32
    %c0_i32_0 = arith.constant 0 : i32
    %c0_i32_1 = arith.constant 0 : i32
    return %c0_i32, %c0_i32_0 : i32, i32
  }
  func.func @transform_7(%arg0: i32) -> (i32, i32) {
    %c0_i32 = arith.constant 0 : i32
    %c0_i32_0 = arith.constant 0 : i32
    %c0_i32_1 = arith.constant 0 : i32
    return %c0_i32, %c0_i32_0 : i32, i32
  }
  func.func @transform_8(%arg0: i32) -> (i32, i32) {
    %c0_i32 = arith.constant 0 : i32
    %c0_i32_0 = arith.constant 0 : i32
    %c0_i32_1 = arith.constant 0 : i32
    return %c0_i32, %c0_i32_0 : i32, i32
  }
  func.func @transform_9(%arg0: i32) -> (i32, i32) {
    %c0_i32 = arith.constant 0 : i32
    %c0_i32_0 = arith.constant 0 : i32
    %c0_i32_1 = arith.constant 0 : i32
    return %c0_i32, %c0_i32_0 : i32, i32
  }
  func.func @transform_10(%arg0: i32) -> (i32, i32) {
    %c0_i32 = arith.constant 0 : i32
    %c0_i32_0 = arith.constant 0 : i32
    %c0_i32_1 = arith.constant 0 : i32
    return %c0_i32, %c0_i32_0 : i32, i32
  }
  func.func @transform_11(%arg0: i32) -> (i32, i32) {
    %c0_i32 = arith.constant 0 : i32
    %c0_i32_0 = arith.constant 0 : i32
    %c0_i32_1 = arith.constant 0 : i32
    return %c0_i32, %c0_i32_0 : i32, i32
  }
  func.func @transform_12(%arg0: i32) -> (i32, i32) {
    %c0_i32 = arith.constant 0 : i32
    %c0_i32_0 = arith.constant 0 : i32
    %c0_i32_1 = arith.constant 0 : i32
    return %c0_i32, %c0_i32_0 : i32, i32
  }
  func.func @transform_13(%arg0: i32) -> (i32, i32) {
    %c0_i32 = arith.constant 0 : i32
    %c0_i32_0 = arith.constant 0 : i32
    %c0_i32_1 = arith.constant 0 : i32
    return %c0_i32, %c0_i32_0 : i32, i32
  }
  func.func @transform_14(%arg0: i32) -> (i32, i32, i32) {
    %c0_i32 = arith.constant 0 : i32
    %c0_i32_0 = arith.constant 0 : i32
    %c0_i32_1 = arith.constant 0 : i32
    return %arg0, %c0_i32, %c0_i32_0 : i32, i32, i32
  }
}

</mosaic_0001>

<bundles_post_ra>
// kernel: tpu_custom_call.1
= control target key start
LH: loop header
LB: loop body
LE: loop exit
PB: predicated region body
PF: predicated region fallthrough
CT: control target
= control target key end

     0   :  { %s18016_s0 = inlined_call_operand.hbm [shape: f32[16,16,128], index: 0, kind: input, shape index: {}]   ;;  %s18017_s1 = inlined_call_operand.vmem [shape: f32[1,128], index: 1, kind: input, shape index: {}]   ;;  %s18018_s2 = inlined_call_operand.vmem [shape: f32[1,128], index: 2, kind: input, shape index: {}]   ;;  %s18019_s3 = inlined_call_operand.hbm [shape: f32[128,128], index: 3, kind: input, shape index: {}]   ;;  %s18020_s4 = inlined_call_operand.hbm [shape: f32[128,128], index: 4, kind: input, shape index: {}]   ;;  %s18021_s5 = inlined_call_operand.hbm [shape: f32[128,128], index: 5, kind: input, shape index: {}]   ;;  %s18022_s6 = inlined_call_operand.hbm [shape: f32[128,128], index: 6, kind: input, shape index: {}]   ;;  %s18023_s7 = inlined_call_operand.vmem [shape: f32[1,128], index: 7, kind: input, shape index: {}]   ;;  %s18024_s8 = inlined_call_operand.vmem [shape: f32[1,128], index: 8, kind: input, shape index: {}]   ;;  %s18025_s9 = inlined_call_operand.vmem [shape: f32[1,128], index: 9, kind: input, shape index: {}]   ;;  %s18026_s10 = inlined_call_operand.hbm [shape: f32[128,512], index: 10, kind: input, shape index: {}]   ;;  %s18027_s11 = inlined_call_operand.vmem [shape: f32[1,512], index: 11, kind: input, shape index: {}]   ;;  %s18028_s12 = inlined_call_operand.hbm [shape: f32[512,128], index: 12, kind: input, shape index: {}]   ;;  %s18029_s13 = inlined_call_operand.vmem [shape: f32[1,128], index: 13, kind: input, shape index: {}]   ;;  %s18030_s14 = inlined_call_operand.hbm [shape: f32[16,16,128], index: 14, kind: output, shape index: {}]  }
   0x1   :  { %18195 = sst [smem:[#allocation135_spill]] %s18019_s3 }
   0x2   :  { %18196 = sst [smem:[#allocation136_spill]] %s18020_s4 }
   0x3   :  { %18197 = sst [smem:[#allocation137_spill]] %s18021_s5 }
   0x4   :  { %18198 = sst [smem:[#allocation138_spill]] %s18022_s6 }
   0x5   :  { %18199 = sst [smem:[#allocation139_spill]] %s18026_s10 }
   0x6   :  { %18200 = sst [smem:[#allocation140_spill]] %s18028_s12 }
   0x7   :  { %18201 = sst [smem:[#allocation141_spill]] %s18030_s14 }
   0x8   :  { %19 = vsyncpa [#allocation4], 0 }
   0x9   :  { %21 = vsyncpa [#allocation4 + $0x1], 0 }
   0xa   :  { %22 = vsyncpa [#allocation7], 0 }
   0xb   :  { %23 = vsyncpa [#allocation10], 0 }
   0xc   :  { %24 = vsyncpa [#allocation13], 0 }
   0xd   :  { %25 = vsyncpa [#allocation5], 0 }
   0xe   :  { %27 = vsyncpa [#allocation5 + $0x1], 0  ;;  %s13597_s29 = smov 0   ;;  %s13599_s30 = smov 0  }
   0xf   :  { %s13601_s15 = smov 0   ;;  %s13603_s16 = smov 0  }
  0x10 LB: > { %18202 = sst [smem:[#allocation21_spill]] %s13498_s15  ;;  %s13504_s17 = smov [#allocation6]   ;;  %s13502_s16 = sphi %s13603_s16, %s18668_s16   ;;  %s13498_s15 = sphi %s13601_s15, %s18670_s15   ;;  %s13494_s30 = sphi %s13599_s30, %s18672_s30   ;;  %s13490_s29 = sphi %s13597_s29, %s18671_s29  }
  0x11   : > { %s381_s18 = sshll.u32 %s13504_s17, 4  ;;  %s13618_s19 = sadd.s32 4294967295, %s13502_s16   ;;  %s382_s18 = int_to_ptr.vmem [resolvable:$true] %s381_s18 }
  0x12   : > { %p11056_p0 = scmp.ge.s32.totalorder %s13502_s16, 1  ;;  %p18037_p1 = scmp.eq.s32.totalorder %s13618_s19, 0 }
  0x13   : > { %p363_p2 = scmp.lt.s32.totalorder %s13502_s16, 3  ;;  %s13505_s21 = smov [#allocation9]  }
  0x14   : > { %s407_s22 = sshll.u32 %s13505_s21, 4  ;;  %s13506_s24 = smov [#allocation12]   ;;  %s13636_s22 = int_to_ptr.vmem [resolvable:$true] %s407_s22 }
  0x15   : > { %p13623_p3 = pnand %p11056_p0, %p363_p2  ;;  %s442_s25 = sshll.u32 %s13506_s24, 4  ;;  %s13638_s25 = int_to_ptr.vmem [resolvable:$true] %s442_s25 }
  0x16   : > { %s13253_s27 = scalar_lea.vmem %s382_s18, 2048  ;;  %p13261_p11 = scmp.lt.s32.totalorder %s382_s18, %s382_s18 }
  0x17   : > { %s18203_s20 = scalar_select %p13623_p3, 1, 0 }
  0x18   : > { %p12561_p5 = pneg %p13623_p3  ;;  %p13254_p8 = scmp.ne.s32.totalorder %s382_s18, %s13253_s27 }
  0x19   : > { %p13262_p12 = scmp.lt.s32.totalorder %s13253_s27, %s13253_s27 }
  0x1a   : > { %p13632_p6 = pnand %p12561_p5, %p18037_p1 }
  0x1b   : > { %p13263_p13 = por %p13262_p12, %p13261_p11 }
  0x1c   : > { %p13642_p7 = pneg %p13632_p6 }
  0x1e   : > { %p13256_p9 = pnand %p13254_p8, %p13642_p7 }
  0x20   : > { %p13257_p10 = pneg %p13256_p9 }
  0x22   : > { %p13264_p0 = pnand %p13263_p13, %p13257_p10 }
  0x24   : > { %13267 = shalt.err (!%p13264_p0)
}
  0x25   : > { %s18032_s28 = smov 128   ;;  %s18034_s17 = smov 8  }
  0x26   : > { %s18206_s3 = sld [smem:[#allocation135_spill]]  ;;  %s13279_s14 = scalar_lea.vmem %s13636_s22, 2048 }
  0x27   : > { %p13280_p2 = scmp.ne.s32.totalorder %s13636_s22, %s13279_s14  ;;  %p13287_p9 = scmp.lt.s32.totalorder %s13636_s22, %s13636_s22 }
  0x28   : > { %p13288_p10 = scmp.lt.s32.totalorder %s13279_s14, %s13279_s14 }
  0x29   : > { %p13282_p5 = pnand %p13280_p2, %p13642_p7 }
  0x2a   : > { %p13289_p11 = por %p13288_p10, %p13287_p9 }
  0x2b   : > { %p13283_p8 = pneg %p13282_p5 }
  0x2c   : > { %12564 = dma.hbm_to_vmem [thread:$0]  (!%p13632_p6), %s18206_s3, 2048, %s382_s18, [#allocation7], %s18032_s28, %s18032_s28, %s18034_s17  }
  0x2d   : > { %p13290_p12 = pnand %p13289_p11, %p13283_p8 }
  0x2f   : > { %13293 = shalt.err (!%p13290_p12)
}
  0x30   : > { %s18207_s5 = sld [smem:[#allocation137_spill]]  ;;  %s13305_s18 = scalar_lea.vmem %s13638_s25, 8192 }
  0x31   : > { %p13306_p13 = scmp.ne.s32.totalorder %s13638_s25, %s13305_s18  ;;  %p13313_p5 = scmp.lt.s32.totalorder %s13638_s25, %s13638_s25 }
  0x32   : > { %p13314_p8 = scmp.lt.s32.totalorder %s13305_s18, %s13305_s18 }
  0x33   : > { %p13308_p0 = pnand %p13306_p13, %p13642_p7 }
  0x34   : > { %p13315_p9 = por %p13314_p8, %p13313_p5 }
  0x35   : > { %p13309_p2 = pneg %p13308_p0 }
  0x36   : > { %12570 = dma.hbm_to_vmem [thread:$0]  (!%p13632_p6), %s18207_s5, 2048, %s13636_s22, [#allocation10], %s18032_s28, %s18032_s28, %s18034_s17  }
  0x37   : > { %p13316_p10 = pnand %p13315_p9, %p13309_p2 }
  0x39   : > { %13319 = shalt.err (!%p13316_p10)
}
  0x3a   : > { %s13509_s14 = smov 512   ;;  %s13510_s24 = smov 32  }
  0x3b   : > { %s18208_s10 = sld [smem:[#allocation139_spill]]  ;;  %s13511_s22 = smov [#allocation8]  }
  0x3c   : > { %s394_s28 = sshll.u32 %s13511_s22, 4  ;;  %s13512_s17 = smov [#allocation11]   ;;  %s395_s28 = int_to_ptr.vmem [resolvable:$true] %s394_s28 }
  0x3d   : > { %s420_s3 = sshll.u32 %s13512_s17, 4  ;;  %s13331_s5 = scalar_lea.vmem %s395_s28, 2048  ;;  %s421_s3 = int_to_ptr.vmem [resolvable:$true] %s420_s3 }
  0x3e   : > { %p13332_p11 = scmp.ne.s32.totalorder %s395_s28, %s13331_s5  ;;  %p13339_p0 = scmp.lt.s32.totalorder %s395_s28, %s395_s28 }
  0x3f   : > { %p13340_p2 = scmp.lt.s32.totalorder %s13331_s5, %s13331_s5 }
  0x40   : > { %p13334_p12 = pnand %p13332_p11, %p13642_p7 }
  0x41   : > { %12576 = dma.hbm_to_vmem [thread:$0]  (!%p13632_p6), %s18208_s10, 8192, %s13638_s25, [#allocation13], %s13509_s14, %s13509_s14, %s13510_s24  }
  0x42   : > { %p13335_p13 = pneg %p13334_p12  ;;  %p13341_p5 = por %p13340_p2, %p13339_p0 }
  0x44   : > { %p13342_p8 = pnand %p13341_p5, %p13335_p13 }
  0x46   : > { %13345 = shalt.err (!%p13342_p8)
}
  0x47   : > { %s18209_s18 = smov 8   ;;  %s18210_s27 = smov 128  }
  0x48   : > { %s18211_s4 = sld [smem:[#allocation136_spill]]  ;;  %s13357_s17 = scalar_lea.vmem %s421_s3, 2048 }
  0x49   : > { %p13358_p9 = scmp.ne.s32.totalorder %s421_s3, %s13357_s17  ;;  %p13365_p12 = scmp.lt.s32.totalorder %s421_s3, %s421_s3 }
  0x4a   : > { %p13366_p0 = scmp.lt.s32.totalorder %s13357_s17, %s13357_s17 }
  0x4b   : > { %p13360_p10 = pnand %p13358_p9, %p13642_p7 }
  0x4c   : > { %p13367_p13 = por %p13366_p0, %p13365_p12 }
  0x4d   : > { %p13361_p11 = pneg %p13360_p10 }
  0x4e   : > { %12567 = dma.hbm_to_vmem [thread:$0]  (!%p13632_p6), %s18211_s4, 2048, %s395_s28, [#allocation7], %s18210_s27, %s18210_s27, %s18209_s18  }
  0x4f   : > { %p13368_p2 = pnand %p13367_p13, %p13361_p11 }
  0x51   : > { %13371 = shalt.err (!%p13368_p2)
}
  0x52   : > { %s18212_s6 = sld [smem:[#allocation138_spill]]  ;;  %s13513_s28 = smov [#allocation14]  }
  0x53   : > { %s458_s21 = sshll.u32 %s13513_s28, 4  ;;  %s459_s21 = int_to_ptr.vmem [resolvable:$true] %s458_s21 }
  0x54   : > { %s13383_s22 = scalar_lea.vmem %s459_s21, 8192  ;;  %p13391_p10 = scmp.lt.s32.totalorder %s459_s21, %s459_s21 }
  0x55   : > { %p13384_p5 = scmp.ne.s32.totalorder %s459_s21, %s13383_s22  ;;  %p13392_p11 = scmp.lt.s32.totalorder %s13383_s22, %s13383_s22 }
  0x57   : > { %p13386_p8 = pnand %p13384_p5, %p13642_p7  ;;  %p13393_p12 = por %p13392_p11, %p13391_p10 }
  0x58   : > { %12573 = dma.hbm_to_vmem [thread:$0]  (!%p13632_p6), %s18212_s6, 2048, %s421_s3, [#allocation10], %s18210_s27, %s18210_s27, %s18209_s18  }
  0x59   : > { %p13387_p9 = pneg %p13386_p8 }
  0x5b   : > { %p13394_p0 = pnand %p13393_p12, %p13387_p9 }
  0x5d   : > { %13397 = shalt.err (!%p13394_p0)
}
  0x5e   : > { %s18213_s12 = sld [smem:[#allocation140_spill]]  ;;  %s11055_s23 = sadd.s32 4294967294, %s13502_s16  }
  0x5f   : > { %s13715_s26 = sadd.s32 1, %s13502_s16   ;;  %s40_s17 = sadd.s32 1, %s13498_s15 }
  0x60   : > { %18214 = sst [smem:[#allocation22_spill]] %s13715_s26  ;;  %s37_s14 = ssub.s32 %s13502_s16, %s13715_s26 }
  0x61   : > { %p38_p7 = scmp.eq.s32.totalorder %s37_s14, 0  ;;  %p47_p13 = scmp.ne.s32.totalorder %s13498_s15, %s13494_s30 }
  0x62   : > { %p48_p2 = scmp.eq.s32.totalorder %s13502_s16, 0  ;;  %p53_p5 = scmp.ne.s32.totalorder %s13494_s30, %s13490_s29 }
  0x63   : > { %s13726_s5 = scalar_select %p38_p7, %s13498_s15, %s40_s17  }
  0x64   : > { %12579 = dma.hbm_to_vmem [thread:$0]  (!%p13632_p6), %s18213_s12, 8192, %s459_s21, [#allocation13], %s18210_s27, %s18210_s27, %s18209_s18  }
  0x65   : > { %18215 = sst [smem:[#allocation23_spill]] %s13726_s5  ;;  %p13728_p8 = por %p48_p2, %p47_p13 }
  0x66   : > { %p13734_p6 = por %p18037_p1, %p53_p5  ;;  %p350_p9 = scmp.eq.s32.totalorder %s13618_s19, 1 }
  0x67   : > { %p356_p10 = scmp.eq.s32.totalorder %s11055_s23, 1  ;;  %p12594_p11 = scmp.lt.s32.totalorder %s13502_s16, 2 }
  0x68   : > { %s18217_s28 = scalar_select %p13734_p6, 1, 0 }
  0x69   : > { %s475_s21 = sand.u32 1, %s13498_s15   ;;  %p13741_p12 = por %p350_p9, %p47_p13 }
  0x6a   : > { %p13745_p0 = por %p356_p10, %p53_p5  ;;  %s11064_s3 = sshll.u32 %s475_s21, 7 }
  0x6b   : > { %s18218_s22 = scalar_select %p13741_p12, 1, 0 }
  0x6c   : > { %s18219_s25 = scalar_select %p13745_p0, 1, 0 }
  0x6d   : > { %s11282_s14 = sshll.u32 %s13502_s16, 11  ;;  %s479_s23 = scalar_lea.vmem [#allocation3], %s11064_s3 }
  0x6e   : > { %s13753_s6 = scalar_lea.hbm %s18016_s0, %s11282_s14  ;;  %s487_s10 = sshll.u32 %s479_s23, 4  ;;  %s13755_s10 = int_to_ptr.vmem [resolvable:$true] %s487_s10 }
  0x6f   : > { %p13759_p7 = pnand %p12594_p11, %p13728_p8  ;;  %s13763_s5 = scalar_lea.sflag [#allocation4], %s475_s21 }
  0x70   : > { %s13398_s15 = scalar_lea.hbm %s13753_s6, 2048  ;;  %s13403_s3 = scalar_lea.hbm %s18016_s0, 4096 }
  0x71   : > { %p13399_p13 = scmp.ne.s32.totalorder %s13753_s6, %s13398_s15  ;;  %p13400_p2 = pneg %p13759_p7 }
  0x72   : > { %p13404_p8 = scmp.lt.s32.totalorder %s13753_s6, %s18016_s0  ;;  %p13405_p10 = scmp.lt.s32.totalorder %s13403_s3, %s13398_s15 }
  0x73   : > { %p13401_p5 = pnand %p13400_p2, %p13399_p13 }
  0x74   : > { %p13406_p11 = por %p13405_p10, %p13404_p8 }
  0x75   : > { %p13402_p9 = pneg %p13401_p5 }
  0x77   : > { %p13407_p4 = pnand %p13406_p11, %p13402_p9 }
  0x79   : > { %13410 = shalt.err (!%p13407_p4)
}
  0x7a   : > { %s13411_s24 = scalar_lea.vmem %s13755_s10, 2048  ;;  %s13514_s21 = smov [#allocation3]  }
  0x7b   : > { %p13412_p1 = scmp.ne.s32.totalorder %s13755_s10, %s13411_s24  ;;  %s13416_s26 = sshll.u32 %s13514_s21, 4  ;;  %s13417_s26 = int_to_ptr.vmem [resolvable:$false] %s13416_s26 }
  0x7c   : > { %s13418_s4 = scalar_lea.vmem %s13417_s26, 4096  ;;  %p13419_p5 = scmp.lt.s32.totalorder %s13755_s10, %s13417_s26 }
  0x7d   : > { %p13414_p0 = pnand %p13412_p1, %p13400_p2  ;;  %p13420_p12 = scmp.lt.s32.totalorder %s13418_s4, %s13411_s24 }
  0x7f   : > { %p13415_p13 = pneg %p13414_p0  ;;  %p13421_p6 = por %p13420_p12, %p13419_p5 }
  0x81   : > { %p13422_p3 = pnand %p13421_p6, %p13415_p13 }
  0x83   : > { %13425 = shalt.err (!%p13422_p3)
}
  0x84   : > { %12583 = dma.hbm_to_vmem [thread:$0]  (!%p13759_p7), %s13753_s6, 2048, %s13755_s10, %s13763_s5, %s18210_s27, %s18210_s27, %s18209_s18  }
  0x85   : > { %p18221_p1 = scmp.ne.s32.totalorder %s18203_s20, 0 }
  0x87   : > { %499 = sbr.rel (%p18221_p1) target bundleno = 4506 (0x119a), region = 76 }
  0x8c   : > { %s13790_s15 = sand.u32 1, %s13494_s30   ;;  %p18222_p3 = scmp.ne.s32.totalorder %s18217_s28, 0 }
  0x8d   : > { %s11069_s26 = sshll.u32 %s13790_s15, 7  ;;  %s502_s14 = scalar_lea.sflag [#allocation4], %s13790_s15 }
  0x8e   : > { %s13796_s12 = scalar_lea.vmem [#allocation3], %s11069_s26 }
  0x8f   : > { %13469 = dma.done.wait (%p18222_p3), %s502_s14, 2048  }
  0x90   : > { %13471 = vsyncadd (%p18222_p3), %s502_s14, 4294965248  ;;  %p18223_p4 = scmp.eq.s32.totalorder %s13618_s19, 0 }
  0x92   : > { %13473 = dma.done.wait (%p18223_p4), [#allocation7], 4096   ;;  %p18224_p6 = pmov %p18223_p4 }
  0x93   : > { %p18225_p12 = pmov %p18223_p4 }
  0x94   : > { %13475 = vsyncadd (%p18224_p6), [#allocation7], 4294963200 }
  0x95   : > { %13477 = dma.done.wait (%p18225_p12), [#allocation10], 4096   ;;  %p18226_p0 = pmov %p18223_p4 }
  0x97   : > { %13479 = vsyncadd (%p18226_p0), [#allocation10], 4294963200  ;;  %p18227_p7 = pmov %p18226_p0 }
  0x98   : > { %p18228_p2 = pmov %p18226_p0 }
  0x99   : > { %13481 = dma.done.wait (%p18227_p7), [#allocation13], 16384  }
  0x9a   : > { %13483 = vsyncadd (%p18228_p2), [#allocation13], 4294950912  ;;  %v576_v0 = vld [vmem:[%s13796_s12] sm:$0xff]  ;;  %v578_v1 = vld [vmem:[%s13796_s12 + $0x10] sm:$0xff]  ;;  %vm1298_vm0 = vcmask 261120   ;;  %s13515_s27 = smov 96  }
  0x9b   : > { %594 = vadd.xlane.f32.xlu0 %v576_v0  ;;  %598 = vadd.xlane.f32.xlu1 %v578_v1  ;;  %v577_v2 = vld [vmem:[%s13796_s12 + $0x8] sm:$0xff]  ;;  %v579_v3 = vld [vmem:[%s13796_s12 + $0x18] sm:$0xff]  ;;  %v580_v4 = vld [vmem:[%s13796_s12 + $0x20] sm:$0xff]  ;;  %vm2011_vm1 = vcmask 130048   ;;  %s13516_s5 = smov 64   ;;  %s13517_s28 = smov 32  }
  0x9c   : > { %v581_v5 = vld [vmem:[%s13796_s12 + $0x28] sm:$0xff]  ;;  %v13821_v6 = vld [vmem:[%s13796_s12 + $0x30] sm:$0xff]  ;;  %v13824_v7 = vld [vmem:[%s13796_s12 + $0x38] sm:$0xff]  ;;  %vm4548_vm2 = vcmask 523520   ;;  %vm6245_vm3 = vcmask 785920   ;;  %vm7942_vm4 = vcmask 1048320  }
  0x9d   : > { %v13829_v8 = vld [vmem:[%s13796_s12 + $0x40] sm:$0xff]  ;;  %v13832_v9 = vld [vmem:[%s13796_s12 + $0x48] sm:$0xff]  ;;  %v13837_v10 = vld [vmem:[%s13796_s12 + $0x50] sm:$0xff]  ;;  %s17903_s20 = scalar_lea.vmem [#allocation15], %s11069_s26  ;;  %s11284_s26 = sshll.u32 %s13618_s19, 11 }
  0x9e   : > { %v13840_v11 = vld [vmem:[%s13796_s12 + $0x58] sm:$0xff]  ;;  %v13845_v12 = vld [vmem:[%s13796_s12 + $0x60] sm:$0xff]  ;;  %v13848_v13 = vld [vmem:[%s13796_s12 + $0x68] sm:$0xff]  ;;  %s10925_s18 = sshll.u32 %s17903_s20, 4  ;;  %s10911_s17 = scalar_lea.sflag [#allocation5], %s13790_s15  ;;  %s17971_s18 = int_to_ptr.vmem [resolvable:$true] %s10925_s18 }
  0x9f   : > { %596 = vadd.xlane.f32.xlu0 %v577_v2  ;;  %600 = vadd.xlane.f32.xlu1 %v579_v3  ;;  %v13853_v14 = vld [vmem:[%s13796_s12 + $0x70] sm:$0xff]  ;;  %v13856_v15 = vld [vmem:[%s13796_s12 + $0x78] sm:$0xff]  ;;  %v828_v52 = vld [vmem:[#allocation6 + $0x68] sm:$0xff]  ;;  %s13426_s23 = scalar_lea.vmem %s17971_s18, 2048  ;;  %p18665_p8 = scmp.ne.s32.totalorder %s18218_s22, 0 }
  0xa0   : > { %v830_v16 = vld [vmem:[#allocation6 + $0x78] sm:$0xff]  ;;  %v829_v18 = vld [vmem:[#allocation6 + $0x70] sm:$0xff]  ;;  %v989_v53 = vld [vmem:[#allocation8 + $0x68] sm:$0xff]  ;;  %p13427_p9 = scmp.ne.s32.totalorder %s17971_s18, %s13426_s23  ;;  %s13519_s19 = smov [#allocation15]  }
  0xa1   : > { %v991_v17 = vld [vmem:[#allocation8 + $0x78] sm:$0xff]  ;;  %11829 = vmatprep.subr.mxu0 %v830_v16  ;;  %v990_v19 = vld [vmem:[#allocation8 + $0x70] sm:$0xff]  ;;  %v827_v57 = vld [vmem:[#allocation6 + $0x60] sm:$0xff]  ;;  %s13430_s24 = sshll.u32 %s13519_s19, 4  ;;  %s13431_s24 = int_to_ptr.vmem [resolvable:$false] %s13430_s24 }
  0xa2   : > { %11885 = vmatprep.subr.mxu1 %v991_v17  ;;  %11830 = vmatpush3.msra.mxu0 %v830_v16  ;;  %v988_v58 = vld [vmem:[#allocation8 + $0x60] sm:$0xff]  ;;  %p13428_p10 = pnand %p13427_p9, %p18665_p8  ;;  %s13432_s21 = scalar_lea.vmem %s13431_s24, 4096 }
  0xa3   : > { %602 = vadd.xlane.f32.xlu0 %v580_v4  ;;  %604 = vadd.xlane.f32.xlu1 %v581_v5  ;;  %p13433_p13 = scmp.lt.s32.totalorder %s17971_s18, %s13431_s24  ;;  %p13434_p5 = scmp.lt.s32.totalorder %s13432_s21, %s13426_s23 }
  0xa4   : > { %11886 = vmatpush3.msra.mxu1 %v991_v17  ;;  %11831 = vmatprep.subr.mxu0 %v829_v18  ;;  %p13429_p11 = pneg %p13428_p10 }
  0xa5   : > { %11887 = vmatprep.subr.mxu1 %v990_v19  ;;  %11832 = vmatpush3.msra.mxu0 %v829_v18  ;;  %p13435_p1 = por %p13434_p5, %p13433_p13 }
  0xa6   : > { %11888 = vmatpush3.msra.mxu1 %v990_v19  ;;  %11833 = vmatprep.subr.mxu0 %v828_v52 }
  0xa7   : > { %606 = vadd.xlane.f32.xlu0 %v13821_v6  ;;  %608 = vadd.xlane.f32.xlu1 %v13824_v7  ;;  %p13436_p3 = pnand %p13435_p1, %p13429_p11 }
  0xa8   : > { %11889 = vmatprep.subr.mxu1 %v989_v53  ;;  %11834 = vmatpush3.msra.mxu0 %v828_v52  ;;  %v816_v52 = vld [vmem:[#allocation6 + $0x8] sm:$0xff] }
  0xa9   : > { %11890 = vmatpush3.msra.mxu1 %v989_v53  ;;  %11835 = vmatprep.subr.mxu0 %v827_v57  ;;  %v977_v53 = vld [vmem:[#allocation8 + $0x8] sm:$0xff] }
  0xaa   : > { %11891 = vmatprep.subr.mxu1 %v988_v58  ;;  %11836 = vmatpush3.msra.mxu0 %v827_v57 }
  0xab   : > { %610 = vadd.xlane.f32.xlu0 %v13829_v8  ;;  %612 = vadd.xlane.f32.xlu1 %v13832_v9 }
  0xac   : > { %11892 = vmatpush3.msra.mxu1 %v988_v58 }
  0xaf   : > { %614 = vadd.xlane.f32.xlu0 %v13837_v10  ;;  %616 = vadd.xlane.f32.xlu1 %v13840_v11 }
  0xb3   : > { %618 = vadd.xlane.f32.xlu0 %v13845_v12  ;;  %620 = vadd.xlane.f32.xlu1 %v13848_v13 }
  0xb7   : > { %622 = vadd.xlane.f32.xlu0 %v13853_v14  ;;  %624 = vadd.xlane.f32.xlu1 %v13856_v15 }
 0x124   : > { %v595_v20 = vpop.xlane.xlu0 %594  ;;  %v599_v21 = vpop.xlane.xlu1 %598 }
 0x125   : > { %v627_v22 = vmul.f32 0.0078125, %v595_v20  ;;  %v629_v23 = vmul.f32 0.0078125, %v599_v21  ;;  %v824_v21 = vld [vmem:[#allocation6 + $0x48] sm:$0xff] }
 0x127   : > { %v13860_v24 = vsub.f32 %v576_v0, %v627_v22  ;;  %v13862_v25 = vsub.f32 %v578_v1, %v629_v23  ;;  %v985_v22 = vld [vmem:[#allocation8 + $0x48] sm:$0xff] }
 0x128   : > { %v597_v26 = vpop.xlane.xlu0 %596  ;;  %v601_v27 = vpop.xlane.xlu1 %600 }
 0x129   : > { %v628_v28 = vmul.f32 0.0078125, %v597_v26  ;;  %v659_v29 = vmul.f32 %v13860_v24, %v13860_v24  ;;  %v630_v30 = vmul.f32 0.0078125, %v601_v27  ;;  %v661_v31 = vmul.f32 %v13862_v25, %v13862_v25  ;;  %v823_v26 = vld [vmem:[#allocation6 + $0x40] sm:$0xff] }
 0x12a   : > { %v984_v27 = vld [vmem:[#allocation8 + $0x40] sm:$0xff] }
 0x12b   : > { %675 = vadd.xlane.f32.xlu0 %v659_v29  ;;  %v13868_v32 = vsub.f32 %v577_v2, %v628_v28  ;;  %v13870_v33 = vsub.f32 %v579_v3, %v630_v30  ;;  %v826_v3 = vld [vmem:[#allocation6 + $0x58] sm:$0xff] }
 0x12c   : > { %v603_v34 = vpop.xlane.xlu0 %602  ;;  %v605_v35 = vpop.xlane.xlu1 %604  ;;  %11837 = vmatprep.subr.mxu0 %v826_v3 }
 0x12d   : > { %v631_v36 = vmul.f32 0.0078125, %v603_v34  ;;  %v660_v37 = vmul.f32 %v13868_v32, %v13868_v32  ;;  %v632_v38 = vmul.f32 0.0078125, %v605_v35  ;;  %v662_v39 = vmul.f32 %v13870_v33, %v13870_v33  ;;  %11838 = vmatpush3.msra.mxu0 %v826_v3  ;;  %v983_v35 = vld [vmem:[#allocation8 + $0x38] sm:$0xff] }
 0x12f   : > { %679 = vadd.xlane.f32.xlu0 %v661_v31  ;;  %677 = vadd.xlane.f32.xlu1 %v660_v37  ;;  %v13876_v40 = vsub.f32 %v580_v4, %v631_v36  ;;  %v13878_v41 = vsub.f32 %v581_v5, %v632_v38  ;;  %v987_v4 = vld [vmem:[#allocation8 + $0x58] sm:$0xff] }
 0x130   : > { %v607_v42 = vpop.xlane.xlu0 %606  ;;  %v609_v43 = vpop.xlane.xlu1 %608  ;;  %11893 = vmatprep.subr.mxu1 %v987_v4 }
 0x131   : > { %v633_v44 = vmul.f32 0.0078125, %v607_v42  ;;  %v663_v45 = vmul.f32 %v13876_v40, %v13876_v40  ;;  %v634_v46 = vmul.f32 0.0078125, %v609_v43  ;;  %v664_v47 = vmul.f32 %v13878_v41, %v13878_v41  ;;  %11894 = vmatpush3.msra.mxu1 %v987_v4  ;;  %v982_v42 = vld [vmem:[#allocation8 + $0x30] sm:$0xff]  ;;  %v820_v43 = vld [vmem:[#allocation6 + $0x28] sm:$0xff] }
 0x133   : > { %681 = vadd.xlane.f32.xlu1 %v662_v39  ;;  %683 = vadd.xlane.f32.xlu0 %v663_v45  ;;  %v13885_v48 = vsub.f32 %v13821_v6, %v633_v44  ;;  %v13888_v49 = vsub.f32 %v13824_v7, %v634_v46  ;;  %v821_v39 = vld [vmem:[#allocation6 + $0x30] sm:$0xff]  ;;  %v981_v44 = vld [vmem:[#allocation8 + $0x28] sm:$0xff]  ;;  %v980_v45 = vld [vmem:[#allocation8 + $0x20] sm:$0xff] }
 0x134   : > { %v611_v50 = vpop.xlane.xlu0 %610  ;;  %v613_v51 = vpop.xlane.xlu1 %612  ;;  %v818_v46 = vld [vmem:[#allocation6 + $0x18] sm:$0xff] }
 0x135   : > { %v635_v54 = vmul.f32 0.0078125, %v611_v50  ;;  %v665_v55 = vmul.f32 %v13885_v48, %v13885_v48  ;;  %v636_v56 = vmul.f32 0.0078125, %v613_v51  ;;  %v666_v59 = vmul.f32 %v13888_v49, %v13888_v49  ;;  %v817_v50 = vld [vmem:[#allocation6 + $0x10] sm:$0xff] }
 0x136   : > { %v978_v51 = vld [vmem:[#allocation8 + $0x10] sm:$0xff] }
 0x137   : > { %685 = vadd.xlane.f32.xlu1 %v664_v47  ;;  %687 = vadd.xlane.f32.xlu0 %v665_v55  ;;  %v13895_v60 = vsub.f32 %v13829_v8, %v635_v54  ;;  %v13898_v61 = vsub.f32 %v13832_v9, %v636_v56  ;;  %v825_v8 = vld [vmem:[#allocation6 + $0x50] sm:$0xff]  ;;  %v979_v47 = vld [vmem:[#allocation8 + $0x18] sm:$0xff]  ;;  %v815_v54 = vld [vmem:[#allocation6] sm:$0xff] }
 0x138   : > { %v615_v62 = vpop.xlane.xlu0 %614  ;;  %v617_v63 = vpop.xlane.xlu1 %616  ;;  %v986_v9 = vld [vmem:[#allocation8 + $0x50] sm:$0xff]  ;;  %11839 = vmatprep.subr.mxu0 %v825_v8  ;;  %v976_v55 = vld [vmem:[#allocation8] sm:$0xff]  ;;  %v13934_v56 = vld [vmem:[#allocation9 + $0x78] sm:$0xff] }
 0x139   : > { %v637_v0 = vmul.f32 0.0078125, %v615_v62  ;;  %v667_v1 = vmul.f32 %v13895_v60, %v13895_v60  ;;  %v638_v2 = vmul.f32 0.0078125, %v617_v63  ;;  %v668_v5 = vmul.f32 %v13898_v61, %v13898_v61  ;;  %11895 = vmatprep.subr.mxu1 %v986_v9  ;;  %11840 = vmatpush3.msra.mxu0 %v825_v8 }
 0x13a   : > { %11896 = vmatpush3.msra.mxu1 %v986_v9  ;;  %11841 = vmatprep.subr.mxu0 %v824_v21 }
 0x13b   : > { %689 = vadd.xlane.f32.xlu1 %v666_v59  ;;  %691 = vadd.xlane.f32.xlu0 %v667_v1  ;;  %v13905_v6 = vsub.f32 %v13837_v10, %v637_v0  ;;  %v13908_v7 = vsub.f32 %v13840_v11, %v638_v2 }
 0x13c   : > { %v619_v16 = vpop.xlane.xlu0 %618  ;;  %v621_v17 = vpop.xlane.xlu1 %620  ;;  %11897 = vmatprep.subr.mxu1 %v985_v22  ;;  %11842 = vmatpush3.msra.mxu0 %v824_v21 }
 0x13d   : > { %v639_v18 = vmul.f32 0.0078125, %v619_v16  ;;  %v669_v19 = vmul.f32 %v13905_v6, %v13905_v6  ;;  %v640_v20 = vmul.f32 0.0078125, %v621_v17  ;;  %v670_v10 = vmul.f32 %v13908_v7, %v13908_v7  ;;  %11898 = vmatpush3.msra.mxu1 %v985_v22  ;;  %11843 = vmatprep.subr.mxu0 %v823_v26 }
 0x13e   : > { %11899 = vmatprep.subr.mxu1 %v984_v27  ;;  %11844 = vmatpush3.msra.mxu0 %v823_v26 }
 0x13f   : > { %693 = vadd.xlane.f32.xlu1 %v668_v5  ;;  %695 = vadd.xlane.f32.xlu0 %v669_v19  ;;  %v13915_v11 = vsub.f32 %v13845_v12, %v639_v18  ;;  %v13918_v23 = vsub.f32 %v13848_v13, %v640_v20  ;;  %v822_v12 = vld [vmem:[#allocation6 + $0x38] sm:$0xff] }
 0x140   : > { %v623_v28 = vpop.xlane.xlu0 %622  ;;  %v625_v29 = vpop.xlane.xlu1 %624  ;;  %11900 = vmatpush3.msra.mxu1 %v984_v27  ;;  %11845 = vmatprep.subr.mxu0 %v822_v12 }
 0x141   : > { %v641_v30 = vmul.f32 0.0078125, %v623_v28  ;;  %v671_v31 = vmul.f32 %v13915_v11, %v13915_v11  ;;  %v642_v34 = vmul.f32 0.0078125, %v625_v29  ;;  %v672_v13 = vmul.f32 %v13918_v23, %v13918_v23  ;;  %11901 = vmatprep.subr.mxu1 %v983_v35  ;;  %11846 = vmatpush3.msra.mxu0 %v822_v12 }
 0x142   : > { %11902 = vmatpush3.msra.mxu1 %v983_v35  ;;  %11847 = vmatprep.subr.mxu0 %v821_v39 }
 0x143   : > { %697 = vadd.xlane.f32.xlu1 %v670_v10  ;;  %699 = vadd.xlane.f32.xlu0 %v671_v31  ;;  %v13925_v36 = vsub.f32 %v13853_v14, %v641_v30  ;;  %v13928_v37 = vsub.f32 %v13856_v15, %v642_v34  ;;  %v819_v15 = vld [vmem:[#allocation6 + $0x20] sm:$0xff] }
 0x144   : > { %11903 = vmatprep.subr.mxu1 %v982_v42  ;;  %11848 = vmatpush3.msra.mxu0 %v821_v39  ;;  %v13941_v31 = vld [vmem:[%s18017_s1] ss:$0 sm:$0xff] }
 0x145   : > { %v673_v38 = vmul.f32 %v13925_v36, %v13925_v36  ;;  %v674_v14 = vmul.f32 %v13928_v37, %v13928_v37  ;;  %11904 = vmatpush3.msra.mxu1 %v982_v42  ;;  %11849 = vmatprep.subr.mxu0 %v820_v43  ;;  %v13947_v39 = vld [vmem:[%s18018_s2] ss:$0 sm:$0xff] }
 0x146   : > { %11905 = vmatprep.subr.mxu1 %v981_v44  ;;  %11850 = vmatpush3.msra.mxu0 %v820_v43 }
 0x147   : > { %701 = vadd.xlane.f32.xlu1 %v672_v13  ;;  %703 = vadd.xlane.f32.xlu0 %v673_v38 }
 0x148   : > { %11906 = vmatpush3.msra.mxu1 %v981_v44  ;;  %11851 = vmatprep.subr.mxu0 %v819_v15 }
 0x149   : > { %11907 = vmatprep.subr.mxu1 %v980_v45  ;;  %11852 = vmatpush3.msra.mxu0 %v819_v15 }
 0x14a   : > { %11908 = vmatpush3.msra.mxu1 %v980_v45  ;;  %11853 = vmatprep.subr.mxu0 %v818_v46 }
 0x14b   : > { %705 = vadd.xlane.f32.xlu1 %v674_v14  ;;  %11909 = vmatprep.subr.mxu1 %v979_v47 }
 0x14c   : > { %11854 = vmatpush3.msra.mxu0 %v818_v46  ;;  %11910 = vmatpush3.msra.mxu1 %v979_v47 }
 0x14d   : > { %11855 = vmatprep.subr.mxu0 %v817_v50  ;;  %11911 = vmatprep.subr.mxu1 %v978_v51 }
 0x14e   : > { %11856 = vmatpush3.msra.mxu0 %v817_v50  ;;  %11912 = vmatpush3.msra.mxu1 %v978_v51 }
 0x14f   : > { %11857 = vmatprep.subr.mxu0 %v816_v52  ;;  %11913 = vmatprep.subr.mxu1 %v977_v53 }
 0x150   : > { %11858 = vmatpush3.msra.mxu0 %v816_v52  ;;  %11914 = vmatpush3.msra.mxu1 %v977_v53 }
 0x151   : > { %11859 = vmatprep.subr.mxu0 %v815_v54  ;;  %11915 = vmatprep.subr.mxu1 %v976_v55 }
 0x152   : > { %11860 = vmatpush3.msra.mxu0 %v815_v54  ;;  %11916 = vmatpush3.msra.mxu1 %v976_v55 }
 0x153   : > { %11941 = vmatprep.subr.mxu0 %v13934_v56  ;;  %12501 = vmatprep.subr.mxu1 %v13934_v56 }
 0x1b4   : > { %v676_v57 = vpop.xlane.xlu0 %675 }
 0x1b5   : > { %v707_v58 = vmul.f32 0.0078125, %v676_v57 }
 0x1b7   : > { %v723_v59 = vadd.f32 1e-05, %v707_v58 }
 0x1b8   : > { %v678_v62 = vpop.xlane.xlu1 %677  ;;  %v680_v63 = vpop.xlane.xlu0 %679 }
 0x1b9   : > { %12650 = vrsqrt.f32 %v723_v59  ;;  %v708_v0 = vmul.f32 0.0078125, %v678_v62  ;;  %v709_v1 = vmul.f32 0.0078125, %v680_v63 }
 0x1bb   : > { %v724_v2 = vadd.f32 1e-05, %v708_v0  ;;  %v725_v3 = vadd.f32 1e-05, %v709_v1 }
 0x1bc   : > { %v682_v4 = vpop.xlane.xlu1 %681  ;;  %v684_v5 = vpop.xlane.xlu0 %683 }
 0x1bd   : > { %12652 = vrsqrt.f32 %v724_v2  ;;  %v710_v8 = vmul.f32 0.0078125, %v682_v4  ;;  %v711_v9 = vmul.f32 0.0078125, %v684_v5  ;;  %v1151_v5 = vld [vmem:[#allocation9 + $0x70] sm:$0xff] }
 0x1be   : > { %12654 = vrsqrt.f32 %v725_v3 }
 0x1bf   : > { %v726_v16 = vadd.f32 1e-05, %v710_v8  ;;  %v727_v17 = vadd.f32 1e-05, %v711_v9 }
 0x1c0   : > { %v686_v18 = vpop.xlane.xlu1 %685  ;;  %v688_v19 = vpop.xlane.xlu0 %687 }
 0x1c1   : > { %12656 = vrsqrt.f32 %v726_v16  ;;  %v712_v20 = vmul.f32 0.0078125, %v686_v18  ;;  %v713_v21 = vmul.f32 0.0078125, %v688_v19 }
 0x1c2   : > { %12658 = vrsqrt.f32 %v727_v17 }
 0x1c3   : > { %v728_v22 = vadd.f32 1e-05, %v712_v20  ;;  %v729_v10 = vadd.f32 1e-05, %v713_v21  ;;  %v1150_v21 = vld [vmem:[#allocation9 + $0x68] sm:$0xff] }
 0x1c4   : > { %v690_v26 = vpop.xlane.xlu1 %689  ;;  %v692_v27 = vpop.xlane.xlu0 %691 }
 0x1c5   : > { %12660 = vrsqrt.f32 %v728_v22  ;;  %v714_v28 = vmul.f32 0.0078125, %v690_v26  ;;  %v715_v29 = vmul.f32 0.0078125, %v692_v27 }
 0x1c6   : > { %v12651_v30 = vpop.eup %12650  ;;  %12662 = vrsqrt.f32 %v729_v10 }
 0x1c7   : > { %v730_v34 = vadd.f32 1e-05, %v714_v28  ;;  %v731_v12 = vadd.f32 1e-05, %v715_v29  ;;  %v755_v35 = vmul.f32 %v12651_v30, %v13860_v24  ;;  %v1149_v30 = vld [vmem:[#allocation9 + $0x60] sm:$0xff] }
 0x1c8   : > { %v694_v13 = vpop.xlane.xlu1 %693  ;;  %v696_v38 = vpop.xlane.xlu0 %695 }
 0x1c9   : > { %12664 = vrsqrt.f32 %v730_v34  ;;  %v716_v42 = vmul.f32 0.0078125, %v694_v13  ;;  %v717_v14 = vmul.f32 0.0078125, %v696_v38  ;;  %v777_v43 = vmul.f32 %v13941_v31, %v755_v35  ;;  %v1148_v38 = vld [vmem:[#allocation9 + $0x58] sm:$0xff] }
 0x1ca   : > { %v12653_v44 = vpop.eup %12652  ;;  %12666 = vrsqrt.f32 %v731_v12 }
 0x1cb   : > { %v12655_v15 = vpop.eup %12654  ;;  %v732_v45 = vadd.f32 1e-05, %v716_v42  ;;  %v733_v46 = vadd.f32 1e-05, %v717_v14  ;;  %v13951_v47 = vadd.f32 %v13947_v39, %v777_v43  ;;  %v756_v24 = vmul.f32 %v12653_v44, %v13868_v32  ;;  %v1147_v44 = vld [vmem:[#allocation9 + $0x50] sm:$0xff] }
 0x1cc   : > { %v698_v50 = vpop.xlane.xlu1 %697  ;;  %v700_v51 = vpop.xlane.xlu0 %699  ;;  %v757_v52 = vmul.f32 %v12655_v15, %v13862_v25 }
 0x1cd   : > { %12668 = vrsqrt.f32 %v732_v45  ;;  %v718_v53 = vmul.f32 0.0078125, %v698_v50  ;;  %v719_v54 = vmul.f32 0.0078125, %v700_v51  ;;  %11861 = vmatprep.mubr.f32.mxu0 %v13951_v47  ;;  %11917 = vmatprep.mubr.f32.mxu1 %v13951_v47  ;;  %v778_v55 = vmul.f32 %v13941_v31, %v756_v24  ;;  %v1146_v24 = vld [vmem:[#allocation9 + $0x48] sm:$0xff] }
 0x1ce   : > { %v12657_v57 = vpop.eup %12656  ;;  %12670 = vrsqrt.f32 %v733_v46  ;;  %v779_v58 = vmul.f32 %v13941_v31, %v757_v52 }
 0x1cf   : > { %v12659_v59 = vpop.eup %12658  ;;  %v734_v62 = vadd.f32 1e-05, %v718_v53  ;;  %v13960_v32 = vadd.f32 %v13947_v39, %v778_v55  ;;  %v758_v25 = vmul.f32 %v12657_v57, %v13870_v33  ;;  %v735_v63 = vadd.f32 1e-05, %v719_v54  ;;  %v1145_v53 = vld [vmem:[#allocation9 + $0x40] sm:$0xff] }
 0x1d0   : > { %v702_v0 = vpop.xlane.xlu1 %701  ;;  %v704_v1 = vpop.xlane.xlu0 %703  ;;  %v13964_v2 = vadd.f32 %v13947_v39, %v779_v58  ;;  %v759_v3 = vmul.f32 %v12659_v59, %v13876_v40  ;;  %v1144_v58 = vld [vmem:[#allocation9 + $0x38] sm:$0xff] }
 0x1d1   : > { %v720_v4 = vmul.f32 0.0078125, %v702_v0  ;;  %11862 = vmatmul.mubr.f32.vlgmr.msra.gmra.mxu0 %v13960_v32  ;;  %11918 = vmatmul.mubr.f32.vlgmr.msra.gmra.mxu1 %v13960_v32  ;;  %v780_v8 = vmul.f32 %v13941_v31, %v758_v25  ;;  %12672 = vrsqrt.f32 %v734_v62  ;;  %v721_v16 = vmul.f32 0.0078125, %v704_v1 }
 0x1d2   : > { %v12661_v9 = vpop.eup %12660  ;;  %11864 = vmatprep.mubr.f32.mxu0 %v13964_v2  ;;  %11920 = vmatprep.mubr.f32.mxu1 %v13964_v2  ;;  %v781_v33 = vmul.f32 %v13941_v31, %v759_v3  ;;  %12674 = vrsqrt.f32 %v735_v63  ;;  %v1143_v63 = vld [vmem:[#allocation9 + $0x30] sm:$0xff] }
 0x1d3   : > { %v12663_v17 = vpop.eup %12662  ;;  %11942 = vmatpush3.msra.mxu0 %v13934_v56  ;;  %12517 = vmatpush3.msra.mxu1 %v13934_v56  ;;  %v13976_v40 = vadd.f32 %v13947_v39, %v780_v8  ;;  %v760_v18 = vmul.f32 %v12661_v9, %v13878_v41  ;;  %v736_v19 = vadd.f32 1e-05, %v720_v4  ;;  %v737_v27 = vadd.f32 1e-05, %v721_v16  ;;  %v1142_v4 = vld [vmem:[#allocation9 + $0x28] sm:$0xff]  ;;  %v1141_v9 = vld [vmem:[#allocation9 + $0x20] sm:$0xff] }
 0x1d4   : > { %11943 = vmatprep.subr.mxu0 %v1151_v5  ;;  %12502 = vmatprep.subr.mxu1 %v1151_v5  ;;  %v706_v20 = vpop.xlane.xlu1 %705  ;;  %v13980_v22 = vadd.f32 %v13947_v39, %v781_v33  ;;  %v761_v10 = vmul.f32 %v12663_v17, %v13885_v48  ;;  %v1140_v33 = vld [vmem:[#allocation9 + $0x18] sm:$0xff] }
 0x1d5   : > { %11944 = vmatpush3.msra.mxu0 %v1151_v5  ;;  %12518 = vmatpush3.msra.mxu1 %v1151_v5  ;;  %v782_v56 = vmul.f32 %v13941_v31, %v760_v18  ;;  %v722_v28 = vmul.f32 0.0078125, %v706_v20  ;;  %12676 = vrsqrt.f32 %v736_v19  ;;  %v1138_v20 = vld [vmem:[#allocation9 + $0x8] sm:$0xff] }
 0x1d6   : > { %v12665_v26 = vpop.eup %12664  ;;  %11865 = vmatmul.mubr.f32.gmra.mxu0 %v13976_v40  ;;  %11921 = vmatmul.mubr.f32.gmra.mxu1 %v13976_v40  ;;  %v783_v41 = vmul.f32 %v13941_v31, %v761_v10  ;;  %12678 = vrsqrt.f32 %v737_v27 }
 0x1d7   : > { %v12667_v29 = vpop.eup %12666  ;;  %11945 = vmatprep.subr.mxu0 %v1150_v21  ;;  %12503 = vmatprep.subr.mxu1 %v1150_v21  ;;  %v762_v34 = vmul.f32 %v12665_v26, %v13888_v49  ;;  %v13991_v48 = vadd.f32 %v13947_v39, %v782_v56  ;;  %v738_v13 = vadd.f32 1e-05, %v722_v28 }
 0x1d8   : > { %11867 = vmatprep.mubr.f32.mxu0 %v13980_v22  ;;  %11923 = vmatprep.mubr.f32.mxu1 %v13980_v22  ;;  %v763_v12 = vmul.f32 %v12667_v29, %v13895_v60  ;;  %v13995_v49 = vadd.f32 %v13947_v39, %v783_v41 }
 0x1d9   : > { %11946 = vmatpush3.msra.mxu0 %v1150_v21  ;;  %12519 = vmatpush3.msra.mxu1 %v1150_v21  ;;  %v784_v42 = vmul.f32 %v13941_v31, %v762_v34  ;;  %12680 = vrsqrt.f32 %v738_v13 }
 0x1da   : > { %v12669_v35 = vpop.eup %12668  ;;  %11947 = vmatprep.subr.mxu0 %v1149_v30  ;;  %12504 = vmatprep.subr.mxu1 %v1149_v30  ;;  %v785_v60 = vmul.f32 %v13941_v31, %v763_v12 }
 0x1db   : > { %v12671_v14 = vpop.eup %12670  ;;  %11948 = vmatpush3.msra.mxu0 %v1149_v30  ;;  %12520 = vmatpush3.msra.mxu1 %v1149_v30  ;;  %v764_v43 = vmul.f32 %v12669_v35, %v13898_v61  ;;  %v14005_v15 = vadd.f32 %v13947_v39, %v784_v42 }
 0x1dc   : > { %11868 = vmatmul.mubr.f32.gmra.mxu0 %v13991_v48  ;;  %11924 = vmatmul.mubr.f32.gmra.mxu1 %v13991_v48  ;;  %v765_v45 = vmul.f32 %v12671_v14, %v13905_v6  ;;  %v14009_v61 = vadd.f32 %v13947_v39, %v785_v60 }
 0x1dd   : > { %11949 = vmatprep.subr.mxu0 %v1148_v38  ;;  %12505 = vmatprep.subr.mxu1 %v1148_v38  ;;  %v786_v50 = vmul.f32 %v13941_v31, %v764_v43 }
 0x1de   : > { %11870 = vmatprep.mubr.f32.mxu0 %v13995_v49  ;;  %11926 = vmatprep.mubr.f32.mxu1 %v13995_v49  ;;  %v12673_v46 = vpop.eup %12672  ;;  %v787_v6 = vmul.f32 %v13941_v31, %v765_v45 }
 0x1df   : > { %11950 = vmatpush3.msra.mxu0 %v1148_v38  ;;  %12521 = vmatpush3.msra.mxu1 %v1148_v38  ;;  %v12675_v51 = vpop.eup %12674  ;;  %v766_v52 = vmul.f32 %v12673_v46, %v13908_v7  ;;  %v14019_v54 = vadd.f32 %v13947_v39, %v786_v50 }
 0x1e0   : > { %11951 = vmatprep.subr.mxu0 %v1147_v44  ;;  %12506 = vmatprep.subr.mxu1 %v1147_v44  ;;  %v767_v55 = vmul.f32 %v12675_v51, %v13915_v11  ;;  %v14023_v7 = vadd.f32 %v13947_v39, %v787_v6 }
 0x1e1   : > { %11952 = vmatpush3.msra.mxu0 %v1147_v44  ;;  %12522 = vmatpush3.msra.mxu1 %v1147_v44  ;;  %v788_v59 = vmul.f32 %v13941_v31, %v766_v52 }
 0x1e2   : > { %11871 = vmatmul.mubr.f32.gmra.mxu0 %v14005_v15  ;;  %11927 = vmatmul.mubr.f32.gmra.mxu1 %v14005_v15  ;;  %v12677_v57 = vpop.eup %12676  ;;  %v789_v11 = vmul.f32 %v13941_v31, %v767_v55 }
 0x1e3   : > { %11953 = vmatprep.subr.mxu0 %v1146_v24  ;;  %12507 = vmatprep.subr.mxu1 %v1146_v24  ;;  %v12679_v62 = vpop.eup %12678  ;;  %v768_v25 = vmul.f32 %v12677_v57, %v13918_v23  ;;  %v14033_v0 = vadd.f32 %v13947_v39, %v788_v59 }
 0x1e4   : > { %11873 = vmatprep.mubr.f32.mxu0 %v14009_v61  ;;  %11929 = vmatprep.mubr.f32.mxu1 %v14009_v61  ;;  %v769_v1 = vmul.f32 %v12679_v62, %v13925_v36  ;;  %v811_v23 = vadd.f32 %v13947_v39, %v789_v11 }
 0x1e5   : > { %11954 = vmatpush3.msra.mxu0 %v1146_v24  ;;  %12523 = vmatpush3.msra.mxu1 %v1146_v24  ;;  %v790_v5 = vmul.f32 %v13941_v31, %v768_v25 }
 0x1e6   : > { %11955 = vmatprep.subr.mxu0 %v1145_v53  ;;  %12508 = vmatprep.subr.mxu1 %v1145_v53  ;;  %v12681_v3 = vpop.eup %12680  ;;  %v791_v8 = vmul.f32 %v13941_v31, %v769_v1 }
 0x1e7   : > { %11956 = vmatpush3.msra.mxu0 %v1145_v53  ;;  %12524 = vmatpush3.msra.mxu1 %v1145_v53  ;;  %v770_v36 = vmul.f32 %v12681_v3, %v13928_v37  ;;  %v812_v16 = vadd.f32 %v13947_v39, %v790_v5  ;;  %v1139_v37 = vld [vmem:[#allocation9 + $0x10] sm:$0xff] }
 0x1e8   : > { %11874 = vmatmul.mubr.f32.gmra.mxu0 %v14019_v54  ;;  %11930 = vmatmul.mubr.f32.gmra.mxu1 %v14019_v54  ;;  %v813_v17 = vadd.f32 %v13947_v39, %v791_v8 }
 0x1e9   : > { %11957 = vmatprep.subr.mxu0 %v1144_v58  ;;  %12509 = vmatprep.subr.mxu1 %v1144_v58  ;;  %v792_v18 = vmul.f32 %v13941_v31, %v770_v36  ;;  %v1137_v31 = vld [vmem:[#allocation9] sm:$0xff] }
 0x1ea   : > { %11876 = vmatprep.mubr.f32.mxu0 %v14023_v7  ;;  %11932 = vmatprep.mubr.f32.mxu1 %v14023_v7 }
 0x1eb   : > { %11958 = vmatpush3.msra.mxu0 %v1144_v58  ;;  %12525 = vmatpush3.msra.mxu1 %v1144_v58  ;;  %v814_v19 = vadd.f32 %v13947_v39, %v792_v18 }
 0x1ec   : > { %11959 = vmatprep.subr.mxu0 %v1143_v63  ;;  %12510 = vmatprep.subr.mxu1 %v1143_v63 }
 0x1ed   : > { %11960 = vmatpush3.msra.mxu0 %v1143_v63  ;;  %12526 = vmatpush3.msra.mxu1 %v1143_v63 }
 0x1ee   : > { %11877 = vmatmul.mubr.f32.gmra.mxu0 %v14033_v0  ;;  %11933 = vmatmul.mubr.f32.gmra.mxu1 %v14033_v0 }
 0x1ef   : > { %11961 = vmatprep.subr.mxu0 %v1142_v4  ;;  %12511 = vmatprep.subr.mxu1 %v1142_v4 }
 0x1f0   : > { %11879 = vmatprep.mubr.f32.mxu0 %v811_v23  ;;  %11935 = vmatprep.mubr.f32.mxu1 %v811_v23 }
 0x1f1   : > { %11962 = vmatpush3.msra.mxu0 %v1142_v4  ;;  %12527 = vmatpush3.msra.mxu1 %v1142_v4 }
 0x1f2   : > { %11963 = vmatprep.subr.mxu0 %v1141_v9  ;;  %12512 = vmatprep.subr.mxu1 %v1141_v9 }
 0x1f3   : > { %11964 = vmatpush3.msra.mxu0 %v1141_v9  ;;  %12528 = vmatpush3.msra.mxu1 %v1141_v9 }
 0x1f4   : > { %11880 = vmatmul.mubr.f32.gmra.mxu0 %v812_v16  ;;  %11936 = vmatmul.mubr.f32.gmra.mxu1 %v812_v16 }
 0x1f5   : > { %11965 = vmatprep.subr.mxu0 %v1140_v33  ;;  %12513 = vmatprep.subr.mxu1 %v1140_v33 }
 0x1f6   : > { %11882 = vmatprep.mubr.f32.mxu0 %v813_v17  ;;  %11938 = vmatprep.mubr.f32.mxu1 %v813_v17 }
 0x1f7   : > { %11966 = vmatpush3.msra.mxu0 %v1140_v33  ;;  %12529 = vmatpush3.msra.mxu1 %v1140_v33 }
 0x1f8   : > { %11967 = vmatprep.subr.mxu0 %v1139_v37  ;;  %12514 = vmatprep.subr.mxu1 %v1139_v37 }
 0x1f9   : > { %11968 = vmatpush3.msra.mxu0 %v1139_v37  ;;  %12530 = vmatpush3.msra.mxu1 %v1139_v37 }
 0x1fa   : > { %11883 = vmatmul.mubr.f32.gmra.mxu0 %v814_v19  ;;  %11939 = vmatmul.mubr.f32.gmra.mxu1 %v814_v19 }
 0x1fb   : > { %11969 = vmatprep.subr.mxu0 %v1138_v20  ;;  %12515 = vmatprep.subr.mxu1 %v1138_v20 }
 0x1fc   : > { %11970 = vmatpush3.msra.mxu0 %v1138_v20  ;;  %12531 = vmatpush3.msra.mxu1 %v1138_v20 }
 0x1fd   : > { %11973 = vmatprep.mubr.f32.mxu0 %v13951_v47  ;;  %11985 = vmatprep.mubr.f32.mxu1 %v14009_v61 }
 0x1fe   : > { %11971 = vmatprep.subr.mxu0 %v1137_v31  ;;  %12516 = vmatprep.subr.mxu1 %v1137_v31 }
 0x1ff   : > { %11972 = vmatpush3.msra.mxu0 %v1137_v31  ;;  %12532 = vmatpush3.msra.mxu1 %v1137_v31 }
 0x200   : > { %11974 = vmatmul.mubr.f32.vlgmr.msra.gmra.mxu0 %v13960_v32  ;;  %11986 = vmatmul.mubr.f32.vlgmr.msra.gmra.mxu1 %v14019_v54 }
 0x201   : > { %11976 = vmatprep.mubr.f32.mxu0 %v13964_v2  ;;  %11988 = vmatprep.mubr.f32.mxu1 %v14023_v7 }
 0x204   : > { %11977 = vmatmul.mubr.f32.gmra.mxu0 %v13976_v40  ;;  %11989 = vmatmul.mubr.f32.gmra.mxu1 %v14033_v0 }
 0x205   : > { %11979 = vmatprep.mubr.f32.mxu0 %v13980_v22  ;;  %11991 = vmatprep.mubr.f32.mxu1 %v811_v23 }
 0x208   : > { %11980 = vmatmul.mubr.f32.gmra.mxu0 %v13991_v48  ;;  %11992 = vmatmul.mubr.f32.gmra.mxu1 %v812_v16 }
 0x209   : > { %11982 = vmatprep.mubr.f32.mxu0 %v13995_v49  ;;  %11994 = vmatprep.mubr.f32.mxu1 %v813_v17 }
 0x20c   : > { %11983 = vmatmul.mubr.f32.gmra.mxu0 %v14005_v15  ;;  %11995 = vmatmul.mubr.f32.gmra.mxu1 %v814_v19 }
 0x291   : > { %v14058_v39 = vpop.f32.mrf.mxu0  ;;  %v14060_v47 = vpop.f32.mrf.mxu1 }
 0x292   : > { %18229 = vst [vmem:[#allocation24_spill] sm:$0xff] %v14058_v39  ;;  %18230 = vst [vmem:[#allocation25_spill] sm:$0xff] %v14060_v47  ;;  %2858 = vrot.lane.b32.xlu0 %v14060_v47, %s13515_s27  ;;  %11997 = vmatprep.subr.msk.mxu1 %vm1298_vm0, %v14060_v47 }
 0x293   : > { %2854 = vrot.lane.b32.xlu1 %v14058_v39, %s13515_s27  ;;  %v14068_v32 = vpop.f32.mrf.mxu0  ;;  %v14070_v2 = vpop.f32.mrf.mxu1  ;;  %11998 = vmatpush3.xpose.msk.msra.mxu1 %vm1298_vm0, %v14060_v47 }
 0x294   : > { %18231 = vst [vmem:[#allocation26_spill] sm:$0xff] %v14068_v32  ;;  %18232 = vst [vmem:[#allocation27_spill] sm:$0xff] %v14070_v2  ;;  %11999 = vmatprep.subr.msk.mxu1 %vm1298_vm0, %v14070_v2  ;;  %12001 = vmatprep.mubr.msk.f32.mxu1 %vm1298_vm0, %v14068_v32 }
 0x296   : > { %v14078_v40 = vpop.f32.mrf.mxu0  ;;  %v14080_v21 = vpop.f32.mrf.mxu1 }
 0x297   : > { %18233 = vst [vmem:[#allocation28_spill] sm:$0xff] %v14078_v40  ;;  %18234 = vst [vmem:[#allocation29_spill] sm:$0xff] %v14080_v21  ;;  %2856 = vrot.lane.b32.xlu1 %v14070_v2, %s13515_s27  ;;  %12000 = vmatpush3.xpose.msk.msra.mxu1 %vm1298_vm0, %v14070_v2 }
 0x298   : > { %v14086_v22 = vpop.f32.mrf.mxu0  ;;  %v14088_v10 = vpop.f32.mrf.mxu1  ;;  %12004 = vmatprep.subr.msk.mxu1 %vm1298_vm0, %v14080_v21 }
 0x299   : > { %18235 = vst [vmem:[#allocation30_spill] sm:$0xff] %v14086_v22  ;;  %18236 = vst [vmem:[#allocation31_spill] sm:$0xff] %v14088_v10  ;;  %2947 = vrot.lane.b32.xlu0 %v14088_v10, %s13515_s27 }
 0x29a   : > { %12002 = vmatmul.mubr.msk.f32.vlgmr.msra.gmra.mxu1 %vm1298_vm0, %v14058_v39 }
 0x29b   : > { %2852 = vrot.lane.b32.xlu1 %v14068_v32, %s13515_s27  ;;  %12005 = vmatpush3.xpose.msk.msra.mxu1 %vm1298_vm0, %v14080_v21 }
 0x29c   : > { %v14100_v56 = vpop.f32.mrf.mxu0  ;;  %v14102_v26 = vpop.f32.mrf.mxu1  ;;  %12008 = vmatprep.mubr.msk.f32.mxu1 %vm1298_vm0, %v14086_v22  ;;  %12006 = vmatprep.subr.msk.mxu1 %vm1298_vm0, %v14088_v10 }
 0x29d   : > { %18237 = vst [vmem:[#allocation32_spill] sm:$0xff] %v14100_v56  ;;  %18238 = vst [vmem:[#allocation33_spill] sm:$0xff] %v14102_v26  ;;  %2943 = vrot.lane.b32.xlu0 %v14086_v22, %s13515_s27 }
 0x29e   : > { %v14110_v27 = vpop.f32.mrf.mxu0  ;;  %v14112_v28 = vpop.f32.mrf.mxu1 }
 0x29f   : > { %18239 = vst [vmem:[#allocation34_spill] sm:$0xff] %v14110_v27  ;;  %18240 = vst [vmem:[#allocation35_spill] sm:$0xff] %v14112_v28  ;;  %2949 = vrot.lane.b32.xlu1 %v14080_v21, %s13515_s27  ;;  %12007 = vmatpush3.xpose.msk.msra.mxu1 %vm1298_vm0, %v14088_v10 }
 0x2a0   : > { %12011 = vmatprep.subr.msk.mxu1 %vm1298_vm0, %v14102_v26 }
 0x2a1   : > { %3040 = vrot.lane.b32.xlu0 %v14102_v26, %s13515_s27 }
 0x2a2   : > { %v14122_v41 = vpop.f32.mrf.mxu0  ;;  %v14124_v29 = vpop.f32.mrf.mxu1  ;;  %12009 = vmatmul.mubr.msk.f32.vlgmr.msra.gmra.mxu1 %vm1298_vm0, %v14078_v40 }
 0x2a3   : > { %18241 = vst [vmem:[#allocation36_spill] sm:$0xff] %v14124_v29  ;;  %3038 = vrot.lane.b32.xlu1 %v14112_v28, %s13515_s27  ;;  %12012 = vmatpush3.xpose.msk.msra.mxu1 %vm1298_vm0, %v14102_v26 }
 0x2a4   : > { %v14132_v30 = vpop.f32.mrf.mxu0  ;;  %v14134_v34 = vpop.f32.mrf.mxu1  ;;  %12015 = vmatprep.mubr.msk.f32.mxu1 %vm1298_vm0, %v14110_v27  ;;  %12013 = vmatprep.subr.msk.mxu1 %vm1298_vm0, %v14112_v28 }
 0x2a5   : > { %18242 = vst [vmem:[#allocation37_spill] sm:$0xff] %v14134_v34 }
 0x2a7   : > { %3034 = vrot.lane.b32.xlu1 %v14110_v27, %s13515_s27  ;;  %12014 = vmatpush3.xpose.msk.msra.mxu1 %vm1298_vm0, %v14112_v28 }
 0x2a8   : > { %v14144_v48 = vpop.f32.mrf.mxu0  ;;  %v14146_v12 = vpop.f32.mrf.mxu1  ;;  %12018 = vmatprep.subr.msk.mxu1 %vm1298_vm0, %v14124_v29 }
 0x2a9   : > { %18243 = vst [vmem:[#allocation38_spill] sm:$0xff] %v14146_v12  ;;  %12025 = vmatprep.subr.msk.mxu0 %vm1298_vm0, %v14146_v12 }
 0x2aa   : > { %v14152_v35 = vpop.f32.mrf.mxu0  ;;  %v14154_v13 = vpop.f32.mrf.mxu1  ;;  %12026 = vmatpush3.xpose.msk.msra.mxu0 %vm1298_vm0, %v14146_v12  ;;  %12016 = vmatmul.mubr.msk.f32.vlgmr.msra.gmra.mxu1 %vm1298_vm0, %v14100_v56 }
 0x2ab   : > { %18244 = vst [vmem:[#allocation39_spill] sm:$0xff] %v14154_v13  ;;  %12027 = vmatprep.subr.msk.mxu0 %vm1298_vm0, %v14154_v13  ;;  %12029 = vmatprep.mubr.msk.f32.mxu0 %vm1298_vm0, %v14152_v35 }
 0x2ac   : > { %12019 = vmatpush3.xpose.msk.msra.mxu1 %vm1298_vm0, %v14124_v29  ;;  %12022 = vmatprep.mubr.msk.f32.mxu1 %vm1298_vm0, %v14132_v30 }
 0x2ad   : > { %12020 = vmatprep.subr.msk.mxu1 %vm1298_vm0, %v14134_v34 }
 0x2ae   : > { %v14170_v38 = vpop.f32.mrf.mxu0  ;;  %v14172_v49 = vpop.f32.mrf.mxu1  ;;  %12028 = vmatpush3.xpose.msk.msra.mxu0 %vm1298_vm0, %v14154_v13 }
 0x2b0   : > { %v14176_v42 = vpop.f32.mrf.mxu0  ;;  %v14178_v14 = vpop.f32.mrf.mxu1  ;;  %12021 = vmatpush3.xpose.msk.msra.mxu1 %vm1298_vm0, %v14134_v34 }
 0x2b1   : > { %12030 = vmatmul.mubr.msk.f32.vlgmr.msra.gmra.mxu0 %vm1298_vm0, %v14144_v48  ;;  %12032 = vmatprep.subr.msk.mxu1 %vm1298_vm0, %v14172_v49 }
 0x2b3   : > { %12023 = vmatmul.mubr.msk.f32.vlgmr.msra.gmra.mxu1 %vm1298_vm0, %v14122_v41 }
 0x2b4   : > { %v14188_v60 = vpop.f32.mrf.mxu0  ;;  %v14190_v43 = vpop.f32.mrf.mxu1  ;;  %12033 = vmatpush3.xpose.msk.msra.mxu1 %vm1298_vm0, %v14172_v49  ;;  %12036 = vmatprep.mubr.msk.f32.mxu1 %vm1298_vm0, %v14176_v42 }
 0x2b5   : > { %12039 = vmatprep.subr.msk.mxu0 %vm1298_vm0, %v14190_v43  ;;  %12034 = vmatprep.subr.msk.mxu1 %vm1298_vm0, %v14178_v14 }
 0x2b6   : > { %v14200_v44 = vpop.f32.mrf.mxu0  ;;  %v14202_v15 = vpop.f32.mrf.mxu1  ;;  %12040 = vmatpush3.xpose.msk.msra.mxu0 %vm1298_vm0, %v14190_v43 }
 0x2b7   : > { %12041 = vmatprep.subr.msk.mxu0 %vm1298_vm0, %v14202_v15  ;;  %12043 = vmatprep.mubr.msk.f32.mxu0 %vm1298_vm0, %v14200_v44 }
 0x2b8   : > { %12035 = vmatpush3.xpose.msk.msra.mxu1 %vm1298_vm0, %v14178_v14 }
 0x2ba   : > { %v14212_v45 = vpop.f32.mrf.mxu0  ;;  %v14214_v46 = vpop.f32.mrf.mxu1  ;;  %12042 = vmatpush3.xpose.msk.msra.mxu0 %vm1298_vm0, %v14202_v15 }
 0x2bb   : > { %12046 = vmatprep.subr.msk.mxu1 %vm1298_vm0, %v14214_v46  ;;  %12037 = vmatmul.mubr.msk.f32.vlgmr.msra.gmra.mxu1 %vm1298_vm0, %v14170_v38 }
 0x2bc   : > { %v14222_v24 = vpop.f32.mrf.mxu0  ;;  %12047 = vmatpush3.xpose.msk.msra.mxu1 %vm1298_vm0, %v14214_v46  ;;  %v14226_v61 = vpop.f32.mrf.mxu1 }
 0x2bd   : > { %12044 = vmatmul.mubr.msk.f32.vlgmr.msra.gmra.mxu0 %vm1298_vm0, %v14188_v60  ;;  %12050 = vmatprep.mubr.msk.f32.mxu1 %vm1298_vm0, %v14222_v24 }
 0x2be   : > { %12048 = vmatprep.subr.msk.mxu1 %vm1298_vm0, %v14226_v61 }
 0x2c0   : > { %v14234_v50 = vpop.f32.mrf.mxu0  ;;  %12049 = vmatpush3.xpose.msk.msra.mxu1 %vm1298_vm0, %v14226_v61  ;;  %v14262_v57 = vpop.f32.mrf.mxu1 }
 0x2c1   : > { %12053 = vmatprep.subr.mxu0 %v14234_v50  ;;  %18247 = vst [vmem:[#allocation42_spill] sm:$0xff] %v14262_v57 }
 0x2c2   : > { %v14239_v51 = vpop.f32.mrf.mxu0  ;;  %12054 = vmatpush3.msra.mxu0 %v14234_v50  ;;  %v14264_v58 = vpop.f32.mrf.mxu1 }
 0x2c3   : > { %12055 = vmatprep.subr.mxu0 %v14239_v51  ;;  %12051 = vmatmul.mubr.msk.f32.vlgmr.msra.gmra.mxu1 %vm1298_vm0, %v14212_v45  ;;  %18248 = vst [vmem:[#allocation43_spill] sm:$0xff] %v14264_v58 }
 0x2c4   : > { %v14245_v6 = vpop.f32.mrf.mxu0  ;;  %12056 = vmatpush3.msra.mxu0 %v14239_v51  ;;  %v14266_v7 = vpop.f32.mrf.mxu1 }
 0x2c5   : > { %18245 = vst [vmem:[#allocation40_spill] sm:$0xff] %v14245_v6  ;;  %12060 = vmatprep.subr.mxu1 %v14245_v6  ;;  %18249 = vst [vmem:[#allocation44_spill] sm:$0xff] %v14266_v7 }
 0x2c6   : > { %v14249_v52 = vpop.f32.mrf.mxu0  ;;  %12061 = vmatpush3.msra.mxu1 %v14245_v6  ;;  %v14268_v59 = vpop.f32.mrf.mxu1 }
 0x2c7   : > { %18246 = vst [vmem:[#allocation41_spill] sm:$0xff] %v14249_v52  ;;  %12062 = vmatprep.subr.mxu1 %v14249_v52  ;;  %18250 = vst [vmem:[#allocation45_spill] sm:$0xff] %v14268_v59 }
 0x2c8   : > { %v14253_v53 = vpop.f32.mrf.mxu0  ;;  %12063 = vmatpush3.msra.mxu1 %v14249_v52  ;;  %v14270_v62 = vpop.f32.mrf.mxu1 }
 0x2c9   : > { %12067 = vmatprep.subr.mxu0 %v14253_v53  ;;  %18251 = vst [vmem:[#allocation46_spill] sm:$0xff] %v14270_v62 }
 0x2ca   : > { %v14257_v54 = vpop.f32.mrf.mxu0  ;;  %v14272_v11 = vpop.f32.mrf.mxu1 }
 0x2cb   : > { %18252 = vst [vmem:[#allocation47_spill] sm:$0xff] %v14272_v11 }
 0x2cc   : > { %v14259_v55 = vpop.f32.mrf.mxu0  ;;  %v14274_v25 = vpop.f32.mrf.mxu1 }
 0x2cd   : > { %12074 = vmatprep.subr.mxu1 %v14259_v55  ;;  %18253 = vst [vmem:[#allocation48_spill] sm:$0xff] %v14274_v25 }
 0x2ce   : > { %v14276_v63 = vpop.f32.mrf.mxu1 }
 0x2cf   : > { %18254 = vst [vmem:[#allocation49_spill] sm:$0xff] %v14276_v63 }
 0x35a   : > { %v12003_v0 = vpop.f32.mrf.mxu1 }
 0x35b   : > { %v14278_v1 = vmul.f32 0.17677669, %v12003_v0  ;;  %v14300_v0 = vpop.f32.mrf.mxu0 }
 0x35c   : > { %v1377_v3 = vpop.f32.mrf.mxu1 }
 0x35d   : > { %v14280_v4 = vmul.f32 0.17677669, %v1377_v3  ;;  %v2015_v23 = vsel %vm2011_vm1, %v14278_v1, -inf }
 0x35e   : > { %2016 = vmax.xlane.f32.xlu1 %v2015_v23 }
 0x35f   : > { %v2012_v5 = vsel %vm2011_vm1, %v14280_v4, -inf }
 0x360   : > { %2013 = vmax.xlane.f32.xlu0 %v2012_v5 }
 0x362   : > { %v12010_v8 = vpop.f32.mrf.mxu1 }
 0x363   : > { %v14286_v36 = vmul.f32 0.17677669, %v12010_v8 }
 0x364   : > { %v1464_v9 = vpop.f32.mrf.mxu1 }
 0x365   : > { %v14288_v16 = vmul.f32 0.17677669, %v1464_v9  ;;  %v2021_v33 = vsel %vm2011_vm1, %v14286_v36, -inf }
 0x366   : > { %2022 = vmax.xlane.f32.xlu0 %v2021_v33 }
 0x367   : > { %v2018_v17 = vsel %vm2011_vm1, %v14288_v16, -inf }
 0x36a   : > { %2019 = vmax.xlane.f32.xlu0 %v2018_v17  ;;  %v12017_v18 = vpop.f32.mrf.mxu1 }
 0x36b   : > { %v14294_v37 = vmul.f32 0.17677669, %v12017_v18 }
 0x36c   : > { %v1551_v19 = vpop.f32.mrf.mxu1 }
 0x36d   : > { %v14296_v20 = vmul.f32 0.17677669, %v1551_v19  ;;  %v2027_v31 = vsel %vm2011_vm1, %v14294_v37, -inf }
 0x36e   : > { %2028 = vmax.xlane.f32.xlu1 %v2027_v31 }
 0x36f   : > { %v2024_v3 = vsel %vm2011_vm1, %v14296_v20, -inf }
 0x370   : > { %2025 = vmax.xlane.f32.xlu0 %v2024_v3 }
 0x371   : > { %v12031_v23 = vpop.f32.mrf.mxu0 }
 0x372   : > { %v14304_v5 = vmul.f32 0.17677669, %v12031_v23 }
 0x373   : > { %v1725_v8 = vpop.f32.mrf.mxu0  ;;  %v12024_v9 = vpop.f32.mrf.mxu1 }
 0x374   : > { %v14306_v33 = vmul.f32 0.17677669, %v1725_v8  ;;  %v14308_v17 = vmul.f32 0.17677669, %v12024_v9  ;;  %v2039_v18 = vsel %vm2011_vm1, %v14304_v5, -inf }
 0x375   : > { %2040 = vmax.xlane.f32.xlu1 %v2039_v18  ;;  %v1638_v19 = vpop.f32.mrf.mxu1 }
 0x376   : > { %v14312_v31 = vmul.f32 0.17677669, %v1638_v19  ;;  %v2033_v27 = vsel %vm2011_vm1, %v14308_v17, -inf  ;;  %v2036_v3 = vsel %vm2011_vm1, %v14306_v33, -inf }
 0x377   : > { %2034 = vmax.xlane.f32.xlu0 %v2033_v27 }
 0x378   : > { %v2030_v23 = vsel %vm2011_vm1, %v14312_v31, -inf }
 0x379   : > { %2037 = vmax.xlane.f32.xlu1 %v2036_v3 }
 0x37b   : > { %2031 = vmax.xlane.f32.xlu0 %v2030_v23  ;;  %v12038_v8 = vpop.f32.mrf.mxu1 }
 0x37c   : > { %v14330_v23 = vmul.f32 0.17677669, %v12038_v8 }
 0x37d   : > { %v12045_v9 = vpop.f32.mrf.mxu0  ;;  %v1812_v28 = vpop.f32.mrf.mxu1 }
 0x37e   : > { %v14320_v22 = vmul.f32 0.17677669, %v12045_v9  ;;  %v14322_v18 = vmul.f32 0.17677669, %v1812_v28  ;;  %v2045_v26 = vsel %vm2011_vm1, %v14330_v23, -inf }
 0x37f   : > { %v1899_v19 = vpop.f32.mrf.mxu0 }
 0x380   : > { %v14324_v39 = vmul.f32 0.17677669, %v1899_v19  ;;  %v2051_v27 = vsel %vm2011_vm1, %v14320_v22, -inf  ;;  %v2042_v3 = vsel %vm2011_vm1, %v14322_v18, -inf }
 0x381   : > { %2052 = vmax.xlane.f32.xlu1 %v2051_v27  ;;  %2043 = vmax.xlane.f32.xlu0 %v2042_v3  ;;  %v14362_v27 = vpop.permute.xlu0 %2858 }
 0x382   : > { %v2048_v9 = vsel %vm2011_vm1, %v14324_v39, -inf }
 0x383   : > { %v12052_v10 = vpop.f32.mrf.mxu1 }
 0x384   : > { %v14334_v21 = vmul.f32 0.17677669, %v12052_v10  ;;  %v14356_v10 = vpop.permute.xlu1 %2854 }
 0x385   : > { %2049 = vmax.xlane.f32.xlu1 %v2048_v9  ;;  %v1986_v28 = vpop.f32.mrf.mxu1  ;;  %18255 = vst [vmem:[#allocation50_spill] sm:$0xff] %v14356_v10  ;;  %v14366_v9 = vpop.permute.xlu0 %2947 }
 0x386   : > { %v14336_v19 = vmul.f32 0.17677669, %v1986_v28  ;;  %v2057_v8 = vsel %vm2011_vm1, %v14334_v21, -inf  ;;  %18259 = vst [vmem:[#allocation54_spill] sm:$0xff] %v14366_v9 }
 0x388   : > { %v2054_v63 = vsel %vm2011_vm1, %v14336_v19, -inf }
 0x389   : > { %2046 = vmax.xlane.f32.xlu1 %v2045_v26  ;;  %2055 = vmax.xlane.f32.xlu0 %v2054_v63  ;;  %v14358_v26 = vpop.permute.xlu1 %2856 }
 0x38a   : > { %18256 = vst [vmem:[#allocation51_spill] sm:$0xff] %v14358_v26 }
 0x38d   : > { %2058 = vmax.xlane.f32.xlu1 %v2057_v8  ;;  %v14360_v63 = vpop.permute.xlu1 %2852  ;;  %v14370_v8 = vpop.permute.xlu0 %2943 }
 0x38e   : > { %18257 = vst [vmem:[#allocation52_spill] sm:$0xff] %v14360_v63  ;;  %18261 = vst [vmem:[#allocation56_spill] sm:$0xff] %v14370_v8 }
 0x391   : > { %v14364_v3 = vpop.permute.xlu1 %2949 }
 0x392   : > { %18258 = vst [vmem:[#allocation53_spill] sm:$0xff] %v14364_v3 }
 0x395   : > { %v14368_v28 = vpop.permute.xlu1 %3038 }
 0x396   : > { %18260 = vst [vmem:[#allocation55_spill] sm:$0xff] %v14368_v28 }
 0x39e   : > { %3222 = vrot.lane.b32.xlu1 %v14146_v12, %s13515_s27 }
 0x39f   : > { %3131 = vrot.lane.b32.xlu0 %v14124_v29, %s13515_s27 }
 0x3a2   : > { %3036 = vrot.lane.b32.xlu1 %v14100_v56, %s13515_s27 }
 0x3a3   : > { %2945 = vrot.lane.b32.xlu0 %v14078_v40, %s13515_s27  ;;  %v14372_v40 = vpop.permute.xlu1 %3034 }
 0x3a4   : > { %18262 = vst [vmem:[#allocation57_spill] sm:$0xff] %v14372_v40 }
 0x3a6   : > { %3220 = vrot.lane.b32.xlu1 %v14154_v13, %s13515_s27  ;;  %v14374_v13 = vpop.permute.xlu0 %3040 }
 0x3a7   : > { %3129 = vrot.lane.b32.xlu0 %v14134_v34, %s13515_s27  ;;  %18263 = vst [vmem:[#allocation58_spill] sm:$0xff] %v14374_v13 }
 0x3e7   : > { %v2017_v34 = vpop.xlane.xlu1 %2016 }
 0x3e8   : > { %v2061_v29 = vsub.f32 %v14278_v1, %v2017_v34 }
 0x3e9   : > { %v2014_v56 = vpop.xlane.xlu0 %2013 }
 0x3ea   : > { %v2078_v12 = vmul.f32 1.442695, %v2061_v29  ;;  %v2060_v10 = vsub.f32 %v14280_v4, %v2014_v56 }
 0x3ec   : > { %12682 = vpow2.f32 %v2078_v12  ;;  %v2076_v26 = vmul.f32 1.442695, %v2060_v10 }
 0x3ee   : > { %12684 = vpow2.f32 %v2076_v26 }
 0x3ef   : > { %v2023_v3 = vpop.xlane.xlu0 %2022 }
 0x3f0   : > { %v2063_v9 = vsub.f32 %v14286_v36, %v2023_v3 }
 0x3f2   : > { %v2082_v28 = vmul.f32 1.442695, %v2063_v9 }
 0x3f3   : > { %v2020_v63 = vpop.xlane.xlu0 %2019 }
 0x3f4   : > { %12686 = vpow2.f32 %v2082_v28  ;;  %v2062_v8 = vsub.f32 %v14288_v16, %v2020_v63 }
 0x3f6   : > { %v2080_v40 = vmul.f32 1.442695, %v2062_v8 }
 0x3f7   : > { %v2029_v13 = vpop.xlane.xlu1 %2028 }
 0x3f8   : > { %12688 = vpow2.f32 %v2080_v40  ;;  %v2065_v34 = vsub.f32 %v14294_v37, %v2029_v13 }
 0x3f9   : > { %v14381_v1 = vpop.eup %12682  ;;  %v2026_v29 = vpop.xlane.xlu0 %2025 }
 0x3fa   : > { %v2086_v56 = vmul.f32 1.442695, %v2065_v34  ;;  %v2064_v12 = vsub.f32 %v14296_v20, %v2026_v29  ;;  %v2111_v4 = vsel %vm2011_vm1, %v14381_v1, 0.0 }
 0x3fb   : > { %v14386_v36 = vpop.eup %12684  ;;  %2112 = vadd.xlane.f32.xlu1 %v2111_v4 }
 0x3fc   : > { %12690 = vpow2.f32 %v2086_v56  ;;  %v2084_v10 = vmul.f32 1.442695, %v2064_v12  ;;  %v2108_v16 = vsel %vm2011_vm1, %v14386_v36, 0.0 }
 0x3fd   : > { %2109 = vadd.xlane.f32.xlu0 %v2108_v16 }
 0x3fe   : > { %12692 = vpow2.f32 %v2084_v10  ;;  %v2041_v40 = vpop.xlane.xlu1 %2040 }
 0x3ff   : > { %v2069_v13 = vsub.f32 %v14304_v5, %v2041_v40 }
 0x400   : > { %v2035_v37 = vpop.xlane.xlu0 %2034 }
 0x401   : > { %v14391_v26 = vpop.eup %12686  ;;  %v2094_v20 = vmul.f32 1.442695, %v2069_v13  ;;  %v2067_v63 = vsub.f32 %v14308_v17, %v2035_v37 }
 0x402   : > { %v2038_v3 = vpop.xlane.xlu1 %2037  ;;  %v2117_v9 = vsel %vm2011_vm1, %v14391_v26, 0.0 }
 0x403   : > { %12694 = vpow2.f32 %v2094_v20  ;;  %v2068_v28 = vsub.f32 %v14306_v33, %v2038_v3  ;;  %v2090_v8 = vmul.f32 1.442695, %v2067_v63  ;;  %2118 = vadd.xlane.f32.xlu0 %v2117_v9 }
 0x404   : > { %v2032_v34 = vpop.xlane.xlu0 %2031 }
 0x405   : > { %v14397_v29 = vpop.eup %12688  ;;  %v2092_v56 = vmul.f32 1.442695, %v2068_v28  ;;  %12696 = vpow2.f32 %v2090_v8  ;;  %v2066_v5 = vsub.f32 %v14312_v31, %v2032_v34 }
 0x406   : > { %v2114_v12 = vsel %vm2011_vm1, %v14397_v29, 0.0 }
 0x407   : > { %12698 = vpow2.f32 %v2092_v56  ;;  %v2088_v17 = vmul.f32 1.442695, %v2066_v5  ;;  %2115 = vadd.xlane.f32.xlu0 %v2114_v12 }
 0x409   : > { %v14402_v4 = vpop.eup %12690  ;;  %12700 = vpow2.f32 %v2088_v17 }
 0x40a   : > { %v2053_v10 = vpop.xlane.xlu1 %2052  ;;  %v2044_v33 = vpop.xlane.xlu0 %2043  ;;  %v2123_v16 = vsel %vm2011_vm1, %v14402_v4, 0.0 }
 0x40b   : > { %v14406_v40 = vpop.eup %12692  ;;  %v2073_v13 = vsub.f32 %v14320_v22, %v2053_v10  ;;  %v2070_v31 = vsub.f32 %v14322_v18, %v2044_v33  ;;  %2124 = vadd.xlane.f32.xlu1 %v2123_v16 }
 0x40c   : > { %v2120_v37 = vsel %vm2011_vm1, %v14406_v40, 0.0 }
 0x40d   : > { %v2102_v20 = vmul.f32 1.442695, %v2073_v13  ;;  %v2096_v63 = vmul.f32 1.442695, %v2070_v31  ;;  %2121 = vadd.xlane.f32.xlu0 %v2120_v37 }
 0x40e   : > { %v2050_v3 = vpop.xlane.xlu1 %2049 }
 0x40f   : > { %12702 = vpow2.f32 %v2102_v20  ;;  %v2072_v9 = vsub.f32 %v14324_v39, %v2050_v3 }
 0x410   : > { %v14413_v28 = vpop.eup %12694  ;;  %12704 = vpow2.f32 %v2096_v63 }
 0x411   : > { %v2100_v8 = vmul.f32 1.442695, %v2072_v9  ;;  %v2135_v22 = vsel %vm2011_vm1, %v14413_v28, 0.0 }
 0x412   : > { %v14417_v34 = vpop.eup %12696  ;;  %v2047_v18 = vpop.xlane.xlu1 %2046  ;;  %2136 = vadd.xlane.f32.xlu1 %v2135_v22 }
 0x413   : > { %v2056_v56 = vpop.xlane.xlu0 %2055  ;;  %12706 = vpow2.f32 %v2100_v8  ;;  %v2071_v5 = vsub.f32 %v14330_v23, %v2047_v18  ;;  %v2129_v39 = vsel %vm2011_vm1, %v14417_v34, 0.0 }
 0x414   : > { %v2074_v12 = vsub.f32 %v14336_v19, %v2056_v56  ;;  %v14423_v17 = vpop.eup %12698  ;;  %2130 = vadd.xlane.f32.xlu0 %v2129_v39 }
 0x415   : > { %v2098_v10 = vmul.f32 1.442695, %v2071_v5  ;;  %v2132_v16 = vsel %vm2011_vm1, %v14423_v17, 0.0 }
 0x416   : > { %v2104_v33 = vmul.f32 1.442695, %v2074_v12  ;;  %v14427_v13 = vpop.eup %12700  ;;  %v2059_v31 = vpop.xlane.xlu1 %2058  ;;  %2133 = vadd.xlane.f32.xlu1 %v2132_v16 }
 0x417   : > { %12708 = vpow2.f32 %v2098_v10  ;;  %v2075_v23 = vsub.f32 %v14334_v21, %v2059_v31  ;;  %v2126_v19 = vsel %vm2011_vm1, %v14427_v13, 0.0 }
 0x418   : > { %12710 = vpow2.f32 %v2104_v33  ;;  %2127 = vadd.xlane.f32.xlu0 %v2126_v19  ;;  %v14518_v33 = vpop.permute.xlu0 %3131 }
 0x419   : > { %v2106_v37 = vmul.f32 1.442695, %v2075_v23  ;;  %v18264_v23 = vld [vmem:[#allocation49_spill] sm:$0xff] }
 0x41a   : > { %v14514_v10 = vpop.permute.xlu1 %3222 }
 0x41b   : > { %12712 = vpow2.f32 %v2106_v37  ;;  %v18265_v37 = vld [vmem:[#allocation33_spill] sm:$0xff] }
 0x41c   : > { %v14432_v20 = vpop.eup %12702  ;;  %v14528_v31 = vpop.permute.xlu0 %2945 }
 0x41d   : > { %v14434_v63 = vpop.eup %12704  ;;  %v2147_v3 = vsel %vm2011_vm1, %v14432_v20, 0.0 }
 0x41e   : > { %2148 = vadd.xlane.f32.xlu1 %v2147_v3  ;;  %v2138_v9 = vsel %vm2011_vm1, %v14434_v63, 0.0  ;;  %v14524_v16 = vpop.permute.xlu1 %3036 }
 0x41f   : > { %2139 = vadd.xlane.f32.xlu0 %v2138_v9  ;;  %v18266_v9 = vld [vmem:[#allocation29_spill] sm:$0xff] }
 0x420   : > { %v14440_v21 = vpop.eup %12706  ;;  %v14538_v3 = vpop.permute.xlu0 %3129 }
 0x421   : > { %v2144_v8 = vsel %vm2011_vm1, %v14440_v21, 0.0 }
 0x422   : > { %2145 = vadd.xlane.f32.xlu1 %v2144_v8  ;;  %v14534_v19 = vpop.permute.xlu1 %3220 }
 0x424   : > { %v14444_v22 = vpop.eup %12708 }
 0x425   : > { %v14446_v18 = vpop.eup %12710  ;;  %v2141_v56 = vsel %vm2011_vm1, %v14444_v22, 0.0 }
 0x426   : > { %2142 = vadd.xlane.f32.xlu1 %v2141_v56  ;;  %v2150_v5 = vsel %vm2011_vm1, %v14446_v18, 0.0  ;;  %v18267_v56 = vld [vmem:[#allocation31_spill] sm:$0xff] }
 0x427   : > { %2151 = vadd.xlane.f32.xlu0 %v2150_v5 }
 0x428   : > { %v14452_v12 = vpop.eup %12712 }
 0x429   : > { %v2153_v39 = vsel %vm2011_vm1, %v14452_v12, 0.0 }
 0x42a   : > { %2154 = vadd.xlane.f32.xlu1 %v2153_v39  ;;  %v18268_v39 = vld [vmem:[#allocation24_spill] sm:$0xff] }
 0x43b   : > { %3216 = vrot.lane.b32.xlu1 %v14152_v35, %s13515_s27 }
 0x43d   : > { %3125 = vrot.lane.b32.xlu0 %v14132_v30, %s13515_s27 }
 0x43f   : > { %3404 = vrot.lane.b32.xlu1 %v14190_v43, %s13515_s27 }
 0x441   : > { %3313 = vrot.lane.b32.xlu0 %v14172_v49, %s13515_s27 }
 0x443   : > { %3218 = vrot.lane.b32.xlu1 %v14144_v48, %s13515_s27 }
 0x445   : > { %3127 = vrot.lane.b32.xlu0 %v14122_v41, %s13515_s27 }
 0x447   : > { %3402 = vrot.lane.b32.xlu1 %v14202_v15, %s13515_s27 }
 0x449   : > { %3311 = vrot.lane.b32.xlu0 %v14178_v14, %s13515_s27 }
 0x44b   : > { %3307 = vrot.lane.b32.xlu1 %v14176_v42, %s13515_s27 }
 0x44d   : > { %3398 = vrot.lane.b32.xlu0 %v14200_v44, %s13515_s27 }
 0x44f   : > { %3495 = vrot.lane.b32.xlu1 %v14214_v46, %s13515_s27 }
 0x451   : > { %3400 = vrot.lane.b32.xlu0 %v14188_v60, %s13515_s27 }
 0x453   : > { %3493 = vrot.lane.b32.xlu1 %v14226_v61, %s13515_s27 }
 0x455   : > { %3309 = vrot.lane.b32.xlu0 %v14170_v38, %s13515_s27 }
 0x457   : > { %3491 = vrot.lane.b32.xlu1 %v14212_v45, %s13515_s27 }
 0x459   : > { %3489 = vrot.lane.b32.xlu0 %v14222_v24, %s13515_s27 }
 0x45b   : > { %3774 = vrot.lane.b32.xlu1 %v14239_v51, %s13515_s27 }
 0x45d   : > { %3776 = vrot.lane.b32.xlu0 %v14234_v50, %s13515_s27 }
 0x45f   : > { %3954 = vrot.lane.b32.xlu1 %v14253_v53, %s13515_s27 }
 0x461   : > { %3865 = vrot.lane.b32.xlu0 %v14245_v6, %s13515_s27 }
 0x463   : > { %3952 = vrot.lane.b32.xlu1 %v14257_v54, %s13515_s27 }
 0x465   : > { %3863 = vrot.lane.b32.xlu0 %v14249_v52, %s13515_s27 }
 0x467   : > { %4132 = vrot.lane.b32.xlu1 %v14262_v57, %s13515_s27 }
 0x469   : > { %4043 = vrot.lane.b32.xlu0 %v14259_v55, %s13515_s27 }
 0x46b   : > { %4130 = vrot.lane.b32.xlu1 %v14264_v58, %s13515_s27 }
 0x46d   : > { %4041 = vrot.lane.b32.xlu0 %v14300_v0, %s13515_s27 }
 0x46f   : > { %4310 = vrot.lane.b32.xlu1 %v14270_v62, %s13515_s27 }
 0x471   : > { %4221 = vrot.lane.b32.xlu0 %v14266_v7, %s13515_s27 }
 0x473   : > { %4308 = vrot.lane.b32.xlu1 %v14272_v11, %s13515_s27 }
 0x475   : > { %4219 = vrot.lane.b32.xlu0 %v14268_v59, %s13515_s27 }
 0x477   : > { %4571 = vrot.lane.b32.xlu1 %v14060_v47, %s13516_s5  ;;  %v18271_v47 = vld [vmem:[#allocation34_spill] sm:$0xff] }
 0x479   : > { %4569 = vrot.lane.b32.xlu0 %v14070_v2, %s13516_s5 }
 0x47b   : > { %4399 = vrot.lane.b32.xlu1 %v14274_v25, %s13515_s27 }
 0x47d   : > { %4565 = vrot.lane.b32.xlu0 %v14068_v32, %s13516_s5  ;;  %v18269_v32 = vld [vmem:[#allocation30_spill] sm:$0xff] }
 0x47f   : > { %4397 = vrot.lane.b32.xlu1 %v18264_v23, %s13515_s27 }
 0x481   : > { %4753 = vrot.lane.b32.xlu0 %v18265_v37, %s13516_s5  ;;  %v18270_v37 = vld [vmem:[#allocation35_spill] sm:$0xff] }
 0x483   : > { %4662 = vrot.lane.b32.xlu1 %v18266_v9, %s13516_s5 }
 0x484   : > { %v2113_v8 = vpop.xlane.xlu1 %2112 }
 0x485   : > { %4660 = vrot.lane.b32.xlu0 %v18267_v56, %s13516_s5  ;;  %12714 = vrcp.f32 %v2113_v8 }
 0x486   : > { %v2110_v5 = vpop.xlane.xlu0 %2109 }
 0x487   : > { %4567 = vrot.lane.b32.xlu1 %v18268_v39, %s13516_s5  ;;  %12716 = vrcp.f32 %v2110_v5 }
 0x489   : > { %4656 = vrot.lane.b32.xlu0 %v18269_v32, %s13516_s5 }
 0x48b   : > { %4751 = vrot.lane.b32.xlu1 %v18270_v37, %s13516_s5 }
 0x48c   : > { %v2119_v2 = vpop.xlane.xlu0 %2118 }
 0x48d   : > { %12718 = vrcp.f32 %v2119_v2 }
 0x48f   : > { %4747 = vrot.lane.b32.xlu1 %v18271_v47, %s13516_s5 }
 0x490   : > { %v2116_v9 = vpop.xlane.xlu0 %2115 }
 0x491   : > { %12720 = vrcp.f32 %v2116_v9 }
 0x492   : > { %v12715_v56 = vpop.eup %12714 }
 0x493   : > { %v2173_v39 = vmul.f32 %v12715_v56, %v14381_v1 }
 0x494   : > { %v12717_v8 = vpop.eup %12716  ;;  %v2125_v52 = vpop.xlane.xlu1 %2124 }
 0x495   : > { %v2172_v6 = vmul.f32 %v12717_v8, %v14386_v36  ;;  %12722 = vrcp.f32 %v2125_v52 }
 0x496   : > { %v2122_v5 = vpop.xlane.xlu0 %2121 }
 0x497   : > { %12724 = vrcp.f32 %v2122_v5  ;;  %12057 = vmatprep.mubr.msk.f32.mxu0 %vm2011_vm1, %v2172_v6 }
 0x498   : > { %12058 = vmatmul.mubr.msk.f32.vlgmr.msra.gmra.mxu0 %vm2011_vm1, %v2173_v39 }
 0x499   : > { %12068 = vmatpush3.msra.mxu0 %v14253_v53 }
 0x49a   : > { %12069 = vmatprep.subr.mxu0 %v14257_v54  ;;  %v12719_v9 = vpop.eup %12718 }
 0x49b   : > { %v2137_v2 = vpop.xlane.xlu1 %2136  ;;  %12070 = vmatpush3.msra.mxu0 %v14257_v54  ;;  %v2175_v6 = vmul.f32 %v12719_v9, %v14391_v26 }
 0x49c   : > { %12081 = vmatprep.subr.mxu0 %v14262_v57  ;;  %12726 = vrcp.f32 %v2137_v2 }
 0x49d   : > { %v2131_v36 = vpop.xlane.xlu0 %2130 }
 0x49e   : > { %v12721_v52 = vpop.eup %12720 }
 0x49f   : > { %v2134_v8 = vpop.xlane.xlu1 %2133  ;;  %v2174_v1 = vmul.f32 %v12721_v52, %v14397_v29 }
 0x4a0   : > { %12728 = vrcp.f32 %v2134_v8 }
 0x4a1   : > { %12730 = vrcp.f32 %v2131_v36  ;;  %v2128_v56 = vpop.xlane.xlu0 %2127  ;;  %12064 = vmatprep.mubr.msk.f32.mxu1 %vm2011_vm1, %v2174_v1 }
 0x4a2   : > { %12732 = vrcp.f32 %v2128_v56  ;;  %12065 = vmatmul.mubr.msk.f32.vlgmr.msra.gmra.mxu1 %vm2011_vm1, %v2175_v6  ;;  %v12723_v39 = vpop.eup %12722 }
 0x4a3   : > { %12075 = vmatpush3.msra.mxu1 %v14259_v55  ;;  %v2177_v26 = vmul.f32 %v12723_v39, %v14402_v4 }
 0x4a4   : > { %v12725_v5 = vpop.eup %12724  ;;  %12076 = vmatprep.subr.mxu1 %v14300_v0 }
 0x4a5   : > { %12077 = vmatpush3.msra.mxu1 %v14300_v0  ;;  %v2176_v29 = vmul.f32 %v12725_v5, %v14406_v40 }
 0x4a6   : > { %12088 = vmatprep.subr.mxu1 %v14266_v7 }
 0x4a7   : > { %v2149_v2 = vpop.xlane.xlu1 %2148  ;;  %12071 = vmatprep.mubr.msk.f32.mxu0 %vm2011_vm1, %v2176_v29 }
 0x4a8   : > { %v2140_v9 = vpop.xlane.xlu0 %2139  ;;  %12072 = vmatmul.mubr.msk.f32.vlgmr.msra.gmra.mxu0 %vm2011_vm1, %v2177_v26 }
 0x4a9   : > { %12734 = vrcp.f32 %v2140_v9  ;;  %12082 = vmatpush3.msra.mxu0 %v14262_v57  ;;  %v12727_v40 = vpop.eup %12726 }
 0x4aa   : > { %12083 = vmatprep.subr.mxu0 %v14264_v58  ;;  %12736 = vrcp.f32 %v2149_v2  ;;  %v2181_v56 = vmul.f32 %v12727_v40, %v14413_v28 }
 0x4ab   : > { %v2146_v36 = vpop.xlane.xlu1 %2145  ;;  %12084 = vmatpush3.msra.mxu0 %v14264_v58 }
 0x4ac   : > { %12738 = vrcp.f32 %v2146_v36  ;;  %12095 = vmatprep.subr.mxu0 %v14270_v62 }
 0x4ad   : > { %v12729_v4 = vpop.eup %12728 }
 0x4ae   : > { %v12731_v52 = vpop.eup %12730  ;;  %v2180_v8 = vmul.f32 %v12729_v4, %v14423_v17 }
 0x4af   : > { %v12733_v1 = vpop.eup %12732  ;;  %v2143_v6 = vpop.xlane.xlu1 %2142  ;;  %v2179_v29 = vmul.f32 %v12731_v52, %v14417_v34 }
 0x4b0   : > { %12740 = vrcp.f32 %v2143_v6  ;;  %12085 = vmatprep.mubr.msk.f32.mxu0 %vm2011_vm1, %v2180_v8  ;;  %v2152_v39 = vpop.xlane.xlu0 %2151  ;;  %v2178_v5 = vmul.f32 %v12733_v1, %v14427_v13 }
 0x4b1   : > { %12086 = vmatmul.mubr.msk.f32.vlgmr.msra.gmra.mxu0 %vm2011_vm1, %v2181_v56  ;;  %12742 = vrcp.f32 %v2152_v39  ;;  %v18273_v39 = vld [vmem:[#allocation51_spill] sm:$0xff] }
 0x4b2   : > { %12096 = vmatpush3.msra.mxu0 %v14270_v62  ;;  %12078 = vmatprep.mubr.msk.f32.mxu1 %vm2011_vm1, %v2178_v5 }
 0x4b3   : > { %v2155_v17 = vpop.xlane.xlu1 %2154  ;;  %12097 = vmatprep.subr.mxu0 %v14272_v11  ;;  %12079 = vmatmul.mubr.msk.f32.vlgmr.msra.gmra.mxu1 %vm2011_vm1, %v2179_v29 }
 0x4b4   : > { %12744 = vrcp.f32 %v2155_v17  ;;  %12098 = vmatpush3.msra.mxu0 %v14272_v11  ;;  %12089 = vmatpush3.msra.mxu1 %v14266_v7  ;;  %v3126_v28 = vpop.permute.xlu0 %3125  ;;  %v18275_v17 = vld [vmem:[#allocation53_spill] sm:$0xff] }
 0x4b5   : > { %12109 = vmatprep.subr.msk.mxu0 %vm1298_vm0, %v14362_v27  ;;  %12090 = vmatprep.subr.mxu1 %v14268_v59 }
 0x4b6   : > { %v12735_v34 = vpop.eup %12734  ;;  %12091 = vmatpush3.msra.mxu1 %v14268_v59 }
 0x4b7   : > { %v3217_v13 = vpop.permute.xlu1 %3216  ;;  %12102 = vmatprep.subr.mxu1 %v14274_v25  ;;  %v2182_v26 = vmul.f32 %v12735_v34, %v14434_v63  ;;  %v12737_v2 = vpop.eup %12736  ;;  %v18272_v63 = vld [vmem:[#allocation52_spill] sm:$0xff] }
 0x4b8   : > { %v14594_v9 = vpop.permute.xlu0 %3313  ;;  %v2185_v52 = vmul.f32 %v12737_v2, %v14432_v20  ;;  %v18278_v2 = vld [vmem:[#allocation55_spill] sm:$0xff] }
 0x4b9   : > { %v12739_v36 = vpop.eup %12738  ;;  %12092 = vmatprep.mubr.msk.f32.mxu1 %vm2011_vm1, %v2182_v26  ;;  %v18276_v26 = vld [vmem:[#allocation50_spill] sm:$0xff] }
 0x4ba   : > { %v2184_v40 = vmul.f32 %v12739_v36, %v14440_v21 }
 0x4bb   : > { %v3405_v4 = vpop.permute.xlu1 %3404 }
 0x4bc   : > { %12099 = vmatprep.mubr.msk.f32.mxu0 %vm2011_vm1, %v2184_v40  ;;  %v3128_v8 = vpop.permute.xlu0 %3127  ;;  %v18279_v40 = vld [vmem:[#allocation54_spill] sm:$0xff] }
 0x4bd   : > { %v12741_v1 = vpop.eup %12740  ;;  %12100 = vmatmul.mubr.msk.f32.vlgmr.msra.gmra.mxu0 %vm2011_vm1, %v2185_v52  ;;  %v18280_v52 = vld [vmem:[#allocation56_spill] sm:$0xff] }
 0x4be   : > { %v12743_v6 = vpop.eup %12742  ;;  %12110 = vmatpush3.xpose.msk.msra.mxu0 %vm1298_vm0, %v14362_v27  ;;  %12113 = vmatprep.mubr.msk.f32.mxu0 %vm1298_vm0, %v18272_v63  ;;  %v2183_v56 = vmul.f32 %v12741_v1, %v14444_v22  ;;  %v18274_v22 = vld [vmem:[#allocation58_spill] sm:$0xff] }
 0x4bf   : > { %12111 = vmatprep.subr.msk.mxu0 %vm1298_vm0, %v18273_v39  ;;  %v3219_v21 = vpop.permute.xlu1 %3218  ;;  %v2186_v20 = vmul.f32 %v12743_v6, %v14446_v18 }
 0x4c0   : > { %12093 = vmatmul.mubr.msk.f32.vlgmr.msra.gmra.mxu1 %vm2011_vm1, %v2183_v56  ;;  %v3312_v5 = vpop.permute.xlu0 %3311 }
 0x4c1   : > { %v12745_v29 = vpop.eup %12744  ;;  %12103 = vmatpush3.msra.mxu1 %v14274_v25  ;;  %12106 = vmatprep.mubr.msk.f32.mxu1 %vm2011_vm1, %v2186_v20 }
 0x4c2   : > { %12104 = vmatprep.subr.mxu1 %v18264_v23  ;;  %12112 = vmatpush3.xpose.msk.msra.mxu0 %vm1298_vm0, %v18273_v39  ;;  %v2187_v27 = vmul.f32 %v12745_v29, %v14452_v12  ;;  %v18277_v12 = vld [vmem:[#allocation57_spill] sm:$0xff] }
 0x4c3   : > { %12105 = vmatpush3.msra.mxu1 %v18264_v23  ;;  %12123 = vmatprep.subr.msk.mxu0 %vm1298_vm0, %v18274_v22  ;;  %v3403_v18 = vpop.permute.xlu1 %3402 }
 0x4c4   : > { %12116 = vmatprep.subr.msk.mxu1 %vm1298_vm0, %v18275_v17  ;;  %12107 = vmatmul.mubr.msk.f32.vlgmr.msra.gmra.mxu1 %vm2011_vm1, %v2187_v27  ;;  %v3399_v34 = vpop.permute.xlu0 %3398 }
 0x4c5   : > { %12114 = vmatmul.mubr.msk.f32.vlgmr.msra.gmra.mxu0 %vm1298_vm0, %v18276_v26  ;;  %12117 = vmatpush3.xpose.msk.msra.mxu1 %vm1298_vm0, %v18275_v17 }
 0x4c6   : > { %12124 = vmatpush3.xpose.msk.msra.mxu0 %vm1298_vm0, %v18274_v22  ;;  %12127 = vmatprep.mubr.msk.f32.mxu0 %vm1298_vm0, %v18277_v12 }
 0x4c7   : > { %12125 = vmatprep.subr.msk.mxu0 %vm1298_vm0, %v18278_v2  ;;  %v3308_v36 = vpop.permute.xlu1 %3307  ;;  %12118 = vmatprep.subr.msk.mxu1 %vm1298_vm0, %v18279_v40 }
 0x4c8   : > { %12120 = vmatprep.mubr.msk.f32.mxu1 %vm1298_vm0, %v18280_v52  ;;  %v3401_v1 = vpop.permute.xlu0 %3400 }
 0x4c9   : > { %12119 = vmatpush3.xpose.msk.msra.mxu1 %vm1298_vm0, %v18279_v40 }
 0x4ca   : > { %12126 = vmatpush3.xpose.msk.msra.mxu0 %vm1298_vm0, %v18278_v2  ;;  %12130 = vmatprep.subr.msk.mxu1 %vm1298_vm0, %v14518_v33 }
 0x4cb   : > { %12137 = vmatprep.subr.msk.mxu0 %vm1298_vm0, %v14514_v10  ;;  %v3496_v6 = vpop.permute.xlu1 %3495 }
 0x4cc   : > { %12121 = vmatmul.mubr.msk.f32.vlgmr.msra.gmra.mxu1 %vm1298_vm0, %v14528_v31  ;;  %v3310_v63 = vpop.permute.xlu0 %3309 }
 0x4cd   : > { %12128 = vmatmul.mubr.msk.f32.vlgmr.msra.gmra.mxu0 %vm1298_vm0, %v14524_v16  ;;  %12131 = vmatpush3.xpose.msk.msra.mxu1 %vm1298_vm0, %v14518_v33 }
 0x4ce   : > { %12138 = vmatpush3.xpose.msk.msra.mxu0 %vm1298_vm0, %v14514_v10  ;;  %12141 = vmatprep.mubr.msk.f32.mxu0 %vm1298_vm0, %v3217_v13 }
 0x4cf   : > { %12139 = vmatprep.subr.msk.mxu0 %vm1298_vm0, %v14534_v19  ;;  %v3494_v56 = vpop.permute.xlu1 %3493  ;;  %12134 = vmatprep.mubr.msk.f32.mxu1 %vm1298_vm0, %v3126_v28 }
 0x4d0   : > { %12132 = vmatprep.subr.msk.mxu1 %vm1298_vm0, %v14538_v3  ;;  %v3490_v31 = vpop.permute.xlu0 %3489 }
 0x4d1   : > { %12133 = vmatpush3.xpose.msk.msra.mxu1 %vm1298_vm0, %v14538_v3 }
 0x4d2   : > { %12140 = vmatpush3.xpose.msk.msra.mxu0 %vm1298_vm0, %v14534_v19  ;;  %12144 = vmatprep.subr.msk.mxu1 %vm1298_vm0, %v14594_v9 }
 0x4d3   : > { %12151 = vmatprep.subr.msk.mxu0 %vm1298_vm0, %v3405_v4  ;;  %v3492_v10 = vpop.permute.xlu1 %3491 }
 0x4d4   : > { %12135 = vmatmul.mubr.msk.f32.vlgmr.msra.gmra.mxu1 %vm1298_vm0, %v3128_v8  ;;  %v3777_v33 = vpop.permute.xlu0 %3776 }
 0x4d5   : > { %12142 = vmatmul.mubr.msk.f32.vlgmr.msra.gmra.mxu0 %vm1298_vm0, %v3219_v21  ;;  %12145 = vmatpush3.xpose.msk.msra.mxu1 %vm1298_vm0, %v14594_v9 }
 0x4d6   : > { %12152 = vmatpush3.xpose.msk.msra.mxu0 %vm1298_vm0, %v3405_v4  ;;  %12155 = vmatprep.mubr.msk.f32.mxu0 %vm1298_vm0, %v3399_v34 }
 0x4d7   : > { %12153 = vmatprep.subr.msk.mxu0 %vm1298_vm0, %v3403_v18  ;;  %12148 = vmatprep.mubr.msk.f32.mxu1 %vm1298_vm0, %v3308_v36  ;;  %v3775_v16 = vpop.permute.xlu1 %3774 }
 0x4d8   : > { %12146 = vmatprep.subr.msk.mxu1 %vm1298_vm0, %v3312_v5  ;;  %v3866_v19 = vpop.permute.xlu0 %3865 }
 0x4d9   : > { %12147 = vmatpush3.xpose.msk.msra.mxu1 %vm1298_vm0, %v3312_v5 }
 0x4da   : > { %12154 = vmatpush3.xpose.msk.msra.mxu0 %vm1298_vm0, %v3403_v18  ;;  %12158 = vmatprep.subr.msk.mxu1 %vm1298_vm0, %v3496_v6 }
 0x4db   : > { %12165 = vmatprep.subr.mxu0 %v3777_v33  ;;  %v14682_v3 = vpop.permute.xlu1 %3954 }
 0x4dc   : > { %12149 = vmatmul.mubr.msk.f32.vlgmr.msra.gmra.mxu1 %vm1298_vm0, %v3310_v63  ;;  %v3864_v28 = vpop.permute.xlu0 %3863 }
 0x4dd   : > { %12156 = vmatmul.mubr.msk.f32.vlgmr.msra.gmra.mxu0 %vm1298_vm0, %v3401_v1  ;;  %12159 = vmatpush3.xpose.msk.msra.mxu1 %vm1298_vm0, %v3496_v6 }
 0x4de   : > { %12166 = vmatpush3.msra.mxu0 %v3777_v33  ;;  %12162 = vmatprep.mubr.msk.f32.mxu1 %vm1298_vm0, %v3490_v31 }
 0x4df   : > { %12167 = vmatprep.subr.mxu0 %v3775_v16  ;;  %12160 = vmatprep.subr.msk.mxu1 %vm1298_vm0, %v3494_v56 }
 0x4e0   : > { %12168 = vmatpush3.msra.mxu0 %v3775_v16  ;;  %v14687_v13 = vpop.permute.xlu0 %4043 }
 0x4e1   : > { %12179 = vmatprep.subr.mxu0 %v14682_v3  ;;  %12161 = vmatpush3.xpose.msk.msra.mxu1 %vm1298_vm0, %v3494_v56 }
 0x4e2   : > { %12172 = vmatprep.subr.mxu1 %v3866_v19 }
 0x4e4   : > { %12163 = vmatmul.mubr.msk.f32.vlgmr.msra.gmra.mxu1 %vm1298_vm0, %v3492_v10 }
 0x4e5   : > { %12173 = vmatpush3.msra.mxu1 %v3866_v19 }
 0x4e6   : > { %12174 = vmatprep.subr.mxu1 %v3864_v28 }
 0x4e7   : > { %12175 = vmatpush3.msra.mxu1 %v3864_v28 }
 0x4e8   : > { %12186 = vmatprep.subr.mxu1 %v14687_v13 }
 0x558   : > { %v12059_v9 = vpop.f32.mrf.mxu0 }
 0x559   : > { %2837 = vst.msk [vmem:[#allocation2 + $0x8] sm:$0xff] %vm1298_vm0, %v12059_v9 }
 0x55a   : > { %v2260_v4 = vpop.f32.mrf.mxu0 }
 0x55b   : > { %2836 = vst.msk [vmem:[#allocation2] sm:$0xff] %vm1298_vm0, %v2260_v4 }
 0x562   : > { %v12066_v8 = vpop.f32.mrf.mxu1 }
 0x563   : > { %2839 = vst.msk [vmem:[#allocation2 + $0x18] sm:$0xff] %vm1298_vm0, %v12066_v8 }
 0x564   : > { %v2341_v39 = vpop.f32.mrf.mxu1 }
 0x565   : > { %2838 = vst.msk [vmem:[#allocation2 + $0x10] sm:$0xff] %vm1298_vm0, %v2341_v39 }
 0x568   : > { %v12073_v21 = vpop.f32.mrf.mxu0 }
 0x569   : > { %2841 = vst.msk [vmem:[#allocation2 + $0x28] sm:$0xff] %vm1298_vm0, %v12073_v21 }
 0x56a   : > { %v2422_v20 = vpop.f32.mrf.mxu0 }
 0x56b   : > { %2840 = vst.msk [vmem:[#allocation2 + $0x20] sm:$0xff] %vm1298_vm0, %v2422_v20 }
 0x571   : > { %v12087_v5 = vpop.f32.mrf.mxu0 }
 0x572   : > { %2845 = vst.msk [vmem:[#allocation2 + $0x48] sm:$0xff] %vm1298_vm0, %v12087_v5 }
 0x573   : > { %v2584_v29 = vpop.f32.mrf.mxu0  ;;  %v12080_v27 = vpop.f32.mrf.mxu1 }
 0x574   : > { %2844 = vst.msk [vmem:[#allocation2 + $0x40] sm:$0xff] %vm1298_vm0, %v2584_v29  ;;  %2843 = vst.msk [vmem:[#allocation2 + $0x38] sm:$0xff] %vm1298_vm0, %v12080_v27 }
 0x575   : > { %v2503_v22 = vpop.f32.mrf.mxu1 }
 0x576   : > { %2842 = vst.msk [vmem:[#allocation2 + $0x30] sm:$0xff] %vm1298_vm0, %v2503_v22 }
 0x57d   : > { %v12101_v18 = vpop.f32.mrf.mxu0 }
 0x57e   : > { %2849 = vst.msk [vmem:[#allocation2 + $0x68] sm:$0xff] %vm1298_vm0, %v12101_v18 }
 0x57f   : > { %v2746_v17 = vpop.f32.mrf.mxu0 }
 0x580   : > { %2848 = vst.msk [vmem:[#allocation2 + $0x60] sm:$0xff] %vm1298_vm0, %v2746_v17  ;;  %v12094_v34 = vpop.f32.mrf.mxu1 }
 0x581   : > { %2847 = vst.msk [vmem:[#allocation2 + $0x58] sm:$0xff] %vm1298_vm0, %v12094_v34 }
 0x582   : > { %v2665_v26 = vpop.f32.mrf.mxu1 }
 0x583   : > { %2846 = vst.msk [vmem:[#allocation2 + $0x50] sm:$0xff] %vm1298_vm0, %v2665_v26 }
 0x584   : > { %v12108_v12 = vpop.f32.mrf.mxu1 }
 0x585   : > { %v12115_v2 = vpop.f32.mrf.mxu0  ;;  %2851 = vst.msk [vmem:[#allocation2 + $0x78] sm:$0xff] %vm1298_vm0, %v12108_v12 }
 0x586   : > { %v14705_v36 = vmul.f32 0.17677669, %v12115_v2  ;;  %v2827_v40 = vpop.f32.mrf.mxu1 }
 0x587   : > { %v2934_v52 = vpop.f32.mrf.mxu0  ;;  %2850 = vst.msk [vmem:[#allocation2 + $0x70] sm:$0xff] %vm1298_vm0, %v2827_v40 }
 0x588   : > { %v14708_v1 = vmul.f32 0.17677669, %v2934_v52  ;;  %v3599_v6 = vsel %vm2011_vm1, %v14705_v36, -inf }
 0x589   : > { %3600 = vmax.xlane.f32.xlu1 %v3599_v6 }
 0x58a   : > { %v3596_v63 = vsel %vm2011_vm1, %v14708_v1, -inf }
 0x58b   : > { %3597 = vmax.xlane.f32.xlu0 %v3596_v63 }
 0x58c   : > { %v12122_v19 = vpop.f32.mrf.mxu1 }
 0x58d   : > { %v12129_v56 = vpop.f32.mrf.mxu0  ;;  %v14720_v28 = vmul.f32 0.17677669, %v12122_v19 }
 0x58e   : > { %v14714_v31 = vmul.f32 0.17677669, %v12129_v56  ;;  %v3025_v4 = vpop.f32.mrf.mxu1 }
 0x58f   : > { %v3116_v10 = vpop.f32.mrf.mxu0  ;;  %v14726_v5 = vmul.f32 0.17677669, %v3025_v4  ;;  %v3605_v22 = vsel %vm2011_vm1, %v14720_v28, -inf }
 0x590   : > { %v14716_v33 = vmul.f32 0.17677669, %v3116_v10  ;;  %v3611_v16 = vsel %vm2011_vm1, %v14714_v31, -inf }
 0x591   : > { %3612 = vmax.xlane.f32.xlu0 %v3611_v16  ;;  %v3602_v26 = vsel %vm2011_vm1, %v14726_v5, -inf }
 0x592   : > { %v3608_v9 = vsel %vm2011_vm1, %v14716_v33, -inf }
 0x594   : > { %v12136_v21 = vpop.f32.mrf.mxu1 }
 0x595   : > { %3609 = vmax.xlane.f32.xlu0 %v3608_v9  ;;  %v12143_v8 = vpop.f32.mrf.mxu0  ;;  %v14734_v17 = vmul.f32 0.17677669, %v12136_v21 }
 0x596   : > { %v14724_v39 = vmul.f32 0.17677669, %v12143_v8  ;;  %v3207_v18 = vpop.f32.mrf.mxu1 }
 0x597   : > { %v3298_v20 = vpop.f32.mrf.mxu0  ;;  %v14742_v6 = vmul.f32 0.17677669, %v3207_v18  ;;  %v3617_v56 = vsel %vm2011_vm1, %v14734_v17, -inf }
 0x598   : > { %v14728_v29 = vmul.f32 0.17677669, %v3298_v20  ;;  %v3623_v27 = vsel %vm2011_vm1, %v14724_v39, -inf }
 0x599   : > { %3624 = vmax.xlane.f32.xlu1 %v3623_v27  ;;  %3606 = vmax.xlane.f32.xlu0 %v3605_v22  ;;  %v3614_v4 = vsel %vm2011_vm1, %v14742_v6, -inf }
 0x59a   : > { %v3620_v34 = vsel %vm2011_vm1, %v14728_v29, -inf }
 0x59c   : > { %v12150_v2 = vpop.f32.mrf.mxu1 }
 0x59d   : > { %3621 = vmax.xlane.f32.xlu1 %v3620_v34  ;;  %3603 = vmax.xlane.f32.xlu0 %v3602_v26  ;;  %v12157_v12 = vpop.f32.mrf.mxu0  ;;  %v14750_v19 = vmul.f32 0.17677669, %v12150_v2  ;;  %v18281_v2 = vld [vmem:[#allocation38_spill] sm:$0xff] }
 0x59e   : > { %v14740_v40 = vmul.f32 0.17677669, %v12157_v12  ;;  %v3389_v16 = vpop.f32.mrf.mxu1 }
 0x59f   : > { %v3480_v52 = vpop.f32.mrf.mxu0  ;;  %v14752_v9 = vmul.f32 0.17677669, %v3389_v16  ;;  %v3629_v18 = vsel %vm2011_vm1, %v14750_v19, -inf  ;;  %v18285_v16 = vld [vmem:[#allocation28_spill] sm:$0xff] }
 0x5a0   : > { %v14744_v63 = vmul.f32 0.17677669, %v3480_v52  ;;  %v3635_v10 = vsel %vm2011_vm1, %v14740_v40, -inf  ;;  %v18282_v52 = vld [vmem:[#allocation32_spill] sm:$0xff] }
 0x5a1   : > { %3618 = vmax.xlane.f32.xlu0 %v3617_v56  ;;  %3636 = vmax.xlane.f32.xlu1 %v3635_v10  ;;  %v3626_v34 = vsel %vm2011_vm1, %v14752_v9, -inf  ;;  %v18283_v56 = vld [vmem:[#allocation36_spill] sm:$0xff]  ;;  %v18284_v10 = vld [vmem:[#allocation39_spill] sm:$0xff] }
 0x5a2   : > { %v3632_v8 = vsel %vm2011_vm1, %v14744_v63, -inf }
 0x5a4   : > { %v12164_v21 = vpop.f32.mrf.mxu1 }
 0x5a5   : > { %3615 = vmax.xlane.f32.xlu0 %v3614_v4  ;;  %3633 = vmax.xlane.f32.xlu1 %v3632_v8  ;;  %v14760_v22 = vmul.f32 0.17677669, %v12164_v21  ;;  %v18286_v4 = vld [vmem:[#allocation37_spill] sm:$0xff]  ;;  %v14782_v8 = vpop.permute.xlu1 %3952 }
 0x5a6   : > { %v3571_v20 = vpop.f32.mrf.mxu1 }
 0x5a7   : > { %v14758_v27 = vmul.f32 0.17677669, %v3571_v20  ;;  %v3641_v12 = vsel %vm2011_vm1, %v14760_v22, -inf }
 0x5a9   : > { %3630 = vmax.xlane.f32.xlu1 %v3629_v18  ;;  %3627 = vmax.xlane.f32.xlu0 %v3626_v34  ;;  %v3638_v26 = vsel %vm2011_vm1, %v14758_v27, -inf  ;;  %v14784_v21 = vpop.permute.xlu1 %4132 }
 0x5ad   : > { %3642 = vmax.xlane.f32.xlu1 %v3641_v12  ;;  %3639 = vmax.xlane.f32.xlu0 %v3638_v26  ;;  %v14786_v20 = vpop.permute.xlu1 %4130  ;;  %v14792_v26 = vpop.permute.xlu0 %4041 }
 0x5ae   : > { %18287 = vst [vmem:[#allocation52_spill] sm:$0xff] %v14792_v26 }
 0x5b1   : > { %v14788_v18 = vpop.permute.xlu1 %4310 }
 0x5b5   : > { %v14790_v34 = vpop.permute.xlu1 %4308 }
 0x5b9   : > { %v14794_v12 = vpop.permute.xlu1 %4571 }
 0x5ba   : > { %18288 = vst [vmem:[#allocation51_spill] sm:$0xff] %v14794_v12 }
 0x5be   : > { %4935 = vrot.lane.b32.xlu1 %v18281_v2, %s13516_s5  ;;  %v14796_v2 = vpop.permute.xlu0 %4221 }
 0x5bf   : > { %18289 = vst [vmem:[#allocation58_spill] sm:$0xff] %v14796_v2 }
 0x5c2   : > { %4749 = vrot.lane.b32.xlu1 %v18282_v52, %s13516_s5 }
 0x5c3   : > { %4844 = vrot.lane.b32.xlu0 %v18283_v56, %s13516_s5  ;;  %v14800_v56 = vpop.permute.xlu0 %4219 }
 0x5c4   : > { %18291 = vst [vmem:[#allocation50_spill] sm:$0xff] %v14800_v56 }
 0x5c6   : > { %4933 = vrot.lane.b32.xlu1 %v18284_v10, %s13516_s5  ;;  %v14798_v10 = vpop.permute.xlu1 %4399 }
 0x5c7   : > { %4658 = vrot.lane.b32.xlu0 %v18285_v16, %s13516_s5  ;;  %18290 = vst [vmem:[#allocation53_spill] sm:$0xff] %v14798_v10 }
 0x5ca   : > { %v14802_v47 = vpop.permute.xlu1 %4397 }
 0x5cb   : > { %4842 = vrot.lane.b32.xlu0 %v18286_v4, %s13516_s5  ;;  %18292 = vst [vmem:[#allocation57_spill] sm:$0xff] %v14802_v47  ;;  %v14804_v4 = vpop.permute.xlu0 %4569 }
 0x5cc   : > { %18293 = vst [vmem:[#allocation55_spill] sm:$0xff] %v14804_v4 }
 0x5ce   : > { %v14806_v52 = vpop.permute.xlu1 %4662 }
 0x5cf   : > { %18294 = vst [vmem:[#allocation54_spill] sm:$0xff] %v14806_v52  ;;  %v14808_v32 = vpop.permute.xlu0 %4565 }
 0x5d0   : > { %18295 = vst [vmem:[#allocation56_spill] sm:$0xff] %v14808_v32 }
 0x5d2   : > { %v14810_v37 = vpop.permute.xlu1 %4567 }
 0x5d3   : > { %18296 = vst [vmem:[#allocation59_spill] sm:$0xff] %v14810_v37  ;;  %v14812_v16 = vpop.permute.xlu0 %4753 }
 0x5d4   : > { %18297 = vst [vmem:[#allocation60_spill] sm:$0xff] %v14812_v16 }
 0x5d6   : > { %v14814_v59 = vpop.permute.xlu1 %4751 }
 0x5d7   : > { %18298 = vst [vmem:[#allocation61_spill] sm:$0xff] %v14814_v59  ;;  %v14816_v23 = vpop.permute.xlu0 %4660 }
 0x5d8   : > { %18299 = vst [vmem:[#allocation62_spill] sm:$0xff] %v14816_v23 }
 0x5da   : > { %v14818_v25 = vpop.permute.xlu1 %4747 }
 0x5db   : > { %18300 = vst [vmem:[#allocation63_spill] sm:$0xff] %v14818_v25  ;;  %v14820_v10 = vpop.permute.xlu0 %4656 }
 0x5dc   : > { %18301 = vst [vmem:[#allocation64_spill] sm:$0xff] %v14820_v10 }
 0x612   : > { %v3601_v56 = vpop.xlane.xlu1 %3600 }
 0x613   : > { %v3645_v47 = vsub.f32 %v14705_v36, %v3601_v56 }
 0x614   : > { %v3598_v4 = vpop.xlane.xlu0 %3597 }
 0x615   : > { %v3662_v2 = vmul.f32 1.442695, %v3645_v47  ;;  %v3644_v52 = vsub.f32 %v14708_v1, %v3598_v4 }
 0x617   : > { %12746 = vpow2.f32 %v3662_v2  ;;  %v3660_v32 = vmul.f32 1.442695, %v3644_v52 }
 0x619   : > { %12748 = vpow2.f32 %v3660_v32 }
 0x61a   : > { %v3613_v37 = vpop.xlane.xlu0 %3612 }
 0x61b   : > { %v3649_v16 = vsub.f32 %v14714_v31, %v3613_v37 }
 0x61d   : > { %v3670_v59 = vmul.f32 1.442695, %v3649_v16 }
 0x61e   : > { %v3610_v12 = vpop.xlane.xlu0 %3609 }
 0x61f   : > { %12750 = vpow2.f32 %v3670_v59  ;;  %v3648_v23 = vsub.f32 %v14716_v33, %v3610_v12 }
 0x621   : > { %v3668_v25 = vmul.f32 1.442695, %v3648_v23 }
 0x622   : > { %v3625_v10 = vpop.xlane.xlu1 %3624  ;;  %v3607_v26 = vpop.xlane.xlu0 %3606 }
 0x623   : > { %12752 = vpow2.f32 %v3668_v25  ;;  %v3653_v36 = vsub.f32 %v14724_v39, %v3625_v10  ;;  %v3647_v47 = vsub.f32 %v14720_v28, %v3607_v26 }
 0x624   : > { %v14828_v1 = vpop.eup %12746 }
 0x625   : > { %v3678_v2 = vmul.f32 1.442695, %v3653_v36  ;;  %v3666_v32 = vmul.f32 1.442695, %v3647_v47  ;;  %v3695_v37 = vsel %vm2011_vm1, %v14828_v1, 0.0 }
 0x626   : > { %v14832_v31 = vpop.eup %12748  ;;  %v3622_v59 = vpop.xlane.xlu1 %3621  ;;  %3696 = vadd.xlane.f32.xlu1 %v3695_v37 }
 0x627   : > { %v3604_v33 = vpop.xlane.xlu0 %3603  ;;  %12754 = vpow2.f32 %v3678_v2  ;;  %v3652_v23 = vsub.f32 %v14728_v29, %v3622_v59  ;;  %v3692_v28 = vsel %vm2011_vm1, %v14832_v31, 0.0 }
 0x628   : > { %v3646_v25 = vsub.f32 %v14726_v5, %v3604_v33  ;;  %12756 = vpow2.f32 %v3666_v32  ;;  %3693 = vadd.xlane.f32.xlu0 %v3692_v28 }
 0x629   : > { %v3676_v39 = vmul.f32 1.442695, %v3652_v23 }
 0x62a   : > { %v3664_v52 = vmul.f32 1.442695, %v3646_v25  ;;  %v3637_v56 = vpop.xlane.xlu1 %3636 }
 0x62b   : > { %v3619_v10 = vpop.xlane.xlu0 %3618  ;;  %12758 = vpow2.f32 %v3676_v39  ;;  %v3657_v16 = vsub.f32 %v14740_v40, %v3637_v56 }
 0x62c   : > { %v3651_v4 = vsub.f32 %v14734_v17, %v3619_v10  ;;  %v14840_v26 = vpop.eup %12750  ;;  %12760 = vpow2.f32 %v3664_v52 }
 0x62d   : > { %v3686_v29 = vmul.f32 1.442695, %v3657_v16  ;;  %v3707_v5 = vsel %vm2011_vm1, %v14840_v26, 0.0 }
 0x62e   : > { %v3674_v12 = vmul.f32 1.442695, %v3651_v4  ;;  %v3634_v36 = vpop.xlane.xlu1 %3633  ;;  %3708 = vadd.xlane.f32.xlu1 %v3707_v5 }
 0x62f   : > { %v3616_v47 = vpop.xlane.xlu0 %3615  ;;  %12762 = vpow2.f32 %v3686_v29  ;;  %v3656_v2 = vsub.f32 %v14744_v63, %v3634_v36 }
 0x630   : > { %v3650_v32 = vsub.f32 %v14742_v6, %v3616_v47  ;;  %v14846_v37 = vpop.eup %12752  ;;  %12764 = vpow2.f32 %v3674_v12 }
 0x631   : > { %v3684_v17 = vmul.f32 1.442695, %v3656_v2  ;;  %v3704_v59 = vsel %vm2011_vm1, %v14846_v37, 0.0 }
 0x632   : > { %v3672_v40 = vmul.f32 1.442695, %v3650_v32  ;;  %v3631_v33 = vpop.xlane.xlu1 %3630  ;;  %3705 = vadd.xlane.f32.xlu0 %v3704_v59 }
 0x633   : > { %v3628_v23 = vpop.xlane.xlu0 %3627  ;;  %12766 = vpow2.f32 %v3684_v17  ;;  %v3655_v25 = vsub.f32 %v14750_v19, %v3631_v33 }
 0x634   : > { %v3654_v28 = vsub.f32 %v14752_v9, %v3628_v23  ;;  %v14852_v39 = vpop.eup %12754  ;;  %12768 = vpow2.f32 %v3672_v40 }
 0x635   : > { %v14854_v6 = vpop.eup %12756  ;;  %v3682_v63 = vmul.f32 1.442695, %v3655_v25  ;;  %v3719_v56 = vsel %vm2011_vm1, %v14852_v39, 0.0 }
 0x636   : > { %v3680_v52 = vmul.f32 1.442695, %v3654_v28  ;;  %v3643_v10 = vpop.xlane.xlu1 %3642  ;;  %3720 = vadd.xlane.f32.xlu1 %v3719_v56  ;;  %v3701_v16 = vsel %vm2011_vm1, %v14854_v6, 0.0 }
 0x637   : > { %v3640_v4 = vpop.xlane.xlu0 %3639  ;;  %12770 = vpow2.f32 %v3682_v63  ;;  %v3659_v19 = vsub.f32 %v14760_v22, %v3643_v10  ;;  %3702 = vadd.xlane.f32.xlu0 %v3701_v16 }
 0x638   : > { %v3658_v9 = vsub.f32 %v14758_v27, %v3640_v4  ;;  %v14862_v29 = vpop.eup %12758  ;;  %12772 = vpow2.f32 %v3680_v52 }
 0x639   : > { %v14864_v12 = vpop.eup %12760  ;;  %v3690_v5 = vmul.f32 1.442695, %v3659_v19  ;;  %v3716_v47 = vsel %vm2011_vm1, %v14862_v29, 0.0  ;;  %v18302_v19 = vld [vmem:[#allocation40_spill] sm:$0xff] }
 0x63a   : > { %v3688_v36 = vmul.f32 1.442695, %v3658_v9  ;;  %3717 = vadd.xlane.f32.xlu1 %v3716_v47  ;;  %v3698_v2 = vsel %vm2011_vm1, %v14864_v12, 0.0  ;;  %v18303_v9 = vld [vmem:[#allocation41_spill] sm:$0xff] }
 0x63b   : > { %12774 = vpow2.f32 %v3690_v5  ;;  %3699 = vadd.xlane.f32.xlu0 %v3698_v2  ;;  %v18304_v5 = vld [vmem:[#allocation25_spill] sm:$0xff]  ;;  %v14964_v47 = vpop.permute.xlu0 %4844 }
 0x63c   : > { %v14870_v22 = vpop.eup %12762  ;;  %12776 = vpow2.f32 %v3688_v36  ;;  %v14962_v36 = vpop.permute.xlu1 %4935 }
 0x63d   : > { %v14872_v27 = vpop.eup %12764  ;;  %v3731_v32 = vsel %vm2011_vm1, %v14870_v22, 0.0 }
 0x63e   : > { %3732 = vadd.xlane.f32.xlu1 %v3731_v32  ;;  %v3713_v17 = vsel %vm2011_vm1, %v14872_v27, 0.0 }
 0x63f   : > { %3714 = vadd.xlane.f32.xlu0 %v3713_v17  ;;  %v14968_v32 = vpop.permute.xlu0 %4658 }
 0x640   : > { %v14878_v40 = vpop.eup %12766  ;;  %v14966_v2 = vpop.permute.xlu1 %4749 }
 0x641   : > { %v14880_v59 = vpop.eup %12768  ;;  %v3728_v33 = vsel %vm2011_vm1, %v14878_v40, 0.0 }
 0x642   : > { %3729 = vadd.xlane.f32.xlu1 %v3728_v33  ;;  %v3710_v23 = vsel %vm2011_vm1, %v14880_v59, 0.0 }
 0x643   : > { %3711 = vadd.xlane.f32.xlu0 %v3710_v23  ;;  %v14972_v33 = vpop.permute.xlu0 %4842 }
 0x644   : > { %v14886_v25 = vpop.eup %12770  ;;  %v14970_v17 = vpop.permute.xlu1 %4933 }
 0x645   : > { %v14888_v28 = vpop.eup %12772  ;;  %v3725_v63 = vsel %vm2011_vm1, %v14886_v25, 0.0 }
 0x646   : > { %3726 = vadd.xlane.f32.xlu1 %v3725_v63  ;;  %v3722_v52 = vsel %vm2011_vm1, %v14888_v28, 0.0 }
 0x647   : > { %3723 = vadd.xlane.f32.xlu0 %v3722_v52 }
 0x648   : > { %v14894_v56 = vpop.eup %12774 }
 0x649   : > { %v14896_v10 = vpop.eup %12776  ;;  %v3737_v16 = vsel %vm2011_vm1, %v14894_v56, 0.0 }
 0x64a   : > { %3738 = vadd.xlane.f32.xlu1 %v3737_v16  ;;  %v3734_v4 = vsel %vm2011_vm1, %v14896_v10, 0.0 }
 0x64b   : > { %3735 = vadd.xlane.f32.xlu0 %v3734_v4 }
 0x65b   : > { %4929 = vrot.lane.b32.xlu1 %v14152_v35, %s13516_s5 }
 0x65f   : > { %5117 = vrot.lane.b32.xlu1 %v14190_v43, %s13516_s5 }
 0x661   : > { %4838 = vrot.lane.b32.xlu0 %v14132_v30, %s13516_s5 }
 0x663   : > { %4931 = vrot.lane.b32.xlu1 %v14144_v48, %s13516_s5 }
 0x665   : > { %5026 = vrot.lane.b32.xlu0 %v14172_v49, %s13516_s5 }
 0x667   : > { %5115 = vrot.lane.b32.xlu1 %v14202_v15, %s13516_s5 }
 0x669   : > { %4840 = vrot.lane.b32.xlu0 %v14122_v41, %s13516_s5 }
 0x66b   : > { %5020 = vrot.lane.b32.xlu1 %v14176_v42, %s13516_s5 }
 0x66d   : > { %5024 = vrot.lane.b32.xlu0 %v14178_v14, %s13516_s5 }
 0x66f   : > { %5208 = vrot.lane.b32.xlu1 %v14214_v46, %s13516_s5 }
 0x671   : > { %5111 = vrot.lane.b32.xlu0 %v14200_v44, %s13516_s5 }
 0x673   : > { %5206 = vrot.lane.b32.xlu1 %v14226_v61, %s13516_s5 }
 0x675   : > { %5113 = vrot.lane.b32.xlu0 %v14188_v60, %s13516_s5 }
 0x677   : > { %5204 = vrot.lane.b32.xlu1 %v14212_v45, %s13516_s5 }
 0x679   : > { %5022 = vrot.lane.b32.xlu0 %v14170_v38, %s13516_s5 }
 0x67b   : > { %5485 = vrot.lane.b32.xlu1 %v14239_v51, %s13516_s5 }
 0x67d   : > { %5202 = vrot.lane.b32.xlu0 %v14222_v24, %s13516_s5 }
 0x67f   : > { %5661 = vrot.lane.b32.xlu1 %v14253_v53, %s13516_s5 }
 0x681   : > { %5487 = vrot.lane.b32.xlu0 %v14234_v50, %s13516_s5 }
 0x683   : > { %5659 = vrot.lane.b32.xlu1 %v14257_v54, %s13516_s5 }
 0x685   : > { %5574 = vrot.lane.b32.xlu0 %v18302_v19, %s13516_s5 }
 0x687   : > { %5835 = vrot.lane.b32.xlu1 %v14262_v57, %s13516_s5 }
 0x689   : > { %5572 = vrot.lane.b32.xlu0 %v18303_v9, %s13516_s5 }
 0x68b   : > { %5833 = vrot.lane.b32.xlu1 %v14264_v58, %s13516_s5 }
 0x68d   : > { %5748 = vrot.lane.b32.xlu0 %v14259_v55, %s13516_s5 }
 0x68f   : > { %6009 = vrot.lane.b32.xlu1 %v14270_v62, %s13516_s5 }
 0x691   : > { %5746 = vrot.lane.b32.xlu0 %v14300_v0, %s13516_s5 }
 0x693   : > { %6007 = vrot.lane.b32.xlu1 %v14272_v11, %s13516_s5 }
 0x695   : > { %5922 = vrot.lane.b32.xlu0 %v14266_v7, %s13516_s5 }
 0x697   : > { %6268 = vrot.lane.b32.xlu1 %v18304_v5, %s13517_s28 }
 0x6af   : > { %v3697_v23 = vpop.xlane.xlu1 %3696 }
 0x6b0   : > { %12778 = vrcp.f32 %v3697_v23 }
 0x6b1   : > { %v3694_v63 = vpop.xlane.xlu0 %3693 }
 0x6b2   : > { %12780 = vrcp.f32 %v3694_v63 }
 0x6b7   : > { %v3709_v52 = vpop.xlane.xlu1 %3708 }
 0x6b8   : > { %12782 = vrcp.f32 %v3709_v52 }
 0x6bb   : > { %v3706_v16 = vpop.xlane.xlu0 %3705 }
 0x6bc   : > { %12784 = vrcp.f32 %v3706_v16 }
 0x6bd   : > { %v12779_v4 = vpop.eup %12778 }
 0x6be   : > { %v3757_v7 = vmul.f32 %v12779_v4, %v14828_v1 }
 0x6bf   : > { %v12781_v5 = vpop.eup %12780  ;;  %v3721_v62 = vpop.xlane.xlu1 %3720 }
 0x6c0   : > { %v3703_v11 = vpop.xlane.xlu0 %3702  ;;  %v3756_v57 = vmul.f32 %v12781_v5, %v14832_v31  ;;  %12786 = vrcp.f32 %v3721_v62 }
 0x6c1   : > { %12788 = vrcp.f32 %v3703_v11 }
 0x6c2   : > { %12169 = vmatprep.mubr.msk.f32.mxu0 %vm2011_vm1, %v3756_v57 }
 0x6c3   : > { %v3718_v58 = vpop.xlane.xlu1 %3717  ;;  %12170 = vmatmul.mubr.msk.f32.vlgmr.msra.gmra.mxu0 %vm2011_vm1, %v3757_v7 }
 0x6c4   : > { %12790 = vrcp.f32 %v3718_v58  ;;  %12180 = vmatpush3.msra.mxu0 %v14682_v3  ;;  %v3700_v23 = vpop.xlane.xlu0 %3699 }
 0x6c5   : > { %12792 = vrcp.f32 %v3700_v23  ;;  %12181 = vmatprep.subr.mxu0 %v14782_v8  ;;  %v12783_v1 = vpop.eup %12782 }
 0x6c6   : > { %12182 = vmatpush3.msra.mxu0 %v14782_v8  ;;  %v3761_v58 = vmul.f32 %v12783_v1, %v14840_v26 }
 0x6c7   : > { %12193 = vmatprep.subr.mxu0 %v14784_v21  ;;  %v3733_v31 = vpop.xlane.xlu1 %3732 }
 0x6c8   : > { %v3715_v62 = vpop.xlane.xlu0 %3714  ;;  %12794 = vrcp.f32 %v3733_v31 }
 0x6c9   : > { %v12785_v63 = vpop.eup %12784  ;;  %12796 = vrcp.f32 %v3715_v62 }
 0x6ca   : > { %v3760_v57 = vmul.f32 %v12785_v63, %v14846_v37  ;;  %v18306_v63 = vld [vmem:[#allocation51_spill] sm:$0xff] }
 0x6cb   : > { %v3730_v7 = vpop.xlane.xlu1 %3729 }
 0x6cc   : > { %12798 = vrcp.f32 %v3730_v7  ;;  %v3712_v11 = vpop.xlane.xlu0 %3711  ;;  %12183 = vmatprep.mubr.msk.f32.mxu0 %vm2011_vm1, %v3760_v57  ;;  %v18307_v57 = vld [vmem:[#allocation58_spill] sm:$0xff] }
 0x6cd   : > { %12800 = vrcp.f32 %v3712_v11  ;;  %12184 = vmatmul.mubr.msk.f32.vlgmr.msra.gmra.mxu0 %vm2011_vm1, %v3761_v58  ;;  %v12787_v3 = vpop.eup %12786 }
 0x6ce   : > { %12194 = vmatpush3.msra.mxu0 %v14784_v21  ;;  %v12789_v52 = vpop.eup %12788  ;;  %v3765_v21 = vmul.f32 %v12787_v3, %v14852_v39 }
 0x6cf   : > { %12195 = vmatprep.subr.mxu0 %v14786_v20  ;;  %v3727_v8 = vpop.xlane.xlu1 %3726  ;;  %v3759_v1 = vmul.f32 %v12789_v52, %v14854_v6 }
 0x6d0   : > { %12802 = vrcp.f32 %v3727_v8  ;;  %12196 = vmatpush3.msra.mxu0 %v14786_v20  ;;  %v3724_v37 = vpop.xlane.xlu0 %3723 }
 0x6d1   : > { %v12791_v16 = vpop.eup %12790  ;;  %12804 = vrcp.f32 %v3724_v37  ;;  %12207 = vmatprep.subr.mxu0 %v14788_v18  ;;  %v18309_v37 = vld [vmem:[#allocation50_spill] sm:$0xff] }
 0x6d2   : > { %v12793_v26 = vpop.eup %12792  ;;  %v3764_v4 = vmul.f32 %v12791_v16, %v14862_v29  ;;  %v18310_v16 = vld [vmem:[#allocation56_spill] sm:$0xff] }
 0x6d3   : > { %v3739_v5 = vpop.xlane.xlu1 %3738  ;;  %v3758_v23 = vmul.f32 %v12793_v26, %v14864_v12  ;;  %v18305_v12 = vld [vmem:[#allocation52_spill] sm:$0xff] }
 0x6d4   : > { %12806 = vrcp.f32 %v3739_v5  ;;  %v3736_v31 = vpop.xlane.xlu0 %3735  ;;  %12197 = vmatprep.mubr.msk.f32.mxu0 %vm2011_vm1, %v3764_v4  ;;  %v18311_v5 = vld [vmem:[#allocation53_spill] sm:$0xff] }
 0x6d5   : > { %12808 = vrcp.f32 %v3736_v31  ;;  %12176 = vmatprep.mubr.msk.f32.mxu1 %vm2011_vm1, %v3758_v23  ;;  %12198 = vmatmul.mubr.msk.f32.vlgmr.msra.gmra.mxu0 %vm2011_vm1, %v3765_v21  ;;  %v12795_v20 = vpop.eup %12794  ;;  %v18312_v31 = vld [vmem:[#allocation57_spill] sm:$0xff] }
 0x6d6   : > { %12177 = vmatmul.mubr.msk.f32.vlgmr.msra.gmra.mxu1 %vm2011_vm1, %v3759_v1  ;;  %12208 = vmatpush3.msra.mxu0 %v14788_v18  ;;  %v12797_v29 = vpop.eup %12796  ;;  %v3769_v11 = vmul.f32 %v12795_v20, %v14870_v22  ;;  %v18308_v22 = vld [vmem:[#allocation55_spill] sm:$0xff]  ;;  %v18313_v1 = vld [vmem:[#allocation60_spill] sm:$0xff] }
 0x6d7   : > { %12187 = vmatpush3.msra.mxu1 %v14687_v13  ;;  %12209 = vmatprep.subr.mxu0 %v14790_v34  ;;  %v15001_v39 = vpop.permute.xlu1 %4929  ;;  %v3763_v3 = vmul.f32 %v12797_v29, %v14872_v27  ;;  %v18314_v29 = vld [vmem:[#allocation59_spill] sm:$0xff] }
 0x6d8   : > { %12188 = vmatprep.subr.mxu1 %v18305_v12  ;;  %12210 = vmatpush3.msra.mxu0 %v14790_v34  ;;  %v15005_v6 = vpop.permute.xlu0 %4838 }
 0x6d9   : > { %v12799_v62 = vpop.eup %12798  ;;  %12189 = vmatpush3.msra.mxu1 %v18305_v12  ;;  %12221 = vmatprep.subr.msk.mxu0 %vm1298_vm0, %v18306_v63  ;;  %v18315_v12 = vld [vmem:[#allocation54_spill] sm:$0xff] }
 0x6da   : > { %v12801_v18 = vpop.eup %12800  ;;  %12200 = vmatprep.subr.mxu1 %v18307_v57  ;;  %v3768_v13 = vmul.f32 %v12799_v62, %v14878_v40 }
 0x6db   : > { %v15012_v7 = vpop.permute.xlu1 %5117  ;;  %v3762_v58 = vmul.f32 %v12801_v18, %v14880_v59  ;;  %v18318_v18 = vld [vmem:[#allocation64_spill] sm:$0xff] }
 0x6dc   : > { %v15016_v34 = vpop.permute.xlu0 %5026  ;;  %12211 = vmatprep.mubr.msk.f32.mxu0 %vm2011_vm1, %v3768_v13 }
 0x6dd   : > { %v12803_v8 = vpop.eup %12802  ;;  %12190 = vmatprep.mubr.msk.f32.mxu1 %vm2011_vm1, %v3762_v58  ;;  %12212 = vmatmul.mubr.msk.f32.vlgmr.msra.gmra.mxu0 %vm2011_vm1, %v3769_v11 }
 0x6de   : > { %v12805_v52 = vpop.eup %12804  ;;  %12191 = vmatmul.mubr.msk.f32.vlgmr.msra.gmra.mxu1 %vm2011_vm1, %v3763_v3  ;;  %12222 = vmatpush3.xpose.msk.msra.mxu0 %vm1298_vm0, %v18306_v63  ;;  %v3767_v40 = vmul.f32 %v12803_v8, %v14886_v25  ;;  %v18317_v63 = vld [vmem:[#allocation62_spill] sm:$0xff] }
 0x6df   : > { %12201 = vmatpush3.msra.mxu1 %v18307_v57  ;;  %12223 = vmatprep.subr.msk.mxu0 %vm1298_vm0, %v18308_v22  ;;  %v4932_v59 = vpop.permute.xlu1 %4931  ;;  %v3766_v27 = vmul.f32 %v12805_v52, %v14888_v28  ;;  %v18319_v57 = vld [vmem:[#allocation61_spill] sm:$0xff] }
 0x6e0   : > { %12202 = vmatprep.subr.mxu1 %v18309_v37  ;;  %12225 = vmatprep.mubr.msk.f32.mxu0 %vm1298_vm0, %v18310_v16  ;;  %v4841_v26 = vpop.permute.xlu0 %4840 }
 0x6e1   : > { %v12807_v4 = vpop.eup %12806  ;;  %12203 = vmatpush3.msra.mxu1 %v18309_v37  ;;  %12204 = vmatprep.mubr.msk.f32.mxu1 %vm2011_vm1, %v3766_v27 }
 0x6e2   : > { %v12809_v25 = vpop.eup %12808  ;;  %12214 = vmatprep.subr.mxu1 %v18311_v5  ;;  %12205 = vmatmul.mubr.msk.f32.vlgmr.msra.gmra.mxu1 %vm2011_vm1, %v3767_v40  ;;  %v3771_v21 = vmul.f32 %v12807_v4, %v14894_v56 }
 0x6e3   : > { %12215 = vmatpush3.msra.mxu1 %v18311_v5  ;;  %12224 = vmatpush3.xpose.msk.msra.mxu0 %vm1298_vm0, %v18308_v22  ;;  %v5116_v28 = vpop.permute.xlu1 %5115  ;;  %v3770_v23 = vmul.f32 %v12809_v25, %v14896_v10  ;;  %v18316_v10 = vld [vmem:[#allocation63_spill] sm:$0xff] }
 0x6e4   : > { %12216 = vmatprep.subr.mxu1 %v18312_v31  ;;  %12235 = vmatprep.subr.msk.mxu0 %vm1298_vm0, %v18313_v1  ;;  %v5025_v20 = vpop.permute.xlu0 %5024 }
 0x6e5   : > { %12217 = vmatpush3.msra.mxu1 %v18312_v31  ;;  %12218 = vmatprep.mubr.msk.f32.mxu1 %vm2011_vm1, %v3770_v23 }
 0x6e6   : > { %12226 = vmatmul.mubr.msk.f32.vlgmr.msra.gmra.mxu0 %vm1298_vm0, %v18314_v29  ;;  %12228 = vmatprep.subr.msk.mxu1 %vm1298_vm0, %v18315_v12 }
 0x6e7   : > { %12219 = vmatmul.mubr.msk.f32.vlgmr.msra.gmra.mxu1 %vm2011_vm1, %v3771_v21  ;;  %12236 = vmatpush3.xpose.msk.msra.mxu0 %vm1298_vm0, %v18313_v1  ;;  %v5021_v56 = vpop.permute.xlu1 %5020 }
 0x6e8   : > { %12229 = vmatpush3.xpose.msk.msra.mxu1 %vm1298_vm0, %v18315_v12  ;;  %12239 = vmatprep.mubr.msk.f32.mxu0 %vm1298_vm0, %v18316_v10  ;;  %v5112_v62 = vpop.permute.xlu0 %5111 }
 0x6e9   : > { %12230 = vmatprep.subr.msk.mxu1 %vm1298_vm0, %v18317_v63  ;;  %12232 = vmatprep.mubr.msk.f32.mxu1 %vm1298_vm0, %v18318_v18 }
 0x6ea   : > { %12237 = vmatprep.subr.msk.mxu0 %vm1298_vm0, %v18319_v57 }
 0x6eb   : > { %12238 = vmatpush3.xpose.msk.msra.mxu0 %vm1298_vm0, %v18319_v57  ;;  %v5209_v13 = vpop.permute.xlu1 %5208 }
 0x6ec   : > { %12231 = vmatpush3.xpose.msk.msra.mxu1 %vm1298_vm0, %v18317_v63  ;;  %12249 = vmatprep.subr.msk.mxu0 %vm1298_vm0, %v14962_v36  ;;  %v5114_v58 = vpop.permute.xlu0 %5113 }
 0x6ed   : > { %12242 = vmatprep.subr.msk.mxu1 %vm1298_vm0, %v14964_v47 }
 0x6ee   : > { %12240 = vmatmul.mubr.msk.f32.vlgmr.msra.gmra.mxu0 %vm1298_vm0, %v14966_v2 }
 0x6ef   : > { %12233 = vmatmul.mubr.msk.f32.vlgmr.msra.gmra.mxu1 %vm1298_vm0, %v14968_v32  ;;  %12250 = vmatpush3.xpose.msk.msra.mxu0 %vm1298_vm0, %v14962_v36  ;;  %v5207_v11 = vpop.permute.xlu1 %5206 }
 0x6f0   : > { %12243 = vmatpush3.xpose.msk.msra.mxu1 %vm1298_vm0, %v14964_v47  ;;  %12246 = vmatprep.mubr.msk.f32.mxu1 %vm1298_vm0, %v15005_v6  ;;  %v5023_v3 = vpop.permute.xlu0 %5022 }
 0x6f1   : > { %12253 = vmatprep.mubr.msk.f32.mxu0 %vm1298_vm0, %v15001_v39  ;;  %12244 = vmatprep.subr.msk.mxu1 %vm1298_vm0, %v14972_v33 }
 0x6f2   : > { %12251 = vmatprep.subr.msk.mxu0 %vm1298_vm0, %v14970_v17 }
 0x6f3   : > { %12252 = vmatpush3.xpose.msk.msra.mxu0 %vm1298_vm0, %v14970_v17  ;;  %v5205_v47 = vpop.permute.xlu1 %5204 }
 0x6f4   : > { %12245 = vmatpush3.xpose.msk.msra.mxu1 %vm1298_vm0, %v14972_v33  ;;  %12263 = vmatprep.subr.msk.mxu0 %vm1298_vm0, %v15012_v7  ;;  %v5203_v36 = vpop.permute.xlu0 %5202 }
 0x6f5   : > { %12256 = vmatprep.subr.msk.mxu1 %vm1298_vm0, %v15016_v34 }
 0x6f6   : > { %12254 = vmatmul.mubr.msk.f32.vlgmr.msra.gmra.mxu0 %vm1298_vm0, %v4932_v59 }
 0x6f7   : > { %12247 = vmatmul.mubr.msk.f32.vlgmr.msra.gmra.mxu1 %vm1298_vm0, %v4841_v26  ;;  %12264 = vmatpush3.xpose.msk.msra.mxu0 %vm1298_vm0, %v15012_v7  ;;  %v5486_v32 = vpop.permute.xlu1 %5485 }
 0x6f8   : > { %12257 = vmatpush3.xpose.msk.msra.mxu1 %vm1298_vm0, %v15016_v34  ;;  %12260 = vmatprep.mubr.msk.f32.mxu1 %vm1298_vm0, %v5021_v56  ;;  %v5488_v2 = vpop.permute.xlu0 %5487 }
 0x6f9   : > { %12267 = vmatprep.mubr.msk.f32.mxu0 %vm1298_vm0, %v5112_v62  ;;  %12258 = vmatprep.subr.msk.mxu1 %vm1298_vm0, %v5025_v20 }
 0x6fa   : > { %12265 = vmatprep.subr.msk.mxu0 %vm1298_vm0, %v5116_v28 }
 0x6fb   : > { %12266 = vmatpush3.xpose.msk.msra.mxu0 %vm1298_vm0, %v5116_v28  ;;  %v15114_v33 = vpop.permute.xlu1 %5661 }
 0x6fc   : > { %12259 = vmatpush3.xpose.msk.msra.mxu1 %vm1298_vm0, %v5025_v20  ;;  %12277 = vmatprep.subr.mxu0 %v5488_v2  ;;  %v5575_v17 = vpop.permute.xlu0 %5574 }
 0x6fd   : > { %12270 = vmatprep.subr.msk.mxu1 %vm1298_vm0, %v5209_v13 }
 0x6fe   : > { %12268 = vmatmul.mubr.msk.f32.vlgmr.msra.gmra.mxu0 %vm1298_vm0, %v5114_v58 }
 0x6ff   : > { %12261 = vmatmul.mubr.msk.f32.vlgmr.msra.gmra.mxu1 %vm1298_vm0, %v5023_v3  ;;  %12278 = vmatpush3.msra.mxu0 %v5488_v2 }
 0x700   : > { %12271 = vmatpush3.xpose.msk.msra.mxu1 %vm1298_vm0, %v5209_v13  ;;  %12274 = vmatprep.mubr.msk.f32.mxu1 %vm1298_vm0, %v5203_v36  ;;  %v5573_v39 = vpop.permute.xlu0 %5572 }
 0x701   : > { %12272 = vmatprep.subr.msk.mxu1 %vm1298_vm0, %v5207_v11  ;;  %12279 = vmatprep.subr.mxu0 %v5486_v32 }
 0x702   : > { %12280 = vmatpush3.msra.mxu0 %v5486_v32 }
 0x703   : > { %12291 = vmatprep.subr.mxu0 %v15114_v33 }
 0x704   : > { %12273 = vmatpush3.xpose.msk.msra.mxu1 %vm1298_vm0, %v5207_v11  ;;  %v15119_v6 = vpop.permute.xlu0 %5748 }
 0x705   : > { %12284 = vmatprep.subr.mxu1 %v5575_v17 }
 0x707   : > { %12275 = vmatmul.mubr.msk.f32.vlgmr.msra.gmra.mxu1 %vm1298_vm0, %v5205_v47 }
 0x708   : > { %12285 = vmatpush3.msra.mxu1 %v5575_v17 }
 0x709   : > { %12286 = vmatprep.subr.mxu1 %v5573_v39 }
 0x70a   : > { %12287 = vmatpush3.msra.mxu1 %v5573_v39 }
 0x70b   : > { %12298 = vmatprep.subr.mxu1 %v15119_v6 }
 0x783   : > { %v15122_v7 = vpop.f32.mrf.mxu0 }
 0x784   : > { %18320 = vst [vmem:[#allocation40_spill] sm:$0xff] %v15122_v7 }
 0x785   : > { %v15124_v34 = vpop.f32.mrf.mxu0 }
 0x786   : > { %18321 = vst [vmem:[#allocation41_spill] sm:$0xff] %v15124_v34 }
 0x78d   : > { %v15126_v8 = vpop.f32.mrf.mxu0 }
 0x78e   : > { %18322 = vst [vmem:[#allocation25_spill] sm:$0xff] %v15126_v8 }
 0x78f   : > { %v15128_v52 = vpop.f32.mrf.mxu0 }
 0x790   : > { %18323 = vst [vmem:[#allocation52_spill] sm:$0xff] %v15128_v52 }
 0x795   : > { %v15132_v22 = vpop.f32.mrf.mxu0 }
 0x796   : > { %v15130_v40 = vpop.f32.mrf.mxu1  ;;  %18325 = vst [vmem:[#allocation58_spill] sm:$0xff] %v15132_v22 }
 0x797   : > { %18324 = vst [vmem:[#allocation51_spill] sm:$0xff] %v15130_v40  ;;  %v15136_v27 = vpop.f32.mrf.mxu0 }
 0x798   : > { %v15134_v59 = vpop.f32.mrf.mxu1  ;;  %18327 = vst [vmem:[#allocation50_spill] sm:$0xff] %v15136_v27 }
 0x799   : > { %18326 = vst [vmem:[#allocation55_spill] sm:$0xff] %v15134_v59 }
 0x79d   : > { %v15140_v16 = vpop.f32.mrf.mxu0 }
 0x79e   : > { %v15138_v37 = vpop.f32.mrf.mxu1  ;;  %18329 = vst [vmem:[#allocation53_spill] sm:$0xff] %v15140_v16 }
 0x79f   : > { %18328 = vst [vmem:[#allocation56_spill] sm:$0xff] %v15138_v37  ;;  %v15144_v4 = vpop.f32.mrf.mxu0 }
 0x7a0   : > { %v15142_v26 = vpop.f32.mrf.mxu1  ;;  %18331 = vst [vmem:[#allocation60_spill] sm:$0xff] %v15144_v4 }
 0x7a1   : > { %18330 = vst [vmem:[#allocation57_spill] sm:$0xff] %v15142_v26 }
 0x7a2   : > { %v15146_v25 = vpop.f32.mrf.mxu1 }
 0x7a3   : > { %18332 = vst [vmem:[#allocation59_spill] sm:$0xff] %v15146_v25 }
 0x7a4   : > { %v15150_v23 = vpop.f32.mrf.mxu1 }
 0x7a5   : > { %18333 = vst [vmem:[#allocation54_spill] sm:$0xff] %v15150_v23  ;;  %v15240_v23 = vpop.permute.xlu0 %5746 }
 0x7a6   : > { %v12227_v5 = vpop.f32.mrf.mxu0 }
 0x7a7   : > { %v15148_v28 = vmul.f32 0.17677669, %v12227_v5  ;;  %v15158_v29 = vpop.f32.mrf.mxu1 }
 0x7a8   : > { %v4647_v21 = vpop.f32.mrf.mxu0  ;;  %18334 = vst [vmem:[#allocation63_spill] sm:$0xff] %v15158_v29  ;;  %v18338_v29 = vld [vmem:[#allocation45_spill] sm:$0xff] }
 0x7a9   : > { %v15152_v31 = vmul.f32 0.17677669, %v4647_v21  ;;  %v5312_v1 = vsel %vm2011_vm1, %v15148_v28, -inf  ;;  %v15162_v10 = vpop.f32.mrf.mxu1 }
 0x7aa   : > { %5313 = vmax.xlane.f32.xlu1 %v5312_v1  ;;  %18335 = vst [vmem:[#allocation62_spill] sm:$0xff] %v15162_v10 }
 0x7ab   : > { %v5309_v20 = vsel %vm2011_vm1, %v15152_v31, -inf }
 0x7ac   : > { %5310 = vmax.xlane.f32.xlu0 %v5309_v20 }
 0x7ae   : > { %v12241_v12 = vpop.f32.mrf.mxu0 }
 0x7af   : > { %v15160_v56 = vmul.f32 0.17677669, %v12241_v12  ;;  %v12234_v57 = vpop.f32.mrf.mxu1 }
 0x7b0   : > { %v4829_v62 = vpop.f32.mrf.mxu0  ;;  %v15168_v13 = vmul.f32 0.17677669, %v12234_v57 }
 0x7b1   : > { %v15164_v63 = vmul.f32 0.17677669, %v4829_v62  ;;  %v5324_v18 = vsel %vm2011_vm1, %v15160_v56, -inf  ;;  %v4738_v11 = vpop.f32.mrf.mxu1 }
 0x7b2   : > { %5325 = vmax.xlane.f32.xlu0 %v5324_v18  ;;  %v15174_v2 = vmul.f32 0.17677669, %v4738_v11  ;;  %v5318_v5 = vsel %vm2011_vm1, %v15168_v13, -inf }
 0x7b3   : > { %v5321_v58 = vsel %vm2011_vm1, %v15164_v63, -inf }
 0x7b4   : > { %v5315_v12 = vsel %vm2011_vm1, %v15174_v2, -inf }
 0x7b6   : > { %5322 = vmax.xlane.f32.xlu0 %v5321_v58  ;;  %v12255_v3 = vpop.f32.mrf.mxu0 }
 0x7b7   : > { %v15172_v36 = vmul.f32 0.17677669, %v12255_v3  ;;  %v12248_v32 = vpop.f32.mrf.mxu1 }
 0x7b8   : > { %v5011_v47 = vpop.f32.mrf.mxu0  ;;  %v15182_v21 = vmul.f32 0.17677669, %v12248_v32 }
 0x7b9   : > { %v15176_v17 = vmul.f32 0.17677669, %v5011_v47  ;;  %v5336_v39 = vsel %vm2011_vm1, %v15172_v36, -inf  ;;  %v4920_v1 = vpop.f32.mrf.mxu1 }
 0x7ba   : > { %5337 = vmax.xlane.f32.xlu1 %v5336_v39  ;;  %5319 = vmax.xlane.f32.xlu0 %v5318_v5  ;;  %v15190_v11 = vmul.f32 0.17677669, %v4920_v1  ;;  %v5330_v47 = vsel %vm2011_vm1, %v15182_v21, -inf }
 0x7bb   : > { %v5333_v20 = vsel %vm2011_vm1, %v15176_v17, -inf }
 0x7be   : > { %5334 = vmax.xlane.f32.xlu1 %v5333_v20  ;;  %5316 = vmax.xlane.f32.xlu0 %v5315_v12  ;;  %v12269_v62 = vpop.f32.mrf.mxu0  ;;  %v5327_v12 = vsel %vm2011_vm1, %v15190_v11, -inf }
 0x7bf   : > { %v12262_v18 = vpop.f32.mrf.mxu1  ;;  %v15188_v57 = vmul.f32 0.17677669, %v12269_v62 }
 0x7c0   : > { %v5193_v58 = vpop.f32.mrf.mxu0  ;;  %v15198_v5 = vmul.f32 0.17677669, %v12262_v18 }
 0x7c1   : > { %v15192_v3 = vmul.f32 0.17677669, %v5193_v58  ;;  %v5348_v32 = vsel %vm2011_vm1, %v15188_v57, -inf  ;;  %v5102_v39 = vpop.f32.mrf.mxu1 }
 0x7c2   : > { %5331 = vmax.xlane.f32.xlu0 %v5330_v47  ;;  %5349 = vmax.xlane.f32.xlu1 %v5348_v32  ;;  %v15200_v20 = vmul.f32 0.17677669, %v5102_v39  ;;  %v5342_v47 = vsel %vm2011_vm1, %v15198_v5, -inf }
 0x7c3   : > { %v5345_v1 = vsel %vm2011_vm1, %v15192_v3, -inf }
 0x7c4   : > { %v5339_v18 = vsel %vm2011_vm1, %v15200_v20, -inf }
 0x7c6   : > { %5328 = vmax.xlane.f32.xlu0 %v5327_v12  ;;  %5346 = vmax.xlane.f32.xlu1 %v5345_v1  ;;  %v18336_v1 = vld [vmem:[#allocation48_spill] sm:$0xff] }
 0x7c7   : > { %v12276_v62 = vpop.f32.mrf.mxu1 }
 0x7c8   : > { %v15206_v58 = vmul.f32 0.17677669, %v12276_v62  ;;  %v18337_v62 = vld [vmem:[#allocation49_spill] sm:$0xff] }
 0x7c9   : > { %v5284_v10 = vpop.f32.mrf.mxu1 }
 0x7ca   : > { %v15212_v32 = vmul.f32 0.17677669, %v5284_v10  ;;  %5343 = vmax.xlane.f32.xlu1 %v5342_v47  ;;  %5340 = vmax.xlane.f32.xlu0 %v5339_v18  ;;  %v5354_v39 = vsel %vm2011_vm1, %v15206_v58, -inf  ;;  %v18339_v10 = vld [vmem:[#allocation24_spill] sm:$0xff]  ;;  %v18340_v47 = vld [vmem:[#allocation27_spill] sm:$0xff]  ;;  %v18341_v18 = vld [vmem:[#allocation26_spill] sm:$0xff] }
 0x7cc   : > { %v5351_v12 = vsel %vm2011_vm1, %v15212_v32, -inf }
 0x7ce   : > { %5355 = vmax.xlane.f32.xlu1 %v5354_v39  ;;  %5352 = vmax.xlane.f32.xlu0 %v5351_v12  ;;  %v15230_v39 = vpop.permute.xlu1 %5659 }
 0x7d2   : > { %v15232_v12 = vpop.permute.xlu1 %5835 }
 0x7d6   : > { %v15234_v4 = vpop.permute.xlu1 %5833 }
 0x7da   : > { %v15236_v16 = vpop.permute.xlu1 %6009 }
 0x7de   : > { %v15238_v25 = vpop.permute.xlu1 %6007 }
 0x7df   : > { %6096 = vrot.lane.b32.xlu1 %v18336_v1, %s13516_s5 }
 0x7e2   : > { %v15242_v27 = vpop.permute.xlu1 %6268 }
 0x7e3   : > { %6094 = vrot.lane.b32.xlu1 %v18337_v62, %s13516_s5 }
 0x7e4   : > { %5920 = vrot.lane.b32.xlu0 %v18338_v29, %s13516_s5 }
 0x7e7   : > { %6264 = vrot.lane.b32.xlu1 %v18339_v10, %s13517_s28  ;;  %v15244_v10 = vpop.permute.xlu0 %5922 }
 0x7e8   : > { %6266 = vrot.lane.b32.xlu0 %v18340_v47, %s13517_s28 }
 0x7ec   : > { %6262 = vrot.lane.b32.xlu0 %v18341_v18, %s13517_s28 }
 0x833   : > { %v5314_v47 = vpop.xlane.xlu1 %5313 }
 0x834   : > { %v5358_v22 = vsub.f32 %v15148_v28, %v5314_v47 }
 0x835   : > { %v5311_v18 = vpop.xlane.xlu0 %5310 }
 0x836   : > { %v5375_v26 = vmul.f32 1.442695, %v5358_v22  ;;  %v5357_v37 = vsub.f32 %v15152_v31, %v5311_v18 }
 0x838   : > { %12810 = vpow2.f32 %v5375_v26  ;;  %v5373_v52 = vmul.f32 1.442695, %v5357_v37 }
 0x83a   : > { %12812 = vpow2.f32 %v5373_v52 }
 0x83b   : > { %v5326_v8 = vpop.xlane.xlu0 %5325 }
 0x83c   : > { %v5362_v59 = vsub.f32 %v15160_v56, %v5326_v8 }
 0x83e   : > { %v5383_v40 = vmul.f32 1.442695, %v5362_v59 }
 0x83f   : > { %v5323_v34 = vpop.xlane.xlu0 %5322 }
 0x840   : > { %12814 = vpow2.f32 %v5383_v40  ;;  %v5361_v1 = vsub.f32 %v15164_v63, %v5323_v34 }
 0x842   : > { %v5381_v7 = vmul.f32 1.442695, %v5361_v1 }
 0x843   : > { %v5338_v62 = vpop.xlane.xlu1 %5337  ;;  %v5320_v29 = vpop.xlane.xlu0 %5319 }
 0x844   : > { %12816 = vpow2.f32 %v5381_v7  ;;  %v5366_v28 = vsub.f32 %v15172_v36, %v5338_v62  ;;  %v5360_v22 = vsub.f32 %v15168_v13, %v5320_v29 }
 0x845   : > { %v15252_v31 = vpop.eup %12810 }
 0x846   : > { %v5391_v37 = vmul.f32 1.442695, %v5366_v28  ;;  %v5379_v52 = vmul.f32 1.442695, %v5360_v22  ;;  %v5408_v8 = vsel %vm2011_vm1, %v15252_v31, 0.0 }
 0x847   : > { %v15256_v59 = vpop.eup %12812  ;;  %v5335_v40 = vpop.xlane.xlu1 %5334  ;;  %5409 = vadd.xlane.f32.xlu1 %v5408_v8 }
 0x848   : > { %v5317_v34 = vpop.xlane.xlu0 %5316  ;;  %12818 = vpow2.f32 %v5391_v37  ;;  %v5365_v26 = vsub.f32 %v15176_v17, %v5335_v40  ;;  %v5405_v29 = vsel %vm2011_vm1, %v15256_v59, 0.0 }
 0x849   : > { %v5359_v7 = vsub.f32 %v15174_v2, %v5317_v34  ;;  %12820 = vpow2.f32 %v5379_v52  ;;  %5406 = vadd.xlane.f32.xlu0 %v5405_v29 }
 0x84a   : > { %v5389_v56 = vmul.f32 1.442695, %v5365_v26 }
 0x84b   : > { %v5377_v63 = vmul.f32 1.442695, %v5359_v7  ;;  %v5350_v13 = vpop.xlane.xlu1 %5349 }
 0x84c   : > { %v5332_v36 = vpop.xlane.xlu0 %5331  ;;  %12822 = vpow2.f32 %v5389_v56  ;;  %v5370_v1 = vsub.f32 %v15188_v57, %v5350_v13 }
 0x84d   : > { %v5364_v62 = vsub.f32 %v15182_v21, %v5332_v36  ;;  %v15264_v47 = vpop.eup %12814  ;;  %12824 = vpow2.f32 %v5377_v63 }
 0x84e   : > { %v5399_v17 = vmul.f32 1.442695, %v5370_v1  ;;  %v5420_v2 = vsel %vm2011_vm1, %v15264_v47, 0.0 }
 0x84f   : > { %v5387_v18 = vmul.f32 1.442695, %v5364_v62  ;;  %v5347_v28 = vpop.xlane.xlu1 %5346  ;;  %5421 = vadd.xlane.f32.xlu1 %v5420_v2 }
 0x850   : > { %v5329_v22 = vpop.xlane.xlu0 %5328  ;;  %12826 = vpow2.f32 %v5399_v17  ;;  %v5369_v37 = vsub.f32 %v15192_v3, %v5347_v28 }
 0x851   : > { %v5363_v52 = vsub.f32 %v15190_v11, %v5329_v22  ;;  %v15270_v8 = vpop.eup %12816  ;;  %12828 = vpow2.f32 %v5387_v18 }
 0x852   : > { %v5397_v21 = vmul.f32 1.442695, %v5369_v37  ;;  %v5417_v40 = vsel %vm2011_vm1, %v15270_v8, 0.0 }
 0x853   : > { %v5385_v57 = vmul.f32 1.442695, %v5363_v52  ;;  %v5344_v34 = vpop.xlane.xlu1 %5343  ;;  %5418 = vadd.xlane.f32.xlu0 %v5417_v40 }
 0x854   : > { %v5341_v26 = vpop.xlane.xlu0 %5340  ;;  %12830 = vpow2.f32 %v5397_v21  ;;  %v5368_v7 = vsub.f32 %v15198_v5, %v5344_v34 }
 0x855   : > { %v5367_v29 = vsub.f32 %v15200_v20, %v5341_v26  ;;  %v15276_v56 = vpop.eup %12818  ;;  %12832 = vpow2.f32 %v5385_v57 }
 0x856   : > { %v15278_v11 = vpop.eup %12820  ;;  %v5395_v3 = vmul.f32 1.442695, %v5368_v7  ;;  %v5432_v13 = vsel %vm2011_vm1, %v15276_v56, 0.0 }
 0x857   : > { %v5393_v63 = vmul.f32 1.442695, %v5367_v29  ;;  %v5356_v36 = vpop.xlane.xlu1 %5355  ;;  %5433 = vadd.xlane.f32.xlu1 %v5432_v13  ;;  %v5414_v1 = vsel %vm2011_vm1, %v15278_v11, 0.0 }
 0x858   : > { %v5353_v62 = vpop.xlane.xlu0 %5352  ;;  %12834 = vpow2.f32 %v5395_v3  ;;  %v5372_v5 = vsub.f32 %v15206_v58, %v5356_v36  ;;  %5415 = vadd.xlane.f32.xlu0 %v5414_v1 }
 0x859   : > { %v5371_v20 = vsub.f32 %v15212_v32, %v5353_v62  ;;  %v15286_v17 = vpop.eup %12822  ;;  %12836 = vpow2.f32 %v5393_v63 }
 0x85a   : > { %v15288_v18 = vpop.eup %12824  ;;  %v5403_v2 = vmul.f32 1.442695, %v5372_v5  ;;  %v5429_v22 = vsel %vm2011_vm1, %v15286_v17, 0.0  ;;  %v18342_v5 = vld [vmem:[#allocation31_spill] sm:$0xff] }
 0x85b   : > { %v5401_v28 = vmul.f32 1.442695, %v5371_v20  ;;  %5430 = vadd.xlane.f32.xlu1 %v5429_v22  ;;  %v5411_v37 = vsel %vm2011_vm1, %v15288_v18, 0.0  ;;  %v18343_v20 = vld [vmem:[#allocation28_spill] sm:$0xff]  ;;  %v18346_v22 = vld [vmem:[#allocation30_spill] sm:$0xff] }
 0x85c   : > { %12838 = vpow2.f32 %v5403_v2  ;;  %5412 = vadd.xlane.f32.xlu0 %v5411_v37  ;;  %v18344_v2 = vld [vmem:[#allocation29_spill] sm:$0xff]  ;;  %v18347_v37 = vld [vmem:[#allocation32_spill] sm:$0xff] }
 0x85d   : > { %v15294_v58 = vpop.eup %12826  ;;  %12840 = vpow2.f32 %v5401_v28  ;;  %v18345_v28 = vld [vmem:[#allocation35_spill] sm:$0xff] }
 0x85e   : > { %v15296_v32 = vpop.eup %12828  ;;  %v5444_v52 = vsel %vm2011_vm1, %v15294_v58, 0.0 }
 0x85f   : > { %5445 = vadd.xlane.f32.xlu1 %v5444_v52  ;;  %v5426_v21 = vsel %vm2011_vm1, %v15296_v32, 0.0  ;;  %v18348_v52 = vld [vmem:[#allocation33_spill] sm:$0xff] }
 0x860   : > { %5427 = vadd.xlane.f32.xlu0 %v5426_v21  ;;  %v18349_v21 = vld [vmem:[#allocation37_spill] sm:$0xff] }
 0x861   : > { %v15302_v57 = vpop.eup %12830 }
 0x862   : > { %v15304_v40 = vpop.eup %12832  ;;  %v5441_v34 = vsel %vm2011_vm1, %v15302_v57, 0.0 }
 0x863   : > { %5442 = vadd.xlane.f32.xlu1 %v5441_v34  ;;  %v5423_v26 = vsel %vm2011_vm1, %v15304_v40, 0.0  ;;  %v18350_v34 = vld [vmem:[#allocation34_spill] sm:$0xff] }
 0x864   : > { %5424 = vadd.xlane.f32.xlu0 %v5423_v26  ;;  %v18351_v26 = vld [vmem:[#allocation36_spill] sm:$0xff] }
 0x865   : > { %v15310_v7 = vpop.eup %12834 }
 0x866   : > { %v15312_v29 = vpop.eup %12836  ;;  %v5438_v3 = vsel %vm2011_vm1, %v15310_v7, 0.0 }
 0x867   : > { %5439 = vadd.xlane.f32.xlu1 %v5438_v3  ;;  %v5435_v63 = vsel %vm2011_vm1, %v15312_v29, 0.0  ;;  %v18352_v3 = vld [vmem:[#allocation39_spill] sm:$0xff] }
 0x868   : > { %5436 = vadd.xlane.f32.xlu0 %v5435_v63  ;;  %v18353_v63 = vld [vmem:[#allocation38_spill] sm:$0xff] }
 0x869   : > { %v15318_v13 = vpop.eup %12838 }
 0x86a   : > { %v15320_v36 = vpop.eup %12840  ;;  %v5450_v1 = vsel %vm2011_vm1, %v15318_v13, 0.0 }
 0x86b   : > { %5451 = vadd.xlane.f32.xlu1 %v5450_v1  ;;  %v5447_v62 = vsel %vm2011_vm1, %v15320_v36, 0.0 }
 0x86c   : > { %5448 = vadd.xlane.f32.xlu0 %v5447_v62 }
 0x87c   : > { %6357 = vrot.lane.b32.xlu1 %v18342_v5, %s13517_s28 }
 0x880   : > { %6355 = vrot.lane.b32.xlu1 %v18343_v20, %s13517_s28 }
 0x882   : > { %6359 = vrot.lane.b32.xlu0 %v18344_v2, %s13517_s28 }
 0x884   : > { %6448 = vrot.lane.b32.xlu1 %v18345_v28, %s13517_s28 }
 0x886   : > { %6353 = vrot.lane.b32.xlu0 %v18346_v22, %s13517_s28 }
 0x888   : > { %6446 = vrot.lane.b32.xlu1 %v18347_v37, %s13517_s28 }
 0x88a   : > { %6450 = vrot.lane.b32.xlu0 %v18348_v52, %s13517_s28 }
 0x88c   : > { %6539 = vrot.lane.b32.xlu1 %v18349_v21, %s13517_s28 }
 0x88e   : > { %6444 = vrot.lane.b32.xlu0 %v18350_v34, %s13517_s28 }
 0x890   : > { %6537 = vrot.lane.b32.xlu1 %v14122_v41, %s13517_s28  ;;  %v15392_v41 = vpop.permute.xlu1 %6096 }
 0x892   : > { %6541 = vrot.lane.b32.xlu0 %v18351_v26, %s13517_s28 }
 0x894   : > { %6630 = vrot.lane.b32.xlu1 %v18352_v3, %s13517_s28 }
 0x896   : > { %6535 = vrot.lane.b32.xlu0 %v14132_v30, %s13517_s28  ;;  %v15396_v30 = vpop.permute.xlu0 %5920 }
 0x898   : > { %6628 = vrot.lane.b32.xlu1 %v14144_v48, %s13517_s28  ;;  %v15400_v48 = vpop.permute.xlu1 %6094 }
 0x89a   : > { %6632 = vrot.lane.b32.xlu0 %v18353_v63, %s13517_s28 }
 0x89c   : > { %6721 = vrot.lane.b32.xlu1 %v14178_v14, %s13517_s28 }
 0x89e   : > { %6626 = vrot.lane.b32.xlu0 %v14152_v35, %s13517_s28  ;;  %v15404_v35 = vpop.permute.xlu0 %6266 }
 0x8a0   : > { %6719 = vrot.lane.b32.xlu1 %v14170_v38, %s13517_s28  ;;  %v15406_v38 = vpop.permute.xlu1 %6264 }
 0x8a2   : > { %6723 = vrot.lane.b32.xlu0 %v14172_v49, %s13517_s28  ;;  %v15408_v49 = vpop.permute.xlu0 %6262 }
 0x8a4   : > { %6812 = vrot.lane.b32.xlu1 %v14202_v15, %s13517_s28 }
 0x8a6   : > { %6717 = vrot.lane.b32.xlu0 %v14176_v42, %s13517_s28 }
 0x8a8   : > { %6810 = vrot.lane.b32.xlu1 %v14188_v60, %s13517_s28 }
 0x8aa   : > { %6814 = vrot.lane.b32.xlu0 %v14190_v43, %s13517_s28 }
 0x8ac   : > { %6903 = vrot.lane.b32.xlu1 %v14226_v61, %s13517_s28 }
 0x8ae   : > { %6808 = vrot.lane.b32.xlu0 %v14200_v44, %s13517_s28 }
 0x8b0   : > { %6901 = vrot.lane.b32.xlu1 %v14212_v45, %s13517_s28 }
 0x8b2   : > { %6905 = vrot.lane.b32.xlu0 %v14214_v46, %s13517_s28 }
 0x8b4   : > { %7182 = vrot.lane.b32.xlu1 %v14239_v51, %s13517_s28 }
 0x8b6   : > { %6899 = vrot.lane.b32.xlu0 %v14222_v24, %s13517_s28 }
 0x8b8   : > { %7269 = vrot.lane.b32.xlu1 %v18303_v9, %s13517_s28 }
 0x8ba   : > { %7184 = vrot.lane.b32.xlu0 %v14234_v50, %s13517_s28 }
 0x8bc   : > { %7356 = vrot.lane.b32.xlu1 %v14257_v54, %s13517_s28 }
 0x8be   : > { %7271 = vrot.lane.b32.xlu0 %v18302_v19, %s13517_s28 }
 0x8c0   : > { %7443 = vrot.lane.b32.xlu1 %v14300_v0, %s13517_s28 }
 0x8c2   : > { %7358 = vrot.lane.b32.xlu0 %v14253_v53, %s13517_s28 }
 0x8c6   : > { %7445 = vrot.lane.b32.xlu0 %v14259_v55, %s13517_s28 }
 0x8d0   : > { %v5410_v42 = vpop.xlane.xlu1 %5409 }
 0x8d1   : > { %12842 = vrcp.f32 %v5410_v42 }
 0x8d2   : > { %v5407_v14 = vpop.xlane.xlu0 %5406 }
 0x8d3   : > { %12844 = vrcp.f32 %v5407_v14 }
 0x8d8   : > { %v5422_v60 = vpop.xlane.xlu1 %5421 }
 0x8d9   : > { %12846 = vrcp.f32 %v5422_v60 }
 0x8dc   : > { %v5419_v43 = vpop.xlane.xlu0 %5418 }
 0x8dd   : > { %12848 = vrcp.f32 %v5419_v43 }
 0x8de   : > { %v12843_v44 = vpop.eup %12842 }
 0x8df   : > { %v5470_v61 = vmul.f32 %v12843_v44, %v15252_v31 }
 0x8e0   : > { %v12845_v15 = vpop.eup %12844  ;;  %v5434_v45 = vpop.xlane.xlu1 %5433 }
 0x8e1   : > { %v5416_v46 = vpop.xlane.xlu0 %5415  ;;  %v5469_v24 = vmul.f32 %v12845_v15, %v15256_v59  ;;  %12850 = vrcp.f32 %v5434_v45 }
 0x8e2   : > { %12852 = vrcp.f32 %v5416_v46 }
 0x8e3   : > { %12281 = vmatprep.mubr.msk.f32.mxu0 %vm2011_vm1, %v5469_v24 }
 0x8e4   : > { %v5431_v50 = vpop.xlane.xlu1 %5430  ;;  %12282 = vmatmul.mubr.msk.f32.vlgmr.msra.gmra.mxu0 %vm2011_vm1, %v5470_v61 }
 0x8e5   : > { %12854 = vrcp.f32 %v5431_v50  ;;  %12292 = vmatpush3.msra.mxu0 %v15114_v33  ;;  %v5413_v51 = vpop.xlane.xlu0 %5412 }
 0x8e6   : > { %12856 = vrcp.f32 %v5413_v51  ;;  %12293 = vmatprep.subr.mxu0 %v15230_v39  ;;  %v12847_v54 = vpop.eup %12846 }
 0x8e7   : > { %12294 = vmatpush3.msra.mxu0 %v15230_v39  ;;  %v5474_v31 = vmul.f32 %v12847_v54, %v15264_v47 }
 0x8e8   : > { %12305 = vmatprep.subr.mxu0 %v15232_v12  ;;  %v5446_v53 = vpop.xlane.xlu1 %5445 }
 0x8e9   : > { %v5428_v55 = vpop.xlane.xlu0 %5427  ;;  %12858 = vrcp.f32 %v5446_v53 }
 0x8ea   : > { %v12849_v0 = vpop.eup %12848  ;;  %12860 = vrcp.f32 %v5428_v55 }
 0x8eb   : > { %v5473_v19 = vmul.f32 %v12849_v0, %v15270_v8 }
 0x8ec   : > { %v5443_v9 = vpop.xlane.xlu1 %5442 }
 0x8ed   : > { %12862 = vrcp.f32 %v5443_v9  ;;  %v5425_v33 = vpop.xlane.xlu0 %5424  ;;  %12295 = vmatprep.mubr.msk.f32.mxu0 %vm2011_vm1, %v5473_v19 }
 0x8ee   : > { %12864 = vrcp.f32 %v5425_v33  ;;  %12296 = vmatmul.mubr.msk.f32.vlgmr.msra.gmra.mxu0 %vm2011_vm1, %v5474_v31  ;;  %v12851_v39 = vpop.eup %12850 }
 0x8ef   : > { %12306 = vmatpush3.msra.mxu0 %v15232_v12  ;;  %v12853_v1 = vpop.eup %12852  ;;  %v5478_v12 = vmul.f32 %v12851_v39, %v15276_v56 }
 0x8f0   : > { %12307 = vmatprep.subr.mxu0 %v15234_v4  ;;  %v5440_v59 = vpop.xlane.xlu1 %5439  ;;  %v5472_v22 = vmul.f32 %v12853_v1, %v15278_v11 }
 0x8f1   : > { %12866 = vrcp.f32 %v5440_v59  ;;  %12308 = vmatpush3.msra.mxu0 %v15234_v4  ;;  %v5437_v8 = vpop.xlane.xlu0 %5436 }
 0x8f2   : > { %v12855_v62 = vpop.eup %12854  ;;  %12868 = vrcp.f32 %v5437_v8  ;;  %12319 = vmatprep.subr.mxu0 %v15236_v16 }
 0x8f3   : > { %v12857_v47 = vpop.eup %12856  ;;  %v5477_v5 = vmul.f32 %v12855_v62, %v15286_v17 }
 0x8f4   : > { %v5452_v20 = vpop.xlane.xlu1 %5451  ;;  %v5471_v2 = vmul.f32 %v12857_v47, %v15288_v18 }
 0x8f5   : > { %12870 = vrcp.f32 %v5452_v20  ;;  %v5449_v28 = vpop.xlane.xlu0 %5448  ;;  %12309 = vmatprep.mubr.msk.f32.mxu0 %vm2011_vm1, %v5477_v5 }
 0x8f6   : > { %12872 = vrcp.f32 %v5449_v28  ;;  %12288 = vmatprep.mubr.msk.f32.mxu1 %vm2011_vm1, %v5471_v2  ;;  %12310 = vmatmul.mubr.msk.f32.vlgmr.msra.gmra.mxu0 %vm2011_vm1, %v5478_v12  ;;  %v12859_v4 = vpop.eup %12858 }
 0x8f7   : > { %12289 = vmatmul.mubr.msk.f32.vlgmr.msra.gmra.mxu1 %vm2011_vm1, %v5472_v22  ;;  %12320 = vmatpush3.msra.mxu0 %v15236_v16  ;;  %v12861_v17 = vpop.eup %12860  ;;  %v5482_v21 = vmul.f32 %v12859_v4, %v15294_v58 }
 0x8f8   : > { %12299 = vmatpush3.msra.mxu1 %v15119_v6  ;;  %12321 = vmatprep.subr.mxu0 %v15238_v25  ;;  %v6358_v56 = vpop.permute.xlu1 %6357 }
 0x8f9   : > { %12300 = vmatprep.subr.mxu1 %v15240_v23  ;;  %12322 = vmatpush3.msra.mxu0 %v15238_v25  ;;  %v6360_v11 = vpop.permute.xlu0 %6359  ;;  %v5476_v25 = vmul.f32 %v12861_v17, %v15296_v32 }
 0x8fa   : > { %v12863_v18 = vpop.eup %12862  ;;  %12301 = vmatpush3.msra.mxu1 %v15240_v23  ;;  %12333 = vmatprep.subr.msk.mxu0 %vm1298_vm0, %v15242_v27 }
 0x8fb   : > { %v12865_v37 = vpop.eup %12864  ;;  %12312 = vmatprep.subr.mxu1 %v15244_v10  ;;  %v5481_v6 = vmul.f32 %v12863_v18, %v15302_v57 }
 0x8fc   : > { %v6356_v16 = vpop.permute.xlu1 %6355  ;;  %v5475_v52 = vmul.f32 %v12865_v37, %v15304_v40 }
 0x8fd   : > { %v6354_v34 = vpop.permute.xlu0 %6353  ;;  %12323 = vmatprep.mubr.msk.f32.mxu0 %vm2011_vm1, %v5481_v6 }
 0x8fe   : > { %v12867_v26 = vpop.eup %12866  ;;  %12302 = vmatprep.mubr.msk.f32.mxu1 %vm2011_vm1, %v5475_v52  ;;  %12324 = vmatmul.mubr.msk.f32.vlgmr.msra.gmra.mxu0 %vm2011_vm1, %v5482_v21 }
 0x8ff   : > { %v12869_v23 = vpop.eup %12868  ;;  %12303 = vmatmul.mubr.msk.f32.vlgmr.msra.gmra.mxu1 %vm2011_vm1, %v5476_v25  ;;  %12334 = vmatpush3.xpose.msk.msra.mxu0 %vm1298_vm0, %v15242_v27  ;;  %v5480_v57 = vmul.f32 %v12867_v26, %v15310_v7 }
 0x900   : > { %12313 = vmatpush3.msra.mxu1 %v15244_v10  ;;  %12335 = vmatprep.subr.msk.mxu0 %vm1298_vm0, %v15404_v35  ;;  %v6449_v58 = vpop.permute.xlu1 %6448  ;;  %v5479_v32 = vmul.f32 %v12869_v23, %v15312_v29 }
 0x901   : > { %12314 = vmatprep.subr.mxu1 %v15396_v30  ;;  %12337 = vmatprep.mubr.msk.f32.mxu0 %vm1298_vm0, %v15408_v49  ;;  %v6451_v40 = vpop.permute.xlu0 %6450 }
 0x902   : > { %v12871_v3 = vpop.eup %12870  ;;  %12315 = vmatpush3.msra.mxu1 %v15396_v30  ;;  %12316 = vmatprep.mubr.msk.f32.mxu1 %vm2011_vm1, %v5479_v32 }
 0x903   : > { %v12873_v27 = vpop.eup %12872  ;;  %12326 = vmatprep.subr.mxu1 %v15392_v41  ;;  %12317 = vmatmul.mubr.msk.f32.vlgmr.msra.gmra.mxu1 %vm2011_vm1, %v5480_v57  ;;  %v5484_v29 = vmul.f32 %v12871_v3, %v15318_v13 }
 0x904   : > { %12327 = vmatpush3.msra.mxu1 %v15392_v41  ;;  %12336 = vmatpush3.xpose.msk.msra.mxu0 %vm1298_vm0, %v15404_v35  ;;  %v6447_v10 = vpop.permute.xlu1 %6446  ;;  %v5483_v7 = vmul.f32 %v12873_v27, %v15320_v36 }
 0x905   : > { %12328 = vmatprep.subr.mxu1 %v15400_v48  ;;  %12347 = vmatprep.subr.msk.mxu0 %vm1298_vm0, %v6451_v40  ;;  %v6445_v63 = vpop.permute.xlu0 %6444 }
 0x906   : > { %12329 = vmatpush3.msra.mxu1 %v15400_v48  ;;  %12330 = vmatprep.mubr.msk.f32.mxu1 %vm2011_vm1, %v5483_v7 }
 0x907   : > { %12338 = vmatmul.mubr.msk.f32.vlgmr.msra.gmra.mxu0 %vm1298_vm0, %v15406_v38  ;;  %12340 = vmatprep.subr.msk.mxu1 %vm1298_vm0, %v6360_v11 }
 0x908   : > { %12331 = vmatmul.mubr.msk.f32.vlgmr.msra.gmra.mxu1 %vm2011_vm1, %v5484_v29  ;;  %12348 = vmatpush3.xpose.msk.msra.mxu0 %vm1298_vm0, %v6451_v40  ;;  %v6540_v36 = vpop.permute.xlu1 %6539 }
 0x909   : > { %12341 = vmatpush3.xpose.msk.msra.mxu1 %vm1298_vm0, %v6360_v11  ;;  %12351 = vmatprep.mubr.msk.f32.mxu0 %vm1298_vm0, %v6445_v63  ;;  %v6542_v13 = vpop.permute.xlu0 %6541 }
 0x90a   : > { %12342 = vmatprep.subr.msk.mxu1 %vm1298_vm0, %v6358_v56  ;;  %12344 = vmatprep.mubr.msk.f32.mxu1 %vm1298_vm0, %v6354_v34 }
 0x90b   : > { %12349 = vmatprep.subr.msk.mxu0 %vm1298_vm0, %v6449_v58 }
 0x90c   : > { %12350 = vmatpush3.xpose.msk.msra.mxu0 %vm1298_vm0, %v6449_v58  ;;  %v6538_v41 = vpop.permute.xlu1 %6537 }
 0x90d   : > { %12343 = vmatpush3.xpose.msk.msra.mxu1 %vm1298_vm0, %v6358_v56  ;;  %v6536_v30 = vpop.permute.xlu0 %6535 }
 0x90e   : > { %12354 = vmatprep.subr.msk.mxu1 %vm1298_vm0, %v6542_v13 }
 0x90f   : > { %12352 = vmatmul.mubr.msk.f32.vlgmr.msra.gmra.mxu0 %vm1298_vm0, %v6447_v10 }
 0x910   : > { %12345 = vmatmul.mubr.msk.f32.vlgmr.msra.gmra.mxu1 %vm1298_vm0, %v6356_v16  ;;  %v6631_v48 = vpop.permute.xlu1 %6630 }
 0x911   : > { %12355 = vmatpush3.xpose.msk.msra.mxu1 %vm1298_vm0, %v6542_v13  ;;  %12358 = vmatprep.mubr.msk.f32.mxu1 %vm1298_vm0, %v6536_v30  ;;  %v6633_v35 = vpop.permute.xlu0 %6632 }
 0x912   : > { %12356 = vmatprep.subr.msk.mxu1 %vm1298_vm0, %v6540_v36  ;;  %12361 = vmatprep.subr.msk.mxu0 %vm1298_vm0, %v6633_v35 }
 0x913   : > { %12362 = vmatpush3.xpose.msk.msra.mxu0 %vm1298_vm0, %v6633_v35 }
 0x914   : > { %12363 = vmatprep.subr.msk.mxu0 %vm1298_vm0, %v6631_v48  ;;  %v6629_v38 = vpop.permute.xlu1 %6628 }
 0x915   : > { %12357 = vmatpush3.xpose.msk.msra.mxu1 %vm1298_vm0, %v6540_v36  ;;  %v6627_v49 = vpop.permute.xlu0 %6626 }
 0x916   : > { %12365 = vmatprep.mubr.msk.f32.mxu0 %vm1298_vm0, %v6627_v49 }
 0x917   : > { %12364 = vmatpush3.xpose.msk.msra.mxu0 %vm1298_vm0, %v6631_v48 }
 0x918   : > { %12359 = vmatmul.mubr.msk.f32.vlgmr.msra.gmra.mxu1 %vm1298_vm0, %v6538_v41  ;;  %v6722_v42 = vpop.permute.xlu1 %6721 }
 0x919   : > { %v6724_v14 = vpop.permute.xlu0 %6723 }
 0x91a   : > { %12366 = vmatmul.mubr.msk.f32.vlgmr.msra.gmra.mxu0 %vm1298_vm0, %v6629_v38  ;;  %12368 = vmatprep.subr.msk.mxu1 %vm1298_vm0, %v6724_v14 }
 0x91b   : > { %12369 = vmatpush3.xpose.msk.msra.mxu1 %vm1298_vm0, %v6724_v14 }
 0x91c   : > { %12370 = vmatprep.subr.msk.mxu1 %vm1298_vm0, %v6722_v42  ;;  %v6720_v60 = vpop.permute.xlu1 %6719 }
 0x91d   : > { %v6718_v43 = vpop.permute.xlu0 %6717 }
 0x91e   : > { %12372 = vmatprep.mubr.msk.f32.mxu1 %vm1298_vm0, %v6718_v43 }
 0x91f   : > { %12371 = vmatpush3.xpose.msk.msra.mxu1 %vm1298_vm0, %v6722_v42 }
 0x920   : > { %v6813_v44 = vpop.permute.xlu1 %6812 }
 0x921   : > { %v6815_v15 = vpop.permute.xlu0 %6814 }
 0x922   : > { %12373 = vmatmul.mubr.msk.f32.vlgmr.msra.gmra.mxu1 %vm1298_vm0, %v6720_v60  ;;  %12375 = vmatprep.subr.msk.mxu0 %vm1298_vm0, %v6815_v15 }
 0x923   : > { %12376 = vmatpush3.xpose.msk.msra.mxu0 %vm1298_vm0, %v6815_v15 }
 0x924   : > { %12377 = vmatprep.subr.msk.mxu0 %vm1298_vm0, %v6813_v44  ;;  %v6811_v45 = vpop.permute.xlu1 %6810 }
 0x925   : > { %v6809_v46 = vpop.permute.xlu0 %6808 }
 0x926   : > { %12379 = vmatprep.mubr.msk.f32.mxu0 %vm1298_vm0, %v6809_v46 }
 0x927   : > { %12378 = vmatpush3.xpose.msk.msra.mxu0 %vm1298_vm0, %v6813_v44 }
 0x928   : > { %v6904_v24 = vpop.permute.xlu1 %6903 }
 0x929   : > { %v6906_v61 = vpop.permute.xlu0 %6905 }
 0x92a   : > { %12380 = vmatmul.mubr.msk.f32.vlgmr.msra.gmra.mxu0 %vm1298_vm0, %v6811_v45  ;;  %12382 = vmatprep.subr.msk.mxu1 %vm1298_vm0, %v6906_v61 }
 0x92b   : > { %12383 = vmatpush3.xpose.msk.msra.mxu1 %vm1298_vm0, %v6906_v61 }
 0x92c   : > { %12384 = vmatprep.subr.msk.mxu1 %vm1298_vm0, %v6904_v24  ;;  %v6902_v50 = vpop.permute.xlu1 %6901 }
 0x92d   : > { %v6900_v51 = vpop.permute.xlu0 %6899 }
 0x92e   : > { %12386 = vmatprep.mubr.msk.f32.mxu1 %vm1298_vm0, %v6900_v51 }
 0x92f   : > { %12385 = vmatpush3.xpose.msk.msra.mxu1 %vm1298_vm0, %v6904_v24 }
 0x930   : > { %v7183_v53 = vpop.permute.xlu1 %7182 }
 0x931   : > { %v7185_v54 = vpop.permute.xlu0 %7184 }
 0x932   : > { %12387 = vmatmul.mubr.msk.f32.vlgmr.msra.gmra.mxu1 %vm1298_vm0, %v6902_v50  ;;  %12389 = vmatprep.subr.mxu0 %v7185_v54 }
 0x933   : > { %12390 = vmatpush3.msra.mxu0 %v7185_v54 }
 0x934   : > { %12391 = vmatprep.subr.mxu0 %v7183_v53  ;;  %v7270_v0 = vpop.permute.xlu1 %7269 }
 0x935   : > { %12392 = vmatpush3.msra.mxu0 %v7183_v53  ;;  %v7272_v55 = vpop.permute.xlu0 %7271 }
 0x936   : > { %12396 = vmatprep.subr.mxu1 %v7272_v55 }
 0x937   : > { %12397 = vmatpush3.msra.mxu1 %v7272_v55 }
 0x938   : > { %12398 = vmatprep.subr.mxu1 %v7270_v0 }
 0x939   : > { %12399 = vmatpush3.msra.mxu1 %v7270_v0  ;;  %v15518_v19 = vpop.permute.xlu0 %7358 }
 0x93a   : > { %12403 = vmatprep.subr.mxu0 %v15518_v19 }
 0x93d   : > { %v15521_v9 = vpop.permute.xlu0 %7445 }
 0x93e   : > { %12410 = vmatprep.subr.mxu1 %v15521_v9 }
 0x9a4   : > { %v15524_v31 = vpop.f32.mrf.mxu0 }
 0x9a6   : > { %v15526_v33 = vpop.f32.mrf.mxu0 }
 0x9ae   : > { %v15528_v39 = vpop.f32.mrf.mxu0 }
 0x9b0   : > { %v15530_v59 = vpop.f32.mrf.mxu0 }
 0x9b6   : > { %v15534_v8 = vpop.f32.mrf.mxu0 }
 0x9b7   : > { %v15532_v1 = vpop.f32.mrf.mxu1 }
 0x9b8   : > { %v15538_v47 = vpop.f32.mrf.mxu0 }
 0x9b9   : > { %v15536_v62 = vpop.f32.mrf.mxu1 }
 0x9be   : > { %v15542_v20 = vpop.f32.mrf.mxu0 }
 0x9bf   : > { %v15540_v5 = vpop.f32.mrf.mxu1 }
 0x9c0   : > { %v15548_v28 = vpop.f32.mrf.mxu0 }
 0x9c1   : > { %v15544_v2 = vpop.f32.mrf.mxu1 }
 0x9c3   : > { %v15546_v12 = vpop.f32.mrf.mxu1 }
 0x9c5   : > { %v15550_v22 = vpop.f32.mrf.mxu1 }
 0x9c7   : > { %v12339_v4 = vpop.f32.mrf.mxu0 }
 0x9c8   : > { %v15552_v56 = vmul.f32 0.17677669, %v12339_v4  ;;  %v15558_v37 = vpop.f32.mrf.mxu1 }
 0x9c9   : > { %v6344_v17 = vpop.f32.mrf.mxu0 }
 0x9ca   : > { %v15554_v11 = vmul.f32 0.17677669, %v6344_v17  ;;  %v7009_v18 = vsel %vm2011_vm1, %v15552_v56, -inf  ;;  %v15562_v16 = vpop.f32.mrf.mxu1 }
 0x9cb   : > { %7010 = vmax.xlane.f32.xlu1 %v7009_v18  ;;  %v18354_v18 = vld [vmem:[#allocation43_spill] sm:$0xff] }
 0x9cc   : > { %v7006_v6 = vsel %vm2011_vm1, %v15554_v11, -inf }
 0x9cd   : > { %7007 = vmax.xlane.f32.xlu0 %v7006_v6  ;;  %v18355_v6 = vld [vmem:[#allocation44_spill] sm:$0xff] }
 0x9cf   : > { %v12353_v52 = vpop.f32.mrf.mxu0 }
 0x9d0   : > { %v15564_v21 = vmul.f32 0.17677669, %v12353_v52  ;;  %v12346_v34 = vpop.f32.mrf.mxu1  ;;  %v18356_v52 = vld [vmem:[#allocation42_spill] sm:$0xff] }
 0x9d1   : > { %v6526_v25 = vpop.f32.mrf.mxu0  ;;  %v15570_v57 = vmul.f32 0.17677669, %v12346_v34  ;;  %v18357_v34 = vld [vmem:[#allocation45_spill] sm:$0xff] }
 0x9d2   : > { %v15566_v26 = vmul.f32 0.17677669, %v6526_v25  ;;  %v7021_v23 = vsel %vm2011_vm1, %v15564_v21, -inf  ;;  %v6435_v32 = vpop.f32.mrf.mxu1  ;;  %v15628_v25 = vpop.permute.xlu1 %7356 }
 0x9d3   : > { %7022 = vmax.xlane.f32.xlu1 %v7021_v23  ;;  %v15574_v40 = vmul.f32 0.17677669, %v6435_v32  ;;  %v7015_v3 = vsel %vm2011_vm1, %v15570_v57, -inf }
 0x9d4   : > { %v7018_v58 = vsel %vm2011_vm1, %v15566_v26, -inf }
 0x9d5   : > { %7019 = vmax.xlane.f32.xlu0 %v7018_v58  ;;  %v7012_v29 = vsel %vm2011_vm1, %v15574_v40, -inf }
 0x9d6   : > { %v15630_v23 = vpop.permute.xlu1 %7443 }
 0x9d8   : > { %v12360_v27 = vpop.f32.mrf.mxu1 }
 0x9d9   : > { %7016 = vmax.xlane.f32.xlu0 %v7015_v3  ;;  %v15582_v36 = vmul.f32 0.17677669, %v12360_v27 }
 0x9da   : > { %v12367_v10 = vpop.f32.mrf.mxu0  ;;  %v6617_v13 = vpop.f32.mrf.mxu1 }
 0x9db   : > { %v15578_v7 = vmul.f32 0.17677669, %v12367_v10  ;;  %v15590_v35 = vmul.f32 0.17677669, %v6617_v13  ;;  %v7027_v38 = vsel %vm2011_vm1, %v15582_v36, -inf }
 0x9dc   : > { %v6708_v63 = vpop.f32.mrf.mxu0 }
 0x9dd   : > { %7013 = vmax.xlane.f32.xlu0 %v7012_v29  ;;  %v15584_v41 = vmul.f32 0.17677669, %v6708_v63  ;;  %v7033_v30 = vsel %vm2011_vm1, %v15578_v7, -inf  ;;  %v7024_v49 = vsel %vm2011_vm1, %v15590_v35, -inf }
 0x9de   : > { %7034 = vmax.xlane.f32.xlu1 %v7033_v30 }
 0x9df   : > { %v7030_v48 = vsel %vm2011_vm1, %v15584_v41, -inf }
 0x9e1   : > { %7031 = vmax.xlane.f32.xlu0 %v7030_v48 }
 0x9e2   : > { %7028 = vmax.xlane.f32.xlu1 %v7027_v38  ;;  %v12374_v42 = vpop.f32.mrf.mxu1 }
 0x9e3   : > { %v15598_v15 = vmul.f32 0.17677669, %v12374_v42 }
 0x9e4   : > { %v6799_v43 = vpop.f32.mrf.mxu1 }
 0x9e5   : > { %7025 = vmax.xlane.f32.xlu0 %v7024_v49  ;;  %v15604_v24 = vmul.f32 0.17677669, %v6799_v43  ;;  %v7039_v50 = vsel %vm2011_vm1, %v15598_v15, -inf }
 0x9e7   : > { %v7036_v54 = vsel %vm2011_vm1, %v15604_v24, -inf }
 0x9ea   : > { %v12381_v14 = vpop.f32.mrf.mxu0 }
 0x9eb   : > { %v15596_v60 = vmul.f32 0.17677669, %v12381_v14 }
 0x9ec   : > { %v6890_v44 = vpop.f32.mrf.mxu0 }
 0x9ed   : > { %v15600_v45 = vmul.f32 0.17677669, %v6890_v44  ;;  %v7045_v46 = vsel %vm2011_vm1, %v15596_v60, -inf }
 0x9ee   : > { %7046 = vmax.xlane.f32.xlu1 %v7045_v46 }
 0x9ef   : > { %v7042_v61 = vsel %vm2011_vm1, %v15600_v45, -inf }
 0x9f0   : > { %7043 = vmax.xlane.f32.xlu0 %v7042_v61 }
 0x9f2   : > { %7040 = vmax.xlane.f32.xlu1 %v7039_v50  ;;  %v12388_v51 = vpop.f32.mrf.mxu1 }
 0x9f3   : > { %v15610_v53 = vmul.f32 0.17677669, %v12388_v51 }
 0x9f4   : > { %7037 = vmax.xlane.f32.xlu0 %v7036_v54  ;;  %v6981_v55 = vpop.f32.mrf.mxu1 }
 0x9f5   : > { %v15614_v0 = vmul.f32 0.17677669, %v6981_v55  ;;  %v7051_v4 = vsel %vm2011_vm1, %v15610_v53, -inf }
 0x9f6   : > { %7052 = vmax.xlane.f32.xlu1 %v7051_v4 }
 0x9f7   : > { %v7048_v17 = vsel %vm2011_vm1, %v15614_v0, -inf }
 0x9f8   : > { %7049 = vmax.xlane.f32.xlu0 %v7048_v17 }
 0xa07   : > { %7530 = vrot.lane.b32.xlu1 %v18354_v18, %s13517_s28 }
 0xa0b   : > { %7619 = vrot.lane.b32.xlu1 %v18355_v6, %s13517_s28 }
 0xa0e   : > { %7532 = vrot.lane.b32.xlu0 %v18356_v52, %s13517_s28 }
 0xa0f   : > { %7617 = vrot.lane.b32.xlu1 %v18357_v34, %s13517_s28 }
 0xa54   : > { %v7011_v58 = vpop.xlane.xlu1 %7010 }
 0xa55   : > { %v7055_v32 = vsub.f32 %v15552_v56, %v7011_v58 }
 0xa56   : > { %v7008_v3 = vpop.xlane.xlu0 %7007 }
 0xa57   : > { %v7072_v27 = vmul.f32 1.442695, %v7055_v32  ;;  %v7054_v10 = vsub.f32 %v15554_v11, %v7008_v3 }
 0xa59   : > { %12874 = vpow2.f32 %v7072_v27  ;;  %v7070_v29 = vmul.f32 1.442695, %v7054_v10 }
 0xa5b   : > { %12876 = vpow2.f32 %v7070_v29 }
 0xa5c   : > { %v7023_v63 = vpop.xlane.xlu1 %7022 }
 0xa5d   : > { %v7059_v13 = vsub.f32 %v15564_v21, %v7023_v63 }
 0xa5e   : > { %v7020_v30 = vpop.xlane.xlu0 %7019 }
 0xa5f   : > { %v7080_v48 = vmul.f32 1.442695, %v7059_v13  ;;  %v7058_v38 = vsub.f32 %v15566_v26, %v7020_v30 }
 0xa61   : > { %12878 = vpow2.f32 %v7080_v48  ;;  %v7078_v49 = vmul.f32 1.442695, %v7058_v38 }
 0xa62   : > { %v7017_v42 = vpop.xlane.xlu0 %7016 }
 0xa63   : > { %12880 = vpow2.f32 %v7078_v49  ;;  %v7057_v56 = vsub.f32 %v15570_v57, %v7017_v42 }
 0xa65   : > { %v7076_v14 = vmul.f32 1.442695, %v7057_v56 }
 0xa66   : > { %v15637_v43 = vpop.eup %12874  ;;  %v7014_v11 = vpop.xlane.xlu0 %7013 }
 0xa67   : > { %12882 = vpow2.f32 %v7076_v14  ;;  %v7056_v44 = vsub.f32 %v15574_v40, %v7014_v11  ;;  %v7035_v46 = vpop.xlane.xlu1 %7034  ;;  %v7105_v21 = vsel %vm2011_vm1, %v15637_v43, 0.0 }
 0xa68   : > { %v15642_v61 = vpop.eup %12876  ;;  %v7063_v26 = vsub.f32 %v15578_v7, %v7035_v46  ;;  %7106 = vadd.xlane.f32.xlu1 %v7105_v21 }
 0xa69   : > { %v7102_v50 = vsel %vm2011_vm1, %v15642_v61, 0.0  ;;  %v7074_v57 = vmul.f32 1.442695, %v7056_v44 }
 0xa6a   : > { %v7088_v51 = vmul.f32 1.442695, %v7063_v26  ;;  %7103 = vadd.xlane.f32.xlu0 %v7102_v50  ;;  %v7032_v54 = vpop.xlane.xlu0 %7031 }
 0xa6b   : > { %v7062_v55 = vsub.f32 %v15584_v41, %v7032_v54  ;;  %v7029_v4 = vpop.xlane.xlu1 %7028 }
 0xa6c   : > { %12884 = vpow2.f32 %v7088_v51  ;;  %v7061_v40 = vsub.f32 %v15582_v36, %v7029_v4 }
 0xa6d   : > { %v7086_v17 = vmul.f32 1.442695, %v7062_v55  ;;  %12886 = vpow2.f32 %v7074_v57 }
 0xa6e   : > { %v15649_v18 = vpop.eup %12878  ;;  %v7084_v6 = vmul.f32 1.442695, %v7061_v40  ;;  %v7026_v34 = vpop.xlane.xlu0 %7025 }
 0xa6f   : > { %12888 = vpow2.f32 %v7086_v17  ;;  %v7117_v7 = vsel %vm2011_vm1, %v15649_v18, 0.0  ;;  %v7060_v36 = vsub.f32 %v15590_v35, %v7026_v34 }
 0xa70   : > { %v15653_v52 = vpop.eup %12880  ;;  %7118 = vadd.xlane.f32.xlu1 %v7117_v7  ;;  %12890 = vpow2.f32 %v7084_v6  ;;  %v18358_v6 = vld [vmem:[#allocation47_spill] sm:$0xff]  ;;  %v18359_v7 = vld [vmem:[#allocation46_spill] sm:$0xff] }
 0xa71   : > { %v7114_v41 = vsel %vm2011_vm1, %v15653_v52, 0.0  ;;  %v7082_v29 = vmul.f32 1.442695, %v7060_v36 }
 0xa72   : > { %7115 = vadd.xlane.f32.xlu0 %v7114_v41 }
 0xa74   : > { %v15657_v58 = vpop.eup %12882 }
 0xa75   : > { %v7111_v32 = vsel %vm2011_vm1, %v15657_v58, 0.0 }
 0xa76   : > { %7112 = vadd.xlane.f32.xlu1 %v7111_v32 }
 0xa77   : > { %v7047_v3 = vpop.xlane.xlu1 %7046 }
 0xa78   : > { %v7067_v27 = vsub.f32 %v15596_v60, %v7047_v3 }
 0xa79   : > { %v15663_v10 = vpop.eup %12884  ;;  %v7044_v63 = vpop.xlane.xlu0 %7043 }
 0xa7a   : > { %v7096_v13 = vmul.f32 1.442695, %v7067_v27  ;;  %v7066_v30 = vsub.f32 %v15600_v45, %v7044_v63  ;;  %v7129_v48 = vsel %vm2011_vm1, %v15663_v10, 0.0  ;;  %v15668_v38 = vpop.eup %12886 }
 0xa7b   : > { %v7041_v35 = vpop.xlane.xlu1 %7040  ;;  %7130 = vadd.xlane.f32.xlu0 %v7129_v48  ;;  %v7108_v46 = vsel %vm2011_vm1, %v15668_v38, 0.0  ;;  %v18362_v48 = vld [vmem:[#allocation48_spill] sm:$0xff] }
 0xa7c   : > { %v15670_v49 = vpop.eup %12888  ;;  %12892 = vpow2.f32 %v7096_v13  ;;  %v7094_v42 = vmul.f32 1.442695, %v7066_v30  ;;  %v7065_v60 = vsub.f32 %v15598_v15, %v7041_v35 }
 0xa7d   : > { %12894 = vpow2.f32 %v7082_v29  ;;  %v7126_v56 = vsel %vm2011_vm1, %v15670_v49, 0.0  ;;  %v7038_v14 = vpop.xlane.xlu0 %7037  ;;  %v15675_v11 = vpop.eup %12890 }
 0xa7e   : > { %12896 = vpow2.f32 %v7094_v42  ;;  %v7092_v45 = vmul.f32 1.442695, %v7065_v60  ;;  %7127 = vadd.xlane.f32.xlu1 %v7126_v56  ;;  %v7064_v44 = vsub.f32 %v15604_v24, %v7038_v14  ;;  %v7123_v15 = vsel %vm2011_vm1, %v15675_v11, 0.0  ;;  %v18363_v42 = vld [vmem:[#allocation41_spill] sm:$0xff]  ;;  %v18364_v60 = vld [vmem:[#allocation51_spill] sm:$0xff] }
 0xa7f   : > { %7109 = vadd.xlane.f32.xlu0 %v7108_v46  ;;  %v7053_v34 = vpop.xlane.xlu1 %7052  ;;  %v18365_v14 = vld [vmem:[#allocation55_spill] sm:$0xff]  ;;  %v18367_v46 = vld [vmem:[#allocation52_spill] sm:$0xff] }
 0xa80   : > { %v7090_v21 = vmul.f32 1.442695, %v7064_v44  ;;  %12898 = vpow2.f32 %v7092_v45  ;;  %v7069_v32 = vsub.f32 %v15610_v53, %v7053_v34  ;;  %v18361_v53 = vld [vmem:[#allocation40_spill] sm:$0xff] }
 0xa81   : > { %v7050_v41 = vpop.xlane.xlu0 %7049 }
 0xa82   : > { %12900 = vpow2.f32 %v7090_v21  ;;  %7124 = vadd.xlane.f32.xlu1 %v7123_v15  ;;  %v7068_v36 = vsub.f32 %v15614_v0, %v7050_v41  ;;  %v7100_v27 = vmul.f32 1.442695, %v7069_v32  ;;  %v18360_v0 = vld [vmem:[#allocation49_spill] sm:$0xff]  ;;  %v18368_v21 = vld [vmem:[#allocation56_spill] sm:$0xff] }
 0xa83   : > { %v7531_v35 = vpop.permute.xlu1 %7530  ;;  %v18369_v15 = vld [vmem:[#allocation57_spill] sm:$0xff] }
 0xa84   : > { %v7098_v3 = vmul.f32 1.442695, %v7068_v36 }
 0xa85   : > { %v7533_v44 = vpop.permute.xlu0 %7532 }
 0xa86   : > { %12902 = vpow2.f32 %v7098_v3 }
 0xa87   : > { %12904 = vpow2.f32 %v7100_v27  ;;  %v15730_v56 = vpop.permute.xlu1 %7619 }
 0xa89   : > { %v15682_v26 = vpop.eup %12892 }
 0xa8a   : > { %v15684_v50 = vpop.eup %12894  ;;  %v7141_v57 = vsel %vm2011_vm1, %v15682_v26, 0.0 }
 0xa8b   : > { %v15688_v51 = vpop.eup %12896  ;;  %7142 = vadd.xlane.f32.xlu0 %v7141_v57  ;;  %v7120_v55 = vsel %vm2011_vm1, %v15684_v50, 0.0  ;;  %v15738_v45 = vpop.permute.xlu1 %7617  ;;  %v18370_v57 = vld [vmem:[#allocation58_spill] sm:$0xff] }
 0xa8c   : > { %v7138_v24 = vsel %vm2011_vm1, %v15688_v51, 0.0 }
 0xa8d   : > { %7139 = vadd.xlane.f32.xlu1 %v7138_v24  ;;  %v15692_v54 = vpop.eup %12898 }
 0xa8e   : > { %v7135_v17 = vsel %vm2011_vm1, %v15692_v54, 0.0 }
 0xa8f   : > { %v15696_v4 = vpop.eup %12900  ;;  %7121 = vadd.xlane.f32.xlu0 %v7120_v55 }
 0xa90   : > { %v7132_v40 = vsel %vm2011_vm1, %v15696_v4, 0.0 }
 0xa91   : > { %7133 = vadd.xlane.f32.xlu1 %v7132_v40 }
 0xa93   : > { %7136 = vadd.xlane.f32.xlu0 %v7135_v17  ;;  %v15708_v29 = vpop.eup %12902 }
 0xa94   : > { %v15710_v63 = vpop.eup %12904  ;;  %v7144_v13 = vsel %vm2011_vm1, %v15708_v29, 0.0 }
 0xa95   : > { %v7147_v30 = vsel %vm2011_vm1, %v15710_v63, 0.0 }
 0xaa2   : > { %7704 = vrot.lane.b32.xlu1 %v18358_v6, %s13517_s28 }
 0xaa9   : > { %7706 = vrot.lane.b32.xlu0 %v18359_v7, %s13517_s28 }
 0xac6   : > { %7145 = vadd.xlane.f32.xlu1 %v7144_v13 }
 0xac8   : > { %7148 = vadd.xlane.f32.xlu0 %v7147_v30 }
 0xad7   : > { %7791 = vrot.lane.b32.xlu1 %v18360_v0, %s13517_s28 }
 0xadb   : > { %4502 = vrot.lane.b32.xlu1 %v18361_v53, %s13517_s28 }
 0xade   : > { %7793 = vrot.lane.b32.xlu0 %v18362_v48, %s13517_s28 }
 0xadf   : > { %6199 = vrot.lane.b32.xlu1 %v15524_v31, %s13516_s5  ;;  %v18366_v31 = vld [vmem:[#allocation25_spill] sm:$0xff] }
 0xae2   : > { %4500 = vrot.lane.b32.xlu0 %v18363_v42, %s13517_s28 }
 0xae3   : > { %4506 = vrot.lane.b32.xlu1 %v18364_v60, %s13517_s28 }
 0xae6   : > { %6197 = vrot.lane.b32.xlu0 %v15526_v33, %s13516_s5 }
 0xae7   : > { %6203 = vrot.lane.b32.xlu1 %v15532_v1, %s13516_s5 }
 0xaea   : > { %4504 = vrot.lane.b32.xlu0 %v18365_v14, %s13517_s28 }
 0xaeb   : > { %4510 = vrot.lane.b32.xlu1 %v18366_v31, %s13517_s28 }
 0xaee   : > { %6201 = vrot.lane.b32.xlu0 %v15536_v62, %s13516_s5 }
 0xaef   : > { %6207 = vrot.lane.b32.xlu1 %v15528_v39, %s13516_s5 }
 0xaf1   : > { %v7107_v33 = vpop.xlane.xlu1 %7106 }
 0xaf2   : > { %4508 = vrot.lane.b32.xlu0 %v18367_v46, %s13517_s28  ;;  %12906 = vrcp.f32 %v7107_v33 }
 0xaf3   : > { %v7104_v1 = vpop.xlane.xlu0 %7103  ;;  %4514 = vrot.lane.b32.xlu1 %v18368_v21, %s13517_s28 }
 0xaf4   : > { %12908 = vrcp.f32 %v7104_v1 }
 0xaf6   : > { %6205 = vrot.lane.b32.xlu0 %v15530_v59, %s13516_s5  ;;  %v18371_v59 = vld [vmem:[#allocation50_spill] sm:$0xff] }
 0xaf7   : > { %6211 = vrot.lane.b32.xlu1 %v15540_v5, %s13516_s5 }
 0xaf9   : > { %v7119_v62 = vpop.xlane.xlu1 %7118 }
 0xafa   : > { %4512 = vrot.lane.b32.xlu0 %v18369_v15, %s13517_s28  ;;  %12910 = vrcp.f32 %v7119_v62 }
 0xafb   : > { %v7116_v39 = vpop.xlane.xlu0 %7115  ;;  %4518 = vrot.lane.b32.xlu1 %v18370_v57, %s13517_s28 }
 0xafc   : > { %12912 = vrcp.f32 %v7116_v39 }
 0xafe   : > { %6209 = vrot.lane.b32.xlu0 %v15544_v2, %s13516_s5 }
 0xaff   : > { %v12907_v24 = vpop.eup %12906  ;;  %v7113_v40 = vpop.xlane.xlu1 %7112 }
 0xb00   : > { %v7167_v17 = vmul.f32 %v12907_v24, %v15637_v43  ;;  %12914 = vrcp.f32 %v7113_v40 }
 0xb01   : > { %v12909_v55 = vpop.eup %12908 }
 0xb02   : > { %4516 = vrot.lane.b32.xlu0 %v18371_v59, %s13517_s28  ;;  %v7166_v5 = vmul.f32 %v12909_v55, %v15642_v61 }
 0xb04   : > { %12393 = vmatprep.mubr.msk.f32.mxu0 %vm2011_vm1, %v7166_v5  ;;  %v7131_v6 = vpop.xlane.xlu0 %7130 }
 0xb05   : > { %12394 = vmatmul.mubr.msk.f32.vlgmr.msra.gmra.mxu0 %vm2011_vm1, %v7167_v17  ;;  %12916 = vrcp.f32 %v7131_v6 }
 0xb06   : > { %12404 = vmatpush3.msra.mxu0 %v15518_v19 }
 0xb07   : > { %12405 = vmatprep.subr.mxu0 %v15628_v25  ;;  %v7128_v2 = vpop.xlane.xlu1 %7127  ;;  %v12911_v7 = vpop.eup %12910 }
 0xb08   : > { %12918 = vrcp.f32 %v7128_v2  ;;  %12406 = vmatpush3.msra.mxu0 %v15628_v25  ;;  %v7110_v61 = vpop.xlane.xlu0 %7109  ;;  %v7171_v34 = vmul.f32 %v12911_v7, %v15649_v18 }
 0xb09   : > { %v12913_v41 = vpop.eup %12912  ;;  %12417 = vmatprep.subr.mxu0 %v7533_v44  ;;  %12920 = vrcp.f32 %v7110_v61 }
 0xb0a   : > { %v7170_v43 = vmul.f32 %v12913_v41, %v15653_v52 }
 0xb0b   : > { %v7125_v19 = vpop.xlane.xlu1 %7124 }
 0xb0c   : > { %12407 = vmatprep.mubr.msk.f32.mxu0 %vm2011_vm1, %v7170_v43  ;;  %v7990_v43 = vld [vmem:[#allocation11 + $0x78] sm:$0xff] }
 0xb0d   : > { %12408 = vmatmul.mubr.msk.f32.vlgmr.msra.gmra.mxu0 %vm2011_vm1, %v7171_v34  ;;  %v12915_v36 = vpop.eup %12914  ;;  %v7989_v34 = vld [vmem:[#allocation11 + $0x70] sm:$0xff] }
 0xb0e   : > { %12418 = vmatpush3.msra.mxu0 %v7533_v44  ;;  %v7169_v53 = vmul.f32 %v12915_v36, %v15657_v58  ;;  %v7987_v36 = vld [vmem:[#allocation11 + $0x60] sm:$0xff] }
 0xb0f   : > { %12419 = vmatprep.subr.mxu0 %v7531_v35 }
 0xb10   : > { %12420 = vmatpush3.msra.mxu0 %v7531_v35 }
 0xb12   : > { %v12917_v32 = vpop.eup %12916 }
 0xb13   : > { %v7175_v18 = vmul.f32 %v12917_v32, %v15663_v10  ;;  %v7986_v32 = vld [vmem:[#allocation11 + $0x58] sm:$0xff] }
 0xb14   : > { %v7143_v3 = vpop.xlane.xlu0 %7142 }
 0xb15   : > { %v12919_v25 = vpop.eup %12918  ;;  %12922 = vrcp.f32 %v7143_v3  ;;  %v7985_v3 = vld [vmem:[#allocation11 + $0x50] sm:$0xff] }
 0xb16   : > { %v12921_v27 = vpop.eup %12920  ;;  %v7140_v13 = vpop.xlane.xlu1 %7139  ;;  %v7174_v30 = vmul.f32 %v12919_v25, %v15670_v49  ;;  %v7984_v25 = vld [vmem:[#allocation11 + $0x48] sm:$0xff] }
 0xb17   : > { %12924 = vrcp.f32 %v7140_v13  ;;  %v7168_v52 = vmul.f32 %v12921_v27, %v15668_v38  ;;  %v7983_v27 = vld [vmem:[#allocation11 + $0x40] sm:$0xff]  ;;  %v7982_v13 = vld [vmem:[#allocation11 + $0x38] sm:$0xff] }
 0xb18   : > { %12926 = vrcp.f32 %v7125_v19  ;;  %12421 = vmatprep.mubr.msk.f32.mxu0 %vm2011_vm1, %v7174_v30  ;;  %v7122_v0 = vpop.xlane.xlu0 %7121  ;;  %v7988_v19 = vld [vmem:[#allocation11 + $0x68] sm:$0xff]  ;;  %v7981_v30 = vld [vmem:[#allocation11 + $0x30] sm:$0xff] }
 0xb19   : > { %12422 = vmatmul.mubr.msk.f32.vlgmr.msra.gmra.mxu0 %vm2011_vm1, %v7175_v18  ;;  %12928 = vrcp.f32 %v7122_v0  ;;  %12400 = vmatprep.mubr.msk.f32.mxu1 %vm2011_vm1, %v7168_v52  ;;  %v7980_v18 = vld [vmem:[#allocation11 + $0x28] sm:$0xff]  ;;  %v7979_v52 = vld [vmem:[#allocation11 + $0x20] sm:$0xff]  ;;  %v7978_v0 = vld [vmem:[#allocation11 + $0x18] sm:$0xff] }
 0xb1a   : > { %v7134_v48 = vpop.xlane.xlu1 %7133  ;;  %12401 = vmatmul.mubr.msk.f32.vlgmr.msra.gmra.mxu1 %vm2011_vm1, %v7169_v53  ;;  %v7977_v53 = vld [vmem:[#allocation11 + $0x10] sm:$0xff] }
 0xb1b   : > { %12930 = vrcp.f32 %v7134_v48  ;;  %12411 = vmatpush3.msra.mxu1 %v15521_v9  ;;  %v7976_v48 = vld [vmem:[#allocation11 + $0x8] sm:$0xff] }
 0xb1c   : > { %12412 = vmatprep.subr.mxu1 %v15630_v23  ;;  %v7137_v10 = vpop.xlane.xlu0 %7136 }
 0xb1d   : > { %12413 = vmatpush3.msra.mxu1 %v15630_v23  ;;  %12932 = vrcp.f32 %v7137_v10  ;;  %v7975_v10 = vld [vmem:[#allocation11] sm:$0xff] }
 0xb1e   : > { %12424 = vmatprep.subr.mxu1 %v15730_v56  ;;  %v7705_v38 = vpop.permute.xlu1 %7704 }
 0xb20   : > { %v7707_v58 = vpop.permute.xlu0 %7706 }
 0xb21   : > { %12431 = vmatprep.subr.mxu0 %v7707_v58 }
 0xb22   : > { %12432 = vmatpush3.msra.mxu0 %v7707_v58  ;;  %v12923_v49 = vpop.eup %12922 }
 0xb23   : > { %12433 = vmatprep.subr.mxu0 %v7705_v38  ;;  %v7179_v14 = vmul.f32 %v12923_v49, %v15682_v26 }
 0xb24   : > { %v12925_v35 = vpop.eup %12924  ;;  %12434 = vmatpush3.msra.mxu0 %v7705_v38 }
 0xb25   : > { %v12927_v42 = vpop.eup %12926  ;;  %v7178_v60 = vmul.f32 %v12925_v35, %v15688_v51  ;;  %12445 = vmatprep.subr.mxu0 %v7990_v43 }
 0xb26   : > { %v12929_v9 = vpop.eup %12928  ;;  %v7173_v44 = vmul.f32 %v12927_v42, %v15675_v11 }
 0xb27   : > { %12435 = vmatprep.mubr.msk.f32.mxu0 %vm2011_vm1, %v7178_v60  ;;  %v7172_v23 = vmul.f32 %v12929_v9, %v15684_v50 }
 0xb28   : > { %v12931_v31 = vpop.eup %12930  ;;  %12436 = vmatmul.mubr.msk.f32.vlgmr.msra.gmra.mxu0 %vm2011_vm1, %v7179_v14  ;;  %v18372_v14 = vld [vmem:[#allocation54_spill] sm:$0xff] }
 0xb29   : > { %12414 = vmatprep.mubr.msk.f32.mxu1 %vm2011_vm1, %v7172_v23  ;;  %v7176_v33 = vmul.f32 %v12931_v31, %v15696_v4  ;;  %12446 = vmatpush3.msra.mxu0 %v7990_v43  ;;  %v18373_v23 = vld [vmem:[#allocation59_spill] sm:$0xff] }
 0xb2a   : > { %v12933_v46 = vpop.eup %12932  ;;  %12415 = vmatmul.mubr.msk.f32.vlgmr.msra.gmra.mxu1 %vm2011_vm1, %v7173_v44  ;;  %12447 = vmatprep.subr.mxu0 %v7989_v34 }
 0xb2b   : > { %12425 = vmatpush3.msra.mxu1 %v15730_v56  ;;  %12428 = vmatprep.mubr.msk.f32.mxu1 %vm2011_vm1, %v7176_v33  ;;  %v7177_v26 = vmul.f32 %v12933_v46, %v15692_v54 }
 0xb2c   : > { %12426 = vmatprep.subr.mxu1 %v15738_v45  ;;  %12448 = vmatpush3.msra.mxu0 %v7989_v34 }
 0xb2d   : > { %12427 = vmatpush3.msra.mxu1 %v15738_v45  ;;  %12449 = vmatprep.subr.mxu0 %v7988_v19 }
 0xb2e   : > { %12429 = vmatmul.mubr.msk.f32.vlgmr.msra.gmra.mxu1 %vm2011_vm1, %v7177_v26  ;;  %12450 = vmatpush3.msra.mxu0 %v7988_v19 }
 0xb2f   : > { %12451 = vmatprep.subr.mxu0 %v7987_v36 }
 0xb30   : > { %12452 = vmatpush3.msra.mxu0 %v7987_v36 }
 0xb31   : > { %12453 = vmatprep.subr.mxu0 %v7986_v32 }
 0xb32   : > { %12454 = vmatpush3.msra.mxu0 %v7986_v32 }
 0xb33   : > { %12455 = vmatprep.subr.mxu0 %v7985_v3 }
 0xb34   : > { %12456 = vmatpush3.msra.mxu0 %v7985_v3 }
 0xb35   : > { %12457 = vmatprep.subr.mxu0 %v7984_v25 }
 0xb36   : > { %12458 = vmatpush3.msra.mxu0 %v7984_v25 }
 0xb37   : > { %12459 = vmatprep.subr.mxu0 %v7983_v27 }
 0xb38   : > { %12460 = vmatpush3.msra.mxu0 %v7983_v27 }
 0xb39   : > { %12461 = vmatprep.subr.mxu0 %v7982_v13 }
 0xb3a   : > { %12462 = vmatpush3.msra.mxu0 %v7982_v13 }
 0xb3b   : > { %12463 = vmatprep.subr.mxu0 %v7981_v30 }
 0xb3c   : > { %12464 = vmatpush3.msra.mxu0 %v7981_v30 }
 0xb3d   : > { %12465 = vmatprep.subr.mxu0 %v7980_v18 }
 0xb3e   : > { %12466 = vmatpush3.msra.mxu0 %v7980_v18 }
 0xb3f   : > { %12467 = vmatprep.subr.mxu0 %v7979_v52 }
 0xb40   : > { %12468 = vmatpush3.msra.mxu0 %v7979_v52 }
 0xb41   : > { %12469 = vmatprep.subr.mxu0 %v7978_v0 }
 0xb42   : > { %12470 = vmatpush3.msra.mxu0 %v7978_v0 }
 0xb43   : > { %12471 = vmatprep.subr.mxu0 %v7977_v53 }
 0xb44   : > { %12472 = vmatpush3.msra.mxu0 %v7977_v53 }
 0xb45   : > { %12473 = vmatprep.subr.mxu0 %v7976_v48 }
 0xb46   : > { %12474 = vmatpush3.msra.mxu0 %v7976_v48 }
 0xb47   : > { %12475 = vmatprep.subr.mxu0 %v7975_v10 }
 0xb48   : > { %12476 = vmatpush3.msra.mxu0 %v7975_v10 }
 0xb4f   : > { %v7146_v11 = vpop.xlane.xlu1 %7145 }
 0xb50   : > { %12934 = vrcp.f32 %v7146_v11  ;;  %v18376_v11 = vld [vmem:[#allocation63_spill] sm:$0xff] }
 0xb51   : > { %v7149_v50 = vpop.xlane.xlu0 %7148 }
 0xb52   : > { %12936 = vrcp.f32 %v7149_v50 }
 0xb53   : > { %v7792_v51 = vpop.permute.xlu1 %7791 }
 0xb55   : > { %v7794_v4 = vpop.permute.xlu0 %7793 }
 0xb56   : > { %12438 = vmatprep.subr.mxu1 %v7794_v4 }
 0xb57   : > { %v4503_v1 = vpop.permute.xlu1 %4502  ;;  %12439 = vmatpush3.msra.mxu1 %v7794_v4 }
 0xb58   : > { %4550 = vst.msk [vmem:[#allocation2 + $0x8] sm:$0xff] %vm4548_vm2, %v4503_v1  ;;  %12440 = vmatprep.subr.mxu1 %v7792_v51 }
 0xb59   : > { %12441 = vmatpush3.msra.mxu1 %v7792_v51  ;;  %v4501_v54 = vpop.permute.xlu0 %4500 }
 0xb5a   : > { %4549 = vst.msk [vmem:[#allocation2] sm:$0xff] %vm4548_vm2, %v4501_v54 }
 0xb5b   : > { %v6200_v56 = vpop.permute.xlu1 %6199 }
 0xb5c   : > { %6247 = vst.msk [vmem:[#allocation2 + $0x8] sm:$0xff] %vm6245_vm3, %v6200_v56 }
 0xb5d   : > { %v12935_v45 = vpop.eup %12934  ;;  %v6198_v21 = vpop.permute.xlu0 %6197 }
 0xb5e   : > { %6246 = vst.msk [vmem:[#allocation2] sm:$0xff] %vm6245_vm3, %v6198_v21  ;;  %v7180_v62 = vmul.f32 %v12935_v45, %v15708_v29 }
 0xb5f   : > { %v12937_v15 = vpop.eup %12936  ;;  %v4507_v39 = vpop.permute.xlu1 %4506 }
 0xb60   : > { %4552 = vst.msk [vmem:[#allocation2 + $0x18] sm:$0xff] %vm4548_vm2, %v4507_v39  ;;  %12442 = vmatprep.mubr.msk.f32.mxu1 %vm2011_vm1, %v7180_v62  ;;  %v7181_v57 = vmul.f32 %v12937_v15, %v15710_v63 }
 0xb61   : > { %v4505_v24 = vpop.permute.xlu0 %4504 }
 0xb62   : > { %4551 = vst.msk [vmem:[#allocation2 + $0x10] sm:$0xff] %vm4548_vm2, %v4505_v24  ;;  %12443 = vmatmul.mubr.msk.f32.vlgmr.msra.gmra.mxu1 %vm2011_vm1, %v7181_v57 }
 0xb63   : > { %v6204_v55 = vpop.permute.xlu1 %6203 }
 0xb64   : > { %6249 = vst.msk [vmem:[#allocation2 + $0x18] sm:$0xff] %vm6245_vm3, %v6204_v55 }
 0xb65   : > { %v6202_v59 = vpop.permute.xlu0 %6201 }
 0xb66   : > { %6248 = vst.msk [vmem:[#allocation2 + $0x10] sm:$0xff] %vm6245_vm3, %v6202_v59 }
 0xb67   : > { %v4511_v29 = vpop.permute.xlu1 %4510 }
 0xb68   : > { %4554 = vst.msk [vmem:[#allocation2 + $0x28] sm:$0xff] %vm4548_vm2, %v4511_v29 }
 0xb69   : > { %v4509_v5 = vpop.permute.xlu0 %4508 }
 0xb6a   : > { %4553 = vst.msk [vmem:[#allocation2 + $0x20] sm:$0xff] %vm4548_vm2, %v4509_v5 }
 0xb6b   : > { %v6208_v40 = vpop.permute.xlu1 %6207 }
 0xb6c   : > { %6251 = vst.msk [vmem:[#allocation2 + $0x28] sm:$0xff] %vm6245_vm3, %v6208_v40 }
 0xb6d   : > { %v6206_v63 = vpop.permute.xlu0 %6205 }
 0xb6e   : > { %6250 = vst.msk [vmem:[#allocation2 + $0x20] sm:$0xff] %vm6245_vm3, %v6206_v63 }
 0xb6f   : > { %v4515_v17 = vpop.permute.xlu1 %4514 }
 0xb70   : > { %4556 = vst.msk [vmem:[#allocation2 + $0x38] sm:$0xff] %vm4548_vm2, %v4515_v17 }
 0xb71   : > { %v4513_v6 = vpop.permute.xlu0 %4512 }
 0xb72   : > { %4555 = vst.msk [vmem:[#allocation2 + $0x30] sm:$0xff] %vm4548_vm2, %v4513_v6 }
 0xb73   : > { %v6212_v2 = vpop.permute.xlu1 %6211 }
 0xb74   : > { %6253 = vst.msk [vmem:[#allocation2 + $0x38] sm:$0xff] %vm6245_vm3, %v6212_v2 }
 0xb75   : > { %v6210_v7 = vpop.permute.xlu0 %6209 }
 0xb76   : > { %6252 = vst.msk [vmem:[#allocation2 + $0x30] sm:$0xff] %vm6245_vm3, %v6210_v7 }
 0xb77   : > { %v4519_v61 = vpop.permute.xlu1 %4518 }
 0xb78   : > { %4558 = vst.msk [vmem:[#allocation2 + $0x48] sm:$0xff] %vm4548_vm2, %v4519_v61 }
 0xb79   : > { %v4517_v41 = vpop.permute.xlu0 %4516 }
 0xb7a   : > { %4557 = vst.msk [vmem:[#allocation2 + $0x40] sm:$0xff] %vm4548_vm2, %v4517_v41 }
 0xbc5   : > { %v12395_v58 = vpop.f32.mrf.mxu0 }
 0xbc6   : > { %7896 = vrot.lane.b32.xlu1 %v12395_v58, %s13515_s27 }
 0xbc7   : > { %v7260_v38 = vpop.f32.mrf.mxu0 }
 0xbc8   : > { %7894 = vrot.lane.b32.xlu0 %v7260_v38, %s13515_s27 }
 0xbcd   : > { %v12409_v49 = vpop.f32.mrf.mxu0 }
 0xbce   : > { %7904 = vrot.lane.b32.xlu1 %v12409_v49, %s13515_s27 }
 0xbcf   : > { %v7434_v35 = vpop.f32.mrf.mxu0 }
 0xbd0   : > { %7902 = vrot.lane.b32.xlu0 %v7434_v35, %s13515_s27 }
 0xbd9   : > { %v12423_v9 = vpop.f32.mrf.mxu0 }
 0xbda   : > { %v12402_v42 = vpop.f32.mrf.mxu1 }
 0xbdb   : > { %7900 = vrot.lane.b32.xlu1 %v12402_v42, %s13515_s27  ;;  %v7608_v31 = vpop.f32.mrf.mxu0  ;;  %v15897_v42 = vld [vmem:[%s18023_s7] ss:$0 sm:$0xff] }
 0xbdc   : > { %v7347_v60 = vpop.f32.mrf.mxu1 }
 0xbdd   : > { %7898 = vrot.lane.b32.xlu0 %v7347_v60, %s13515_s27 }
 0xbdf   : > { %6215 = vrot.lane.b32.xlu1 %v15534_v8, %s13516_s5  ;;  %v18374_v8 = vld [vmem:[#allocation53_spill] sm:$0xff] }
 0xbe1   : > { %6213 = vrot.lane.b32.xlu0 %v15538_v47, %s13516_s5  ;;  %v18375_v47 = vld [vmem:[#allocation60_spill] sm:$0xff] }
 0xbe3   : > { %7912 = vrot.lane.b32.xlu1 %v12423_v9, %s13515_s27 }
 0xbe5   : > { %4520 = vrot.lane.b32.xlu0 %v18372_v14, %s13517_s28 }
 0xbe7   : > { %4522 = vrot.lane.b32.xlu1 %v18373_v23, %s13517_s28  ;;  %v13226_v23 = vld [vmem:[%s13796_s12 + $0x8] sm:$0xff] }
 0xbe8   : > { %v12437_v26 = vpop.f32.mrf.mxu0 }
 0xbe9   : > { %7910 = vrot.lane.b32.xlu0 %v7608_v31, %s13515_s27 }
 0xbea   : > { %v12416_v44 = vpop.f32.mrf.mxu1 }
 0xbeb   : > { %7908 = vrot.lane.b32.xlu1 %v12416_v44, %s13515_s27 }
 0xbec   : > { %v7521_v33 = vpop.f32.mrf.mxu1 }
 0xbed   : > { %7906 = vrot.lane.b32.xlu0 %v7521_v33, %s13515_s27  ;;  %v13227_v33 = vld [vmem:[%s13796_s12] sm:$0xff] }
 0xbee   : > { %v12430_v46 = vpop.f32.mrf.mxu1 }
 0xbef   : > { %6219 = vrot.lane.b32.xlu1 %v15546_v12, %s13516_s5 }
 0xbf0   : > { %v7695_v12 = vpop.f32.mrf.mxu1 }
 0xbf1   : > { %6217 = vrot.lane.b32.xlu0 %v15550_v22, %s13516_s5  ;;  %v7782_v22 = vpop.f32.mrf.mxu0 }
 0xbf3   : > { %4526 = vrot.lane.b32.xlu1 %v18374_v8, %s13517_s28 }
 0xbf5   : > { %4524 = vrot.lane.b32.xlu0 %v18375_v47, %s13517_s28 }
 0xbf7   : > { %6223 = vrot.lane.b32.xlu1 %v15542_v20, %s13516_s5  ;;  %v18377_v20 = vld [vmem:[#allocation62_spill] sm:$0xff] }
 0xbf9   : > { %6221 = vrot.lane.b32.xlu0 %v15548_v28, %s13516_s5 }
 0xbfb   : > { %7916 = vrot.lane.b32.xlu1 %v12430_v46, %s13515_s27 }
 0xbfd   : > { %7914 = vrot.lane.b32.xlu0 %v7695_v12, %s13515_s27 }
 0xbff   : > { %7920 = vrot.lane.b32.xlu1 %v12437_v26, %s13515_s27 }
 0xc01   : > { %7918 = vrot.lane.b32.xlu0 %v7782_v22, %s13515_s27 }
 0xc03   : > { %4530 = vrot.lane.b32.xlu1 %v18376_v11, %s13517_s28  ;;  %v13228_v11 = vld [vmem:[%s13796_s12 + $0x10] sm:$0xff] }
 0xc05   : > { %4528 = vrot.lane.b32.xlu0 %v18377_v20, %s13517_s28  ;;  %s18663_s28 = sld [smem:[#allocation141_spill]] }
 0xc07   : > { %6227 = vrot.lane.b32.xlu1 %v15558_v37, %s13516_s5 }
 0xc09   : > { %6225 = vrot.lane.b32.xlu0 %v15562_v16, %s13516_s5 }
 0xc0b   : > { %s17969_s3 = scalar_lea.hbm %s18663_s28, %s11284_s26 }
 0xc22   : > { %v12444_v28 = vpop.f32.mrf.mxu1 }
 0xc23   : > { %7924 = vrot.lane.b32.xlu1 %v12444_v28, %s13515_s27 }
 0xc24   : > { %v7869_v50 = vpop.f32.mrf.mxu1 }
 0xc25   : > { %7922 = vrot.lane.b32.xlu0 %v7869_v50, %s13515_s27 }
 0xc38   : > { %v7897_v51 = vpop.permute.xlu1 %7896 }
 0xc39   : > { %7944 = vst.msk [vmem:[#allocation2 + $0x8] sm:$0xff] %vm7942_vm4, %v7897_v51  ;;  %v13229_v51 = vld [vmem:[%s13796_s12 + $0x28] sm:$0xff] }
 0xc3a   : > { %v7895_v4 = vpop.permute.xlu0 %7894 }
 0xc3b   : > { %7943 = vst.msk [vmem:[#allocation2] sm:$0xff] %vm7942_vm4, %v7895_v4 }
 0xc40   : > { %v7905_v1 = vpop.permute.xlu1 %7904  ;;  %v7960_v16 = vld [vmem:[#allocation2 + $0x8] sm:$0xff] }
 0xc41   : > { %7948 = vst.msk [vmem:[#allocation2 + $0x28] sm:$0xff] %vm7942_vm4, %v7905_v1  ;;  %v13230_v1 = vld [vmem:[%s13796_s12 + $0x18] sm:$0xff] }
 0xc42   : > { %v7903_v37 = vpop.permute.xlu0 %7902  ;;  %v7959_v54 = vld [vmem:[#allocation2] sm:$0xff] }
 0xc43   : > { %7947 = vst.msk [vmem:[#allocation2 + $0x20] sm:$0xff] %vm7942_vm4, %v7903_v37  ;;  %12477 = vmatprep.mubr.f32.mxu0 %v7959_v54 }
 0xc44   : > { %12478 = vmatmul.mubr.f32.vlgmr.msra.gmra.mxu0 %v7960_v16  ;;  %v13231_v16 = vld [vmem:[%s13796_s12 + $0x20] sm:$0xff] }
 0xc48   : > { %v7964_v5 = vld [vmem:[#allocation2 + $0x28] sm:$0xff] }
 0xc4a   : > { %v7963_v59 = vld [vmem:[#allocation2 + $0x20] sm:$0xff] }
 0xc4d   : > { %v7901_v56 = vpop.permute.xlu1 %7900 }
 0xc4e   : > { %7946 = vst.msk [vmem:[#allocation2 + $0x18] sm:$0xff] %vm7942_vm4, %v7901_v56 }
 0xc4f   : > { %v7899_v45 = vpop.permute.xlu0 %7898 }
 0xc50   : > { %7945 = vst.msk [vmem:[#allocation2 + $0x10] sm:$0xff] %vm7942_vm4, %v7899_v45 }
 0xc51   : > { %v6216_v21 = vpop.permute.xlu1 %6215 }
 0xc52   : > { %6255 = vst.msk [vmem:[#allocation2 + $0x48] sm:$0xff] %vm6245_vm3, %v6216_v21 }
 0xc53   : > { %v6214_v62 = vpop.permute.xlu0 %6213 }
 0xc54   : > { %6254 = vst.msk [vmem:[#allocation2 + $0x40] sm:$0xff] %vm6245_vm3, %v6214_v62 }
 0xc55   : > { %v7913_v15 = vpop.permute.xlu1 %7912  ;;  %v7962_v24 = vld [vmem:[#allocation2 + $0x18] sm:$0xff] }
 0xc56   : > { %7952 = vst.msk [vmem:[#allocation2 + $0x48] sm:$0xff] %vm7942_vm4, %v7913_v15  ;;  %v13232_v15 = vld [vmem:[%s13796_s12 + $0x38] sm:$0xff] }
 0xc57   : > { %v4521_v39 = vpop.permute.xlu0 %4520  ;;  %v7961_v57 = vld [vmem:[#allocation2 + $0x10] sm:$0xff] }
 0xc58   : > { %4559 = vst.msk [vmem:[#allocation2 + $0x50] sm:$0xff] %vm4548_vm2, %v4521_v39  ;;  %12480 = vmatprep.mubr.f32.mxu0 %v7961_v57 }
 0xc59   : > { %v4523_v55 = vpop.permute.xlu1 %4522  ;;  %12481 = vmatmul.mubr.f32.gmra.mxu0 %v7962_v24 }
 0xc5a   : > { %4560 = vst.msk [vmem:[#allocation2 + $0x58] sm:$0xff] %vm4548_vm2, %v4523_v55  ;;  %12483 = vmatprep.mubr.f32.mxu0 %v7963_v59  ;;  %v13233_v55 = vld [vmem:[%s13796_s12 + $0x30] sm:$0xff] }
 0xc5b   : > { %v7911_v29 = vpop.permute.xlu0 %7910 }
 0xc5c   : > { %7951 = vst.msk [vmem:[#allocation2 + $0x40] sm:$0xff] %vm7942_vm4, %v7911_v29 }
 0xc5d   : > { %v7909_v40 = vpop.permute.xlu1 %7908  ;;  %12484 = vmatmul.mubr.f32.gmra.mxu0 %v7964_v5  ;;  %v7968_v36 = vld [vmem:[#allocation2 + $0x48] sm:$0xff] }
 0xc5e   : > { %7950 = vst.msk [vmem:[#allocation2 + $0x38] sm:$0xff] %vm7942_vm4, %v7909_v40  ;;  %v13234_v40 = vld [vmem:[%s13796_s12 + $0x48] sm:$0xff] }
 0xc5f   : > { %v7907_v63 = vpop.permute.xlu0 %7906 }
 0xc60   : > { %7949 = vst.msk [vmem:[#allocation2 + $0x30] sm:$0xff] %vm7942_vm4, %v7907_v63 }
 0xc61   : > { %v6220_v17 = vpop.permute.xlu1 %6219 }
 0xc62   : > { %6257 = vst.msk [vmem:[#allocation2 + $0x58] sm:$0xff] %vm6245_vm3, %v6220_v17 }
 0xc63   : > { %v6218_v6 = vpop.permute.xlu0 %6217  ;;  %v7967_v34 = vld [vmem:[#allocation2 + $0x40] sm:$0xff] }
 0xc64   : > { %6256 = vst.msk [vmem:[#allocation2 + $0x50] sm:$0xff] %vm6245_vm3, %v6218_v6  ;;  %v13235_v6 = vld [vmem:[%s13796_s12 + $0x40] sm:$0xff] }
 0xc65   : > { %v4527_v2 = vpop.permute.xlu1 %4526  ;;  %v7966_v41 = vld [vmem:[#allocation2 + $0x38] sm:$0xff] }
 0xc66   : > { %4562 = vst.msk [vmem:[#allocation2 + $0x68] sm:$0xff] %vm4548_vm2, %v4527_v2 }
 0xc67   : > { %v4525_v7 = vpop.permute.xlu0 %4524  ;;  %v7965_v61 = vld [vmem:[#allocation2 + $0x30] sm:$0xff] }
 0xc68   : > { %4561 = vst.msk [vmem:[#allocation2 + $0x60] sm:$0xff] %vm4548_vm2, %v4525_v7  ;;  %12486 = vmatprep.mubr.f32.mxu0 %v7965_v61 }
 0xc69   : > { %v6224_v43 = vpop.permute.xlu1 %6223  ;;  %12487 = vmatmul.mubr.f32.gmra.mxu0 %v7966_v41 }
 0xc6a   : > { %6259 = vst.msk [vmem:[#allocation2 + $0x68] sm:$0xff] %vm6245_vm3, %v6224_v43  ;;  %12489 = vmatprep.mubr.f32.mxu0 %v7967_v34  ;;  %v13236_v43 = vld [vmem:[%s13796_s12 + $0x58] sm:$0xff] }
 0xc6b   : > { %v6222_v19 = vpop.permute.xlu0 %6221 }
 0xc6c   : > { %6258 = vst.msk [vmem:[#allocation2 + $0x60] sm:$0xff] %vm6245_vm3, %v6222_v19 }
 0xc6d   : > { %v7917_v32 = vpop.permute.xlu1 %7916  ;;  %12490 = vmatmul.mubr.f32.gmra.mxu0 %v7968_v36 }
 0xc6e   : > { %7954 = vst.msk [vmem:[#allocation2 + $0x58] sm:$0xff] %vm7942_vm4, %v7917_v32  ;;  %v13237_v32 = vld [vmem:[%s13796_s12 + $0x50] sm:$0xff] }
 0xc6f   : > { %v7915_v3 = vpop.permute.xlu0 %7914 }
 0xc70   : > { %7953 = vst.msk [vmem:[#allocation2 + $0x50] sm:$0xff] %vm7942_vm4, %v7915_v3 }
 0xc71   : > { %v7921_v25 = vpop.permute.xlu1 %7920 }
 0xc72   : > { %7956 = vst.msk [vmem:[#allocation2 + $0x68] sm:$0xff] %vm7942_vm4, %v7921_v25 }
 0xc73   : > { %v7919_v27 = vpop.permute.xlu0 %7918 }
 0xc74   : > { %7955 = vst.msk [vmem:[#allocation2 + $0x60] sm:$0xff] %vm7942_vm4, %v7919_v27 }
 0xc75   : > { %v4531_v13 = vpop.permute.xlu1 %4530  ;;  %v7970_v52 = vld [vmem:[#allocation2 + $0x58] sm:$0xff] }
 0xc76   : > { %4564 = vst.msk [vmem:[#allocation2 + $0x78] sm:$0xff] %vm4548_vm2, %v4531_v13  ;;  %v13238_v13 = vld [vmem:[%s13796_s12 + $0x68] sm:$0xff] }
 0xc77   : > { %v4529_v30 = vpop.permute.xlu0 %4528  ;;  %v7969_v18 = vld [vmem:[#allocation2 + $0x50] sm:$0xff] }
 0xc78   : > { %4563 = vst.msk [vmem:[#allocation2 + $0x70] sm:$0xff] %vm4548_vm2, %v4529_v30  ;;  %12492 = vmatprep.mubr.f32.mxu0 %v7969_v18 }
 0xc79   : > { %v6228_v0 = vpop.permute.xlu1 %6227  ;;  %12493 = vmatmul.mubr.f32.gmra.mxu0 %v7970_v52  ;;  %v7972_v10 = vld [vmem:[#allocation2 + $0x68] sm:$0xff]  ;;  %v13239_v52 = vld [vmem:[%s13796_s12 + $0x60] sm:$0xff] }
 0xc7a   : > { %6261 = vst.msk [vmem:[#allocation2 + $0x78] sm:$0xff] %vm6245_vm3, %v6228_v0 }
 0xc7b   : > { %v6226_v53 = vpop.permute.xlu0 %6225  ;;  %v7971_v48 = vld [vmem:[#allocation2 + $0x60] sm:$0xff] }
 0xc7c   : > { %6260 = vst.msk [vmem:[#allocation2 + $0x70] sm:$0xff] %vm6245_vm3, %v6226_v53  ;;  %12495 = vmatprep.mubr.f32.mxu0 %v7971_v48 }
 0xc7d   : > { %12496 = vmatmul.mubr.f32.gmra.mxu0 %v7972_v10 }
 0xc95   : > { %v7925_v58 = vpop.permute.xlu1 %7924 }
 0xc96   : > { %7958 = vst.msk [vmem:[#allocation2 + $0x78] sm:$0xff] %vm7942_vm4, %v7925_v58  ;;  %v13240_v58 = vld [vmem:[%s13796_s12 + $0x78] sm:$0xff] }
 0xc97   : > { %v7923_v38 = vpop.permute.xlu0 %7922 }
 0xc98   : > { %7957 = vst.msk [vmem:[#allocation2 + $0x70] sm:$0xff] %vm7942_vm4, %v7923_v38 }
 0xc9d   : > { %v7974_v35 = vld [vmem:[#allocation2 + $0x78] sm:$0xff] }
 0xc9f   : > { %v7973_v49 = vld [vmem:[#allocation2 + $0x70] sm:$0xff] }
 0xca0   : > { %12498 = vmatprep.mubr.f32.mxu0 %v7973_v49 }
 0xca1   : > { %12499 = vmatmul.mubr.f32.gmra.mxu0 %v7974_v35  ;;  %v13241_v35 = vld [vmem:[%s13796_s12 + $0x70] sm:$0xff] }
 0xd04   : > { %v12479_v60 = vpop.f32.mrf.mxu0 }
 0xd05   : > { %v8070_v9 = vadd.f32 %v12479_v60, %v15897_v42 }
 0xd06   : > { %v8064_v14 = vpop.f32.mrf.mxu0 }
 0xd07   : > { %v15901_v31 = vadd.f32 %v13226_v23, %v8070_v9  ;;  %v8065_v44 = vadd.f32 %v15897_v42, %v8064_v14  ;;  %v8442_v9 = vld [vmem:[#allocation12 + $0x1e8] sm:$0xff]  ;;  %v8444_v14 = vld [vmem:[#allocation12 + $0x1f8] sm:$0xff]  ;;  %v8441_v23 = vld [vmem:[#allocation12 + $0x1e0] sm:$0xff] }
 0xd08   : > { %8467 = vmatprep.subr.mxu1 %v8442_v9  ;;  %8628 = vmatprep.subr.mxu0 %v8444_v14  ;;  %v8412_v14 = vld [vmem:[#allocation12 + $0xf8] sm:$0xff] }
 0xd09   : > { %18378 = vst [vmem:[#allocation64_spill] sm:$0xff] %v15901_v31  ;;  %v15905_v8 = vadd.f32 %v13227_v33, %v8065_v44  ;;  %8163 = vadd.xlane.f32.xlu1 %v15901_v31  ;;  %v8443_v44 = vld [vmem:[#allocation12 + $0x1f0] sm:$0xff]  ;;  %v8438_v33 = vld [vmem:[#allocation12 + $0x1c8] sm:$0xff]  ;;  %8468 = vmatpush1.msra.mxu1 %v8441_v23  ;;  %v8409_v23 = vld [vmem:[#allocation12 + $0xe0] sm:$0xff] }
 0xd0a   : > { %8629 = vmatpush1.msra.mxu0 %v8443_v44  ;;  %8469 = vmatprep.subr.mxu1 %v8438_v33  ;;  %v8411_v44 = vld [vmem:[#allocation12 + $0xf0] sm:$0xff]  ;;  %v8406_v33 = vld [vmem:[#allocation12 + $0xc8] sm:$0xff] }
 0xd0b   : > { %18379 = vst [vmem:[#allocation61_spill] sm:$0xff] %v15905_v8  ;;  %8161 = vadd.xlane.f32.xlu0 %v15905_v8 }
 0xd19   : > { %v12482_v47 = vpop.f32.mrf.mxu0 }
 0xd1a   : > { %v8080_v22 = vadd.f32 %v12482_v47, %v15897_v42  ;;  %v8440_v47 = vld [vmem:[#allocation12 + $0x1d8] sm:$0xff] }
 0xd1b   : > { %v8074_v46 = vpop.f32.mrf.mxu0  ;;  %8630 = vmatprep.subr.mxu0 %v8440_v47 }
 0xd1c   : > { %v8075_v26 = vadd.f32 %v15897_v42, %v8074_v46  ;;  %v15920_v37 = vadd.f32 %v13230_v1, %v8080_v22  ;;  %v8437_v46 = vld [vmem:[#allocation12 + $0x1c0] sm:$0xff] }
 0xd1d   : > { %v12485_v12 = vpop.f32.mrf.mxu0  ;;  %v8433_v22 = vld [vmem:[#allocation12 + $0x1a0] sm:$0xff]  ;;  %8470 = vmatpush1.msra.mxu1 %v8437_v46  ;;  %v8408_v46 = vld [vmem:[#allocation12 + $0xd8] sm:$0xff] }
 0xd1e   : > { %v15912_v20 = vadd.f32 %v13228_v11, %v8075_v26  ;;  %v8090_v28 = vadd.f32 %v12485_v12, %v15897_v42  ;;  %18382 = vst [vmem:[#allocation26_spill] sm:$0xff] %v15920_v37  ;;  %v8439_v26 = vld [vmem:[#allocation12 + $0x1d0] sm:$0xff]  ;;  %v8436_v12 = vld [vmem:[#allocation12 + $0x1b8] sm:$0xff] }
 0xd1f   : > { %v8084_v50 = vpop.f32.mrf.mxu0  ;;  %v8435_v11 = vld [vmem:[#allocation12 + $0x1b0] sm:$0xff]  ;;  %8631 = vmatpush1.msra.mxu0 %v8439_v26  ;;  %v8405_v26 = vld [vmem:[#allocation12 + $0xc0] sm:$0xff] }
 0xd20   : > { %18380 = vst [vmem:[#allocation24_spill] sm:$0xff] %v15912_v20  ;;  %v15916_v4 = vadd.f32 %v13229_v51, %v8090_v28  ;;  %8165 = vadd.xlane.f32.xlu0 %v15912_v20  ;;  %v8085_v54 = vadd.f32 %v15897_v42, %v8084_v50  ;;  %8632 = vmatprep.subr.mxu0 %v8436_v12  ;;  %v8407_v12 = vld [vmem:[#allocation12 + $0xd0] sm:$0xff] }
 0xd21   : > { %8633 = vmatpush1.msra.mxu0 %v8435_v11 }
 0xd22   : > { %18381 = vst [vmem:[#allocation27_spill] sm:$0xff] %v15916_v4  ;;  %8171 = vadd.xlane.f32.xlu1 %v15916_v4  ;;  %v15926_v56 = vadd.f32 %v13231_v16, %v8085_v54 }
 0xd24   : > { %8167 = vadd.xlane.f32.xlu0 %v15920_v37  ;;  %18383 = vst [vmem:[#allocation31_spill] sm:$0xff] %v15926_v56 }
 0xd28   : > { %8169 = vadd.xlane.f32.xlu0 %v15926_v56 }
 0xd29   : > { %v12488_v45 = vpop.f32.mrf.mxu0 }
 0xd2a   : > { %v8100_v21 = vadd.f32 %v12488_v45, %v15897_v42 }
 0xd2b   : > { %v8094_v62 = vpop.f32.mrf.mxu0 }
 0xd2c   : > { %v15931_v39 = vadd.f32 %v13232_v15, %v8100_v21  ;;  %v8095_v57 = vadd.f32 %v15897_v42, %v8094_v62  ;;  %v8430_v62 = vld [vmem:[#allocation12 + $0x188] sm:$0xff]  ;;  %v8432_v15 = vld [vmem:[#allocation12 + $0x198] sm:$0xff] }
 0xd2d   : > { %v12491_v24 = vpop.f32.mrf.mxu0  ;;  %8634 = vmatprep.subr.mxu0 %v8432_v15  ;;  %v8400_v15 = vld [vmem:[#allocation12 + $0x98] sm:$0xff] }
 0xd2e   : > { %18384 = vst [vmem:[#allocation28_spill] sm:$0xff] %v15931_v39  ;;  %v15935_v59 = vadd.f32 %v13233_v55, %v8095_v57  ;;  %v8110_v29 = vadd.f32 %v12491_v24, %v15897_v42  ;;  %8175 = vadd.xlane.f32.xlu1 %v15931_v39  ;;  %v8429_v57 = vld [vmem:[#allocation12 + $0x180] sm:$0xff]  ;;  %v8431_v24 = vld [vmem:[#allocation12 + $0x190] sm:$0xff]  ;;  %v8426_v55 = vld [vmem:[#allocation12 + $0x168] sm:$0xff] }
 0xd2f   : > { %v8104_v5 = vpop.f32.mrf.mxu0  ;;  %8635 = vmatpush1.msra.mxu0 %v8431_v24 }
 0xd30   : > { %18385 = vst [vmem:[#allocation29_spill] sm:$0xff] %v15935_v59  ;;  %v15940_v63 = vadd.f32 %v13234_v40, %v8110_v29  ;;  %v8105_v17 = vadd.f32 %v15897_v42, %v8104_v5  ;;  %8173 = vadd.xlane.f32.xlu0 %v15935_v59  ;;  %v8428_v29 = vld [vmem:[#allocation12 + $0x178] sm:$0xff]  ;;  %v8425_v5 = vld [vmem:[#allocation12 + $0x160] sm:$0xff]  ;;  %v8427_v40 = vld [vmem:[#allocation12 + $0x170] sm:$0xff] }
 0xd31   : > { %8636 = vmatprep.subr.mxu0 %v8428_v29  ;;  %v8399_v29 = vld [vmem:[#allocation12 + $0x90] sm:$0xff] }
 0xd32   : > { %18386 = vst [vmem:[#allocation35_spill] sm:$0xff] %v15940_v63  ;;  %v15945_v2 = vadd.f32 %v13235_v6, %v8105_v17  ;;  %8179 = vadd.xlane.f32.xlu1 %v15940_v63  ;;  %8637 = vmatpush1.msra.mxu0 %v8427_v40  ;;  %v8422_v6 = vld [vmem:[#allocation12 + $0x148] sm:$0xff] }
 0xd33   : > { %v8394_v40 = vld [vmem:[#allocation12 + $0x68] sm:$0xff] }
 0xd34   : > { %18387 = vst [vmem:[#allocation30_spill] sm:$0xff] %v15945_v2  ;;  %8177 = vadd.xlane.f32.xlu0 %v15945_v2 }
 0xd39   : > { %v12494_v7 = vpop.f32.mrf.mxu0 }
 0xd3a   : > { %v8120_v61 = vadd.f32 %v12494_v7, %v15897_v42  ;;  %v8424_v7 = vld [vmem:[#allocation12 + $0x158] sm:$0xff] }
 0xd3b   : > { %v8114_v41 = vpop.f32.mrf.mxu0  ;;  %8638 = vmatprep.subr.mxu0 %v8424_v7  ;;  %v8393_v7 = vld [vmem:[#allocation12 + $0x60] sm:$0xff] }
 0xd3c   : > { %v15951_v34 = vadd.f32 %v13236_v43, %v8120_v61  ;;  %v8115_v19 = vadd.f32 %v15897_v42, %v8114_v41  ;;  %v8421_v61 = vld [vmem:[#allocation12 + $0x140] sm:$0xff]  ;;  %v8423_v43 = vld [vmem:[#allocation12 + $0x150] sm:$0xff] }
 0xd3d   : > { %v12497_v36 = vpop.f32.mrf.mxu0  ;;  %8639 = vmatpush1.msra.mxu0 %v8423_v43  ;;  %v8390_v43 = vld [vmem:[#allocation12 + $0x48] sm:$0xff] }
 0xd3e   : > { %18388 = vst [vmem:[#allocation32_spill] sm:$0xff] %v15951_v34  ;;  %v15955_v3 = vadd.f32 %v13237_v32, %v8115_v19  ;;  %v8130_v25 = vadd.f32 %v12497_v36, %v15897_v42  ;;  %8183 = vadd.xlane.f32.xlu1 %v15951_v34  ;;  %v8418_v19 = vld [vmem:[#allocation12 + $0x128] sm:$0xff]  ;;  %v8420_v36 = vld [vmem:[#allocation12 + $0x138] sm:$0xff] }
 0xd3f   : > { %v8124_v27 = vpop.f32.mrf.mxu0  ;;  %8640 = vmatprep.subr.mxu0 %v8420_v36 }
 0xd40   : > { %18389 = vst [vmem:[#allocation33_spill] sm:$0xff] %v15955_v3  ;;  %v15960_v30 = vadd.f32 %v13238_v13, %v8130_v25  ;;  %v8125_v18 = vadd.f32 %v15897_v42, %v8124_v27  ;;  %8181 = vadd.xlane.f32.xlu0 %v15955_v3  ;;  %v8417_v25 = vld [vmem:[#allocation12 + $0x120] sm:$0xff]  ;;  %v8419_v27 = vld [vmem:[#allocation12 + $0x130] sm:$0xff]  ;;  %v8414_v13 = vld [vmem:[#allocation12 + $0x108] sm:$0xff] }
 0xd41   : > { %8641 = vmatpush1.msra.mxu0 %v8419_v27  ;;  %v8391_v27 = vld [vmem:[#allocation12 + $0x50] sm:$0xff] }
 0xd42   : > { %18390 = vst [vmem:[#allocation37_spill] sm:$0xff] %v15960_v30  ;;  %v15965_v0 = vadd.f32 %v13239_v52, %v8125_v18  ;;  %8187 = vadd.xlane.f32.xlu1 %v15960_v30  ;;  %v8416_v52 = vld [vmem:[#allocation12 + $0x118] sm:$0xff] }
 0xd43   : > { %8642 = vmatprep.subr.mxu0 %v8416_v52  ;;  %v8386_v52 = vld [vmem:[#allocation12 + $0x28] sm:$0xff] }
 0xd44   : > { %18391 = vst [vmem:[#allocation34_spill] sm:$0xff] %v15965_v0  ;;  %8185 = vadd.xlane.f32.xlu0 %v15965_v0 }
 0xd61   : > { %v12500_v53 = vpop.f32.mrf.mxu0 }
 0xd62   : > { %v8140_v48 = vadd.f32 %v12500_v53, %v15897_v42  ;;  %v8413_v53 = vld [vmem:[#allocation12 + $0x100] sm:$0xff] }
 0xd63   : > { %v8134_v10 = vpop.f32.mrf.mxu0 }
 0xd64   : > { %v15971_v38 = vadd.f32 %v13240_v58, %v8140_v48  ;;  %v8135_v49 = vadd.f32 %v15897_v42, %v8134_v10  ;;  %v8434_v42 = vld [vmem:[#allocation12 + $0x1a8] sm:$0xff]  ;;  %v8415_v48 = vld [vmem:[#allocation12 + $0x110] sm:$0xff] }
 0xd65   : > { %8471 = vmatprep.subr.mxu1 %v8434_v42  ;;  %v8410_v58 = vld [vmem:[#allocation12 + $0xe8] sm:$0xff]  ;;  %8643 = vmatpush1.msra.mxu0 %v8415_v48 }
 0xd66   : > { %18392 = vst [vmem:[#allocation36_spill] sm:$0xff] %v15971_v38  ;;  %v15975_v60 = vadd.f32 %v13241_v35, %v8135_v49  ;;  %8191 = vadd.xlane.f32.xlu1 %v15971_v38  ;;  %8472 = vmatpush1.msra.mxu1 %v8433_v22 }
 0xd67   : > { %8473 = vmatprep.subr.mxu1 %v8430_v62  ;;  %8644 = vmatprep.subr.mxu0 %v8412_v14  ;;  %v8398_v62 = vld [vmem:[#allocation12 + $0x88] sm:$0xff] }
 0xd68   : > { %18393 = vst [vmem:[#allocation39_spill] sm:$0xff] %v15975_v60  ;;  %8189 = vadd.xlane.f32.xlu0 %v15975_v60  ;;  %8474 = vmatpush1.msra.mxu1 %v8429_v57 }
 0xd69   : > { %8475 = vmatprep.subr.mxu1 %v8426_v55  ;;  %8645 = vmatpush1.msra.mxu0 %v8411_v44  ;;  %v8397_v55 = vld [vmem:[#allocation12 + $0x80] sm:$0xff] }
 0xd6a   : > { %8476 = vmatpush1.msra.mxu1 %v8425_v5  ;;  %8646 = vmatprep.subr.mxu0 %v8408_v46  ;;  %v8384_v46 = vld [vmem:[#allocation12 + $0x18] sm:$0xff] }
 0xd6b   : > { %8477 = vmatprep.subr.mxu1 %v8422_v6  ;;  %8647 = vmatpush1.msra.mxu0 %v8407_v12 }
 0xd6c   : > { %8478 = vmatpush1.msra.mxu1 %v8421_v61  ;;  %v8395_v61 = vld [vmem:[#allocation12 + $0x70] sm:$0xff] }
 0xd6d   : > { %8479 = vmatprep.subr.mxu1 %v8418_v19  ;;  %v8392_v19 = vld [vmem:[#allocation12 + $0x58] sm:$0xff] }
 0xd6e   : > { %8480 = vmatpush1.msra.mxu1 %v8417_v25  ;;  %v8389_v25 = vld [vmem:[#allocation12 + $0x40] sm:$0xff] }
 0xd6f   : > { %8481 = vmatprep.subr.mxu1 %v8414_v13 }
 0xd70   : > { %8482 = vmatpush1.msra.mxu1 %v8413_v53 }
 0xd71   : > { %8483 = vmatprep.subr.mxu1 %v8410_v58  ;;  %v8388_v58 = vld [vmem:[#allocation12 + $0x38] sm:$0xff] }
 0xd72   : > { %8484 = vmatpush1.msra.mxu1 %v8409_v23 }
 0xd73   : > { %8485 = vmatprep.subr.mxu1 %v8406_v33  ;;  %v8382_v33 = vld [vmem:[#allocation12 + $0x8] sm:$0xff] }
 0xd74   : > { %8486 = vmatpush1.msra.mxu1 %v8405_v26  ;;  %v8381_v26 = vld [vmem:[#allocation12] sm:$0xff] }
 0xd92   : > { %v8164_v28 = vpop.xlane.xlu1 %8163 }
 0xd93   : > { %v8194_v50 = vmul.f32 0.0078125, %v8164_v28 }
 0xd94   : > { %v8162_v51 = vpop.xlane.xlu0 %8161 }
 0xd95   : > { %v15980_v1 = vsub.f32 %v15901_v31, %v8194_v50  ;;  %v8193_v54 = vmul.f32 0.0078125, %v8162_v51  ;;  %v8402_v50 = vld [vmem:[#allocation12 + $0xa8] sm:$0xff]  ;;  %v8404_v51 = vld [vmem:[#allocation12 + $0xb8] sm:$0xff] }
 0xd96   : > { %8487 = vmatprep.subr.mxu1 %v8402_v50  ;;  %8648 = vmatprep.subr.mxu0 %v8404_v51  ;;  %v13518_v50 = vmov 0.0  }
 0xd97   : > { %v15983_v16 = vsub.f32 %v15905_v8, %v8193_v54  ;;  %v8226_v45 = vmul.f32 %v15980_v1, %v15980_v1  ;;  %v8401_v54 = vld [vmem:[#allocation12 + $0xa0] sm:$0xff]  ;;  %8531 = vmatprep.mubr.f32.mxu1 %v13518_v50  ;;  %8692 = vmatprep.mubr.f32.mxu0 %v13518_v50 }
 0xd98   : > { %8488 = vmatpush1.msra.mxu1 %v8401_v54 }
 0xd99   : > { %8243 = vadd.xlane.f32.xlu1 %v8226_v45  ;;  %v8225_v21 = vmul.f32 %v15983_v16, %v15983_v16  ;;  %v8403_v45 = vld [vmem:[#allocation12 + $0xb0] sm:$0xff]  ;;  %8489 = vmatprep.subr.mxu1 %v8398_v62 }
 0xd9a   : > { %8649 = vmatpush1.msra.mxu0 %v8403_v45  ;;  %8490 = vmatpush1.msra.mxu1 %v8397_v55 }
 0xd9b   : > { %8241 = vadd.xlane.f32.xlu0 %v8225_v21  ;;  %8650 = vmatprep.subr.mxu0 %v8400_v15 }
 0xd9c   : > { %8651 = vmatpush1.msra.mxu0 %v8399_v29  ;;  %8491 = vmatprep.subr.mxu1 %v8394_v40 }
 0xd9d   : > { %8492 = vmatpush1.msra.mxu1 %v8393_v7 }
 0xd9e   : > { %8493 = vmatprep.subr.mxu1 %v8390_v43 }
 0xd9f   : > { %8494 = vmatpush1.msra.mxu1 %v8389_v25 }
 0xda0   : > { %8495 = vmatprep.subr.mxu1 %v8386_v52 }
 0xda9   : > { %v8166_v17 = vpop.xlane.xlu0 %8165 }
 0xdaa   : > { %v8195_v41 = vmul.f32 0.0078125, %v8166_v17  ;;  %v8396_v17 = vld [vmem:[#allocation12 + $0x78] sm:$0xff] }
 0xdab   : > { %v8172_v32 = vpop.xlane.xlu1 %8171  ;;  %8652 = vmatprep.subr.mxu0 %v8396_v17 }
 0xdac   : > { %v15990_v18 = vsub.f32 %v15912_v20, %v8195_v41  ;;  %v8198_v49 = vmul.f32 0.0078125, %v8172_v32  ;;  %8653 = vmatpush1.msra.mxu0 %v8395_v61 }
 0xdad   : > { %v8168_v10 = vpop.xlane.xlu0 %8167  ;;  %8654 = vmatprep.subr.mxu0 %v8392_v19 }
 0xdae   : > { %v8196_v35 = vmul.f32 0.0078125, %v8168_v10  ;;  %v8227_v9 = vmul.f32 %v15990_v18, %v15990_v18  ;;  %v15998_v22 = vsub.f32 %v15916_v4, %v8198_v49  ;;  %v8385_v49 = vld [vmem:[#allocation12 + $0x20] sm:$0xff]  ;;  %8655 = vmatpush1.msra.mxu0 %v8391_v27 }
 0xdaf   : > { %8656 = vmatprep.subr.mxu0 %v8388_v58  ;;  %8496 = vmatpush1.msra.mxu1 %v8385_v49 }
 0xdb0   : > { %v15995_v47 = vsub.f32 %v15920_v37, %v8196_v35  ;;  %8245 = vadd.xlane.f32.xlu0 %v8227_v9  ;;  %v8230_v57 = vmul.f32 %v15998_v22, %v15998_v22  ;;  %v8387_v9 = vld [vmem:[#allocation12 + $0x30] sm:$0xff]  ;;  %8497 = vmatprep.subr.mxu1 %v8382_v33 }
 0xdb1   : > { %v8170_v42 = vpop.xlane.xlu0 %8169  ;;  %8657 = vmatpush1.msra.mxu0 %v8387_v9  ;;  %8498 = vmatpush1.msra.mxu1 %v8381_v26 }
 0xdb2   : > { %v8197_v11 = vmul.f32 0.0078125, %v8170_v42  ;;  %v8228_v28 = vmul.f32 %v15995_v47, %v15995_v47  ;;  %8658 = vmatprep.subr.mxu0 %v8384_v46 }
 0xdb4   : > { %v16003_v21 = vsub.f32 %v15926_v56, %v8197_v11  ;;  %8247 = vadd.xlane.f32.xlu1 %v8228_v28  ;;  %v8383_v11 = vld [vmem:[#allocation12 + $0x10] sm:$0xff]  ;;  %v10566_v56 = vld [vmem:[#allocation14 + $0x188] sm:$0xff] }
 0xdb5   : > { %8659 = vmatpush1.msra.mxu0 %v8383_v11 }
 0xdb6   : > { %v8229_v24 = vmul.f32 %v16003_v21, %v16003_v21 }
 0xdb7   : > { %v8176_v5 = vpop.xlane.xlu1 %8175 }
 0xdb8   : > { %v8200_v6 = vmul.f32 0.0078125, %v8176_v5  ;;  %8251 = vadd.xlane.f32.xlu1 %v8230_v57  ;;  %8249 = vadd.xlane.f32.xlu0 %v8229_v24 }
 0xdb9   : > { %v8174_v41 = vpop.xlane.xlu0 %8173 }
 0xdba   : > { %v16010_v36 = vsub.f32 %v15931_v39, %v8200_v6  ;;  %v8199_v32 = vmul.f32 0.0078125, %v8174_v41 }
 0xdbb   : > { %v8180_v13 = vpop.xlane.xlu1 %8179 }
 0xdbc   : > { %v16013_v53 = vsub.f32 %v15935_v59, %v8199_v32  ;;  %v8202_v48 = vmul.f32 0.0078125, %v8180_v13  ;;  %v8232_v10 = vmul.f32 %v16010_v36, %v16010_v36  ;;  %v10534_v59 = vld [vmem:[#allocation14 + $0x88] sm:$0xff] }
 0xdbd   : > { %v8178_v35 = vpop.xlane.xlu0 %8177 }
 0xdbe   : > { %v16018_v14 = vsub.f32 %v15940_v63, %v8202_v48  ;;  %v8201_v23 = vmul.f32 0.0078125, %v8178_v35  ;;  %8255 = vadd.xlane.f32.xlu1 %v8232_v10  ;;  %v8231_v44 = vmul.f32 %v16013_v53, %v16013_v53 }
 0xdc0   : > { %v16023_v42 = vsub.f32 %v15945_v2, %v8201_v23  ;;  %8253 = vadd.xlane.f32.xlu0 %v8231_v44  ;;  %v8234_v12 = vmul.f32 %v16018_v14, %v16018_v14 }
 0xdc2   : > { %8259 = vadd.xlane.f32.xlu1 %v8234_v12  ;;  %v8233_v28 = vmul.f32 %v16023_v42, %v16023_v42  ;;  %v16066_v12 = vld [vmem:[%s18024_s8] ss:$0 sm:$0xff] }
 0xdc4   : > { %8257 = vadd.xlane.f32.xlu0 %v8233_v28 }
 0xdc7   : > { %v8184_v51 = vpop.xlane.xlu1 %8183 }
 0xdc8   : > { %v8204_v54 = vmul.f32 0.0078125, %v8184_v51 }
 0xdc9   : > { %v8182_v45 = vpop.xlane.xlu0 %8181 }
 0xdca   : > { %v16032_v62 = vsub.f32 %v15951_v34, %v8204_v54  ;;  %v8203_v15 = vmul.f32 0.0078125, %v8182_v45  ;;  %v16072_v54 = vld [vmem:[%s18025_s9] ss:$0 sm:$0xff]  ;;  %v10520_v34 = vld [vmem:[#allocation14 + $0x18] sm:$0xff] }
 0xdcb   : > { %v8188_v57 = vpop.xlane.xlu1 %8187 }
 0xdcc   : > { %v16035_v24 = vsub.f32 %v15955_v3, %v8203_v15  ;;  %v8206_v55 = vmul.f32 0.0078125, %v8188_v57  ;;  %v8236_v29 = vmul.f32 %v16032_v62, %v16032_v62 }
 0xdcd   : > { %v8186_v5 = vpop.xlane.xlu0 %8185 }
 0xdce   : > { %v16040_v40 = vsub.f32 %v15960_v30, %v8206_v55  ;;  %v8205_v17 = vmul.f32 0.0078125, %v8186_v5  ;;  %8263 = vadd.xlane.f32.xlu1 %v8236_v29  ;;  %v8235_v6 = vmul.f32 %v16035_v24, %v16035_v24 }
 0xdd0   : > { %v16045_v7 = vsub.f32 %v15965_v0, %v8205_v17  ;;  %8261 = vadd.xlane.f32.xlu0 %v8235_v6  ;;  %v8238_v61 = vmul.f32 %v16040_v40, %v16040_v40 }
 0xdd2   : > { %8267 = vadd.xlane.f32.xlu1 %v8238_v61  ;;  %v8237_v41 = vmul.f32 %v16045_v7, %v16045_v7 }
 0xdd4   : > { %8265 = vadd.xlane.f32.xlu0 %v8237_v41 }
 0xdef   : > { %v8192_v43 = vpop.xlane.xlu1 %8191 }
 0xdf0   : > { %v8208_v19 = vmul.f32 0.0078125, %v8192_v43 }
 0xdf1   : > { %v8190_v32 = vpop.xlane.xlu0 %8189 }
 0xdf2   : > { %v16052_v25 = vsub.f32 %v15971_v38, %v8208_v19  ;;  %v8207_v27 = vmul.f32 0.0078125, %v8190_v32 }
 0xdf4   : > { %v16055_v13 = vsub.f32 %v15975_v60, %v8207_v27  ;;  %v8240_v52 = vmul.f32 %v16052_v25, %v16052_v25 }
 0xdf6   : > { %8271 = vadd.xlane.f32.xlu1 %v8240_v52  ;;  %v8239_v48 = vmul.f32 %v16055_v13, %v16055_v13 }
 0xdf8   : > { %8269 = vadd.xlane.f32.xlu0 %v8239_v48 }
 0xe22   : > { %v8244_v10 = vpop.xlane.xlu1 %8243 }
 0xe23   : > { %v8274_v58 = vmul.f32 0.0078125, %v8244_v10 }
 0xe24   : > { %v8242_v49 = vpop.xlane.xlu0 %8241 }
 0xe25   : > { %v8290_v35 = vadd.f32 1e-05, %v8274_v58  ;;  %v8273_v9 = vmul.f32 0.0078125, %v8242_v49 }
 0xe27   : > { %12938 = vrsqrt.f32 %v8290_v35  ;;  %v8289_v23 = vadd.f32 1e-05, %v8273_v9 }
 0xe29   : > { %12940 = vrsqrt.f32 %v8289_v23 }
 0xe34   : > { %v12939_v44 = vpop.eup %12938 }
 0xe35   : > { %v8322_v26 = vmul.f32 %v12939_v44, %v15980_v1 }
 0xe36   : > { %v12941_v33 = vpop.eup %12940 }
 0xe37   : > { %v8321_v46 = vmul.f32 %v12941_v33, %v15983_v16  ;;  %v8344_v16 = vmul.f32 %v16066_v12, %v8322_v26 }
 0xe39   : > { %v8246_v11 = vpop.xlane.xlu0 %8245  ;;  %v8343_v28 = vmul.f32 %v16066_v12, %v8321_v46  ;;  %v8366_v55 = vadd.f32 %v16072_v54, %v8344_v16 }
 0xe3a   : > { %v8275_v51 = vmul.f32 0.0078125, %v8246_v11 }
 0xe3b   : > { %v8365_v45 = vadd.f32 %v16072_v54, %v8343_v28 }
 0xe3c   : > { %v8291_v15 = vadd.f32 1e-05, %v8275_v51 }
 0xe3d   : > { %8532 = vmatmul.mubr.f32.vlgmr.msra.gmra.mxu1 %v8365_v45  ;;  %8693 = vmatmul.mubr.f32.vlgmr.msra.gmra.mxu0 %v8365_v45  ;;  %v8248_v1 = vpop.xlane.xlu1 %8247 }
 0xe3e   : > { %12942 = vrsqrt.f32 %v8291_v15  ;;  %v8276_v57 = vmul.f32 0.0078125, %v8248_v1  ;;  %8537 = vmatprep.mubr.f32.mxu1 %v13518_v50  ;;  %8698 = vmatprep.mubr.f32.mxu0 %v13518_v50 }
 0xe40   : > { %v8292_v29 = vadd.f32 1e-05, %v8276_v57 }
 0xe41   : > { %8538 = vmatmul.mubr.f32.gmra.mxu1 %v8366_v55  ;;  %8699 = vmatmul.mubr.f32.gmra.mxu0 %v8366_v55  ;;  %v8252_v5 = vpop.xlane.xlu1 %8251  ;;  %v8250_v17 = vpop.xlane.xlu0 %8249 }
 0xe42   : > { %12944 = vrsqrt.f32 %v8292_v29  ;;  %v8278_v6 = vmul.f32 0.0078125, %v8252_v5  ;;  %v8277_v61 = vmul.f32 0.0078125, %v8250_v17  ;;  %8543 = vmatprep.mubr.f32.mxu1 %v13518_v50  ;;  %8704 = vmatprep.mubr.f32.mxu0 %v13518_v50 }
 0xe44   : > { %v8294_v41 = vadd.f32 1e-05, %v8278_v6  ;;  %v8293_v43 = vadd.f32 1e-05, %v8277_v61 }
 0xe46   : > { %12946 = vrsqrt.f32 %v8294_v41 }
 0xe47   : > { %12948 = vrsqrt.f32 %v8293_v43  ;;  %v8256_v19 = vpop.xlane.xlu1 %8255 }
 0xe48   : > { %v8280_v32 = vmul.f32 0.0078125, %v8256_v19 }
 0xe49   : > { %v8254_v27 = vpop.xlane.xlu0 %8253 }
 0xe4a   : > { %v8296_v52 = vadd.f32 1e-05, %v8280_v32  ;;  %v8279_v48 = vmul.f32 0.0078125, %v8254_v27 }
 0xe4b   : > { %v12943_v10 = vpop.eup %12942  ;;  %v8260_v58 = vpop.xlane.xlu1 %8259 }
 0xe4c   : > { %v8295_v49 = vadd.f32 1e-05, %v8279_v48  ;;  %v8323_v35 = vmul.f32 %v12943_v10, %v15990_v18  ;;  %12950 = vrsqrt.f32 %v8296_v52  ;;  %v8282_v9 = vmul.f32 0.0078125, %v8260_v58 }
 0xe4d   : > { %v8258_v23 = vpop.xlane.xlu0 %8257 }
 0xe4e   : > { %12952 = vrsqrt.f32 %v8295_v49  ;;  %v8281_v44 = vmul.f32 0.0078125, %v8258_v23  ;;  %v8345_v33 = vmul.f32 %v16066_v12, %v8323_v35  ;;  %v8298_v51 = vadd.f32 1e-05, %v8282_v9 }
 0xe4f   : > { %v12945_v46 = vpop.eup %12944 }
 0xe50   : > { %v8297_v26 = vadd.f32 1e-05, %v8281_v44  ;;  %v8367_v11 = vadd.f32 %v16072_v54, %v8345_v33  ;;  %v8324_v28 = vmul.f32 %v12945_v46, %v15995_v47 }
 0xe52   : > { %12954 = vrsqrt.f32 %v8297_v26  ;;  %8544 = vmatmul.mubr.f32.gmra.mxu1 %v8367_v11  ;;  %8705 = vmatmul.mubr.f32.gmra.mxu0 %v8367_v11  ;;  %v8346_v45 = vmul.f32 %v16066_v12, %v8324_v28 }
 0xe53   : > { %v12947_v18 = vpop.eup %12946  ;;  %8549 = vmatprep.mubr.f32.mxu1 %v13518_v50  ;;  %8710 = vmatprep.mubr.f32.mxu0 %v13518_v50  ;;  %12956 = vrsqrt.f32 %v8298_v51 }
 0xe54   : > { %v12949_v16 = vpop.eup %12948  ;;  %v8368_v15 = vadd.f32 %v16072_v54, %v8346_v45  ;;  %v8326_v57 = vmul.f32 %v12947_v18, %v15998_v22 }
 0xe55   : > { %v8325_v1 = vmul.f32 %v12949_v16, %v16003_v21 }
 0xe56   : > { %8550 = vmatmul.mubr.f32.gmra.mxu1 %v8368_v15  ;;  %8711 = vmatmul.mubr.f32.gmra.mxu0 %v8368_v15  ;;  %v8348_v6 = vmul.f32 %v16066_v12, %v8326_v57 }
 0xe57   : > { %v8264_v47 = vpop.xlane.xlu1 %8263  ;;  %8555 = vmatprep.mubr.f32.mxu1 %v13518_v50  ;;  %8716 = vmatprep.mubr.f32.mxu0 %v13518_v50  ;;  %v8347_v55 = vmul.f32 %v16066_v12, %v8325_v1 }
 0xe58   : > { %v8284_v29 = vmul.f32 0.0078125, %v8264_v47  ;;  %v8370_v48 = vadd.f32 %v16072_v54, %v8348_v6 }
 0xe59   : > { %v8262_v5 = vpop.xlane.xlu0 %8261  ;;  %v8369_v17 = vadd.f32 %v16072_v54, %v8347_v55  ;;  %v12951_v61 = vpop.eup %12950 }
 0xe5a   : > { %v8300_v41 = vadd.f32 1e-05, %v8284_v29  ;;  %v8283_v21 = vmul.f32 0.0078125, %v8262_v5  ;;  %v8328_v10 = vmul.f32 %v12951_v61, %v16010_v36 }
 0xe5b   : > { %v12953_v43 = vpop.eup %12952  ;;  %8556 = vmatmul.mubr.f32.gmra.mxu1 %v8369_v17  ;;  %8717 = vmatmul.mubr.f32.gmra.mxu0 %v8369_v17  ;;  %v8268_v22 = vpop.xlane.xlu1 %8267 }
 0xe5c   : > { %v8299_v19 = vadd.f32 1e-05, %v8283_v21  ;;  %8561 = vmatprep.mubr.f32.mxu1 %v13518_v50  ;;  %8722 = vmatprep.mubr.f32.mxu0 %v13518_v50  ;;  %v8327_v32 = vmul.f32 %v12953_v43, %v16013_v53  ;;  %12958 = vrsqrt.f32 %v8300_v41  ;;  %v8286_v27 = vmul.f32 0.0078125, %v8268_v22 }
 0xe5d   : > { %v8266_v52 = vpop.xlane.xlu0 %8265  ;;  %v8350_v44 = vmul.f32 %v16066_v12, %v8328_v10 }
 0xe5e   : > { %12960 = vrsqrt.f32 %v8299_v19  ;;  %v8285_v58 = vmul.f32 0.0078125, %v8266_v52  ;;  %v8349_v49 = vmul.f32 %v16066_v12, %v8327_v32  ;;  %v8302_v23 = vadd.f32 1e-05, %v8286_v27 }
 0xe5f   : > { %v12955_v35 = vpop.eup %12954  ;;  %8562 = vmatmul.mubr.f32.gmra.mxu1 %v8370_v48  ;;  %8723 = vmatmul.mubr.f32.gmra.mxu0 %v8370_v48  ;;  %v8372_v46 = vadd.f32 %v16072_v54, %v8350_v44  ;;  %v10563_v44 = vld [vmem:[#allocation14 + $0x170] sm:$0xff] }
 0xe60   : > { %v8301_v9 = vadd.f32 1e-05, %v8285_v58  ;;  %8567 = vmatprep.mubr.f32.mxu1 %v13518_v50  ;;  %8728 = vmatprep.mubr.f32.mxu0 %v13518_v50  ;;  %v8371_v53 = vadd.f32 %v16072_v54, %v8349_v49  ;;  %v8329_v33 = vmul.f32 %v12955_v35, %v16023_v42  ;;  %v12957_v36 = vpop.eup %12956  ;;  %v10548_v35 = vld [vmem:[#allocation14 + $0xf8] sm:$0xff] }
 0xe61   : > { %v8330_v11 = vmul.f32 %v12957_v36, %v16018_v14  ;;  %11669 = vmatprep.subr.mxu1 %v10548_v35  ;;  %v10562_v36 = vld [vmem:[#allocation14 + $0x168] sm:$0xff] }
 0xe62   : > { %12962 = vrsqrt.f32 %v8301_v9  ;;  %v8351_v26 = vmul.f32 %v16066_v12, %v8329_v33  ;;  %v10564_v9 = vld [vmem:[#allocation14 + $0x178] sm:$0xff]  ;;  %v10530_v33 = vld [vmem:[#allocation14 + $0x68] sm:$0xff] }
 0xe63   : > { %8568 = vmatmul.mubr.f32.gmra.mxu1 %v8371_v53  ;;  %8729 = vmatmul.mubr.f32.gmra.mxu0 %v8371_v53  ;;  %12964 = vrsqrt.f32 %v8302_v23  ;;  %v8352_v28 = vmul.f32 %v16066_v12, %v8330_v11  ;;  %v10547_v53 = vld [vmem:[#allocation14 + $0xf0] sm:$0xff]  ;;  %v10529_v11 = vld [vmem:[#allocation14 + $0x60] sm:$0xff] }
 0xe64   : > { %8573 = vmatprep.mubr.f32.mxu1 %v13518_v50  ;;  %8734 = vmatprep.mubr.f32.mxu0 %v13518_v50  ;;  %v8373_v42 = vadd.f32 %v16072_v54, %v8351_v26  ;;  %v10531_v23 = vld [vmem:[#allocation14 + $0x70] sm:$0xff]  ;;  %v10577_v26 = vld [vmem:[#allocation14 + $0x1e0] sm:$0xff] }
 0xe65   : > { %v8374_v18 = vadd.f32 %v16072_v54, %v8352_v28  ;;  %v10544_v28 = vld [vmem:[#allocation14 + $0xd8] sm:$0xff] }
 0xe67   : > { %8574 = vmatmul.mubr.f32.gmra.mxu1 %v8372_v46  ;;  %8735 = vmatmul.mubr.f32.gmra.mxu0 %v8372_v46  ;;  %v10545_v46 = vld [vmem:[#allocation14 + $0xe0] sm:$0xff] }
 0xe68   : > { %8579 = vmatprep.mubr.f32.mxu1 %v13518_v50  ;;  %8740 = vmatprep.mubr.f32.mxu0 %v13518_v50 }
 0xe69   : > { %v12959_v51 = vpop.eup %12958 }
 0xe6a   : > { %v8332_v16 = vmul.f32 %v12959_v51, %v16032_v62  ;;  %v10576_v51 = vld [vmem:[#allocation14 + $0x1d8] sm:$0xff] }
 0xe6b   : > { %v12961_v45 = vpop.eup %12960  ;;  %8580 = vmatmul.mubr.f32.gmra.mxu1 %v8373_v42  ;;  %8741 = vmatmul.mubr.f32.gmra.mxu0 %v8373_v42  ;;  %v10561_v42 = vld [vmem:[#allocation14 + $0x160] sm:$0xff] }
 0xe6c   : > { %8585 = vmatprep.mubr.f32.mxu1 %v13518_v50  ;;  %8746 = vmatprep.mubr.f32.mxu0 %v13518_v50  ;;  %v8331_v14 = vmul.f32 %v12961_v45, %v16035_v24  ;;  %v8354_v47 = vmul.f32 %v16066_v12, %v8332_v16  ;;  %v10528_v45 = vld [vmem:[#allocation14 + $0x58] sm:$0xff]  ;;  %v10575_v16 = vld [vmem:[#allocation14 + $0x1d0] sm:$0xff] }
 0xe6e   : > { %v8353_v15 = vmul.f32 %v16066_v12, %v8331_v14  ;;  %v8376_v62 = vadd.f32 %v16072_v54, %v8354_v47  ;;  %v10560_v14 = vld [vmem:[#allocation14 + $0x158] sm:$0xff]  ;;  %v10574_v47 = vld [vmem:[#allocation14 + $0x1c8] sm:$0xff] }
 0xe6f   : > { %v12963_v1 = vpop.eup %12962  ;;  %8586 = vmatmul.mubr.f32.gmra.mxu1 %v8374_v18  ;;  %8747 = vmatmul.mubr.f32.gmra.mxu0 %v8374_v18  ;;  %v10543_v18 = vld [vmem:[#allocation14 + $0xd0] sm:$0xff] }
 0xe70   : > { %8591 = vmatprep.mubr.f32.mxu1 %v13518_v50  ;;  %8752 = vmatprep.mubr.f32.mxu0 %v13518_v50  ;;  %v8375_v57 = vadd.f32 %v16072_v54, %v8353_v15  ;;  %v8333_v55 = vmul.f32 %v12963_v1, %v16045_v7  ;;  %v12965_v24 = vpop.eup %12964  ;;  %v10527_v15 = vld [vmem:[#allocation14 + $0x50] sm:$0xff] }
 0xe71   : > { %v8334_v5 = vmul.f32 %v12965_v24, %v16040_v40  ;;  %v10559_v1 = vld [vmem:[#allocation14 + $0x150] sm:$0xff]  ;;  %v10558_v24 = vld [vmem:[#allocation14 + $0x148] sm:$0xff] }
 0xe72   : > { %v8355_v29 = vmul.f32 %v16066_v12, %v8333_v55  ;;  %v10526_v55 = vld [vmem:[#allocation14 + $0x48] sm:$0xff] }
 0xe73   : > { %8592 = vmatmul.mubr.f32.gmra.mxu1 %v8375_v57  ;;  %8753 = vmatmul.mubr.f32.gmra.mxu0 %v8375_v57  ;;  %v8356_v17 = vmul.f32 %v16066_v12, %v8334_v5  ;;  %v10542_v57 = vld [vmem:[#allocation14 + $0xc8] sm:$0xff]  ;;  %v8447_v5 = vlaneseq }
 0xe74   : > { %8597 = vmatprep.mubr.f32.mxu1 %v13518_v50  ;;  %8758 = vmatprep.mubr.f32.mxu0 %v13518_v50  ;;  %v8377_v7 = vadd.f32 %v16072_v54, %v8355_v29  ;;  %v10573_v29 = vld [vmem:[#allocation14 + $0x1c0] sm:$0xff] }
 0xe75   : > { %v8378_v6 = vadd.f32 %v16072_v54, %v8356_v17  ;;  %v10525_v17 = vld [vmem:[#allocation14 + $0x40] sm:$0xff] }
 0xe77   : > { %8598 = vmatmul.mubr.f32.gmra.mxu1 %v8376_v62  ;;  %8759 = vmatmul.mubr.f32.gmra.mxu0 %v8376_v62  ;;  %v10541_v62 = vld [vmem:[#allocation14 + $0xc0] sm:$0xff] }
 0xe78   : > { %8603 = vmatprep.mubr.f32.mxu1 %v13518_v50  ;;  %8764 = vmatprep.mubr.f32.mxu0 %v13518_v50 }
 0xe7b   : > { %8604 = vmatmul.mubr.f32.gmra.mxu1 %v8377_v7  ;;  %8765 = vmatmul.mubr.f32.gmra.mxu0 %v8377_v7  ;;  %v16149_v7 = vshrl.u32 %v8447_v5, 7  ;;  %v10522_v5 = vld [vmem:[#allocation14 + $0x28] sm:$0xff] }
 0xe7c   : > { %8609 = vmatprep.mubr.f32.mxu1 %v13518_v50  ;;  %8770 = vmatprep.mubr.f32.mxu0 %v13518_v50 }
 0xe7f   : > { %8610 = vmatmul.mubr.f32.gmra.mxu1 %v8378_v6  ;;  %8771 = vmatmul.mubr.f32.gmra.mxu0 %v8378_v6  ;;  %v8272_v40 = vpop.xlane.xlu1 %8271  ;;  %v10557_v6 = vld [vmem:[#allocation14 + $0x140] sm:$0xff] }
 0xe80   : > { %v8288_v61 = vmul.f32 0.0078125, %v8272_v40  ;;  %8615 = vmatprep.mubr.f32.mxu1 %v13518_v50  ;;  %8776 = vmatprep.mubr.f32.mxu0 %v13518_v50  ;;  %v8449_v40 = vsub.s32 0, %v16149_v7 }
 0xe81   : > { %v8270_v41 = vpop.xlane.xlu0 %8269 }
 0xe82   : > { %v8304_v21 = vadd.f32 1e-05, %v8288_v61  ;;  %v8287_v43 = vmul.f32 0.0078125, %v8270_v41  ;;  %v8457_v61 = vsub.s32 2, %v16149_v7  ;;  %v10540_v41 = vld [vmem:[#allocation14 + $0xb8] sm:$0xff] }
 0xe84   : > { %12966 = vrsqrt.f32 %v8304_v21  ;;  %v8303_v22 = vadd.f32 1e-05, %v8287_v43  ;;  %v10572_v21 = vld [vmem:[#allocation14 + $0x1b8] sm:$0xff]  ;;  %v8445_v43 = vld [vmem:[%s18027_s11] sm:$0xf] }
 0xe86   : > { %12968 = vrsqrt.f32 %v8303_v22  ;;  %v16156_v22 = vrot.slane %v8445_v43, %v8449_v40  ;;  %v10554_v40 = vld [vmem:[#allocation14 + $0x128] sm:$0xff] }
 0xe91   : > { %v12967_v19 = vpop.eup %12966 }
 0xe92   : > { %v8336_v52 = vmul.f32 %v12967_v19, %v16052_v25  ;;  %v10532_v25 = vld [vmem:[#allocation14 + $0x78] sm:$0xff]  ;;  %v16158_v19 = vrot.slane %v8445_v43, %v8457_v61  ;;  %v10537_v61 = vld [vmem:[#allocation14 + $0xa0] sm:$0xff] }
 0xe93   : > { %v12969_v32 = vpop.eup %12968  ;;  %11670 = vmatpush3.msra.mxu1 %v10532_v25  ;;  %v10539_v25 = vld [vmem:[#allocation14 + $0xb0] sm:$0xff] }
 0xe94   : > { %v8335_v27 = vmul.f32 %v12969_v32, %v16055_v13  ;;  %v8358_v58 = vmul.f32 %v16066_v12, %v8336_v52  ;;  %v10580_v13 = vld [vmem:[#allocation14 + $0x1f8] sm:$0xff]  ;;  %11671 = vmatprep.subr.mxu1 %v10547_v53 }
 0xe95   : > { %11749 = vmatprep.subr.mxu0 %v10580_v13  ;;  %11672 = vmatpush3.msra.mxu1 %v10531_v23 }
 0xe96   : > { %v8357_v48 = vmul.f32 %v16066_v12, %v8335_v27  ;;  %v8380_v49 = vadd.f32 %v16072_v54, %v8358_v58  ;;  %11750 = vmatpush3.msra.mxu0 %v10564_v9  ;;  %v10579_v12 = vld [vmem:[#allocation14 + $0x1f0] sm:$0xff]  ;;  %v10556_v58 = vld [vmem:[#allocation14 + $0x138] sm:$0xff] }
 0xe97   : > { %11751 = vmatprep.subr.mxu0 %v10579_v12  ;;  %v10571_v9 = vld [vmem:[#allocation14 + $0x1b0] sm:$0xff] }
 0xe98   : > { %v8379_v10 = vadd.f32 %v16072_v54, %v8357_v48  ;;  %11752 = vmatpush3.msra.mxu0 %v10563_v44  ;;  %v10578_v54 = vld [vmem:[#allocation14 + $0x1e8] sm:$0xff] }
 0xe99   : > { %11753 = vmatprep.subr.mxu0 %v10578_v54 }
 0xe9a   : > { %8616 = vmatmul.mubr.f32.gmra.mxu1 %v8379_v10  ;;  %8777 = vmatmul.mubr.f32.gmra.mxu0 %v8379_v10  ;;  %v10524_v10 = vld [vmem:[#allocation14 + $0x38] sm:$0xff] }
 0xe9b   : > { %8621 = vmatprep.mubr.f32.mxu1 %v13518_v50  ;;  %8782 = vmatprep.mubr.f32.mxu0 %v13518_v50  ;;  %v10546_v50 = vld [vmem:[#allocation14 + $0xe8] sm:$0xff] }
 0xe9c   : > { %11673 = vmatprep.subr.mxu1 %v10546_v50  ;;  %11754 = vmatpush3.msra.mxu0 %v10562_v36 }
 0xe9d   : > { %11674 = vmatpush3.msra.mxu1 %v10530_v33  ;;  %11755 = vmatprep.subr.mxu0 %v10577_v26  ;;  %v10523_v26 = vld [vmem:[#allocation14 + $0x30] sm:$0xff] }
 0xe9e   : > { %8622 = vmatmul.mubr.f32.gmra.mxu1 %v8380_v49  ;;  %8783 = vmatmul.mubr.f32.gmra.mxu0 %v8380_v49 }
 0xe9f   : > { %11675 = vmatprep.subr.mxu1 %v10545_v46  ;;  %11756 = vmatpush3.msra.mxu0 %v10561_v42  ;;  %v10538_v42 = vld [vmem:[#allocation14 + $0xa8] sm:$0xff] }
 0xea0   : > { %11676 = vmatpush3.msra.mxu1 %v10529_v11  ;;  %11757 = vmatprep.subr.mxu0 %v10576_v51  ;;  %v10555_v11 = vld [vmem:[#allocation14 + $0x130] sm:$0xff] }
 0xea1   : > { %11677 = vmatprep.subr.mxu1 %v10544_v28  ;;  %11758 = vmatpush3.msra.mxu0 %v10560_v14  ;;  %v10570_v28 = vld [vmem:[#allocation14 + $0x1a8] sm:$0xff] }
 0xea2   : > { %11678 = vmatpush3.msra.mxu1 %v10528_v45  ;;  %11759 = vmatprep.subr.mxu0 %v10575_v16 }
 0xea3   : > { %11679 = vmatprep.subr.mxu1 %v10543_v18  ;;  %11760 = vmatpush3.msra.mxu0 %v10559_v1  ;;  %v8453_v1 = vsub.s32 1, %v16149_v7 }
 0xea4   : > { %11680 = vmatpush3.msra.mxu1 %v10527_v15  ;;  %11761 = vmatprep.subr.mxu0 %v10574_v47  ;;  %v8461_v47 = vsub.s32 3, %v16149_v7  ;;  %v10569_v7 = vld [vmem:[#allocation14 + $0x1a0] sm:$0xff] }
 0xea5   : > { %11681 = vmatprep.subr.mxu1 %v10542_v57  ;;  %11762 = vmatpush3.msra.mxu0 %v10558_v24 }
 0xea6   : > { %11682 = vmatpush3.msra.mxu1 %v10526_v55  ;;  %11763 = vmatprep.subr.mxu0 %v10573_v29 }
 0xea7   : > { %11683 = vmatprep.subr.mxu1 %v10541_v62  ;;  %11764 = vmatpush3.msra.mxu0 %v10557_v6 }
 0xea8   : > { %11684 = vmatpush3.msra.mxu1 %v10525_v17  ;;  %11765 = vmatprep.subr.mxu0 %v10572_v21  ;;  %v16202_v17 = vrot.slane %v8445_v43, %v8453_v1 }
 0xea9   : > { %11685 = vmatprep.subr.mxu1 %v10540_v41  ;;  %11766 = vmatpush3.msra.mxu0 %v10556_v58  ;;  %v16206_v41 = vrot.slane %v8445_v43, %v8461_v47 }
 0xeaa   : > { %11686 = vmatpush3.msra.mxu1 %v10524_v10  ;;  %11767 = vmatprep.subr.mxu0 %v10571_v9 }
 0xeab   : > { %11687 = vmatprep.subr.mxu1 %v10539_v25  ;;  %11768 = vmatpush3.msra.mxu0 %v10555_v11  ;;  %v10568_v11 = vld [vmem:[#allocation14 + $0x198] sm:$0xff] }
 0xeac   : > { %11688 = vmatpush3.msra.mxu1 %v10523_v26  ;;  %11769 = vmatprep.subr.mxu0 %v10570_v28 }
 0xead   : > { %11689 = vmatprep.subr.mxu1 %v10538_v42  ;;  %11770 = vmatpush3.msra.mxu0 %v10554_v40 }
 0xeae   : > { %11690 = vmatpush3.msra.mxu1 %v10522_v5  ;;  %11771 = vmatprep.subr.mxu0 %v10569_v7 }
 0xeaf   : > { %11691 = vmatprep.subr.mxu1 %v10537_v61 }
 0xefd   : > { %v8533_v32 = vpop.f32.mrf.mxu1  ;;  %v8694_v27 = vpop.f32.mrf.mxu0 }
 0xefe   : > { %v16161_v52 = vadd.f32 %v8533_v32, %v16156_v22  ;;  %v16164_v48 = vadd.f32 %v8694_v27, %v16158_v19 }
 0xeff   : > { %v8535_v13 = vpop.f32.mrf.mxu1  ;;  %v8696_v44 = vpop.f32.mrf.mxu0 }
 0xf00   : > { %v16167_v49 = vmul.f32 0.70710677, %v16161_v52  ;;  %v16170_v35 = vmul.f32 0.70710677, %v16164_v48  ;;  %v8536_v58 = vadd.f32 %v8535_v13, %v16202_v17  ;;  %v8697_v25 = vadd.f32 %v8696_v44, %v16206_v41  ;;  %v10536_v44 = vld [vmem:[#allocation14 + $0x98] sm:$0xff] }
 0xf01   : > { %v8539_v50 = vpop.f32.mrf.mxu1  ;;  %v8700_v46 = vpop.f32.mrf.mxu0 }
 0xf02   : > { %v16173_v53 = vand.u32 2147483647, %v16167_v49  ;;  %v16176_v12 = vand.u32 2147483647, %v16170_v35  ;;  %v16181_v36 = vadd.f32 %v8539_v50, %v16156_v22  ;;  %v16187_v14 = vadd.f32 %v8700_v46, %v16158_v19 }
 0xf03   : > { %v8541_v24 = vpop.f32.mrf.mxu1  ;;  %v16204_v6 = vpop.f32.mrf.mxu0  ;;  %v16227_v26 = vmul.f32 0.70710677, %v8536_v58  ;;  %v16232_v42 = vmul.f32 0.70710677, %v8697_v25  ;;  %v16264_v3 = vmul.f32 0.5, %v8536_v58  ;;  %v16266_v2 = vmul.f32 0.5, %v8697_v25 }
 0xf04   : > { %v8981_v23 = vmul.f32 0.3275911, %v16173_v53  ;;  %v8983_v33 = vmul.f32 0.3275911, %v16176_v12  ;;  %v16184_v45 = vmul.f32 0.70710677, %v16181_v36 }
 0xf05   : > { %v16193_v16 = vmul.f32 0.70710677, %v16187_v14  ;;  %v9815_v40 = vsub.f32 0.0, %v16176_v12  ;;  %v8920_v61 = vand.u32 2147483647, %v16232_v42  ;;  %18395 = vst [vmem:[#allocation43_spill] sm:$0xff] %v16264_v3 }
 0xf06   : > { %v9045_v54 = vadd.f32 1.0, %v8981_v23  ;;  %v9047_v51 = vadd.f32 1.0, %v8983_v33  ;;  %v16190_v18 = vand.u32 2147483647, %v16184_v45  ;;  %v10553_v33 = vld [vmem:[#allocation14 + $0x120] sm:$0xff]  ;;  %18396 = vst [vmem:[#allocation44_spill] sm:$0xff] %v16266_v2 }
 0xf07   : > { %v16198_v57 = vand.u32 2147483647, %v16193_v16  ;;  %11772 = vmatpush3.msra.mxu0 %v10553_v33  ;;  %v8542_v33 = vadd.f32 %v8541_v24, %v16202_v17  ;;  %v9879_v38 = vmul.f32 %v9815_v40, %v16176_v12  ;;  %v9816_v60 = vsub.f32 0.0, %v8920_v61 }
 0xf08   : > { %12970 = vrcp.f32 %v9045_v54  ;;  %v8985_v15 = vmul.f32 0.3275911, %v16190_v18  ;;  %v10521_v54 = vld [vmem:[#allocation14 + $0x20] sm:$0xff]  ;;  %11773 = vmatprep.subr.mxu0 %v10568_v11  ;;  %vm10197_vm5 = vcmp.lt.f32.partialorder %v16167_v49, 0.0  ;;  %vm10199_vm6 = vcmp.lt.f32.partialorder %v16170_v35, 0.0 }
 0xf09   : > { %12972 = vrcp.f32 %v9047_v51  ;;  %v8987_v62 = vmul.f32 0.3275911, %v16198_v57  ;;  %11692 = vmatpush3.msra.mxu1 %v10521_v54  ;;  %v9813_v51 = vsub.f32 0.0, %v16173_v53  ;;  %v9945_v63 = vmul.f32 1.442695, %v9879_v38 }
 0xf0a   : > { %v9049_v55 = vadd.f32 1.0, %v8985_v15  ;;  %11693 = vmatprep.subr.mxu1 %v10536_v44  ;;  %vm10201_vm7 = vcmp.lt.f32.partialorder %v16184_v45, 0.0  ;;  %vm10203_vm8 = vcmp.lt.f32.partialorder %v16193_v16, 0.0 }
 0xf0b   : > { %v9051_v32 = vadd.f32 1.0, %v8987_v62  ;;  %v9877_v7 = vmul.f32 %v9813_v51, %v16173_v53  ;;  %11694 = vmatpush3.msra.mxu1 %v10520_v34 }
 0xf0c   : > { %12974 = vrcp.f32 %v9049_v55  ;;  %v8918_v55 = vand.u32 2147483647, %v16227_v26 }
 0xf0d   : > { %12976 = vrcp.f32 %v9051_v32  ;;  %v9941_v53 = vmul.f32 1.442695, %v9877_v7  ;;  %v10535_v7 = vld [vmem:[#allocation14 + $0x90] sm:$0xff] }
 0xf0e   : > { %v9814_v44 = vsub.f32 0.0, %v8918_v55  ;;  %v8982_v51 = vmul.f32 0.3275911, %v8918_v55  ;;  %11695 = vmatprep.subr.mxu1 %v10535_v7 }
 0xf10   : > { %v9878_v12 = vmul.f32 %v9814_v44, %v8918_v55  ;;  %v9046_v39 = vadd.f32 1.0, %v8982_v51  ;;  %v8703_v55 = vadd.f32 %v16204_v6, %v16206_v41  ;;  %v9819_v6 = vsub.f32 0.0, %v16198_v57 }
 0xf12   : > { %v8545_v29 = vpop.f32.mrf.mxu1  ;;  %v8706_v27 = vpop.f32.mrf.mxu0 }
 0xf13   : > { %v16209_v21 = vadd.f32 %v8545_v29, %v16156_v22  ;;  %v16219_v43 = vadd.f32 %v8706_v27, %v16158_v19 }
 0xf14   : > { %v16247_v27 = vpop.f32.mrf.mxu1  ;;  %v16276_v25 = vpop.f32.mrf.mxu0 }
 0xf15   : > { %v16211_v10 = vpop.eup %12970  ;;  %v16216_v9 = vmul.f32 0.70710677, %v16209_v21  ;;  %v16230_v13 = vmul.f32 0.70710677, %v16219_v43  ;;  %v16334_v8 = vadd.f32 %v16276_v25, %v16206_v41  ;;  %v10565_v25 = vld [vmem:[#allocation14 + $0x180] sm:$0xff] }
 0xf16   : > { %v9237_v23 = vmul.f32 1.0614054, %v16211_v10  ;;  %v16225_v46 = vpop.eup %12972  ;;  %v8551_v30 = vpop.f32.mrf.mxu1 }
 0xf17   : > { %v16223_v50 = vand.u32 2147483647, %v16216_v9  ;;  %v16237_v15 = vand.u32 2147483647, %v16230_v13  ;;  %v9239_v47 = vmul.f32 1.0614054, %v16225_v46 }
 0xf18   : > { %v9301_v1 = vadd.f32 -1.4531521, %v9237_v23  ;;  %vm10205_vm9 = vcmp.lt.f32.partialorder %v16216_v9, 0.0  ;;  %vm10207_vm10 = vcmp.lt.f32.partialorder %v16230_v13, 0.0 }
 0xf19   : > { %v8989_v28 = vmul.f32 0.3275911, %v16223_v50  ;;  %v8991_v29 = vmul.f32 0.3275911, %v16237_v15  ;;  %v16242_v5 = vpop.eup %12974  ;;  %v9303_v54 = vadd.f32 -1.4531521, %v9239_v47 }
 0xf1a   : > { %v9365_v23 = vmul.f32 %v16211_v10, %v9301_v1  ;;  %v9241_v11 = vmul.f32 1.0614054, %v16242_v5  ;;  %v16256_v0 = vpop.eup %12976  ;;  %v16259_v47 = vmul.f32 0.70710677, %v8542_v33 }
 0xf1b   : > { %v9053_v62 = vadd.f32 1.0, %v8989_v28  ;;  %v9055_v32 = vadd.f32 1.0, %v8991_v29  ;;  %v16253_v28 = vmul.f32 0.5, %v16161_v52  ;;  %v8984_v29 = vmul.f32 0.3275911, %v8920_v61 }
 0xf1c   : > { %v9429_v1 = vadd.f32 1.4214138, %v9365_v23  ;;  %v9367_v24 = vmul.f32 %v16225_v46, %v9303_v54  ;;  %18394 = vst [vmem:[#allocation38_spill] sm:$0xff] %v16259_v47  ;;  %v16262_v52 = vmul.f32 0.5, %v16164_v48  ;;  %v9305_v40 = vadd.f32 -1.4531521, %v9241_v11 }
 0xf1d   : > { %12978 = vrcp.f32 %v9053_v62  ;;  %v10552_v62 = vld [vmem:[#allocation14 + $0x118] sm:$0xff]  ;;  %v9880_v23 = vmul.f32 %v9816_v60, %v8920_v61  ;;  %v16269_v54 = vadd.f32 %v8551_v30, %v16156_v22  ;;  %v9048_v48 = vadd.f32 1.0, %v8984_v29 }
 0xf1e   : > { %12980 = vrcp.f32 %v9055_v32  ;;  %11774 = vmatpush3.msra.mxu0 %v10552_v62  ;;  %v10567_v32 = vld [vmem:[#allocation14 + $0x190] sm:$0xff]  ;;  %v9243_v58 = vmul.f32 1.0614054, %v16256_v0  ;;  %v9493_v34 = vmul.f32 %v16211_v10, %v9429_v1  ;;  %v9431_v44 = vadd.f32 1.4214138, %v9367_v24 }
 0xf1f   : > { %11775 = vmatprep.subr.mxu0 %v10567_v32  ;;  %12982 = vpow2.f32 %v9941_v53  ;;  %v8922_v38 = vand.u32 2147483647, %v16259_v47  ;;  %v9943_v60 = vmul.f32 1.442695, %v9878_v12  ;;  %v16279_v30 = vmul.f32 0.5, %v16181_v36 }
 0xf20   : > { %v9369_v61 = vmul.f32 %v16242_v5, %v9305_v40  ;;  %v9817_v11 = vsub.f32 0.0, %v16190_v18  ;;  %12984 = vpow2.f32 %v9945_v63  ;;  %v9947_v51 = vmul.f32 1.442695, %v9880_v23  ;;  %v8712_v63 = vpop.f32.mrf.mxu0 }
 0xf21   : > { %v16285_v29 = vmul.f32 0.70710677, %v16269_v54  ;;  %12986 = vrcp.f32 %v9046_v39  ;;  %v16288_v53 = vmul.f32 0.5, %v16187_v14  ;;  %v9307_v1 = vadd.f32 -1.4531521, %v9243_v58  ;;  %v10519_v39 = vld [vmem:[#allocation14 + $0x10] sm:$0xff] }
 0xf22   : > { %v16290_v24 = vmul.f32 0.70710677, %v8703_v55  ;;  %v9557_v36 = vadd.f32 -0.28449672, %v9493_v34  ;;  %v9495_v62 = vmul.f32 %v16225_v46, %v9431_v44  ;;  %v8986_v12 = vmul.f32 0.3275911, %v8922_v38  ;;  %11696 = vmatpush3.msra.mxu1 %v10519_v39 }
 0xf23   : > { %v16294_v40 = vand.u32 2147483647, %v16285_v29  ;;  %12988 = vpow2.f32 %v9943_v60  ;;  %v9433_v7 = vadd.f32 1.4214138, %v9369_v61  ;;  %v9881_v32 = vmul.f32 %v9817_v11, %v16190_v18  ;;  %v10551_v14 = vld [vmem:[#allocation14 + $0x110] sm:$0xff]  ;;  %11697 = vmatprep.subr.mxu1 %v10534_v59 }
 0xf24   : > { %18397 = vst [vmem:[#allocation42_spill] sm:$0xff] %v16290_v24  ;;  %v16297_v23 = vmul.f32 0.5, %v8542_v33  ;;  %12990 = vrcp.f32 %v9048_v48  ;;  %v9883_v34 = vmul.f32 %v9819_v6, %v16198_v57  ;;  %v9818_v44 = vsub.f32 0.0, %v8922_v38  ;;  %11776 = vmatpush3.msra.mxu0 %v10551_v14 }
 0xf25   : > { %v8993_v4 = vmul.f32 0.3275911, %v16294_v40  ;;  %12992 = vpow2.f32 %v9947_v51  ;;  %v9371_v18 = vmul.f32 %v16256_v0, %v9307_v1  ;;  %v8924_v33 = vand.u32 2147483647, %v16290_v24  ;;  %11777 = vmatprep.subr.mxu0 %v10566_v56 }
 0xf26   : > { %18398 = vst [vmem:[#allocation45_spill] sm:$0xff] %v16297_v23  ;;  %v16308_v61 = vadd.f32 %v8712_v63, %v16158_v19  ;;  %v9621_v57 = vmul.f32 %v16211_v10, %v9557_v36  ;;  %v9559_v48 = vadd.f32 -0.28449672, %v9495_v62  ;;  %v16313_v11 = vadd.f32 %v16247_v27, %v16202_v17 }
 0xf27   : > { %v9057_v6 = vadd.f32 1.0, %v8993_v4  ;;  %v9497_v39 = vmul.f32 %v16242_v5, %v9433_v7  ;;  %v9949_v51 = vmul.f32 1.442695, %v9881_v32  ;;  %v9050_v14 = vadd.f32 1.0, %v8986_v12 }
 0xf28   : > { %v9953_v37 = vmul.f32 1.442695, %v9883_v34  ;;  %v9882_v20 = vmul.f32 %v9818_v44, %v8922_v38  ;;  %v9435_v56 = vadd.f32 1.4214138, %v9371_v18  ;;  %v16318_v59 = vmul.f32 0.5, %v8703_v55 }
 0xf29   : > { %12994 = vrcp.f32 %v9057_v6  ;;  %v9820_v36 = vsub.f32 0.0, %v8924_v33  ;;  %v16321_v62 = vmul.f32 0.70710677, %v16308_v61  ;;  %v9685_v27 = vadd.f32 0.2548296, %v9621_v57 }
 0xf2a   : > { %v16299_v58 = vpop.eup %12978  ;;  %18399 = vst [vmem:[#allocation47_spill] sm:$0xff] %v16318_v59  ;;  %v9623_v4 = vmul.f32 %v16225_v46, %v9559_v48  ;;  %v9821_v7 = vsub.f32 0.0, %v16223_v50  ;;  %v16326_v12 = vmul.f32 0.70710677, %v16313_v11  ;;  %v9561_v38 = vadd.f32 -0.28449672, %v9497_v39  ;;  %v16337_v39 = vpop.f32.mrf.mxu1 }
 0xf2b   : > { %v16303_v60 = vpop.eup %12980  ;;  %v9245_v1 = vmul.f32 1.0614054, %v16299_v58  ;;  %12996 = vpow2.f32 %v9949_v51  ;;  %v16329_v44 = vand.u32 2147483647, %v16321_v62  ;;  %v9951_v55 = vmul.f32 1.442695, %v9882_v20 }
 0xf2c   : > { %v9247_v63 = vmul.f32 1.0614054, %v16303_v60  ;;  %18400 = vst [vmem:[#allocation46_spill] sm:$0xff] %v16326_v12  ;;  %v12983_v32 = vpop.eup %12982  ;;  %12998 = vrcp.f32 %v9050_v14  ;;  %v8988_v18 = vmul.f32 0.3275911, %v8924_v33  ;;  %v9499_v57 = vmul.f32 %v16256_v0, %v9435_v56  ;;  %v10518_v51 = vld [vmem:[#allocation14 + $0x8] sm:$0xff] }
 0xf2d   : > { %v9309_v34 = vadd.f32 -1.4531521, %v9245_v1  ;;  %v12985_v31 = vpop.eup %12984  ;;  %v9884_v48 = vmul.f32 %v9820_v36, %v8924_v33  ;;  %v8995_v59 = vmul.f32 0.3275911, %v16329_v44  ;;  %v10550_v1 = vld [vmem:[#allocation14 + $0x108] sm:$0xff]  ;;  %v9749_v20 = vmul.f32 %v16211_v10, %v9685_v27  ;;  %11698 = vmatpush3.msra.mxu1 %v10518_v51  ;;  %v10533_v33 = vld [vmem:[#allocation14 + $0x80] sm:$0xff] }
 0xf2e   : > { %v9311_v6 = vadd.f32 -1.4531521, %v9247_v63  ;;  %v16339_v23 = vpop.eup %12986  ;;  %v9687_v14 = vadd.f32 0.2548296, %v9623_v4  ;;  %v9885_v63 = vmul.f32 %v9821_v7, %v16223_v50  ;;  %v8926_v56 = vand.u32 2147483647, %v16326_v12  ;;  %11778 = vmatpush3.msra.mxu0 %v10550_v1  ;;  %11699 = vmatprep.subr.mxu1 %v10533_v33 }
 0xf2f   : > { %v9625_v36 = vmul.f32 %v16242_v5, %v9561_v38  ;;  %v9373_v24 = vmul.f32 %v16299_v58, %v9309_v34  ;;  %v9823_v47 = vsub.f32 0.0, %v16237_v15  ;;  %v9059_v2 = vadd.f32 1.0, %v8995_v59  ;;  %11779 = vmatprep.subr.mxu0 %v10565_v25  ;;  %v8557_v59 = vpop.f32.mrf.mxu1 }
 0xf30   : > { %v16347_v3 = vpop.eup %12988  ;;  %13000 = vpow2.f32 %v9953_v37  ;;  %v9052_v10 = vadd.f32 1.0, %v8988_v18  ;;  %v16350_v50 = vmul.f32 0.5, %v16209_v21  ;;  %v9375_v27 = vmul.f32 %v16303_v60, %v9311_v6  ;;  %v16361_v21 = vpop.f32.mrf.mxu0 }
 0xf31   : > { %18401 = vst [vmem:[#allocation49_spill] sm:$0xff] %v16347_v3  ;;  %v16353_v4 = vpop.eup %12990  ;;  %v9563_v7 = vadd.f32 -0.28449672, %v9499_v57  ;;  %13002 = vpow2.f32 %v9951_v55  ;;  %v9955_v38 = vmul.f32 1.442695, %v9884_v48  ;;  %v10069_v1 = vmul.f32 %v12983_v32, %v9749_v20  ;;  %v10517_v32 = vld [vmem:[#allocation14] sm:$0xff] }
 0xf32   : > { %v16356_v34 = vmul.f32 0.70710677, %v16334_v8  ;;  %v16358_v51 = vpop.eup %12992  ;;  %v9751_v37 = vmul.f32 %v16225_v46, %v9687_v14  ;;  %v9822_v18 = vsub.f32 0.0, %v8926_v56  ;;  %13004 = vrcp.f32 %v9059_v2  ;;  %11700 = vmatpush3.msra.mxu1 %v10517_v32 }
 0xf33   : > { %18403 = vst [vmem:[#allocation48_spill] sm:$0xff] %v16358_v51  ;;  %v9689_v33 = vadd.f32 0.2548296, %v9625_v36  ;;  %v9437_v6 = vadd.f32 1.4214138, %v9373_v24  ;;  %v9887_v57 = vmul.f32 %v9823_v47, %v16237_v15  ;;  %13006 = vrcp.f32 %v9052_v10 }
 0xf34   : > { %18402 = vst [vmem:[#allocation40_spill] sm:$0xff] %v16356_v34  ;;  %v9957_v25 = vmul.f32 1.442695, %v9885_v63  ;;  %v9439_v55 = vadd.f32 1.4214138, %v9375_v27  ;;  %v16365_v12 = vadd.f32 %v8557_v59, %v16156_v22  ;;  %v9627_v46 = vmul.f32 %v16256_v0, %v9563_v7  ;;  %v8718_v63 = vpop.f32.mrf.mxu0 }
 0xf35   : > { %v8990_v48 = vmul.f32 0.3275911, %v8926_v56  ;;  %13008 = vpow2.f32 %v9955_v38  ;;  %v16372_v2 = vmul.f32 0.5, %v16219_v43  ;;  %v8928_v24 = vand.u32 2147483647, %v16356_v34 }
 0xf36   : > { %v16367_v3 = vpop.eup %12994  ;;  %v10133_v15 = vsub.f32 1.0, %v10069_v1  ;;  %v16375_v47 = vmul.f32 %v12985_v31, %v9751_v37  ;;  %v16378_v20 = vmul.f32 0.5, %v16313_v11  ;;  %v9886_v14 = vmul.f32 %v9822_v18, %v8926_v56 }
 0xf37   : > { %v9753_v36 = vmul.f32 %v16242_v5, %v9689_v33  ;;  %v9501_v10 = vmul.f32 %v16299_v58, %v9437_v6  ;;  %13010 = vpow2.f32 %v9957_v25  ;;  %v9961_v27 = vmul.f32 1.442695, %v9887_v57 }
 0xf38   : > { %18404 = vst [vmem:[#allocation41_spill] sm:$0xff] %v16378_v20  ;;  %v12997_v43 = vpop.eup %12996  ;;  %v9503_v7 = vmul.f32 %v16303_v60, %v9439_v55  ;;  %v9054_v38 = vadd.f32 1.0, %v8990_v48  ;;  %v9249_v59 = vmul.f32 1.0614054, %v16367_v3  ;;  %v16385_v31 = vmul.f32 0.70710677, %v16365_v12 }
 0xf39   : > { %v16387_v11 = vpop.eup %12998  ;;  %v9691_v56 = vadd.f32 0.2548296, %v9627_v46  ;;  %v8992_v1 = vmul.f32 0.3275911, %v8928_v24  ;;  %v9824_v5 = vsub.f32 0.0, %v8928_v24  ;;  %v16391_v37 = vadd.f32 %v8718_v63, %v16158_v19 }
 0xf3a   : > { %18405 = vst [vmem:[#allocation51_spill] sm:$0xff] %v16387_v11  ;;  %v10261_v18 = vsub.f32 0.0, %v10133_v15  ;;  %v10135_v33 = vsub.f32 1.0, %v16375_v47  ;;  %v9959_v6 = vmul.f32 1.442695, %v9886_v14  ;;  %v16397_v57 = vmul.f32 %v12997_v43, %v9753_v36  ;;  %v16407_v36 = vpop.f32.mrf.mxu1 }
 0xf3b   : > { %v16395_v25 = vand.u32 2147483647, %v16385_v31  ;;  %v9565_v55 = vadd.f32 -0.28449672, %v9501_v10  ;;  %13012 = vpow2.f32 %v9961_v27  ;;  %v16400_v48 = vmul.f32 0.5, %v16334_v8 }
 0xf3c   : > { %v9567_v46 = vadd.f32 -0.28449672, %v9503_v7  ;;  %13014 = vrcp.f32 %v9054_v38  ;;  %v9313_v32 = vadd.f32 -1.4531521, %v9249_v59  ;;  %v9755_v34 = vmul.f32 %v16256_v0, %v9691_v56 }
 0xf3d   : > { %18406 = vst [vmem:[#allocation55_spill] sm:$0xff] %v16400_v48  ;;  %v8997_v63 = vmul.f32 0.3275911, %v16395_v25  ;;  %v13001_v20 = vpop.eup %13000  ;;  %v9056_v47 = vadd.f32 1.0, %v8992_v1  ;;  %v9888_v14 = vmul.f32 %v9824_v5, %v8928_v24  ;;  %v16405_v11 = vmul.f32 0.70710677, %v16391_v37 }
 0xf3e   : > { %v16409_v10 = vpop.eup %13002  ;;  %v10325_v8 = vsel %vm10197_vm5, %v10261_v18, %v10133_v15  ;;  %v10263_v27 = vsub.f32 0.0, %v10135_v33  ;;  %13016 = vpow2.f32 %v9959_v6  ;;  %v10137_v0 = vsub.f32 1.0, %v16397_v57  ;;  %v8563_v57 = vpop.f32.mrf.mxu1 }
 0xf3f   : > { %18407 = vst [vmem:[#allocation25_spill] sm:$0xff] %v16409_v10  ;;  %v9061_v43 = vadd.f32 1.0, %v8997_v63  ;;  %v16414_v7 = vpop.eup %13004  ;;  %v9629_v24 = vmul.f32 %v16299_v58, %v9565_v55  ;;  %v9825_v38 = vsub.f32 0.0, %v16294_v40  ;;  %v16420_v59 = vand.u32 2147483647, %v16405_v11 }
 0xf40   : > { %v9631_v56 = vmul.f32 %v16303_v60, %v9567_v46  ;;  %v9377_v49 = vmul.f32 %v16367_v3, %v9313_v32  ;;  %v8554_v15 = vadd.f32 %v16337_v39, %v16202_v17  ;;  %v16426_v1 = vpop.eup %13006  ;;  %v10075_v5 = vmul.f32 %v13001_v20, %v9755_v34 }
 0xf41   : > { %13018 = vrcp.f32 %v9061_v43  ;;  %18408 = vst [vmem:[#allocation52_spill] sm:$0xff] %v16426_v1  ;;  %v9963_v18 = vmul.f32 1.442695, %v9888_v14  ;;  %v8999_v6 = vmul.f32 0.3275911, %v16420_v59  ;;  %v10389_v63 = vadd.f32 1.0, %v10325_v8  ;;  %v16436_v43 = vpop.f32.mrf.mxu0 }
 0xf42   : > { %13020 = vrcp.f32 %v9056_v47  ;;  %v16429_v55 = vpop.eup %13008  ;;  %v10327_v46 = vsel %vm10199_vm6, %v10263_v27, %v10135_v33  ;;  %v9251_v32 = vmul.f32 1.0614054, %v16414_v7  ;;  %v8715_v39 = vadd.f32 %v16361_v21, %v16206_v41 }
 0xf43   : > { %18409 = vst [vmem:[#allocation56_spill] sm:$0xff] %v16429_v55  ;;  %v10265_v48 = vsub.f32 0.0, %v10137_v0  ;;  %v9693_v34 = vadd.f32 0.2548296, %v9629_v24  ;;  %v9889_v20 = vmul.f32 %v9825_v38, %v16294_v40  ;;  %v9063_v47 = vadd.f32 1.0, %v8999_v6  ;;  %v8724_v6 = vpop.f32.mrf.mxu0 }
 0xf44   : > { %v13011_v14 = vpop.eup %13010  ;;  %v9695_v55 = vadd.f32 0.2548296, %v9631_v56  ;;  %v9441_v8 = vadd.f32 1.4214138, %v9377_v49  ;;  %v16440_v10 = vmul.f32 0.70710677, %v8554_v15  ;;  %v16443_v35 = vadd.f32 %v8563_v57, %v16156_v22 }
 0xf45   : > { %v10391_v33 = vadd.f32 1.0, %v10327_v46  ;;  %v10139_v27 = vsub.f32 1.0, %v10075_v5  ;;  %v9827_v21 = vsub.f32 0.0, %v16329_v44  ;;  %13022 = vrcp.f32 %v9063_v47 }
 0xf46   : > { %18410 = vst [vmem:[#allocation57_spill] sm:$0xff] %v16440_v10  ;;  %13024 = vpow2.f32 %v9963_v18  ;;  %v16447_v24 = vmul.f32 0.5, %v16269_v54  ;;  %v9315_v40 = vadd.f32 -1.4531521, %v9251_v32  ;;  %v16449_v38 = vmul.f32 0.70710677, %v8715_v39 }
 0xf47   : > { %v16452_v56 = vmul.f32 %v10389_v63, %v16253_v28  ;;  %v10329_v49 = vsel %vm10201_vm7, %v10265_v48, %v10137_v0  ;;  %v9757_v57 = vmul.f32 %v16299_v58, %v9693_v34  ;;  %v9965_v5 = vmul.f32 1.442695, %v9889_v20 }
 0xf48   : > { %18411 = vst [vmem:[#allocation58_spill] sm:$0xff] %v16449_v38  ;;  %v13013_v46 = vpop.eup %13012  ;;  %v9759_v47 = vmul.f32 %v16303_v60, %v9695_v55  ;;  %v9505_v18 = vmul.f32 %v16367_v3, %v9441_v8  ;;  %v8930_v54 = vand.u32 2147483647, %v16440_v10  ;;  %v16461_v32 = vmul.f32 0.70710677, %v16443_v35 }
 0xf49   : > { %18412 = vst [vmem:[#allocation50_spill] sm:$0xff] %v16452_v56  ;;  %v16463_v1 = vpop.eup %13014  ;;  %v16466_v28 = vmul.f32 %v10391_v33, %v16262_v52  ;;  %v10267_v45 = vsub.f32 0.0, %v10139_v27  ;;  %v9891_v48 = vmul.f32 %v9827_v21, %v16329_v44  ;;  %v16470_v58 = vadd.f32 %v8724_v6, %v16158_v19 }
 0xf4a   : > { %18413 = vst [vmem:[#allocation54_spill] sm:$0xff] %v16463_v1  ;;  %v16473_v60 = vmul.f32 0.5, %v16308_v61  ;;  %v9379_v0 = vmul.f32 %v16414_v7, %v9315_v40  ;;  %v8932_v55 = vand.u32 2147483647, %v16449_v38  ;;  %v16478_v63 = vand.u32 2147483647, %v16461_v32 }
 0xf4b   : > { %18414 = vst [vmem:[#allocation59_spill] sm:$0xff] %v16466_v28  ;;  %v16480_v34 = vpop.eup %13016  ;;  %v10393_v52 = vadd.f32 1.0, %v10329_v49  ;;  %v10077_v20 = vmul.f32 %v13011_v14, %v9757_v57  ;;  %13026 = vpow2.f32 %v9965_v5  ;;  %v16482_v8 = vmul.f32 0.5, %v8554_v15 }
 0xf4c   : > { %18415 = vst [vmem:[#allocation53_spill] sm:$0xff] %v16480_v34  ;;  %v10079_v44 = vmul.f32 %v13013_v46, %v9759_v47  ;;  %v9569_v33 = vadd.f32 -0.28449672, %v9505_v18  ;;  %v9826_v21 = vsub.f32 0.0, %v8930_v54  ;;  %v9001_v61 = vmul.f32 0.3275911, %v16478_v63  ;;  %v16510_v34 = vpop.f32.mrf.mxu1 }
 0xf4d   : > { %18416 = vst [vmem:[#allocation60_spill] sm:$0xff] %v16482_v8  ;;  %v10331_v40 = vsel %vm10203_vm8, %v10267_v45, %v10139_v27  ;;  %v9969_v38 = vmul.f32 1.442695, %v9891_v48  ;;  %v8994_v10 = vmul.f32 0.3275911, %v8930_v54  ;;  %v9828_v14 = vsub.f32 0.0, %v8932_v55 }
 0xf4e   : > { %v16485_v6 = vpop.eup %13018  ;;  %v16490_v1 = vmul.f32 0.70710677, %v16470_v58  ;;  %v9443_v15 = vadd.f32 1.4214138, %v9379_v0  ;;  %v9065_v5 = vadd.f32 1.0, %v9001_v61  ;;  %v16497_v46 = vmul.f32 %v10393_v52, %v16279_v30 }
 0xf4f   : > { %v16492_v49 = vpop.eup %13020  ;;  %v9253_v57 = vmul.f32 1.0614054, %v16485_v6  ;;  %v10141_v47 = vsub.f32 1.0, %v10077_v20  ;;  %v16500_v16 = vmul.f32 0.5, %v8715_v39  ;;  %v10143_v18 = vsub.f32 1.0, %v10079_v44 }
 0xf50   : > { %18417 = vst [vmem:[#allocation63_spill] sm:$0xff] %v16492_v49  ;;  %18418 = vst [vmem:[#allocation62_spill] sm:$0xff] %v16497_v46  ;;  %v16503_v27 = vand.u32 2147483647, %v16490_v1  ;;  %v9633_v45 = vmul.f32 %v16367_v3, %v9569_v33  ;;  %v9890_v48 = vmul.f32 %v9826_v21, %v8930_v54  ;;  %13028 = vrcp.f32 %v9065_v5 }
 0xf51   : > { %18419 = vst [vmem:[#allocation65_spill] sm:$0xff] %v16500_v16  ;;  %v10395_v0 = vadd.f32 1.0, %v10331_v40  ;;  %13030 = vpow2.f32 %v9969_v38  ;;  %v9317_v8 = vadd.f32 -1.4531521, %v9253_v57  ;;  %v9507_v52 = vmul.f32 %v16414_v7, %v9443_v15 }
 0xf52   : > { %v9003_v61 = vmul.f32 0.3275911, %v16503_v27  ;;  %v16507_v30 = vpop.eup %13022  ;;  %v9058_v20 = vadd.f32 1.0, %v8994_v10  ;;  %v8996_v39 = vmul.f32 0.3275911, %v8932_v55  ;;  %v9892_v16 = vmul.f32 %v9828_v14, %v8932_v55  ;;  %v10549_v14 = vld [vmem:[#allocation14 + $0x100] sm:$0xff] }
 0xf53   : > { %v16512_v49 = vpop.eup %13024  ;;  %v10269_v44 = vsub.f32 0.0, %v10141_v47  ;;  %v9255_v54 = vmul.f32 1.0614054, %v16507_v30  ;;  %v8560_v38 = vadd.f32 %v16407_v36, %v16202_v17  ;;  %v10271_v21 = vsub.f32 0.0, %v10143_v18  ;;  %11780 = vmatpush3.msra.mxu0 %v10549_v14 }
 0xf54   : > { %18420 = vst [vmem:[#allocation66_spill] sm:$0xff] %v16512_v49  ;;  %v9067_v33 = vadd.f32 1.0, %v9003_v61  ;;  %v9697_v40 = vadd.f32 0.2548296, %v9633_v45  ;;  %v9967_v57 = vmul.f32 1.442695, %v9890_v48  ;;  %v9381_v10 = vmul.f32 %v16485_v6, %v9317_v8  ;;  %v16527_v45 = vpop.f32.mrf.mxu0  ;;  %v8569_v48 = vpop.f32.mrf.mxu1 }
 0xf55   : > { %v9829_v5 = vsub.f32 0.0, %v16395_v25  ;;  %v9831_v55 = vsub.f32 0.0, %v16420_v59  ;;  %v16522_v15 = vadd.f32 %v16436_v43, %v16206_v41  ;;  %v16525_v49 = vmul.f32 %v10395_v0, %v16288_v53 }
 0xf56   : > { %13032 = vrcp.f32 %v9067_v33  ;;  %v9571_v36 = vadd.f32 -0.28449672, %v9507_v52  ;;  %v9060_v61 = vadd.f32 1.0, %v8996_v39  ;;  %v10333_v8 = vsel %vm10205_vm9, %v10269_v44, %v10141_v47 }
 0xf57   : > { %18421 = vst [vmem:[#allocation67_spill] sm:$0xff] %v16525_v49  ;;  %13034 = vrcp.f32 %v9058_v20  ;;  %v9971_v46 = vmul.f32 1.442695, %v9892_v16  ;;  %v9319_v28 = vadd.f32 -1.4531521, %v9255_v54  ;;  %v10335_v33 = vsel %vm10207_vm10, %v10271_v21, %v10143_v18 }
 0xf58   : > { %v16531_v56 = vmul.f32 0.70710677, %v8560_v38  ;;  %v13027_v43 = vpop.eup %13026  ;;  %v9761_v53 = vmul.f32 %v16367_v3, %v9697_v40  ;;  %13036 = vpow2.f32 %v9967_v57  ;;  %v9893_v0 = vmul.f32 %v9829_v5, %v16395_v25  ;;  %v8730_v3 = vpop.f32.mrf.mxu0 }
 0xf59   : > { %v9445_v52 = vadd.f32 1.4214138, %v9381_v10  ;;  %v9895_v20 = vmul.f32 %v9831_v55, %v16420_v59  ;;  %v16539_v39 = vmul.f32 0.70710677, %v16522_v15  ;;  %v16542_v9 = vadd.f32 %v8569_v48, %v16156_v22 }
 0xf5a   : > { %18422 = vst [vmem:[#allocation68_spill] sm:$0xff] %v16531_v56  ;;  %v10397_v47 = vadd.f32 1.0, %v10333_v8  ;;  %v9635_v16 = vmul.f32 %v16414_v7, %v9571_v36  ;;  %13038 = vrcp.f32 %v9060_v61  ;;  %v16546_v13 = vmul.f32 0.5, %v16365_v12 }
 0xf5b   : > { %18423 = vst [vmem:[#allocation69_spill] sm:$0xff] %v16539_v39  ;;  %v10399_v18 = vadd.f32 1.0, %v10335_v33  ;;  %13040 = vpow2.f32 %v9971_v46  ;;  %v9383_v25 = vmul.f32 %v16507_v30, %v9319_v28  ;;  %v8934_v59 = vand.u32 2147483647, %v16531_v56 }
 0xf5c   : > { %v10081_v44 = vmul.f32 %v13027_v43, %v9761_v53  ;;  %v9973_v54 = vmul.f32 1.442695, %v9893_v0  ;;  %v16551_v21 = vmul.f32 0.5, %v16391_v37  ;;  %v16554_v40 = vmul.f32 0.70710677, %v16542_v9 }
 0xf5d   : > { %v16556_v57 = vpop.eup %13028  ;;  %v9509_v12 = vmul.f32 %v16485_v6, %v9445_v52  ;;  %v9977_v5 = vmul.f32 1.442695, %v9895_v20  ;;  %v8936_v10 = vand.u32 2147483647, %v16539_v39  ;;  %v16561_v46 = vadd.f32 %v8730_v3, %v16158_v19  ;;  %v16600_v39 = vpop.f32.mrf.mxu1 }
 0xf5e   : > { %v13031_v28 = vpop.eup %13030  ;;  %v16564_v55 = vmul.f32 %v10397_v47, %v16350_v50  ;;  %v9699_v14 = vadd.f32 0.2548296, %v9635_v16  ;;  %v9257_v37 = vmul.f32 1.0614054, %v16556_v57  ;;  %v16568_v36 = vand.u32 2147483647, %v16554_v40 }
 0xf5f   : > { %v16571_v61 = vmul.f32 %v10399_v18, %v16372_v2  ;;  %vm10209_vm11 = vcmp.lt.f32.partialorder %v16285_v29, 0.0  ;;  %v9447_v48 = vadd.f32 1.4214138, %v9383_v25  ;;  %v16574_v8 = vmul.f32 0.5, %v8560_v38 }
 0xf60   : > { %18424 = vst [vmem:[#allocation70_spill] sm:$0xff] %v16564_v55  ;;  %v8998_v43 = vmul.f32 0.3275911, %v8934_v59  ;;  %v10145_v33 = vsub.f32 1.0, %v10081_v44  ;;  %13042 = vpow2.f32 %v9973_v54  ;;  %v9321_v53 = vadd.f32 -1.4531521, %v9257_v37 }
 0xf61   : > { %18425 = vst [vmem:[#allocation71_spill] sm:$0xff] %v16571_v61  ;;  %18426 = vst [vmem:[#allocation72_spill] sm:$0xff] %v16574_v8  ;;  %v9005_v50 = vmul.f32 0.3275911, %v16568_v36  ;;  %v9573_v0 = vadd.f32 -0.28449672, %v9509_v12  ;;  %13044 = vpow2.f32 %v9977_v5  ;;  %v9763_v2 = vmul.f32 %v16414_v7, %v9699_v14 }
 0xf62   : > { %v9830_v52 = vsub.f32 0.0, %v8934_v59  ;;  %v16578_v20 = vmul.f32 0.70710677, %v16561_v46  ;;  %v9832_v16 = vsub.f32 0.0, %v8936_v10  ;;  %v16585_v38 = vadd.f32 %v16510_v34, %v16202_v17 }
 0xf63   : > { %v16580_v47 = vpop.eup %13032  ;;  %v9069_v3 = vadd.f32 1.0, %v9005_v50  ;;  %v9511_v25 = vmul.f32 %v16507_v30, %v9447_v48  ;;  %v9000_v44 = vmul.f32 0.3275911, %v8936_v10  ;;  %v10273_v5 = vsub.f32 0.0, %v10145_v33 }
 0xf64   : > { %v16587_v18 = vpop.eup %13034  ;;  %v9259_v54 = vmul.f32 1.0614054, %v16580_v47  ;;  %v16592_v12 = vand.u32 2147483647, %v16578_v20  ;;  %v9385_v37 = vmul.f32 %v16556_v57, %v9321_v53  ;;  %v9833_v7 = vsub.f32 0.0, %v16478_v63 }
 0xf65   : > { %18427 = vst [vmem:[#allocation73_spill] sm:$0xff] %v16587_v18  ;;  %13046 = vrcp.f32 %v9069_v3  ;;  %v16596_v14 = vpop.eup %13036  ;;  %v9637_v34 = vmul.f32 %v16485_v6, %v9573_v0  ;;  %v9894_v50 = vmul.f32 %v9830_v52, %v8934_v59  ;;  %v10083_v61 = vmul.f32 %v13031_v28, %v9763_v2 }
 0xf66   : > { %18428 = vst [vmem:[#allocation74_spill] sm:$0xff] %v16596_v14  ;;  %v9323_v8 = vadd.f32 -1.4531521, %v9259_v54  ;;  %v9007_v48 = vmul.f32 0.3275911, %v16592_v12  ;;  %v9062_v55 = vadd.f32 1.0, %v8998_v43  ;;  %v9896_v56 = vmul.f32 %v9832_v16, %v8936_v10 }
 0xf67   : > { %v16603_v18 = vmul.f32 0.70710677, %v16585_v38  ;;  %v16605_v53 = vpop.eup %13038  ;;  %v9575_v49 = vadd.f32 -0.28449672, %v9511_v25  ;;  %v9064_v3 = vadd.f32 1.0, %v9000_v44  ;;  %v9835_v14 = vsub.f32 0.0, %v16503_v27  ;;  %v8575_v25 = vpop.f32.mrf.mxu1 }
 0xf68   : > { %v9071_v51 = vadd.f32 1.0, %v9007_v48  ;;  %v16608_v0 = vpop.eup %13040  ;;  %v10337_v59 = vsel %vm10209_vm11, %v10273_v5, %v10145_v33  ;;  %v9449_v52 = vadd.f32 1.4214138, %v9385_v37  ;;  %v9897_v28 = vmul.f32 %v9833_v7, %v16478_v63  ;;  %v16618_v33 = vpop.f32.mrf.mxu0 }
 0xf69   : > { %18429 = vst [vmem:[#allocation75_spill] sm:$0xff] %v16603_v18  ;;  %18430 = vst [vmem:[#allocation76_spill] sm:$0xff] %v16608_v0  ;;  %v9387_v10 = vmul.f32 %v16580_v47, %v9323_v8  ;;  %vm10211_vm12 = vcmp.lt.f32.partialorder %v16321_v62, 0.0  ;;  %v9701_v43 = vadd.f32 0.2548296, %v9637_v34  ;;  %v8727_v16 = vadd.f32 %v16527_v45, %v16206_v41 }
 0xf6a   : > { %v9975_v2 = vmul.f32 1.442695, %v9894_v50  ;;  %13048 = vrcp.f32 %v9071_v51  ;;  %v10147_v44 = vsub.f32 1.0, %v10083_v61  ;;  %v9979_v54 = vmul.f32 1.442695, %v9896_v56  ;;  %v8736_v48 = vpop.f32.mrf.mxu0 }
 0xf6b   : > { %13050 = vrcp.f32 %v9062_v55  ;;  %v8938_v29 = vand.u32 2147483647, %v16603_v18  ;;  %v10401_v5 = vadd.f32 1.0, %v10337_v59  ;;  %v9639_v63 = vmul.f32 %v16507_v30, %v9575_v49 }
 0xf6c   : > { %13052 = vrcp.f32 %v9064_v3  ;;  %v9899_v8 = vmul.f32 %v9835_v14, %v16503_v27  ;;  %v9513_v37 = vmul.f32 %v16556_v57, %v9449_v52  ;;  %v9981_v7 = vmul.f32 1.442695, %v9897_v28 }
 0xf6d   : > { %v9451_v34 = vadd.f32 1.4214138, %v9387_v10  ;;  %v16624_v51 = vadd.f32 %v8575_v25, %v16156_v22  ;;  %v13043_v45 = vpop.eup %13042  ;;  %v9765_v56 = vmul.f32 %v16485_v6, %v9701_v43  ;;  %13054 = vpow2.f32 %v9975_v2 }
 0xf6e   : > { %v16628_v55 = vmul.f32 0.5, %v16522_v15  ;;  %v16630_v61 = vmul.f32 0.70710677, %v8727_v16  ;;  %v13045_v49 = vpop.eup %13044  ;;  %v10275_v50 = vsub.f32 0.0, %v10147_v44  ;;  %13056 = vpow2.f32 %v9979_v54 }
 0xf6f   : > { %v16633_v27 = vmul.f32 0.5, %v16443_v35  ;;  %v9834_v14 = vsub.f32 0.0, %v8938_v29  ;;  %v16636_v3 = vmul.f32 %v10401_v5, %v16447_v24  ;;  %v9703_v59 = vadd.f32 0.2548296, %v9639_v63 }
 0xf70   : > { %18431 = vst [vmem:[#allocation77_spill] sm:$0xff] %v16628_v55  ;;  %18432 = vst [vmem:[#allocation78_spill] sm:$0xff] %v16630_v61  ;;  %v16639_v6 = vmul.f32 0.5, %v16470_v58  ;;  %v9985_v52 = vmul.f32 1.442695, %v9899_v8  ;;  %13058 = vpow2.f32 %v9981_v7  ;;  %v9515_v28 = vmul.f32 %v16580_v47, %v9451_v34 }
 0xf71   : > { %18433 = vst [vmem:[#allocation79_spill] sm:$0xff] %v16636_v3  ;;  %v9577_v15 = vadd.f32 -0.28449672, %v9513_v37  ;;  %v16643_v10 = vmul.f32 0.70710677, %v16624_v51  ;;  %v10085_v35 = vmul.f32 %v13043_v45, %v9765_v56  ;;  %v16649_v24 = vadd.f32 %v8736_v48, %v16158_v19  ;;  %v16708_v3 = vpop.f32.mrf.mxu0 }
 0xf72   : > { %v16645_v43 = vpop.eup %13046  ;;  %v9002_v2 = vmul.f32 0.3275911, %v8938_v29  ;;  %v8940_v25 = vand.u32 2147483647, %v16630_v61  ;;  %v10339_v58 = vsel %vm10211_vm12, %v10275_v50, %v10147_v44  ;;  %v9898_v54 = vmul.f32 %v9834_v14, %v8938_v29 }
 0xf73   : > { %v9261_v5 = vmul.f32 1.0614054, %v16645_v43  ;;  %v16655_v63 = vand.u32 2147483647, %v16643_v10  ;;  %v9767_v8 = vmul.f32 %v16507_v30, %v9703_v59  ;;  %13060 = vpow2.f32 %v9985_v52 }
 0xf74   : > { %v16659_v37 = vmul.f32 0.5, %v16585_v38  ;;  %v16661_v7 = vmul.f32 0.5, %v8727_v16  ;;  %vm10213_vm13 = vcmp.lt.f32.partialorder %v16385_v31, 0.0  ;;  %v9641_v34 = vmul.f32 %v16556_v57, %v9577_v15 }
 0xf75   : > { %v9579_v62 = vadd.f32 -0.28449672, %v9515_v28  ;;  %v9325_v44 = vadd.f32 -1.4531521, %v9261_v5  ;;  %v9009_v29 = vmul.f32 0.3275911, %v16655_v63  ;;  %v10087_v15 = vmul.f32 %v13045_v49, %v9767_v8 }
 0xf76   : > { %18434 = vst [vmem:[#allocation80_spill] sm:$0xff] %v16659_v37  ;;  %18435 = vst [vmem:[#allocation81_spill] sm:$0xff] %v16661_v7  ;;  %v10403_v45 = vadd.f32 1.0, %v10339_v58  ;;  %v10149_v56 = vsub.f32 1.0, %v10085_v35  ;;  %v9836_v50 = vsub.f32 0.0, %v8940_v25  ;;  %v9066_v38 = vadd.f32 1.0, %v9002_v2  ;;  %v16686_v37 = vpop.f32.mrf.mxu1 }
 0xf77   : > { %v16667_v14 = vmul.f32 0.70710677, %v16649_v24  ;;  %v16669_v30 = vpop.eup %13048  ;;  %v9983_v48 = vmul.f32 1.442695, %v9898_v54  ;;  %v9389_v16 = vmul.f32 %v16645_v43, %v9325_v44  ;;  %v9073_v59 = vadd.f32 1.0, %v9009_v29 }
 0xf78   : > { %v16672_v52 = vpop.eup %13050  ;;  %v9837_v28 = vsub.f32 0.0, %v16568_v36  ;;  %v9263_v5 = vmul.f32 1.0614054, %v16669_v30  ;;  %v16678_v35 = vadd.f32 %v16600_v39, %v16202_v17  ;;  %v9705_v7 = vadd.f32 0.2548296, %v9641_v34 }
 0xf79   : > { %v16680_v58 = vpop.eup %13052  ;;  %v9643_v2 = vmul.f32 %v16580_v47, %v9579_v62  ;;  %13062 = vrcp.f32 %v9073_v59  ;;  %v16684_v54 = vand.u32 2147483647, %v16667_v14  ;;  %v10277_v44 = vsub.f32 0.0, %v10149_v56 }
 0xf7a   : > { %18436 = vst [vmem:[#allocation82_spill] sm:$0xff] %v16680_v58  ;;  %v9004_v29 = vmul.f32 0.3275911, %v8940_v25  ;;  %v9900_v49 = vmul.f32 %v9836_v50, %v8940_v25  ;;  %v9327_v8 = vadd.f32 -1.4531521, %v9263_v5  ;;  %v16688_v61 = vpop.eup %13054  ;;  %v16691_v39 = vmul.f32 %v10403_v45, %v16473_v60 }
 0xf7b   : > { %18437 = vst [vmem:[#allocation83_spill] sm:$0xff] %v16688_v61  ;;  %vm10215_vm14 = vcmp.lt.f32.partialorder %v16405_v11, 0.0  ;;  %v9453_v34 = vadd.f32 1.4214138, %v9389_v16  ;;  %v9839_v62 = vsub.f32 0.0, %v16592_v12  ;;  %v16696_v55 = vpop.eup %13056  ;;  %v10151_v18 = vsub.f32 1.0, %v10087_v15 }
 0xf7c   : > { %18438 = vst [vmem:[#allocation84_spill] sm:$0xff] %v16691_v39  ;;  %v9011_v59 = vmul.f32 0.3275911, %v16684_v54  ;;  %18439 = vst [vmem:[#allocation85_spill] sm:$0xff] %v16696_v55  ;;  %v9901_v25 = vmul.f32 %v9837_v28, %v16568_v36  ;;  %v9391_v50 = vmul.f32 %v16669_v30, %v9327_v8  ;;  %v16702_v5 = vadd.f32 %v16618_v33, %v16206_v41  ;;  %v8581_v8 = vpop.f32.mrf.mxu1 }
 0xf7d   : > { %v9769_v60 = vmul.f32 %v16556_v57, %v9705_v7  ;;  %v9707_v45 = vadd.f32 0.2548296, %v9643_v2  ;;  %v16706_v16 = vmul.f32 0.70710677, %v16678_v35  ;;  %v13059_v61 = vpop.eup %13058  ;;  %v10341_v15 = vsel %vm10213_vm13, %v10277_v44, %v10149_v56  ;;  %v8742_v44 = vpop.f32.mrf.mxu0 }
 0xf7e   : > { %v9075_v39 = vadd.f32 1.0, %v9011_v59  ;;  %13064 = vrcp.f32 %v9066_v38  ;;  %v9068_v36 = vadd.f32 1.0, %v9004_v29  ;;  %v9987_v28 = vmul.f32 1.442695, %v9900_v49 }
 0xf7f   : > { %18440 = vst [vmem:[#allocation86_spill] sm:$0xff] %v16706_v16  ;;  %v9517_v33 = vmul.f32 %v16645_v43, %v9453_v34  ;;  %v9455_v55 = vadd.f32 1.4214138, %v9391_v50  ;;  %v9903_v57 = vmul.f32 %v9839_v62, %v16592_v12  ;;  %v10279_v7 = vsub.f32 0.0, %v10151_v18 }
 0xf80   : > { %13066 = vrcp.f32 %v9075_v39  ;;  %v9989_v2 = vmul.f32 1.442695, %v9901_v25  ;;  %v16715_v59 = vmul.f32 0.70710677, %v16702_v5  ;;  %v13061_v0 = vpop.eup %13060  ;;  %v10089_v58 = vmul.f32 %v13059_v61, %v9769_v60 }
 0xf81   : > { %13068 = vpow2.f32 %v9983_v48  ;;  %v9771_v31 = vmul.f32 %v16580_v47, %v9707_v45  ;;  %v8942_v56 = vand.u32 2147483647, %v16706_v16  ;;  %v16720_v38 = vadd.f32 %v8581_v8, %v16156_v22 }
 0xf82   : > { %18441 = vst [vmem:[#allocation87_spill] sm:$0xff] %v16715_v59  ;;  %v10405_v29 = vadd.f32 1.0, %v10341_v15  ;;  %13070 = vrcp.f32 %v9068_v36  ;;  %v16723_v12 = vmul.f32 0.5, %v16542_v9  ;;  %v16726_v48 = vmul.f32 0.5, %v16561_v46 }
 0xf83   : > { %13072 = vpow2.f32 %v9987_v28  ;;  %v9581_v49 = vadd.f32 -0.28449672, %v9517_v33  ;;  %v9519_v61 = vmul.f32 %v16669_v30, %v9455_v55  ;;  %v9993_v39 = vmul.f32 1.442695, %v9903_v57 }
 0xf84   : > { %v10343_v47 = vsel %vm10215_vm14, %v10279_v7, %v10151_v18  ;;  %v8944_v34 = vand.u32 2147483647, %v16715_v59  ;;  %v16733_v62 = vmul.f32 0.70710677, %v16720_v38  ;;  %v16736_v25 = vadd.f32 %v8742_v44, %v16158_v19 }
 0xf85   : > { %v10153_v9 = vsub.f32 1.0, %v10089_v58  ;;  %vm10217_vm15 = vcmp.lt.f32.partialorder %v16461_v32, 0.0  ;;  %v10091_v46 = vmul.f32 %v13061_v0, %v9771_v31  ;;  %13074 = vpow2.f32 %v9989_v2 }
 0xf86   : > { %v9006_v50 = vmul.f32 0.3275911, %v8942_v56  ;;  %v16739_v60 = vpop.eup %13062  ;;  %v16742_v55 = vmul.f32 %v10405_v29, %v16546_v13  ;;  %v16745_v11 = vmul.f32 0.5, %v16678_v35  ;;  %v9838_v18 = vsub.f32 0.0, %v8942_v56 }
 0xf87   : > { %v16748_v45 = vand.u32 2147483647, %v16733_v62  ;;  %v10407_v15 = vadd.f32 1.0, %v10343_v47  ;;  %v9645_v58 = vmul.f32 %v16645_v43, %v9581_v49  ;;  %v9583_v36 = vadd.f32 -0.28449672, %v9519_v61 }
 0xf88   : > { %18442 = vst [vmem:[#allocation88_spill] sm:$0xff] %v16742_v55  ;;  %18443 = vst [vmem:[#allocation89_spill] sm:$0xff] %v16745_v11  ;;  %v9265_v0 = vmul.f32 1.0614054, %v16739_v60  ;;  %vm10219_vm0 = vcmp.lt.f32.partialorder %v16490_v1, 0.0  ;;  %13076 = vpow2.f32 %v9993_v39  ;;  %v9840_v28 = vsub.f32 0.0, %v8944_v34 }
 0xf89   : > { %v9013_v13 = vmul.f32 0.3275911, %v16748_v45  ;;  %v16755_v8 = vmul.f32 0.70710677, %v16736_v25  ;;  %v10281_v35 = vsub.f32 0.0, %v10153_v9  ;;  %v10155_v33 = vsub.f32 1.0, %v10091_v46 }
 0xf8a   : > { %v9070_v57 = vadd.f32 1.0, %v9006_v50  ;;  %v16759_v7 = vadd.f32 %v16686_v37, %v16202_v17  ;;  %v9329_v2 = vadd.f32 -1.4531521, %v9265_v0  ;;  %v9841_v31 = vsub.f32 0.0, %v16655_v63 }
 0xf8b   : > { %v9077_v44 = vadd.f32 1.0, %v9013_v13  ;;  %v16763_v29 = vand.u32 2147483647, %v16755_v8  ;;  %v16765_v49 = vpop.eup %13064  ;;  %v9709_v61 = vadd.f32 0.2548296, %v9645_v58  ;;  %v9647_v39 = vmul.f32 %v16669_v30, %v9583_v36 }
 0xf8c   : > { %v9902_v47 = vmul.f32 %v9838_v18, %v8942_v56  ;;  %v16769_v46 = vmul.f32 0.5, %v16702_v5  ;;  %v16774_v37 = vmul.f32 %v10407_v15, %v16551_v21  ;;  %v9008_v0 = vmul.f32 0.3275911, %v8944_v34  ;;  %v8583_v5 = vpop.f32.mrf.mxu1 }
 0xf8d   : > { %v16771_v50 = vpop.eup %13066  ;;  %v9904_v11 = vmul.f32 %v9840_v28, %v8944_v34  ;;  %13078 = vrcp.f32 %v9077_v44  ;;  %v10283_v59 = vsub.f32 0.0, %v10155_v33  ;;  %v8739_v58 = vadd.f32 %v16708_v3, %v16206_v41 }
 0xf8e   : > { %18444 = vst [vmem:[#allocation90_spill] sm:$0xff] %v16769_v46  ;;  %18445 = vst [vmem:[#allocation91_spill] sm:$0xff] %v16774_v37  ;;  %v16776_v13 = vpop.eup %13068  ;;  %v9267_v16 = vmul.f32 1.0614054, %v16771_v50  ;;  %v9015_v56 = vmul.f32 0.3275911, %v16763_v29  ;;  %v10345_v18 = vsel %vm10217_vm15, %v10281_v35, %v10153_v9  ;;  %v9393_v21 = vmul.f32 %v16739_v60, %v9329_v2 }
 0xf8f   : > { %18446 = vst [vmem:[#allocation92_spill] sm:$0xff] %v16776_v13  ;;  %v9905_v15 = vmul.f32 %v9841_v31, %v16655_v63  ;;  %v16787_v34 = vmul.f32 0.70710677, %v16759_v7  ;;  %v16789_v36 = vpop.eup %13070  ;;  %v9773_v28 = vmul.f32 %v16645_v43, %v9709_v61  ;;  %v9711_v44 = vadd.f32 0.2548296, %v9647_v39  ;;  %v8587_v31 = vpop.f32.mrf.mxu1 }
 0xf90   : > { %18448 = vst [vmem:[#allocation94_spill] sm:$0xff] %v16789_v36  ;;  %v9331_v46 = vadd.f32 -1.4531521, %v9267_v16  ;;  %v9079_v3 = vadd.f32 1.0, %v9015_v56  ;;  %v16792_v13 = vpop.eup %13072  ;;  %13080 = vrcp.f32 %v9070_v57  ;;  %v9991_v37 = vmul.f32 1.442695, %v9902_v47 }
 0xf91   : > { %18447 = vst [vmem:[#allocation93_spill] sm:$0xff] %v16787_v34  ;;  %18449 = vst [vmem:[#allocation95_spill] sm:$0xff] %v16792_v13  ;;  %v9072_v32 = vadd.f32 1.0, %v9008_v0  ;;  %v9843_v9 = vsub.f32 0.0, %v16684_v54  ;;  %v10347_v63 = vsel %vm10219_vm0, %v10283_v59, %v10155_v33  ;;  %v16798_v2 = vmul.f32 0.70710677, %v8739_v58 }
 0xf92   : > { %v9395_v35 = vmul.f32 %v16771_v50, %v9331_v46  ;;  %13082 = vrcp.f32 %v9079_v3  ;;  %v13075_v43 = vpop.eup %13074  ;;  %v10409_v61 = vadd.f32 1.0, %v10345_v18  ;;  %v9995_v16 = vmul.f32 1.442695, %v9904_v11 }
 0xf93   : > { %18450 = vst [vmem:[#allocation96_spill] sm:$0xff] %v16798_v2  ;;  %v16801_v39 = vmul.f32 0.5, %v16624_v51  ;;  %v9457_v57 = vadd.f32 1.4214138, %v9393_v21  ;;  %v10093_v47 = vmul.f32 %v13075_v43, %v9773_v28  ;;  %v9775_v0 = vmul.f32 %v16669_v30, %v9711_v44  ;;  %v8744_v21 = vpop.f32.mrf.mxu0 }
 0xf94   : > { %v9997_v56 = vmul.f32 1.442695, %v9905_v15  ;;  %v8946_v1 = vand.u32 2147483647, %v16787_v34  ;;  %v10411_v59 = vadd.f32 1.0, %v10347_v63  ;;  %13084 = vpow2.f32 %v9991_v37 }
 0xf95   : > { %v9459_v33 = vadd.f32 1.4214138, %v9395_v35  ;;  %v16806_v46 = vadd.f32 %v8587_v31, %v16156_v22  ;;  %v13077_v3 = vpop.eup %13076  ;;  %13086 = vrcp.f32 %v9072_v32  ;;  %v16809_v11 = vmul.f32 0.5, %v16649_v24 }
 0xf96   : > { %v9907_v51 = vmul.f32 %v9843_v9, %v16684_v54  ;;  %v8948_v18 = vand.u32 2147483647, %v16798_v2  ;;  %v16814_v30 = vmul.f32 %v10409_v61, %v16633_v27  ;;  %13088 = vpow2.f32 %v9995_v16  ;;  %v8748_v16 = vpop.f32.mrf.mxu0 }
 0xf97   : > { %v9521_v37 = vmul.f32 %v16739_v60, %v9457_v57  ;;  %v16818_v15 = vmul.f32 0.70710677, %v16806_v46  ;;  %v10157_v28 = vsub.f32 1.0, %v10093_v47  ;;  %vm10221_vm1 = vcmp.lt.f32.partialorder %v16554_v40, 0.0 }
 0xf98   : > { %18451 = vst [vmem:[#allocation97_spill] sm:$0xff] %v16814_v30  ;;  %v16821_v44 = vmul.f32 %v13077_v3, %v9775_v0  ;;  %13090 = vpow2.f32 %v9997_v56  ;;  %v9842_v24 = vsub.f32 0.0, %v8946_v1  ;;  %v16824_v54 = vmul.f32 %v10411_v59, %v16639_v6 }
 0xf99   : > { %v9523_v32 = vmul.f32 %v16771_v50, %v9459_v33  ;;  %v16828_v27 = vmul.f32 0.5, %v16759_v7  ;;  %v16831_v9 = vand.u32 2147483647, %v16818_v15  ;;  %v10001_v35 = vmul.f32 1.442695, %v9907_v51 }
 0xf9a   : > { %18452 = vst [vmem:[#allocation98_spill] sm:$0xff] %v16824_v54  ;;  %v16833_v63 = vpop.eup %13078  ;;  %v9010_v31 = vmul.f32 0.3275911, %v8946_v1  ;;  %v16835_v43 = vmul.f32 0.5, %v8739_v58  ;;  %v9844_v61 = vsub.f32 0.0, %v8948_v18  ;;  %v16839_v47 = vadd.f32 %v8583_v5, %v16202_v17 }
 0xf9b   : > { %18453 = vst [vmem:[#allocation99_spill] sm:$0xff] %v16828_v27  ;;  %v9585_v57 = vadd.f32 -0.28449672, %v9521_v37  ;;  %v9269_v6 = vmul.f32 1.0614054, %v16833_v63  ;;  %v10285_v0 = vsub.f32 0.0, %v10157_v28  ;;  %v9906_v59 = vmul.f32 %v9842_v24, %v8946_v1 }
 0xf9c   : > { %18454 = vst [vmem:[#allocation100_spill] sm:$0xff] %v16835_v43  ;;  %v9017_v7 = vmul.f32 0.3275911, %v16831_v9  ;;  %v10159_v56 = vsub.f32 1.0, %v16821_v44  ;;  %vm10223_vm2 = vcmp.lt.f32.partialorder %v16578_v20, 0.0  ;;  %v9845_v33 = vsub.f32 0.0, %v16748_v45 }
 0xf9d   : > { %v9587_v58 = vadd.f32 -0.28449672, %v9523_v32  ;;  %v9333_v3 = vadd.f32 -1.4531521, %v9269_v6  ;;  %v16846_v37 = vadd.f32 %v8748_v16, %v16158_v19  ;;  %v16848_v43 = vpop.eup %13080  ;;  %13092 = vpow2.f32 %v10001_v35 }
 0xf9e   : > { %v9081_v51 = vadd.f32 1.0, %v9017_v7  ;;  %18455 = vst [vmem:[#allocation101_spill] sm:$0xff] %v16848_v43  ;;  %v9074_v5 = vadd.f32 1.0, %v9010_v31  ;;  %v9012_v27 = vmul.f32 0.3275911, %v8948_v18  ;;  %v16851_v2 = vmul.f32 0.5, %v16720_v38 }
 0xf9f   : > { %v16853_v44 = vpop.eup %13082  ;;  %v9649_v1 = vmul.f32 %v16739_v60, %v9585_v57  ;;  %v9908_v24 = vmul.f32 %v9844_v61, %v8948_v18  ;;  %v16857_v32 = vmul.f32 0.70710677, %v16839_v47  ;;  %v9999_v6 = vmul.f32 1.442695, %v9906_v59 }
 0xfa0   : > { %13094 = vrcp.f32 %v9081_v51  ;;  %v9909_v16 = vmul.f32 %v9845_v33, %v16748_v45  ;;  %v8745_v7 = vadd.f32 %v8744_v21, %v16206_v41  ;;  %v16862_v35 = vmul.f32 0.70710677, %v16846_v37 }
 0xfa1   : > { %18456 = vst [vmem:[#allocation102_spill] sm:$0xff] %v16857_v32  ;;  %v10349_v38 = vsel %vm10221_vm1, %v10285_v0, %v10157_v28  ;;  %v10287_v31 = vsub.f32 0.0, %v10159_v56  ;;  %v9651_v34 = vmul.f32 %v16771_v50, %v9587_v58  ;;  %v9397_v18 = vmul.f32 %v16833_v63, %v9333_v3  ;;  %v16868_v61 = vpop.eup %13084 }
 0xfa2   : > { %18457 = vst [vmem:[#allocation103_spill] sm:$0xff] %v16868_v61  ;;  %v9076_v57 = vadd.f32 1.0, %v9012_v27  ;;  %v9271_v59 = vmul.f32 1.0614054, %v16853_v44  ;;  %v9847_v45 = vsub.f32 0.0, %v16763_v29  ;;  %v16875_v33 = vpop.eup %13086  ;;  %13096 = vrcp.f32 %v9074_v5  ;;  %v8589_v61 = vpop.f32.mrf.mxu1 }
 0xfa3   : > { %v16873_v21 = vand.u32 2147483647, %v16862_v35  ;;  %18458 = vst [vmem:[#allocation104_spill] sm:$0xff] %v16875_v33  ;;  %v9713_v51 = vadd.f32 0.2548296, %v9649_v1  ;;  %v16878_v0 = vpop.eup %13088  ;;  %v10413_v58 = vadd.f32 1.0, %v10349_v38  ;;  %13098 = vpow2.f32 %v9999_v6  ;;  %v8750_v5 = vpop.f32.mrf.mxu0 }
 0xfa4   : > { %v10003_v40 = vmul.f32 1.442695, %v9908_v24  ;;  %v8950_v28 = vand.u32 2147483647, %v16857_v32  ;;  %18459 = vst [vmem:[#allocation105_spill] sm:$0xff] %v16878_v0  ;;  %v10351_v30 = vsel %vm10223_vm2, %v10287_v31, %v10159_v56  ;;  %13100 = vrcp.f32 %v9076_v57 }
 0xfa5   : > { %v16880_v3 = vmul.f32 0.70710677, %v8745_v7  ;;  %v9019_v27 = vmul.f32 0.3275911, %v16873_v21  ;;  %v13091_v54 = vpop.eup %13090  ;;  %v9715_v13 = vadd.f32 0.2548296, %v9651_v34  ;;  %v9911_v32 = vmul.f32 %v9847_v45, %v16763_v29  ;;  %v8593_v34 = vpop.f32.mrf.mxu1 }
 0xfa6   : > { %v9461_v33 = vadd.f32 1.4214138, %v9397_v18  ;;  %v10005_v1 = vmul.f32 1.442695, %v9909_v16  ;;  %v9335_v24 = vadd.f32 -1.4531521, %v9271_v59  ;;  %v9777_v6 = vmul.f32 %v16739_v60, %v9713_v51  ;;  %v8754_v60 = vpop.f32.mrf.mxu0 }
 0xfa7   : > { %18460 = vst [vmem:[#allocation106_spill] sm:$0xff] %v16880_v3  ;;  %v9083_v0 = vadd.f32 1.0, %v9019_v27  ;;  %13102 = vpow2.f32 %v10003_v40  ;;  %v16888_v38 = vmul.f32 0.5, %v16736_v25  ;;  %v9014_v55 = vmul.f32 0.3275911, %v8950_v28 }
 0xfa8   : > { %v10415_v43 = vadd.f32 1.0, %v10351_v30  ;;  %v9846_v36 = vsub.f32 0.0, %v8950_v28  ;;  %v8952_v20 = vand.u32 2147483647, %v16880_v3  ;;  %v16892_v56 = vmul.f32 %v10413_v58, %v16723_v12 }
 0xfa9   : > { %13104 = vrcp.f32 %v9083_v0  ;;  %v9779_v16 = vmul.f32 %v16771_v50, %v9715_v13  ;;  %v9525_v29 = vmul.f32 %v16833_v63, %v9461_v33  ;;  %v9399_v31 = vmul.f32 %v16853_v44, %v9335_v24 }
 0xfaa   : > { %18461 = vst [vmem:[#allocation107_spill] sm:$0xff] %v16892_v56  ;;  %13106 = vpow2.f32 %v10005_v1  ;;  %v10009_v25 = vmul.f32 1.442695, %v9911_v32  ;;  %v16898_v18 = vmul.f32 0.5, %v16839_v47  ;;  %v16901_v30 = vadd.f32 %v8589_v61, %v16202_v17  ;;  %v13093_v57 = vpop.eup %13092 }
 0xfab   : > { %v10097_v59 = vmul.f32 %v13091_v54, %v9777_v6  ;;  %v9078_v45 = vadd.f32 1.0, %v9014_v55  ;;  %v16903_v12 = vmul.f32 0.5, %v8745_v7  ;;  %v16906_v50 = vadd.f32 %v8593_v34, %v16156_v22 }
 0xfac   : > { %18462 = vst [vmem:[#allocation108_spill] sm:$0xff] %v16898_v18  ;;  %v16911_v33 = vmul.f32 %v10415_v43, %v16726_v48  ;;  %v9910_v32 = vmul.f32 %v9846_v36, %v8950_v28  ;;  %v9848_v51 = vsub.f32 0.0, %v8952_v20  ;;  %v16914_v47 = vadd.f32 %v8754_v60, %v16158_v19 }
 0xfad   : > { %18463 = vst [vmem:[#allocation109_spill] sm:$0xff] %v16903_v12  ;;  %v16908_v13 = vpop.eup %13094  ;;  %v10099_v61 = vmul.f32 %v13093_v57, %v9779_v16  ;;  %v9589_v40 = vadd.f32 -0.28449672, %v9525_v29  ;;  %v9016_v0 = vmul.f32 0.3275911, %v8952_v20  ;;  %v9849_v55 = vsub.f32 0.0, %v16831_v9 }
 0xfae   : > { %18464 = vst [vmem:[#allocation110_spill] sm:$0xff] %v16911_v33  ;;  %vm10225_vm3 = vcmp.lt.f32.partialorder %v16643_v10, 0.0  ;;  %v9463_v54 = vadd.f32 1.4214138, %v9399_v31  ;;  %13108 = vpow2.f32 %v10009_v25  ;;  %v16919_v7 = vmul.f32 0.70710677, %v16901_v30 }
 0xfaf   : > { %v16922_v48 = vmul.f32 0.70710677, %v16906_v50  ;;  %v10161_v36 = vsub.f32 1.0, %v10097_v59  ;;  %13110 = vrcp.f32 %v9078_v45  ;;  %v9273_v43 = vmul.f32 1.0614054, %v16908_v13  ;;  %v16928_v58 = vpop.eup %13096 }
 0xfb0   : > { %18465 = vst [vmem:[#allocation111_spill] sm:$0xff] %v16919_v7  ;;  %v16926_v28 = vmul.f32 0.70710677, %v16914_v47  ;;  %vm10227_vm4 = vcmp.lt.f32.partialorder %v16667_v14, 0.0  ;;  %v10007_v27 = vmul.f32 1.442695, %v9910_v32  ;;  %v9912_v1 = vmul.f32 %v9848_v51, %v8952_v20  ;;  %v16937_v34 = vpop.eup %13098 }
 0xfb1   : > { %v16932_v24 = vadd.f32 %v8750_v5, %v16206_v41  ;;  %v16935_v6 = vand.u32 2147483647, %v16922_v48  ;;  %18466 = vst [vmem:[#allocation112_spill] sm:$0xff] %v16937_v34  ;;  %v10163_v16 = vsub.f32 1.0, %v10099_v61  ;;  %v9653_v29 = vmul.f32 %v16833_v63, %v9589_v40  ;;  %v16947_v59 = vpop.eup %13100 }
 0xfb2   : > { %v9913_v60 = vmul.f32 %v9849_v55, %v16831_v9  ;;  %v16942_v31 = vand.u32 2147483647, %v16926_v28  ;;  %v9527_v25 = vmul.f32 %v16853_v44, %v9463_v54  ;;  %v9080_v57 = vadd.f32 1.0, %v9016_v0  ;;  %18467 = vst [vmem:[#allocation113_spill] sm:$0xff] %v16947_v59 }
 0xfb3   : > { %v8954_v20 = vand.u32 2147483647, %v16919_v7  ;;  %v9021_v5 = vmul.f32 0.3275911, %v16935_v6  ;;  %v10289_v45 = vsub.f32 0.0, %v10161_v36  ;;  %v9851_v51 = vsub.f32 0.0, %v16873_v21 }
 0xfb4   : > { %v9337_v32 = vadd.f32 -1.4531521, %v9273_v43  ;;  %v9023_v61 = vmul.f32 0.3275911, %v16942_v31  ;;  %v16951_v40 = vpop.eup %13102  ;;  %13112 = vpow2.f32 %v10007_v27  ;;  %v10011_v9 = vmul.f32 1.442695, %v9912_v1 }
 0xfb5   : > { %18468 = vst [vmem:[#allocation114_spill] sm:$0xff] %v16951_v40  ;;  %v16954_v55 = vmul.f32 0.70710677, %v16932_v24  ;;  %v9085_v0 = vadd.f32 1.0, %v9021_v5  ;;  %v10291_v12 = vsub.f32 0.0, %v10163_v16  ;;  %v9850_v59 = vsub.f32 0.0, %v8954_v20 }
 0xfb6   : > { %v16956_v54 = vpop.eup %13104  ;;  %v9717_v18 = vadd.f32 0.2548296, %v9653_v29  ;;  %v10013_v7 = vmul.f32 1.442695, %v9913_v60  ;;  %v9087_v3 = vadd.f32 1.0, %v9023_v61  ;;  %v10353_v27 = vsel %vm10225_vm3, %v10289_v45, %v10161_v36 }
 0xfb7   : > { %18469 = vst [vmem:[#allocation115_spill] sm:$0xff] %v16954_v55  ;;  %v13107_v34 = vpop.eup %13106  ;;  %v9591_v43 = vadd.f32 -0.28449672, %v9527_v25  ;;  %v9275_v33 = vmul.f32 1.0614054, %v16956_v54  ;;  %13114 = vrcp.f32 %v9085_v0  ;;  %v9401_v1 = vmul.f32 %v16908_v13, %v9337_v32 }
 0xfb8   : > { %v9915_v40 = vmul.f32 %v9851_v51, %v16873_v21  ;;  %13116 = vrcp.f32 %v9087_v3  ;;  %v16964_v5 = vmul.f32 0.5, %v16806_v46  ;;  %v9018_v29 = vmul.f32 0.3275911, %v8954_v20 }
 0xfb9   : > { %13118 = vrcp.f32 %v9080_v57  ;;  %v8956_v60 = vand.u32 2147483647, %v16954_v55  ;;  %v10355_v25 = vsel %vm10227_vm4, %v10291_v12, %v10163_v16  ;;  %v9781_v61 = vmul.f32 %v16833_v63, %v9717_v18 }
 0xfba   : > { %v9339_v0 = vadd.f32 -1.4531521, %v9275_v33  ;;  %v9238_v10 = vmul.f32 1.0614054, %v16339_v23  ;;  %v10417_v36 = vadd.f32 1.0, %v10353_v27  ;;  %v9655_v45 = vmul.f32 %v16853_v44, %v9591_v43  ;;  %v8595_v33 = vpop.f32.mrf.mxu1 }
 0xfbb   : > { %13120 = vpow2.f32 %v10011_v9  ;;  %v9914_v21 = vmul.f32 %v9850_v59, %v8954_v20  ;;  %v13109_v3 = vpop.eup %13108  ;;  %v9465_v57 = vadd.f32 1.4214138, %v9401_v1  ;;  %v16973_v46 = vmul.f32 0.5, %v16846_v37 }
 0xfbc   : > { %13122 = vpow2.f32 %v10013_v7  ;;  %v10017_v32 = vmul.f32 1.442695, %v9915_v40  ;;  %v16975_v51 = vpop.eup %13110  ;;  %v10419_v14 = vadd.f32 1.0, %v10355_v25  ;;  %v16978_v63 = vmul.f32 0.5, %v16901_v30  ;;  %v8599_v25 = vpop.f32.mrf.mxu1 }
 0xfbd   : > { %18470 = vst [vmem:[#allocation116_spill] sm:$0xff] %v16975_v51  ;;  %v9082_v18 = vadd.f32 1.0, %v9018_v29  ;;  %v9852_v12 = vsub.f32 0.0, %v8956_v60  ;;  %v10101_v16 = vmul.f32 %v13107_v34, %v9781_v61  ;;  %v9403_v9 = vmul.f32 %v16956_v54, %v9339_v0 }
 0xfbe   : > { %18471 = vst [vmem:[#allocation117_spill] sm:$0xff] %v16978_v63  ;;  %v9020_v20 = vmul.f32 0.3275911, %v8956_v60  ;;  %v9302_v59 = vadd.f32 -1.4531521, %v9238_v10  ;;  %v16982_v7 = vmul.f32 %v10417_v36, %v16801_v39  ;;  %v9529_v27 = vmul.f32 %v16908_v13, %v9465_v57 }
 0xfbf   : > { %v9719_v37 = vadd.f32 0.2548296, %v9655_v45  ;;  %v10015_v43 = vmul.f32 1.442695, %v9914_v21  ;;  %v9240_v40 = vmul.f32 1.0614054, %v16353_v4  ;;  %13124 = vpow2.f32 %v10017_v32 }
 0xfc0   : > { %18472 = vst [vmem:[#allocation118_spill] sm:$0xff] %v16982_v7  ;;  %v16987_v30 = vmul.f32 0.5, %v16932_v24  ;;  %v9366_v1 = vmul.f32 %v16339_v23, %v9302_v59  ;;  %v16991_v34 = vmul.f32 %v10419_v14, %v16809_v11  ;;  %vm10229_vm5 = vcmp.lt.f32.partialorder %v16733_v62, 0.0  ;;  %v8756_v14 = vpop.f32.mrf.mxu0 }
 0xfc1   : > { %13126 = vrcp.f32 %v9082_v18  ;;  %v9916_v39 = vmul.f32 %v9852_v12, %v8956_v60  ;;  %v9304_v29 = vadd.f32 -1.4531521, %v9240_v40  ;;  %v16994_v61 = vpop.eup %13112  ;;  %v10165_v0 = vsub.f32 1.0, %v10101_v16 }
 0xfc2   : > { %18473 = vst [vmem:[#allocation119_spill] sm:$0xff] %v16987_v30  ;;  %18474 = vst [vmem:[#allocation120_spill] sm:$0xff] %v16991_v34  ;;  %v9467_v10 = vadd.f32 1.4214138, %v9403_v9  ;;  %v9084_v36 = vadd.f32 1.0, %v9020_v20  ;;  %v9783_v24 = vmul.f32 %v16853_v44, %v9719_v37  ;;  %13128 = vpow2.f32 %v10015_v43 }
 0xfc3   : > { %18475 = vst [vmem:[#allocation121_spill] sm:$0xff] %v16994_v61  ;;  %v9430_v45 = vadd.f32 1.4214138, %v9366_v1  ;;  %v16998_v21 = vmul.f32 0.5, %v16906_v50  ;;  %v9368_v11 = vmul.f32 %v16353_v4, %v9304_v29  ;;  %v9593_v32 = vadd.f32 -0.28449672, %v9529_v27 }
 0xfc4   : > { %v17001_v57 = vpop.eup %13114  ;;  %v17004_v60 = vmul.f32 0.5, %v16914_v47  ;;  %v17008_v12 = vadd.f32 %v8599_v25, %v16156_v22  ;;  %v10019_v44 = vmul.f32 1.442695, %v9916_v39  ;;  %v17014_v9 = vadd.f32 %v8595_v33, %v16202_v17 }
 0xfc5   : > { %v9494_v18 = vmul.f32 %v16339_v23, %v9430_v45  ;;  %v17010_v16 = vpop.eup %13116  ;;  %v9277_v50 = vmul.f32 1.0614054, %v17001_v57  ;;  %v9432_v20 = vadd.f32 1.4214138, %v9368_v11  ;;  %v10293_v37 = vsub.f32 0.0, %v10165_v0 }
 0xfc6   : > { %v17016_v59 = vpop.eup %13118  ;;  %v9531_v47 = vmul.f32 %v16956_v54, %v9467_v10  ;;  %13130 = vrcp.f32 %v9084_v36  ;;  %v17019_v40 = vmul.f32 %v13109_v3, %v9783_v24  ;;  %v9853_v27 = vsub.f32 0.0, %v16935_v6  ;;  %v8760_v3 = vpop.f32.mrf.mxu0 }
 0xfc7   : > { %18476 = vst [vmem:[#allocation122_spill] sm:$0xff] %v17016_v59  ;;  %v9558_v43 = vadd.f32 -0.28449672, %v9494_v18  ;;  %v9279_v1 = vmul.f32 1.0614054, %v17010_v16  ;;  %v9496_v39 = vmul.f32 %v16353_v4, %v9432_v20  ;;  %v9657_v33 = vmul.f32 %v16908_v13, %v9593_v32 }
 0xfc8   : > { %v17024_v29 = vpop.eup %13120  ;;  %v17028_v25 = vadd.f32 %v8756_v14, %v16206_v41  ;;  %v17032_v10 = vmul.f32 0.70710677, %v17008_v12  ;;  %13132 = vpow2.f32 %v10019_v44  ;;  %v9341_v24 = vadd.f32 -1.4531521, %v9277_v50 }
 0xfc9   : > { %18477 = vst [vmem:[#allocation123_spill] sm:$0xff] %v17024_v29  ;;  %v9622_v45 = vmul.f32 %v16339_v23, %v9558_v43  ;;  %v13123_v36 = vpop.eup %13122  ;;  %v17035_v11 = vmul.f32 0.70710677, %v17014_v9  ;;  %v9560_v18 = vadd.f32 -0.28449672, %v9496_v39  ;;  %v10357_v20 = vsel %vm10229_vm5, %v10293_v37, %v10165_v0 }
 0xfca   : > { %v9595_v32 = vadd.f32 -0.28449672, %v9531_v47  ;;  %v17040_v14 = vand.u32 2147483647, %v17032_v10  ;;  %vm10198_vm6 = vcmp.lt.f32.partialorder %v16227_v26, 0.0  ;;  %v9855_v63 = vsub.f32 0.0, %v16942_v31 }
 0xfcb   : > { %18478 = vst [vmem:[#allocation124_spill] sm:$0xff] %v17035_v11  ;;  %v9686_v30 = vadd.f32 0.2548296, %v9622_v45  ;;  %v9343_v43 = vadd.f32 -1.4531521, %v9279_v1  ;;  %v9624_v44 = vmul.f32 %v16353_v4, %v9560_v18  ;;  %v17046_v50 = vadd.f32 %v8760_v3, %v16158_v19 }
 0xfcc   : > { %v9721_v55 = vadd.f32 0.2548296, %v9657_v33  ;;  %v17049_v39 = vmul.f32 0.70710677, %v17028_v25  ;;  %v9025_v0 = vmul.f32 0.3275911, %v17040_v14  ;;  %v17053_v37 = vpop.eup %13124  ;;  %v9405_v1 = vmul.f32 %v17001_v57, %v9341_v24 }
 0xfcd   : > { %v9750_v62 = vmul.f32 %v16339_v23, %v9686_v30  ;;  %v10167_v47 = vsub.f32 1.0, %v17019_v40  ;;  %vm10231_vm7 = vcmp.lt.f32.partialorder %v16755_v8, 0.0  ;;  %v9917_v45 = vmul.f32 %v9853_v27, %v16935_v6  ;;  %v18481_v30 = vld [vmem:[#allocation49_spill] sm:$0xff] }
 0xfce   : > { %18479 = vst [vmem:[#allocation125_spill] sm:$0xff] %v17049_v39  ;;  %v9688_v3 = vadd.f32 0.2548296, %v9624_v44  ;;  %v17059_v18 = vpop.eup %13126  ;;  %vm10200_vm8 = vcmp.lt.f32.partialorder %v16232_v42, 0.0  ;;  %v9659_v33 = vmul.f32 %v16956_v54, %v9595_v32  ;;  %v8958_v23 = vand.u32 2147483647, %v17035_v11 }
 0xfcf   : > { %18480 = vst [vmem:[#allocation126_spill] sm:$0xff] %v17059_v18  ;;  %v10070_v29 = vmul.f32 %v18481_v30, %v9750_v62  ;;  %v9089_v61 = vadd.f32 1.0, %v9025_v0  ;;  %v10421_v34 = vadd.f32 1.0, %v10357_v20  ;;  %v9407_v40 = vmul.f32 %v17010_v16, %v9343_v43  ;;  %v17070_v6 = vpop.eup %13128  ;;  %v18483_v62 = vld [vmem:[#allocation48_spill] sm:$0xff] }
 0xfd0   : > { %v9752_v7 = vmul.f32 %v16353_v4, %v9688_v3  ;;  %v17068_v24 = vmul.f32 0.70710677, %v17046_v50  ;;  %18482 = vst [vmem:[#allocation49_spill] sm:$0xff] %v17070_v6  ;;  %v9785_v27 = vmul.f32 %v16908_v13, %v9721_v55  ;;  %v8960_v44 = vand.u32 2147483647, %v17049_v39 }
 0xfd1   : > { %v10134_v32 = vsub.f32 1.0, %v10070_v29  ;;  %13134 = vrcp.f32 %v9089_v61  ;;  %v10295_v11 = vsub.f32 0.0, %v10167_v47  ;;  %v9469_v18 = vadd.f32 1.4214138, %v9405_v1 }
 0xfd2   : > { %v10072_v0 = vmul.f32 %v18483_v62, %v9752_v7  ;;  %v17076_v20 = vand.u32 2147483647, %v17068_v24  ;;  %v9723_v43 = vadd.f32 0.2548296, %v9659_v33  ;;  %v10021_v4 = vmul.f32 1.442695, %v9917_v45 }
 0xfd3   : > { %v9854_v3 = vsub.f32 0.0, %v8958_v23  ;;  %v10262_v30 = vsub.f32 0.0, %v10134_v32  ;;  %v17078_v59 = vpop.eup %13130  ;;  %v9471_v6 = vadd.f32 1.4214138, %v9407_v40  ;;  %v9919_v13 = vmul.f32 %v9855_v63, %v16942_v31 }
 0xfd4   : > { %18484 = vst [vmem:[#allocation48_spill] sm:$0xff] %v17078_v59  ;;  %v10136_v55 = vsub.f32 1.0, %v10072_v0  ;;  %v9027_v29 = vmul.f32 0.3275911, %v17076_v20  ;;  %v17082_v61 = vmul.f32 %v13123_v36, %v9785_v27  ;;  %v9022_v1 = vmul.f32 0.3275911, %v8958_v23 }
 0xfd5   : > { %v9856_v39 = vsub.f32 0.0, %v8960_v44  ;;  %v10326_v7 = vsel %vm10198_vm6, %v10262_v30, %v10134_v32  ;;  %v9533_v33 = vmul.f32 %v17001_v57, %v9469_v18  ;;  %v17087_v56 = vpop.eup %13132  ;;  %v10359_v31 = vsel %vm10231_vm7, %v10295_v11, %v10167_v47  ;;  %v18485_v0 = vld [vmem:[#allocation43_spill] sm:$0xff] }
 0xfd6   : > { %v10390_v45 = vadd.f32 1.0, %v10326_v7  ;;  %v10264_v62 = vsub.f32 0.0, %v10136_v55  ;;  %v9091_v51 = vadd.f32 1.0, %v9027_v29  ;;  %v9787_v63 = vmul.f32 %v16956_v54, %v9723_v43  ;;  %v18488_v29 = vld [vmem:[#allocation50_spill] sm:$0xff]  ;;  %v8601_v7 = vpop.f32.mrf.mxu1 }
 0xfd7   : > { %v9918_v40 = vmul.f32 %v9854_v3, %v8958_v23  ;;  %v9024_v36 = vmul.f32 0.3275911, %v8960_v44  ;;  %v9535_v27 = vmul.f32 %v17010_v16, %v9471_v6  ;;  %vm10233_vm9 = vcmp.lt.f32.partialorder %v16818_v15, 0.0  ;;  %v18486_v23 = vld [vmem:[#allocation51_spill] sm:$0xff] }
 0xfd8   : > { %v10454_v59 = vmul.f32 %v10390_v45, %v18485_v0  ;;  %v10328_v26 = vsel %vm10200_vm8, %v10264_v62, %v10136_v55  ;;  %13136 = vrcp.f32 %v9091_v51  ;;  %v10025_v18 = vmul.f32 1.442695, %v9919_v13  ;;  %v18487_v51 = vld [vmem:[#allocation44_spill] sm:$0xff]  ;;  %v8605_v0 = vpop.f32.mrf.mxu1 }
 0xfd9   : > { %v9086_v32 = vadd.f32 1.0, %v9022_v1  ;;  %v10392_v30 = vadd.f32 1.0, %v10328_v26  ;;  %v9857_v8 = vsub.f32 0.0, %v17040_v14  ;;  %v10169_v11 = vsub.f32 1.0, %v17082_v61 }
 0xfda   : > { %v9597_v54 = vadd.f32 -0.28449672, %v9533_v33  ;;  %v9920_v47 = vmul.f32 %v9856_v39, %v8960_v44  ;;  %10652 = vmatprep.mubr.f32.mxu1 %v10454_v59  ;;  %v9242_v6 = vmul.f32 1.0614054, %v18486_v23  ;;  %v17101_v43 = vmul.f32 %v10421_v34, %v16851_v2  ;;  %v17109_v39 = vpop.f32.mrf.mxu0  ;;  %v18489_v34 = vld [vmem:[#allocation52_spill] sm:$0xff] }
 0xfdb   : > { %v10423_v42 = vadd.f32 1.0, %v10359_v31  ;;  %v9088_v3 = vadd.f32 1.0, %v9024_v36  ;;  %v10456_v55 = vmul.f32 %v10392_v30, %v18487_v51  ;;  %10653 = vmatmul.mubr.f32.vlgmr.msra.gmra.mxu1 %v18488_v29  ;;  %v17106_v13 = vmul.f32 %v17053_v37, %v9787_v63 }
 0xfdc   : > { %13138 = vpow2.f32 %v10021_v4  ;;  %v9599_v1 = vadd.f32 -0.28449672, %v9535_v27  ;;  %v10023_v61 = vmul.f32 1.442695, %v9918_v40  ;;  %v9921_v59 = vmul.f32 %v9857_v8, %v17040_v14  ;;  %v18490_v4 = vld [vmem:[#allocation59_spill] sm:$0xff]  ;;  %v8766_v30 = vpop.f32.mrf.mxu0 }
 0xfdd   : > { %13140 = vpow2.f32 %v10025_v18  ;;  %10797 = vmatprep.mubr.f32.mxu0 %v10456_v55  ;;  %v9306_v2 = vadd.f32 -1.4531521, %v9242_v6  ;;  %v9244_v44 = vmul.f32 1.0614054, %v18489_v34  ;;  %v10297_v45 = vsub.f32 0.0, %v10169_v11 }
 0xfde   : > { %v17112_v33 = vpop.eup %13134  ;;  %v9661_v62 = vmul.f32 %v17001_v57, %v9597_v54  ;;  %13142 = vrcp.f32 %v9086_v32  ;;  %v10027_v37 = vmul.f32 1.442695, %v9920_v47  ;;  %10798 = vmatmul.mubr.f32.vlgmr.msra.gmra.mxu0 %v18490_v4  ;;  %v17117_v31 = vmul.f32 %v10423_v42, %v16888_v38 }
 0xfdf   : > { %v17120_v63 = vmul.f32 0.5, %v17014_v9  ;;  %13144 = vrcp.f32 %v9088_v3  ;;  %v9281_v14 = vmul.f32 1.0614054, %v17112_v33  ;;  %v10171_v40 = vsub.f32 1.0, %v17106_v13 }
 0xfe0   : > { %18491 = vst [vmem:[#allocation43_spill] sm:$0xff] %v17117_v31  ;;  %v9663_v36 = vmul.f32 %v17010_v16, %v9599_v1  ;;  %13146 = vpow2.f32 %v10023_v61  ;;  %v17126_v27 = vmul.f32 0.5, %v17028_v25  ;;  %v10029_v18 = vmul.f32 1.442695, %v9921_v59  ;;  %v18538_v31 = vld [vmem:[#allocation76_spill] sm:$0xff] }
 0xfe1   : > { %18492 = vst [vmem:[#allocation51_spill] sm:$0xff] %v17120_v63  ;;  %v9345_v26 = vadd.f32 -1.4531521, %v9281_v14  ;;  %v9370_v38 = vmul.f32 %v18486_v23, %v9306_v2  ;;  %v9308_v32 = vadd.f32 -1.4531521, %v9244_v44  ;;  %v10361_v9 = vsel %vm10233_vm9, %v10297_v45, %v10169_v11 }
 0xfe2   : > { %18493 = vst [vmem:[#allocation44_spill] sm:$0xff] %v17126_v27  ;;  %v9725_v8 = vadd.f32 0.2548296, %v9661_v62  ;;  %13148 = vpow2.f32 %v10027_v37  ;;  %v9859_v54 = vsub.f32 0.0, %v17076_v20  ;;  %vm10235_vm10 = vcmp.lt.f32.partialorder %v16862_v35, 0.0 }
 0xfe3   : > { %v9409_v47 = vmul.f32 %v17112_v33, %v9345_v26  ;;  %v9434_v25 = vadd.f32 1.4214138, %v9370_v38  ;;  %v9372_v6 = vmul.f32 %v18489_v34, %v9308_v32  ;;  %v17136_v42 = vadd.f32 %v8605_v0, %v16156_v22 }
 0xfe4   : > { %v10299_v3 = vsub.f32 0.0, %v10171_v40  ;;  %v9727_v51 = vadd.f32 0.2548296, %v9663_v36  ;;  %v17139_v55 = vadd.f32 %v8601_v7, %v16202_v17  ;;  %v17142_v15 = vadd.f32 %v8766_v30, %v16158_v19 }
 0xfe5   : > { %v17144_v11 = vpop.eup %13136  ;;  %v9473_v29 = vadd.f32 1.4214138, %v9409_v47  ;;  %13150 = vpow2.f32 %v10029_v18  ;;  %v9498_v13 = vmul.f32 %v18486_v23, %v9434_v25  ;;  %v9436_v1 = vadd.f32 1.4214138, %v9372_v6 }
 0xfe6   : > { %v9789_v61 = vmul.f32 %v17001_v57, %v9725_v8  ;;  %v9283_v59 = vmul.f32 1.0614054, %v17144_v11  ;;  %v9923_v2 = vmul.f32 %v9859_v54, %v17076_v20  ;;  %v17151_v44 = vmul.f32 0.70710677, %v17136_v42 }
 0xfe7   : > { %v9537_v7 = vmul.f32 %v17112_v33, %v9473_v29  ;;  %v9562_v45 = vadd.f32 -0.28449672, %v9498_v13  ;;  %v9500_v62 = vmul.f32 %v18489_v34, %v9436_v1  ;;  %v17156_v37 = vmul.f32 0.70710677, %v17142_v15  ;;  %v18495_v1 = vld [vmem:[#allocation38_spill] sm:$0xff] }
 0xfe8   : > { %v9791_v4 = vmul.f32 %v17010_v16, %v9727_v51  ;;  %v9347_v14 = vadd.f32 -1.4531521, %v9283_v59  ;;  %v17160_v57 = vmul.f32 0.70710677, %v17139_v55  ;;  %v17163_v36 = vand.u32 2147483647, %v17151_v44 }
 0xfe9   : > { %v13139_v20 = vpop.eup %13138  ;;  %v9601_v0 = vadd.f32 -0.28449672, %v9537_v7  ;;  %v9626_v26 = vmul.f32 %v18486_v23, %v9562_v45  ;;  %v9564_v18 = vadd.f32 -0.28449672, %v9500_v62  ;;  %v17167_v38 = vand.u32 2147483647, %v17156_v37 }
 0xfea   : > { %18494 = vst [vmem:[#allocation50_spill] sm:$0xff] %v17160_v57  ;;  %v13141_v32 = vpop.eup %13140  ;;  %v17169_v30 = vmul.f32 %v13139_v20, %v9789_v61  ;;  %v9411_v16 = vmul.f32 %v17144_v11, %v9347_v14  ;;  %v10033_v8 = vmul.f32 1.442695, %v9923_v2  ;;  %v9029_v54 = vmul.f32 0.3275911, %v17163_v36 }
 0xfeb   : > { %v17173_v47 = vpop.eup %13142  ;;  %v9665_v25 = vmul.f32 %v17112_v33, %v9601_v0  ;;  %v9690_v6 = vadd.f32 0.2548296, %v9626_v26  ;;  %v9628_v51 = vmul.f32 %v18489_v34, %v9564_v18  ;;  %v9031_v29 = vmul.f32 0.3275911, %v17167_v38  ;;  %v18497_v26 = vld [vmem:[#allocation42_spill] sm:$0xff]  ;;  %v18499_v18 = vld [vmem:[#allocation25_spill] sm:$0xff] }
 0xfec   : > { %v17178_v13 = vpop.eup %13144  ;;  %vm10202_vm11 = vcmp.lt.f32.partialorder %v18495_v1, 0.0  ;;  %v10425_v61 = vadd.f32 1.0, %v10361_v9  ;;  %v10363_v59 = vsel %vm10235_vm10, %v10299_v3, %v10171_v40  ;;  %v10111_v2 = vmul.f32 %v13141_v32, %v9791_v4 }
 0xfed   : > { %v9475_v7 = vadd.f32 1.4214138, %v9411_v16  ;;  %v17183_v45 = vpop.eup %13146  ;;  %vm10237_vm12 = vcmp.lt.f32.partialorder %v16922_v48, 0.0  ;;  %v8962_v62 = vand.u32 2147483647, %v17160_v57  ;;  %v17189_v14 = vadd.f32 %v17109_v39, %v16206_v41 }
 0xfee   : > { %18496 = vst [vmem:[#allocation52_spill] sm:$0xff] %v17183_v45  ;;  %v9754_v20 = vmul.f32 %v18486_v23, %v9690_v6  ;;  %v9692_v0 = vadd.f32 0.2548296, %v9628_v51  ;;  %vm10204_vm13 = vcmp.lt.f32.partialorder %v18497_v26, 0.0  ;;  %v10173_v35 = vsub.f32 1.0, %v17169_v30  ;;  %v8607_v6 = vpop.f32.mrf.mxu1 }
 0xfef   : > { %v9729_v40 = vadd.f32 0.2548296, %v9665_v25  ;;  %v9539_v9 = vmul.f32 %v17144_v11, %v9475_v7  ;;  %v9093_v3 = vadd.f32 1.0, %v9029_v54  ;;  %v17195_v4 = vpop.eup %13148  ;;  %13152 = vpow2.f32 %v10033_v8  ;;  %v18502_v7 = vld [vmem:[#allocation56_spill] sm:$0xff] }
 0xff0   : > { %18498 = vst [vmem:[#allocation59_spill] sm:$0xff] %v17195_v4  ;;  %v10074_v32 = vmul.f32 %v18499_v18, %v9754_v20  ;;  %v9756_v16 = vmul.f32 %v18489_v34, %v9692_v0  ;;  %v9095_v39 = vadd.f32 1.0, %v9031_v29  ;;  %v17200_v27 = vmul.f32 %v10425_v61, %v16964_v5 }
 0xff1   : > { %v10175_v23 = vsub.f32 1.0, %v10111_v2  ;;  %vm10239_vm14 = vcmp.lt.f32.partialorder %v16926_v28, 0.0  ;;  %v17204_v30 = vmul.f32 0.5, %v17008_v12  ;;  %v9603_v25 = vadd.f32 -0.28449672, %v9539_v9 }
 0xff2   : > { %18500 = vst [vmem:[#allocation38_spill] sm:$0xff] %v17200_v27  ;;  %v10427_v54 = vadd.f32 1.0, %v10363_v59  ;;  %v17207_v51 = vmul.f32 0.70710677, %v17189_v14  ;;  %v10138_v8 = vsub.f32 1.0, %v10074_v32  ;;  %v10076_v20 = vmul.f32 %v18502_v7, %v9756_v16  ;;  %v13151_v34 = vpop.eup %13150  ;;  %v8768_v16 = vpop.f32.mrf.mxu0 }
 0xff3   : > { %v10301_v29 = vsub.f32 0.0, %v10173_v35  ;;  %v9793_v5 = vmul.f32 %v17112_v33, %v9729_v40  ;;  %v9667_v61 = vmul.f32 %v17144_v11, %v9603_v25  ;;  %13154 = vrcp.f32 %v9093_v3  ;;  %v8611_v7 = vpop.f32.mrf.mxu1 }
 0xff4   : > { %18501 = vst [vmem:[#allocation42_spill] sm:$0xff] %v17207_v51  ;;  %v9026_v2 = vmul.f32 0.3275911, %v8962_v62  ;;  %v10266_v0 = vsub.f32 0.0, %v10138_v8  ;;  %v10140_v12 = vsub.f32 1.0, %v10076_v20  ;;  %13156 = vrcp.f32 %v9095_v39 }
 0xff5   : > { %v10303_v9 = vsub.f32 0.0, %v10175_v23  ;;  %v17213_v59 = vmul.f32 0.5, %v17046_v50  ;;  %v9858_v18 = vsub.f32 0.0, %v8962_v62  ;;  %v17216_v32 = vadd.f32 %v8607_v6, %v16202_v17 }
 0xff6   : > { %v9731_v63 = vadd.f32 0.2548296, %v9667_v61  ;;  %v8964_v33 = vand.u32 2147483647, %v17207_v51  ;;  %v10330_v40 = vsel %vm10202_vm11, %v10266_v0, %v10138_v8  ;;  %v10268_v3 = vsub.f32 0.0, %v10140_v12  ;;  %v18504_v8 = vld [vmem:[#allocation45_spill] sm:$0xff] }
 0xff7   : > { %v17222_v25 = vmul.f32 %v10427_v54, %v16973_v46  ;;  %v10365_v50 = vsel %vm10237_vm12, %v10301_v29, %v10173_v35  ;;  %v10113_v39 = vmul.f32 %v13151_v34, %v9793_v5  ;;  %v10394_v20 = vadd.f32 1.0, %v10330_v40  ;;  %v8772_v29 = vpop.f32.mrf.mxu0 }
 0xff8   : > { %v9090_v57 = vadd.f32 1.0, %v9026_v2  ;;  %v10332_v6 = vsel %vm10204_vm13, %v10268_v3, %v10140_v12  ;;  %v17229_v61 = vadd.f32 %v8768_v16, %v16206_v41  ;;  %v17232_v51 = vadd.f32 %v8611_v7, %v16156_v22  ;;  %v18508_v7 = vld [vmem:[#allocation62_spill] sm:$0xff] }
 0xff9   : > { %18503 = vst [vmem:[#allocation25_spill] sm:$0xff] %v17222_v25  ;;  %v9922_v1 = vmul.f32 %v9858_v18, %v8962_v62  ;;  %v10458_v0 = vmul.f32 %v10394_v20, %v18504_v8  ;;  %v10396_v46 = vadd.f32 1.0, %v10332_v6  ;;  %v17236_v54 = vmul.f32 0.70710677, %v17216_v32  ;;  %v18506_v62 = vld [vmem:[#allocation47_spill] sm:$0xff]  ;;  %v18535_v25 = vld [vmem:[#allocation58_spill] sm:$0xff] }
 0xffa   : > { %v10429_v48 = vadd.f32 1.0, %v10365_v50  ;;  %v10367_v35 = vsel %vm10239_vm14, %v10303_v9, %v10175_v23  ;;  %vm10241_vm15 = vcmp.lt.f32.partialorder %v17032_v10, 0.0  ;;  %v9795_v26 = vmul.f32 %v17144_v11, %v9731_v63  ;;  %v18511_v6 = vld [vmem:[#allocation67_spill] sm:$0xff] }
 0xffb   : > { %18505 = vst [vmem:[#allocation56_spill] sm:$0xff] %v17236_v54  ;;  %v9860_v34 = vsub.f32 0.0, %v8964_v33  ;;  %v10177_v5 = vsub.f32 1.0, %v10113_v39  ;;  %v9028_v2 = vmul.f32 0.3275911, %v8964_v33  ;;  %10657 = vmatprep.mubr.f32.mxu1 %v10458_v0  ;;  %v10460_v12 = vmul.f32 %v10396_v46, %v18506_v62 }
 0xffc   : > { %v9861_v18 = vsub.f32 0.0, %v17163_v36  ;;  %v17245_v16 = vmul.f32 0.5, %v17139_v55  ;;  %10658 = vmatmul.mubr.f32.gmra.mxu1 %v18508_v7  ;;  %v9863_v28 = vsub.f32 0.0, %v17167_v38  ;;  %v17250_v23 = vmul.f32 0.70710677, %v17229_v61  ;;  %v13153_v11 = vpop.eup %13152 }
 0xffd   : > { %v17253_v63 = vmul.f32 0.70710677, %v17232_v51  ;;  %v10431_v9 = vadd.f32 1.0, %v10367_v35  ;;  %v17256_v40 = vmul.f32 0.5, %v17189_v14  ;;  %10802 = vmatprep.mubr.f32.mxu0 %v10460_v12  ;;  %v8966_v3 = vand.u32 2147483647, %v17236_v54 }
 0xffe   : > { %18507 = vst [vmem:[#allocation45_spill] sm:$0xff] %v17245_v16  ;;  %18509 = vst [vmem:[#allocation47_spill] sm:$0xff] %v17250_v23  ;;  %v17260_v55 = vadd.f32 %v8772_v29, %v16158_v19  ;;  %v10115_v50 = vmul.f32 %v13153_v11, %v9795_v26  ;;  %v10031_v39 = vmul.f32 1.442695, %v9922_v1  ;;  %v9924_v20 = vmul.f32 %v9860_v34, %v8964_v33 }
 0xfff   : > { %18510 = vst [vmem:[#allocation62_spill] sm:$0xff] %v17256_v40  ;;  %10803 = vmatmul.mubr.f32.gmra.mxu0 %v18511_v6  ;;  %v17264_v8 = vand.u32 2147483647, %v17253_v63  ;;  %v17267_v0 = vmul.f32 %v10429_v48, %v16998_v21  ;;  %v10305_v46 = vsub.f32 0.0, %v10177_v5  ;;  %13158 = vrcp.f32 %v9090_v57 }
0x1000   : > { %v9925_v14 = vmul.f32 %v9861_v18, %v17163_v36  ;;  %v17270_v35 = vpop.eup %13154  ;;  %v9092_v62 = vadd.f32 1.0, %v9028_v2  ;;  %v9927_v29 = vmul.f32 %v9863_v28, %v17167_v38  ;;  %v8968_v1 = vand.u32 2147483647, %v17250_v23 }
0x1001   : > { %18512 = vst [vmem:[#allocation67_spill] sm:$0xff] %v17267_v0  ;;  %v9033_v33 = vmul.f32 0.3275911, %v17264_v8  ;;  %v17275_v26 = vpop.eup %13156  ;;  %v17278_v34 = vmul.f32 %v10431_v9, %v17004_v60  ;;  %vm10243_vm0 = vcmp.lt.f32.partialorder %v17068_v24, 0.0  ;;  %v9030_v21 = vmul.f32 0.3275911, %v8966_v3 }
0x1002   : > { %v9862_v57 = vsub.f32 0.0, %v8966_v3  ;;  %v17282_v36 = vmul.f32 0.70710677, %v17260_v55  ;;  %v10179_v48 = vsub.f32 1.0, %v10115_v50  ;;  %13160 = vpow2.f32 %v10031_v39 }
0x1003   : > { %18513 = vst [vmem:[#allocation127_spill] sm:$0xff] %v17278_v34  ;;  %v10035_v2 = vmul.f32 1.442695, %v9924_v20  ;;  %v9097_v38 = vadd.f32 1.0, %v9033_v33  ;;  %v10369_v12 = vsel %vm10241_vm15, %v10305_v46, %v10177_v5  ;;  %v9285_v18 = vmul.f32 1.0614054, %v17270_v35  ;;  %v8613_v46 = vpop.f32.mrf.mxu1 }
0x1004   : > { %v10037_v7 = vmul.f32 1.442695, %v9925_v14  ;;  %v17288_v60 = vand.u32 2147483647, %v17282_v36  ;;  %13162 = vrcp.f32 %v9092_v62  ;;  %v9287_v28 = vmul.f32 1.0614054, %v17275_v26 }
0x1005   : > { %v10041_v11 = vmul.f32 1.442695, %v9927_v29  ;;  %v9864_v9 = vsub.f32 0.0, %v8968_v1  ;;  %v17292_v6 = vmul.f32 0.5, %v17136_v42  ;;  %v9094_v50 = vadd.f32 1.0, %v9030_v21 }
0x1006   : > { %v9926_v39 = vmul.f32 %v9862_v57, %v8966_v3  ;;  %13164 = vrcp.f32 %v9097_v38  ;;  %v10433_v20 = vadd.f32 1.0, %v10369_v12  ;;  %v10307_v10 = vsub.f32 0.0, %v10179_v48 }
0x1007   : > { %13166 = vpow2.f32 %v10035_v2  ;;  %v9035_v5 = vmul.f32 0.3275911, %v17288_v60  ;;  %v9349_v14 = vadd.f32 -1.4531521, %v9285_v18  ;;  %v17296_v62 = vmul.f32 0.5, %v17142_v15  ;;  %v18517_v18 = vld [vmem:[#allocation54_spill] sm:$0xff] }
0x1008   : > { %13168 = vpow2.f32 %v10037_v7  ;;  %v9032_v33 = vmul.f32 0.3275911, %v8968_v1  ;;  %v9351_v29 = vadd.f32 -1.4531521, %v9287_v28  ;;  %v17299_v42 = vmul.f32 0.5, %v17216_v32 }
0x1009   : > { %13170 = vpow2.f32 %v10041_v11  ;;  %v9928_v21 = vmul.f32 %v9864_v9, %v8968_v1  ;;  %v10039_v3 = vmul.f32 1.442695, %v9926_v39  ;;  %v17302_v57 = vmul.f32 0.5, %v17229_v61  ;;  %v18518_v39 = vld [vmem:[#allocation63_spill] sm:$0xff] }
0x100a   : > { %18514 = vst [vmem:[#allocation128_spill] sm:$0xff] %v17299_v42  ;;  %13172 = vrcp.f32 %v9094_v50  ;;  %v8614_v2 = vadd.f32 %v8613_v46, %v16202_v17  ;;  %v17306_v38 = vmul.f32 %v10433_v20, %v17204_v30  ;;  %v10371_v15 = vsel %vm10243_vm0, %v10307_v10, %v10179_v48  ;;  %v18520_v10 = vld [vmem:[#allocation73_spill] sm:$0xff] }
0x100b   : > { %18515 = vst [vmem:[#allocation129_spill] sm:$0xff] %v17302_v57  ;;  %v9099_v12 = vadd.f32 1.0, %v9035_v5  ;;  %v9246_v7 = vmul.f32 1.0614054, %v18517_v18  ;;  %v9413_v32 = vmul.f32 %v17270_v35, %v9349_v14  ;;  %v9096_v28 = vadd.f32 1.0, %v9032_v33 }
0x100c   : > { %18516 = vst [vmem:[#allocation130_spill] sm:$0xff] %v17306_v38  ;;  %v17313_v1 = vmul.f32 0.5, %v17232_v51  ;;  %v9865_v61 = vsub.f32 0.0, %v17264_v8  ;;  %v17316_v11 = vpop.eup %13158  ;;  %v9415_v9 = vmul.f32 %v17275_v26, %v9351_v29  ;;  %v10043_v30 = vmul.f32 1.442695, %v9928_v21 }
0x100d   : > { %v9310_v50 = vadd.f32 -1.4531521, %v9246_v7  ;;  %v9248_v24 = vmul.f32 1.0614054, %v18518_v39  ;;  %v10435_v48 = vadd.f32 1.0, %v10371_v15  ;;  %13174 = vpow2.f32 %v10039_v3 }
0x100e   : > { %v17320_v20 = vmul.f32 0.70710677, %v8614_v2  ;;  %v9250_v5 = vmul.f32 1.0614054, %v18520_v10  ;;  %13176 = vrcp.f32 %v9099_v12  ;;  %v9252_v14 = vmul.f32 1.0614054, %v16605_v53 }
0x100f   : > { %v9374_v51 = vmul.f32 %v18517_v18, %v9310_v50  ;;  %v9312_v46 = vadd.f32 -1.4531521, %v9248_v24  ;;  %v17325_v33 = vpop.eup %13160  ;;  %v9477_v57 = vadd.f32 1.4214138, %v9413_v32  ;;  %13178 = vrcp.f32 %v9096_v28 }
0x1010   : > { %18519 = vst [vmem:[#allocation54_spill] sm:$0xff] %v17320_v20  ;;  %18521 = vst [vmem:[#allocation63_spill] sm:$0xff] %v17325_v33  ;;  %v9929_v29 = vmul.f32 %v9865_v61, %v17264_v8  ;;  %v9314_v21 = vadd.f32 -1.4531521, %v9250_v5  ;;  %v9479_v7 = vadd.f32 1.4214138, %v9415_v9  ;;  %13180 = vpow2.f32 %v10043_v30 }
0x1011   : > { %v9438_v15 = vadd.f32 1.4214138, %v9374_v51  ;;  %v9376_v3 = vmul.f32 %v18518_v39, %v9312_v46  ;;  %v9316_v42 = vadd.f32 -1.4531521, %v9252_v14  ;;  %v17329_v38 = vpop.eup %13162  ;;  %v17332_v12 = vmul.f32 0.5, %v17260_v55  ;;  %v8774_v51 = vpop.f32.mrf.mxu0 }
0x1012   : > { %v8970_v50 = vand.u32 2147483647, %v17320_v20  ;;  %v9378_v24 = vmul.f32 %v18520_v10, %v9314_v21  ;;  %v17339_v8 = vmul.f32 %v10435_v48, %v17213_v59  ;;  %v17341_v28 = vmul.f32 0.5, %v8614_v2 }
0x1013   : > { %v17336_v32 = vpop.eup %13164  ;;  %v9502_v61 = vmul.f32 %v18517_v18, %v9438_v15  ;;  %v9440_v9 = vadd.f32 1.4214138, %v9376_v3  ;;  %v9541_v30 = vmul.f32 %v17270_v35, %v9477_v57  ;;  %v10045_v55 = vmul.f32 1.442695, %v9929_v29 }
0x1014   : > { %18522 = vst [vmem:[#allocation73_spill] sm:$0xff] %v17339_v8  ;;  %18523 = vst [vmem:[#allocation131_spill] sm:$0xff] %v17341_v28  ;;  %v17344_v5 = vpop.eup %13166  ;;  %v9442_v46 = vadd.f32 1.4214138, %v9378_v24  ;;  %v9380_v14 = vmul.f32 %v16605_v53, %v9316_v42  ;;  %v9543_v40 = vmul.f32 %v17275_v26, %v9479_v7  ;;  %v9867_v59 = vsub.f32 0.0, %v17288_v60 }
0x1015   : > { %18524 = vst [vmem:[#allocation132_spill] sm:$0xff] %v17344_v5  ;;  %v17348_v21 = vpop.eup %13168  ;;  %v9566_v2 = vadd.f32 -0.28449672, %v9502_v61  ;;  %v9504_v48 = vmul.f32 %v18518_v39, %v9440_v9  ;;  %v9289_v3 = vmul.f32 1.0614054, %v17336_v32  ;;  %v9866_v42 = vsub.f32 0.0, %v8970_v50 }
0x1016   : > { %v17353_v15 = vpop.eup %13170  ;;  %v9034_v28 = vmul.f32 0.3275911, %v8970_v50  ;;  %v9506_v57 = vmul.f32 %v18520_v10, %v9442_v46  ;;  %v9444_v29 = vadd.f32 1.4214138, %v9380_v14  ;;  %v8775_v8 = vadd.f32 %v8774_v51, %v16206_v41  ;;  %v18526_v14 = vld [vmem:[#allocation46_spill] sm:$0xff] }
0x1017   : > { %v17357_v24 = vpop.eup %13172  ;;  %v9630_v7 = vmul.f32 %v18517_v18, %v9566_v2  ;;  %v9254_v16 = vmul.f32 1.0614054, %v16672_v52  ;;  %v9605_v61 = vadd.f32 -0.28449672, %v9541_v30  ;;  %13182 = vpow2.f32 %v10045_v55 }
0x1018   : > { %18525 = vst [vmem:[#allocation133_spill] sm:$0xff] %v17357_v24  ;;  %v9568_v9 = vadd.f32 -0.28449672, %v9504_v48  ;;  %v9508_v20 = vmul.f32 %v16605_v53, %v9444_v29  ;;  %v9607_v23 = vadd.f32 -0.28449672, %v9543_v40  ;;  %v9931_v34 = vmul.f32 %v9867_v59, %v17288_v60 }
0x1019   : > { %v9694_v5 = vadd.f32 0.2548296, %v9630_v7  ;;  %v9570_v46 = vadd.f32 -0.28449672, %v9506_v57  ;;  %vm10206_vm1 = vcmp.lt.f32.partialorder %v18526_v14, 0.0  ;;  %v17365_v0 = vadd.f32 1.0, %v9034_v28 }
0x101a   : > { %v9353_v54 = vadd.f32 -1.4531521, %v9289_v3  ;;  %v9632_v51 = vmul.f32 %v18518_v39, %v9568_v9  ;;  %v9572_v2 = vadd.f32 -0.28449672, %v9508_v20  ;;  %v17368_v33 = vpop.eup %13174  ;;  %v9930_v30 = vmul.f32 %v9866_v42, %v8970_v50  ;;  %v18529_v28 = vld [vmem:[#allocation82_spill] sm:$0xff]  ;;  %v18531_v20 = vld [vmem:[#allocation40_spill] sm:$0xff] }
0x101b   : > { %18527 = vst [vmem:[#allocation46_spill] sm:$0xff] %v17368_v33  ;;  %v9758_v55 = vmul.f32 %v18517_v18, %v9694_v5  ;;  %v9634_v48 = vmul.f32 %v18520_v10, %v9570_v46  ;;  %v9318_v40 = vadd.f32 -1.4531521, %v9254_v16  ;;  %v17372_v29 = vpop.eup %13176  ;;  %v17374_v60 = vmul.f32 0.5, %v8775_v8  ;;  %v18532_v42 = vld [vmem:[#allocation53_spill] sm:$0xff] }
0x101c   : > { %v9696_v59 = vadd.f32 0.2548296, %v9632_v51  ;;  %v9636_v3 = vmul.f32 %v16605_v53, %v9572_v2  ;;  %v9256_v57 = vmul.f32 1.0614054, %v18529_v28  ;;  %v17378_v7 = vpop.eup %13178  ;;  %vm10208_vm2 = vcmp.lt.f32.partialorder %v18531_v20, 0.0  ;;  %v18533_v9 = vld [vmem:[#allocation57_spill] sm:$0xff] }
0x101d   : > { %18528 = vst [vmem:[#allocation134_spill] sm:$0xff] %v17374_v60  ;;  %18530 = vst [vmem:[#allocation82_spill] sm:$0xff] %v17378_v7  ;;  %v9669_v50 = vmul.f32 %v17270_v35, %v9605_v61  ;;  %v10078_v18 = vmul.f32 %v18532_v42, %v9758_v55  ;;  %v9698_v5 = vadd.f32 0.2548296, %v9634_v48  ;;  %v9382_v16 = vmul.f32 %v16672_v52, %v9318_v40  ;;  %v17387_v33 = vpop.eup %13180  ;;  %v18536_v40 = vld [vmem:[#allocation66_spill] sm:$0xff]  ;;  %v18539_v14 = vld [vmem:[#allocation41_spill] sm:$0xff] }
0x101e   : > { %vm10210_vm3 = vcmp.lt.f32.partialorder %v18533_v9, 0.0  ;;  %v9417_v46 = vmul.f32 %v17336_v32, %v9353_v54  ;;  %v9760_v51 = vmul.f32 %v18518_v39, %v9696_v59  ;;  %v9700_v2 = vadd.f32 0.2548296, %v9636_v3  ;;  %18534 = vst [vmem:[#allocation40_spill] sm:$0xff] %v17387_v33  ;;  %v18541_v20 = vld [vmem:[#allocation55_spill] sm:$0xff] }
0x101f   : > { %v9320_v60 = vadd.f32 -1.4531521, %v9256_v57  ;;  %vm10212_vm4 = vcmp.lt.f32.partialorder %v18535_v25, 0.0  ;;  %v9291_v4 = vmul.f32 1.0614054, %v17372_v29  ;;  %v10142_v61 = vsub.f32 1.0, %v10078_v18 }
0x1020   : > { %v9762_v55 = vmul.f32 %v18520_v10, %v9698_v5  ;;  %v9446_v48 = vadd.f32 1.4214138, %v9382_v16  ;;  %v17392_v42 = vmul.f32 1.442695, %v9931_v34  ;;  %v10080_v27 = vmul.f32 %v18536_v40, %v9760_v51  ;;  %v18537_v57 = vld [vmem:[#allocation74_spill] sm:$0xff]  ;;  %v18544_v25 = vld [vmem:[#allocation65_spill] sm:$0xff] }
0x1021   : > { %v9764_v54 = vmul.f32 %v16605_v53, %v9700_v2  ;;  %v9384_v39 = vmul.f32 %v18529_v28, %v9320_v60  ;;  %v17397_v59 = vmul.f32 0.70710677, %v8775_v8  ;;  %v10270_v3 = vsub.f32 0.0, %v10142_v61 }
0x1022   : > { %v10082_v33 = vmul.f32 %v18537_v57, %v9762_v55  ;;  %v9510_v45 = vmul.f32 %v16672_v52, %v9446_v48  ;;  %v9481_v7 = vadd.f32 1.4214138, %v9417_v46  ;;  %v10144_v18 = vsub.f32 1.0, %v10080_v27 }
0x1023   : > { %v10084_v10 = vmul.f32 %v18538_v31, %v9764_v54  ;;  %v9448_v5 = vadd.f32 1.4214138, %v9384_v39  ;;  %v9355_v34 = vadd.f32 -1.4531521, %v9291_v4  ;;  %v10334_v16 = vsel %vm10206_vm1, %v10270_v3, %v10142_v61  ;;  %v18540_v39 = vld [vmem:[#allocation68_spill] sm:$0xff] }
0x1024   : > { %v10146_v51 = vsub.f32 1.0, %v10082_v33  ;;  %v9574_v53 = vadd.f32 -0.28449672, %v9510_v45  ;;  %v9671_v60 = vmul.f32 %v17275_v26, %v9607_v23  ;;  %v10398_v8 = vadd.f32 1.0, %v10334_v16  ;;  %v17405_v24 = vpop.eup %13182  ;;  %v18542_v16 = vld [vmem:[#allocation70_spill] sm:$0xff] }
0x1025   : > { %v10272_v2 = vsub.f32 0.0, %v10144_v18  ;;  %v10148_v40 = vsub.f32 1.0, %v10084_v10  ;;  %v17407_v55 = vmul.f32 1.442695, %v9930_v30  ;;  %v9512_v31 = vmul.f32 %v18529_v28, %v9448_v5 }
0x1026   : > { %v10274_v46 = vsub.f32 0.0, %v10146_v51  ;;  %v9638_v27 = vmul.f32 %v16672_v52, %v9574_v53  ;;  %v9545_v4 = vmul.f32 %v17336_v32, %v9481_v7  ;;  %v10462_v61 = vmul.f32 %v10398_v8, %v18539_v14  ;;  %v18546_v14 = vld [vmem:[#allocation94_spill] sm:$0xff] }
0x1027   : > { %v10336_v45 = vsel %vm10208_vm2, %v10272_v2, %v10144_v18  ;;  %v10276_v23 = vsub.f32 0.0, %v10148_v40  ;;  %v9419_v33 = vmul.f32 %v17372_v29, %v9355_v34  ;;  %vm10214_vm5 = vcmp.lt.f32.partialorder %v18540_v39, 0.0 }
0x1028   : > { %v10400_v48 = vadd.f32 1.0, %v10336_v45  ;;  %v10338_v30 = vsel %vm10210_vm3, %v10274_v46, %v10146_v51  ;;  %v9702_v54 = vadd.f32 0.2548296, %v9638_v27  ;;  %v9733_v3 = vadd.f32 0.2548296, %v9669_v50  ;;  %10662 = vmatprep.mubr.f32.mxu1 %v10462_v61  ;;  %v18543_v51 = vld [vmem:[#allocation60_spill] sm:$0xff]  ;;  %v8617_v46 = vpop.f32.mrf.mxu1 }
0x1029   : > { %v10402_v57 = vadd.f32 1.0, %v10338_v30  ;;  %v10340_v7 = vsel %vm10212_vm4, %v10276_v23, %v10148_v40  ;;  %v9576_v10 = vadd.f32 -0.28449672, %v9512_v31  ;;  %v9735_v5 = vadd.f32 0.2548296, %v9671_v60  ;;  %10663 = vmatmul.mubr.f32.gmra.mxu1 %v18542_v16  ;;  %v18545_v60 = vld [vmem:[#allocation83_spill] sm:$0xff] }
0x102a   : > { %v10464_v18 = vmul.f32 %v10400_v48, %v18541_v20  ;;  %v10404_v34 = vadd.f32 1.0, %v10340_v7  ;;  %v9766_v53 = vmul.f32 %v16672_v52, %v9702_v54  ;;  %v9609_v9 = vadd.f32 -0.28449672, %v9545_v4  ;;  %v18547_v4 = vld [vmem:[#allocation71_spill] sm:$0xff]  ;;  %v18548_v48 = vld [vmem:[#allocation69_spill] sm:$0xff] }
0x102b   : > { %v10466_v8 = vmul.f32 %v10402_v57, %v18543_v51  ;;  %v9640_v2 = vmul.f32 %v18529_v28, %v9576_v10  ;;  %v9258_v50 = vmul.f32 1.0614054, %v16765_v49  ;;  %v9483_v27 = vadd.f32 1.4214138, %v9419_v33  ;;  %v18549_v30 = vld [vmem:[#allocation79_spill] sm:$0xff] }
0x102c   : > { %10807 = vmatprep.mubr.f32.mxu0 %v10464_v18  ;;  %v10468_v40 = vmul.f32 %v10404_v34, %v18544_v25  ;;  %v10086_v31 = vmul.f32 %v18545_v60, %v9766_v53  ;;  %v9260_v61 = vmul.f32 1.0614054, %v18546_v14  ;;  %13184 = vrcp.f32 %v17365_v0  ;;  %v8778_v0 = vpop.f32.mrf.mxu0 }
0x102d   : > { %v17432_v52 = vand.u32 2147483647, %v17397_v59  ;;  %10808 = vmatmul.mubr.f32.gmra.mxu0 %v18547_v4  ;;  %10667 = vmatprep.mubr.f32.mxu1 %v10466_v8  ;;  %v9704_v45 = vadd.f32 0.2548296, %v9640_v2  ;;  %v9322_v23 = vadd.f32 -1.4531521, %v9258_v50  ;;  %v9797_v33 = vmul.f32 %v17270_v35, %v9733_v3 }
0x102e   : > { %vm10216_vm6 = vcmp.lt.f32.partialorder %v18548_v48, 0.0  ;;  %10812 = vmatprep.mubr.f32.mxu0 %v10468_v40  ;;  %10668 = vmatmul.mubr.f32.gmra.mxu1 %v18549_v30  ;;  %v10150_v54 = vsub.f32 1.0, %v10086_v31  ;;  %v9324_v57 = vadd.f32 -1.4531521, %v9260_v61  ;;  %v17439_v7 = vadd.f32 %v8617_v46, %v16156_v22  ;;  %v18550_v8 = vld [vmem:[#allocation84_spill] sm:$0xff]  ;;  %v18551_v2 = vld [vmem:[#allocation85_spill] sm:$0xff] }
0x102f   : > { %v9799_v10 = vmul.f32 %v17275_v26, %v9735_v5  ;;  %v9673_v20 = vmul.f32 %v17336_v32, %v9609_v9  ;;  %v9768_v18 = vmul.f32 %v18529_v28, %v9704_v45  ;;  %v9386_v16 = vmul.f32 %v16765_v49, %v9322_v23  ;;  %v18552_v23 = vld [vmem:[#allocation72_spill] sm:$0xff] }
0x1030   : > { %v9547_v34 = vmul.f32 %v17372_v29, %v9483_v27  ;;  %v10278_v35 = vsub.f32 0.0, %v10150_v54  ;;  %v9388_v3 = vmul.f32 %v18546_v14, %v9324_v57  ;;  %v17448_v53 = vmul.f32 0.70710677, %v17439_v7 }
0x1031   : > { %v9036_v51 = vmul.f32 0.3275911, %v17432_v52  ;;  %10813 = vmatmul.mubr.f32.gmra.mxu0 %v18550_v8  ;;  %v10088_v26 = vmul.f32 %v18551_v2, %v9768_v18  ;;  %v9450_v5 = vadd.f32 1.4214138, %v9386_v16  ;;  %v17454_v9 = vadd.f32 %v8778_v0, %v16158_v19  ;;  %v18553_v0 = vld [vmem:[#allocation101_spill] sm:$0xff] }
0x1032   : > { %v17457_v28 = vmul.f32 %v17348_v21, %v9797_v33  ;;  %v10342_v50 = vsel %vm10214_vm5, %v10278_v35, %v10150_v54  ;;  %v9452_v46 = vadd.f32 1.4214138, %v9388_v3  ;;  %v17462_v27 = vand.u32 2147483647, %v17448_v53  ;;  %v18554_v3 = vld [vmem:[#allocation88_spill] sm:$0xff] }
0x1033   : > { %v17465_v25 = vmul.f32 %v17353_v15, %v9799_v10  ;;  %v10406_v40 = vadd.f32 1.0, %v10342_v50  ;;  %v10152_v60 = vsub.f32 1.0, %v10088_v26  ;;  %v9514_v31 = vmul.f32 %v16765_v49, %v9450_v5 }
0x1034   : > { %v9737_v61 = vadd.f32 0.2548296, %v9673_v20  ;;  %v9611_v4 = vadd.f32 -0.28449672, %v9547_v34  ;;  %v9516_v45 = vmul.f32 %v18546_v14, %v9452_v46  ;;  %v9037_v21 = vmul.f32 0.3275911, %v17462_v27 }
0x1035   : > { %v10470_v39 = vmul.f32 %v10406_v40, %v18552_v23  ;;  %v10280_v33 = vsub.f32 0.0, %v10152_v60  ;;  %v9578_v30 = vadd.f32 -0.28449672, %v9514_v31  ;;  %v17472_v54 = vmul.f32 0.70710677, %v17454_v9  ;;  %v18555_v46 = vld [vmem:[#allocation75_spill] sm:$0xff] }
0x1036   : > { %13186 = vpow2.f32 %v17392_v42  ;;  %v9580_v15 = vadd.f32 -0.28449672, %v9516_v45  ;;  %v9101_v57 = vadd.f32 1.0, %v9037_v21  ;;  %v9262_v10 = vmul.f32 1.0614054, %v18553_v0  ;;  %v18556_v40 = vld [vmem:[#allocation77_spill] sm:$0xff] }
0x1037   : > { %vm10245_vm7 = vcmp.lt.f32.partialorder %v17151_v44, 0.0  ;;  %v9868_v20 = vsub.f32 0.0, %v17432_v52  ;;  %10672 = vmatprep.mubr.f32.mxu1 %v10470_v39  ;;  %v10344_v18 = vsel %vm10216_vm6, %v10280_v33, %v10152_v60  ;;  %v9642_v16 = vmul.f32 %v16765_v49, %v9578_v30  ;;  %v18557_v21 = vld [vmem:[#allocation78_spill] sm:$0xff] }
0x1038   : > { %v17482_v34 = vand.u32 2147483647, %v17472_v54  ;;  %v10181_v35 = vsub.f32 1.0, %v17457_v28  ;;  %v10408_v42 = vadd.f32 1.0, %v10344_v18  ;;  %10673 = vmatmul.mubr.f32.gmra.mxu1 %v18554_v3  ;;  %v9644_v8 = vmul.f32 %v18546_v14, %v9580_v15  ;;  %v18559_v18 = vld [vmem:[#allocation91_spill] sm:$0xff] }
0x1039   : > { %13188 = vrcp.f32 %v9101_v57  ;;  %v10183_v2 = vsub.f32 1.0, %v17465_v25  ;;  %vm10247_vm8 = vcmp.lt.f32.partialorder %v17156_v37, 0.0  ;;  %v9801_v48 = vmul.f32 %v17336_v32, %v9737_v61  ;;  %v17491_v50 = vpop.eup %13184  ;;  %v18558_v61 = vld [vmem:[#allocation104_spill] sm:$0xff] }
0x103a   : > { %v9706_v26 = vadd.f32 0.2548296, %v9642_v16  ;;  %v9039_v5 = vmul.f32 0.3275911, %v17482_v34  ;;  %vm10218_vm9 = vcmp.lt.f32.partialorder %v18555_v46, 0.0  ;;  %v9675_v28 = vmul.f32 %v17372_v29, %v9611_v4 }
0x103b   : > { %v10472_v60 = vmul.f32 %v10408_v42, %v18556_v40  ;;  %v9708_v31 = vadd.f32 0.2548296, %v9644_v8  ;;  %v9326_v45 = vadd.f32 -1.4531521, %v9262_v10  ;;  %vm10220_vm10 = vcmp.lt.f32.partialorder %v18557_v21, 0.0  ;;  %v18560_v10 = vld [vmem:[#allocation92_spill] sm:$0xff] }
0x103c   : > { %v9932_v25 = vmul.f32 %v9868_v20, %v17432_v52  ;;  %v9770_v23 = vmul.f32 %v16765_v49, %v9706_v26  ;;  %v9103_v32 = vadd.f32 1.0, %v9039_v5  ;;  %v9264_v39 = vmul.f32 1.0614054, %v18558_v61  ;;  %v18561_v42 = vld [vmem:[#allocation95_spill] sm:$0xff] }
0x103d   : > { %v10309_v33 = vsub.f32 0.0, %v10181_v35  ;;  %v9100_v30 = vadd.f32 1.0, %v9036_v51  ;;  %10817 = vmatprep.mubr.f32.mxu0 %v10472_v60  ;;  %v9772_v15 = vmul.f32 %v18546_v14, %v9708_v31  ;;  %v9390_v4 = vmul.f32 %v18553_v0, %v9326_v45  ;;  %v8619_v45 = vpop.f32.mrf.mxu1 }
0x103e   : > { %v10121_v57 = vmul.f32 %v17405_v24, %v9801_v48  ;;  %10818 = vmatmul.mubr.f32.gmra.mxu0 %v18559_v18  ;;  %v10090_v16 = vmul.f32 %v18560_v10, %v9770_v23  ;;  %13190 = vrcp.f32 %v9103_v32  ;;  %v9328_v52 = vadd.f32 -1.4531521, %v9264_v39 }
0x103f   : > { %v10311_v20 = vsub.f32 0.0, %v10183_v2  ;;  %v9739_v49 = vadd.f32 0.2548296, %v9675_v28  ;;  %v10092_v3 = vmul.f32 %v18561_v42, %v9772_v15  ;;  %v9454_v8 = vadd.f32 1.4214138, %v9390_v4 }
0x1040   : > { %13192 = vpow2.f32 %v17407_v55  ;;  %v10051_v51 = vmul.f32 1.442695, %v9932_v25  ;;  %v10154_v26 = vsub.f32 1.0, %v10090_v16  ;;  %v9392_v14 = vmul.f32 %v18558_v61, %v9328_v52  ;;  %v8623_v52 = vpop.f32.mrf.mxu1 }
0x1041   : > { %v10373_v24 = vsel %vm10245_vm7, %v10309_v33, %v10181_v35  ;;  %vm10249_vm11 = vcmp.lt.f32.partialorder %v17253_v63, 0.0  ;;  %v10156_v48 = vsub.f32 1.0, %v10092_v3  ;;  %v9869_v5 = vsub.f32 0.0, %v17462_v27  ;;  %v8780_v35 = vpop.f32.mrf.mxu0 }
0x1042   : > { %v9518_v40 = vmul.f32 %v18553_v0, %v9454_v8  ;;  %v10185_v28 = vsub.f32 1.0, %v10121_v57  ;;  %13194 = vrcp.f32 %v9100_v30  ;;  %v10282_v60 = vsub.f32 0.0, %v10154_v26  ;;  %v18563_v8 = vld [vmem:[#allocation86_spill] sm:$0xff] }
0x1043   : > { %v9456_v31 = vadd.f32 1.4214138, %v9392_v14  ;;  %v10375_v55 = vsel %vm10247_vm8, %v10311_v20, %v10183_v2  ;;  %v9803_v25 = vmul.f32 %v17372_v29, %v9739_v49  ;;  %v10284_v23 = vsub.f32 0.0, %v10156_v48  ;;  %v13187_v32 = vpop.eup %13186  ;;  %v18562_v20 = vld [vmem:[#allocation80_spill] sm:$0xff]  ;;  %v8784_v3 = vpop.f32.mrf.mxu0 }
0x1044   : > { %v9582_v44 = vadd.f32 -0.28449672, %v9518_v40  ;;  %v10437_v39 = vadd.f32 1.0, %v10373_v24  ;;  %13196 = vpow2.f32 %v10051_v51  ;;  %v10346_v33 = vsel %vm10218_vm9, %v10282_v60, %v10154_v26  ;;  %v18564_v51 = vld [vmem:[#allocation81_spill] sm:$0xff] }
0x1045   : > { %v9520_v15 = vmul.f32 %v18558_v61, %v9456_v31  ;;  %v10410_v30 = vadd.f32 1.0, %v10346_v33  ;;  %v10348_v4 = vsel %vm10220_vm10, %v10284_v23, %v10156_v48  ;;  %v9933_v37 = vmul.f32 %v9869_v5, %v17462_v27 }
0x1046   : > { %v9646_v2 = vmul.f32 %v18553_v0, %v9582_v44  ;;  %v17523_v29 = vpop.eup %13188  ;;  %v17525_v57 = vadd.f32 1.0, %v10375_v55  ;;  %v10313_v18 = vsub.f32 0.0, %v10185_v28  ;;  %v10412_v10 = vadd.f32 1.0, %v10348_v4  ;;  %v18568_v44 = vld [vmem:[#allocation87_spill] sm:$0xff] }
0x1047   : > { %v9584_v16 = vadd.f32 -0.28449672, %v9520_v15  ;;  %v17527_v46 = vmul.f32 %v13187_v32, %v9803_v25  ;;  %v10474_v49 = vmul.f32 %v10410_v30, %v18562_v20  ;;  %v9293_v42 = vmul.f32 1.0614054, %v17523_v29 }
0x1048   : > { %v9710_v21 = vadd.f32 0.2548296, %v9646_v2  ;;  %vm10222_vm12 = vcmp.lt.f32.partialorder %v18563_v8, 0.0  ;;  %v17533_v27 = vmul.f32 %v10437_v39, %v17292_v6  ;;  %v10476_v26 = vmul.f32 %v10412_v10, %v18564_v51  ;;  %v18566_v6 = vld [vmem:[#allocation97_spill] sm:$0xff] }
0x1049   : > { %v9648_v14 = vmul.f32 %v18558_v61, %v9584_v16  ;;  %v17538_v24 = vadd.f32 %v8619_v45, %v16202_v17  ;;  %10677 = vmatprep.mubr.f32.mxu1 %v10474_v49  ;;  %v9357_v48 = vadd.f32 -1.4531521, %v9293_v42  ;;  %v10053_v5 = vmul.f32 1.442695, %v9933_v37  ;;  %v18573_v16 = vld [vmem:[#allocation105_spill] sm:$0xff] }
0x104a   : > { %v9774_v40 = vmul.f32 %v18553_v0, %v9710_v21  ;;  %v17542_v60 = vadd.f32 %v8623_v52, %v16156_v22  ;;  %v17546_v31 = vsel %vm10249_vm11, %v10313_v18, %v10185_v28  ;;  %10822 = vmatprep.mubr.f32.mxu0 %v10476_v26  ;;  %10678 = vmatmul.mubr.f32.gmra.mxu1 %v18566_v6  ;;  %v9871_v55 = vsub.f32 0.0, %v17482_v34  ;;  %v18569_v0 = vld [vmem:[#allocation98_spill] sm:$0xff]  ;;  %v18570_v28 = vld [vmem:[#allocation103_spill] sm:$0xff] }
0x104b   : > { %v9712_v25 = vadd.f32 0.2548296, %v9648_v14  ;;  %v17551_v45 = vadd.f32 %v8784_v3, %v16158_v19  ;;  %v17553_v23 = vpop.eup %13190  ;;  %vm10224_vm13 = vcmp.lt.f32.partialorder %v18568_v44, 0.0  ;;  %v18185_v22 = vsub.f32 1.0, %v17527_v46  ;;  %10823 = vmatmul.mubr.f32.gmra.mxu0 %v18569_v0 }
0x104c   : > { %18565 = vst [vmem:[#allocation53_spill] sm:$0xff] %v17542_v60  ;;  %v9421_v63 = vmul.f32 %v17523_v29, %v9357_v48  ;;  %v10094_v32 = vmul.f32 %v18570_v28, %v9774_v40  ;;  %v17561_v39 = vadd.f32 %v8780_v35, %v16206_v41  ;;  %v9295_v33 = vmul.f32 1.0614054, %v17553_v23 }
0x104d   : > { %18567 = vst [vmem:[#allocation57_spill] sm:$0xff] %v17551_v45  ;;  %v9776_v19 = vmul.f32 %v18558_v61, %v9712_v25  ;;  %v17566_v15 = vmul.f32 0.70710677, %v17538_v24  ;;  %v17569_v30 = vmul.f32 0.70710677, %v17542_v60  ;;  %v17571_v4 = vpop.eup %13192  ;;  %13198 = vpow2.f32 %v10053_v5 }
0x104e   : > { %v9485_v37 = vadd.f32 1.4214138, %v9421_v63  ;;  %v10158_v2 = vsub.f32 1.0, %v10094_v32  ;;  %v17574_v18 = vmul.f32 0.70710677, %v17551_v45  ;;  %v9935_v10 = vmul.f32 %v9871_v55, %v17482_v34 }
0x104f   : > { %18571 = vst [vmem:[#allocation58_spill] sm:$0xff] %v17569_v30  ;;  %v9359_v35 = vadd.f32 -1.4531521, %v9295_v33  ;;  %v10096_v52 = vmul.f32 %v18573_v16, %v9776_v19  ;;  %v17579_v61 = vand.u32 2147483647, %v17569_v30  ;;  %v17581_v20 = vpop.eup %13194  ;;  %vm10251_vm14 = vcmp.lt.f32.partialorder %v17282_v36, 0.0 }
0x1050   : > { %18572 = vst [vmem:[#allocation66_spill] sm:$0xff] %v17574_v18  ;;  %v9549_v49 = vmul.f32 %v17523_v29, %v9485_v37  ;;  %v10286_v42 = vsub.f32 0.0, %v10158_v2  ;;  %v17585_v21 = vmul.f32 0.70710677, %v17561_v39  ;;  %v8979_v3 = vand.u32 2147483647, %v17574_v18 }
0x1051   : > { %v9423_v51 = vmul.f32 %v17553_v23, %v9359_v35  ;;  %v10160_v26 = vsub.f32 1.0, %v10096_v52  ;;  %v8974_v34 = vand.u32 2147483647, %v17566_v15  ;;  %v9041_v14 = vmul.f32 0.3275911, %v17579_v61  ;;  %v17591_v48 = vpop.eup %13196  ;;  %v18574_v16 = vld [vmem:[#allocation89_spill] sm:$0xff] }
0x1052   : > { %v9613_v5 = vadd.f32 -0.28449672, %v9549_v49  ;;  %v10350_v40 = vsel %vm10222_vm12, %v10286_v42, %v10158_v2  ;;  %v9043_v6 = vmul.f32 0.3275911, %v8979_v3  ;;  %v9266_v55 = vmul.f32 1.0614054, %v16928_v58 }
0x1053   : > { %v9487_v25 = vadd.f32 1.4214138, %v9423_v51  ;;  %v10414_v0 = vadd.f32 1.0, %v10350_v40  ;;  %v10288_v63 = vsub.f32 0.0, %v10160_v26  ;;  %v9105_v28 = vadd.f32 1.0, %v9041_v14  ;;  %v18598_v18 = vld [vmem:[#allocation121_spill] sm:$0xff] }
0x1054   : > { %v10315_v32 = vsub.f32 0.0, %v18185_v22  ;;  %v9677_v33 = vmul.f32 %v17523_v29, %v9613_v5  ;;  %v8976_v19 = vand.u32 2147483647, %v17585_v21  ;;  %v9107_v37 = vadd.f32 1.0, %v9043_v6  ;;  %v8625_v6 = vpop.f32.mrf.mxu1  ;;  %v18575_v22 = vld [vmem:[#allocation90_spill] sm:$0xff] }
0x1055   : > { %v9551_v35 = vmul.f32 %v17553_v23, %v9487_v25  ;;  %v10478_v8 = vmul.f32 %v10414_v0, %v18574_v16  ;;  %v10352_v2 = vsel %vm10224_vm13, %v10288_v63, %v10160_v26  ;;  %13200 = vrcp.f32 %v9105_v28  ;;  %v18576_v16 = vld [vmem:[#allocation107_spill] sm:$0xff]  ;;  %v18577_v26 = vld [vmem:[#allocation113_spill] sm:$0xff] }
0x1056   : > { %v10057_v52 = vmul.f32 1.442695, %v9935_v10  ;;  %v10416_v49 = vadd.f32 1.0, %v10352_v2  ;;  %v9870_v42 = vsub.f32 0.0, %v8974_v34  ;;  %13202 = vrcp.f32 %v9107_v37  ;;  %v18580_v2 = vld [vmem:[#allocation110_spill] sm:$0xff] }
0x1057   : > { %v17607_v51 = vmul.f32 %v17525_v57, %v17296_v62  ;;  %v9741_v14 = vadd.f32 0.2548296, %v9677_v33  ;;  %10682 = vmatprep.mubr.f32.mxu1 %v10478_v8  ;;  %v9038_v5 = vmul.f32 0.3275911, %v8974_v34  ;;  %v9330_v40 = vadd.f32 -1.4531521, %v9266_v55 }
0x1058   : > { %v9615_v25 = vadd.f32 -0.28449672, %v9551_v35  ;;  %v10480_v0 = vmul.f32 %v10416_v49, %v18575_v22  ;;  %10683 = vmatmul.mubr.f32.gmra.mxu1 %v18576_v16  ;;  %v9872_v44 = vsub.f32 0.0, %v8976_v19  ;;  %v9268_v10 = vmul.f32 1.0614054, %v18577_v26 }
0x1059   : > { %v10441_v63 = vadd.f32 1.0, %v17546_v31  ;;  %v9873_v28 = vsub.f32 0.0, %v17579_v61  ;;  %v9875_v37 = vsub.f32 0.0, %v8979_v3  ;;  %v9394_v62 = vmul.f32 %v16928_v58, %v9330_v40 }
0x105a   : > { %13204 = vpow2.f32 %v10057_v52  ;;  %10827 = vmatprep.mubr.f32.mxu0 %v10480_v0  ;;  %v9934_v57 = vmul.f32 %v9870_v42, %v8974_v34  ;;  %v9332_v55 = vadd.f32 -1.4531521, %v9268_v10  ;;  %v17616_v33 = vadd.f32 %v8625_v6, %v16202_v17  ;;  %v13199_v22 = vpop.eup %13198 }
0x105b   : > { %v18579_v35 = vsub.f32 1.0, %v17527_v46  ;;  %v9805_v31 = vmul.f32 %v17523_v29, %v9741_v14  ;;  %10828 = vmatmul.mubr.f32.gmra.mxu0 %v18580_v2  ;;  %v9040_v49 = vmul.f32 0.3275911, %v8976_v19  ;;  %v9458_v16 = vadd.f32 1.4214138, %v9394_v62 }
0x105c   : > { %18578 = vst [vmem:[#allocation74_spill] sm:$0xff] %v17616_v33  ;;  %v9679_v52 = vmul.f32 %v17553_v23, %v9615_v25  ;;  %v9102_v40 = vadd.f32 1.0, %v9038_v5  ;;  %v9936_v34 = vmul.f32 %v9872_v44, %v8976_v19  ;;  %v9396_v42 = vmul.f32 %v18577_v26, %v9332_v55  ;;  %v8786_v5 = vpop.f32.mrf.mxu0 }
0x105d   : > { %v10379_v8 = vsel %vm10251_vm14, %v10315_v32, %v18579_v35  ;;  %v17627_v17 = vmul.f32 0.5, %v17439_v7  ;;  %v9937_v46 = vmul.f32 %v9873_v28, %v17579_v61  ;;  %v9939_v6 = vmul.f32 %v9875_v37, %v8979_v3 }
0x105e   : > { %v9522_v36 = vmul.f32 %v16928_v58, %v9458_v16  ;;  %v17632_v29 = vmul.f32 %v10441_v63, %v17313_v1  ;;  %v10055_v32 = vmul.f32 1.442695, %v9934_v57  ;;  %v9460_v14 = vadd.f32 1.4214138, %v9396_v42  ;;  %v18584_v16 = vld [vmem:[#allocation93_spill] sm:$0xff] }
0x105f   : > { %v17635_v0 = vmul.f32 0.70710677, %v17616_v33  ;;  %v10443_v19 = vadd.f32 1.0, %v10379_v8  ;;  %v17637_v25 = vmul.f32 %v13199_v22, %v9805_v31  ;;  %v9104_v44 = vadd.f32 1.0, %v9040_v49  ;;  %v18583_v22 = vld [vmem:[#allocation116_spill] sm:$0xff] }
0x1060   : > { %v9586_v7 = vadd.f32 -0.28449672, %v9522_v36  ;;  %v9743_v10 = vadd.f32 0.2548296, %v9679_v52  ;;  %13206 = vrcp.f32 %v9102_v40  ;;  %v10059_v61 = vmul.f32 1.442695, %v9936_v34 }
0x1061   : > { %18581 = vst [vmem:[#allocation76_spill] sm:$0xff] %v17635_v0  ;;  %v9524_v3 = vmul.f32 %v18577_v26, %v9460_v14  ;;  %v10061_v28 = vmul.f32 1.442695, %v9937_v46  ;;  %v10065_v37 = vmul.f32 1.442695, %v9939_v6  ;;  %v17642_v63 = vadd.f32 %v8786_v5, %v16206_v41 }
0x1062   : > { %v9650_v1 = vmul.f32 %v16928_v58, %v9586_v7  ;;  %v17644_v62 = vpop.eup %13200  ;;  %13208 = vpow2.f32 %v10055_v32  ;;  %v8978_v55 = vand.u32 2147483647, %v17635_v0  ;;  %v9270_v35 = vmul.f32 1.0614054, %v18583_v22  ;;  %v18587_v7 = vld [vmem:[#allocation112_spill] sm:$0xff]  ;;  %v18597_v0 = vld [vmem:[#allocation106_spill] sm:$0xff] }
0x1063   : > { %18582 = vst [vmem:[#allocation41_spill] sm:$0xff] %v17642_v63  ;;  %v9588_v57 = vadd.f32 -0.28449672, %v9524_v3  ;;  %v17648_v8 = vpop.eup %13202  ;;  %v18186_v31 = vsub.f32 1.0, %v17637_v25  ;;  %13210 = vrcp.f32 %v9104_v44  ;;  %v9297_v2 = vmul.f32 1.0614054, %v17644_v62 }
0x1064   : > { %v9714_v49 = vadd.f32 0.2548296, %v9650_v1  ;;  %vm10226_vm15 = vcmp.lt.f32.partialorder %v18584_v16, 0.0  ;;  %v9807_v41 = vmul.f32 %v17553_v23, %v9743_v10  ;;  %13212 = vpow2.f32 %v10059_v61  ;;  %v18586_v23 = vld [vmem:[#allocation96_spill] sm:$0xff]  ;;  %v18592_v16 = vld [vmem:[#allocation99_spill] sm:$0xff] }
0x1065   : > { %v9299_v52 = vmul.f32 1.0614054, %v17648_v8  ;;  %v9652_v40 = vmul.f32 %v18577_v26, %v9588_v57  ;;  %v9361_v34 = vadd.f32 -1.4531521, %v9297_v2  ;;  %13214 = vpow2.f32 %v10061_v28 }
0x1066   : > { %v9778_v42 = vmul.f32 %v16928_v58, %v9714_v49  ;;  %v17658_v46 = vmul.f32 0.70710677, %v17642_v63  ;;  %v17661_v6 = vmul.f32 %v10443_v19, %v17332_v12  ;;  %13216 = vpow2.f32 %v10065_v37  ;;  %v18588_v19 = vld [vmem:[#allocation122_spill] sm:$0xff] }
0x1067   : > { %v9716_v36 = vadd.f32 0.2548296, %v9652_v40  ;;  %v9042_v32 = vmul.f32 0.3275911, %v8978_v55  ;;  %v13205_v14 = vpop.eup %13204  ;;  %vm10228_vm0 = vcmp.lt.f32.partialorder %v18586_v23, 0.0  ;;  %v17666_v5 = vsub.f32 0.0, %v18186_v31 }
0x1068   : > { %18585 = vst [vmem:[#allocation68_spill] sm:$0xff] %v17658_v46  ;;  %v9363_v44 = vadd.f32 -1.4531521, %v9299_v52  ;;  %v10098_v10 = vmul.f32 %v18587_v7, %v9778_v42  ;;  %v9334_v58 = vadd.f32 -1.4531521, %v9270_v35  ;;  %v17669_v61 = vmul.f32 %v13205_v14, %v9807_v41  ;;  %v18589_v49 = vld [vmem:[#allocation114_spill] sm:$0xff] }
0x1069   : > { %v9780_v3 = vmul.f32 %v18577_v26, %v9716_v36  ;;  %v9874_v12 = vsub.f32 0.0, %v8978_v55  ;;  %v9272_v28 = vmul.f32 1.0614054, %v18588_v19  ;;  %v9425_v37 = vmul.f32 %v17644_v62, %v9361_v34  ;;  %v18590_v35 = vld [vmem:[#allocation126_spill] sm:$0xff]  ;;  %v18591_v7 = vld [vmem:[#allocation48_spill] sm:$0xff] }
0x106a   : > { %v10162_v1 = vsub.f32 1.0, %v10098_v10  ;;  %v17675_v57 = vand.u32 2147483647, %v17658_v46  ;;  %v9398_v2 = vmul.f32 %v18583_v22, %v9334_v58  ;;  %v9106_v40 = vadd.f32 1.0, %v9042_v32 }
0x106b   : > { %v10100_v52 = vmul.f32 %v18589_v49, %v9780_v3  ;;  %v9336_v42 = vadd.f32 -1.4531521, %v9272_v28  ;;  %v9274_v41 = vmul.f32 1.0614054, %v18590_v35  ;;  %v9427_v14 = vmul.f32 %v17648_v8, %v9363_v44  ;;  %v18594_v44 = vld [vmem:[#allocation118_spill] sm:$0xff] }
0x106c   : > { %v10290_v26 = vsub.f32 0.0, %v10162_v1  ;;  %v9462_v36 = vadd.f32 1.4214138, %v9398_v2  ;;  %v9276_v31 = vmul.f32 1.0614054, %v18591_v7  ;;  %v9938_v34 = vmul.f32 %v9874_v12, %v8978_v55 }
0x106d   : > { %v10164_v45 = vsub.f32 1.0, %v10100_v52  ;;  %v9400_v10 = vmul.f32 %v18588_v19, %v9336_v42  ;;  %v9338_v63 = vadd.f32 -1.4531521, %v9274_v41  ;;  %v17683_v60 = vpop.eup %13206  ;;  %v9489_v58 = vadd.f32 1.4214138, %v9425_v37 }
0x106e   : > { %v10354_v32 = vsel %vm10226_vm15, %v10290_v26, %v10162_v1  ;;  %v9526_v3 = vmul.f32 %v18583_v22, %v9462_v36  ;;  %v9340_v28 = vadd.f32 -1.4531521, %v9276_v31  ;;  %v9491_v55 = vadd.f32 1.4214138, %v9427_v14 }
0x106f   : > { %v10418_v49 = vadd.f32 1.0, %v10354_v32  ;;  %v10292_v2 = vsub.f32 0.0, %v10164_v45  ;;  %v9464_v46 = vadd.f32 1.4214138, %v9400_v10  ;;  %v17689_v33 = vpop.eup %13208  ;;  %v9402_v52 = vmul.f32 %v18590_v35, %v9338_v63 }
0x1070   : > { %v9590_v12 = vadd.f32 -0.28449672, %v9526_v3  ;;  %v9404_v42 = vmul.f32 %v18591_v7, %v9340_v28  ;;  %v17693_v37 = vpop.eup %13210  ;;  %v9044_v41 = vmul.f32 0.3275911, %v17675_v57  ;;  %v9553_v14 = vmul.f32 %v17644_v62, %v9489_v58 }
0x1071   : > { %v10482_v1 = vmul.f32 %v10418_v49, %v18592_v16  ;;  %v10356_v31 = vsel %vm10228_vm0, %v10292_v2, %v10164_v45  ;;  %v9528_v26 = vmul.f32 %v18588_v19, %v9464_v46  ;;  %v17700_v36 = vpop.eup %13212  ;;  %v9466_v32 = vadd.f32 1.4214138, %v9402_v52  ;;  %v18593_v46 = vld [vmem:[#allocation100_spill] sm:$0xff] }
0x1072   : > { %v10420_v10 = vadd.f32 1.0, %v10356_v31  ;;  %v9654_v63 = vmul.f32 %v18583_v22, %v9590_v12  ;;  %v17704_v3 = vpop.eup %13214  ;;  %13218 = vrcp.f32 %v9106_v40  ;;  %v10063_v28 = vmul.f32 1.442695, %v9938_v34  ;;  %v18595_v12 = vld [vmem:[#allocation102_spill] sm:$0xff] }
0x1073   : > { %10687 = vmatprep.mubr.f32.mxu1 %v10482_v1  ;;  %v9592_v49 = vadd.f32 -0.28449672, %v9528_v26  ;;  %v9468_v23 = vadd.f32 1.4214138, %v9404_v42  ;;  %v17706_v45 = vpop.eup %13216  ;;  %v9555_v2 = vmul.f32 %v17648_v8, %v9491_v55  ;;  %v9530_v31 = vmul.f32 %v18590_v35, %v9466_v32 }
0x1074   : > { %v10484_v16 = vmul.f32 %v10420_v10, %v18593_v46  ;;  %10688 = vmatmul.mubr.f32.gmra.mxu1 %v18594_v44  ;;  %v9718_v58 = vadd.f32 0.2548296, %v9654_v63  ;;  %vm10230_vm1 = vcmp.lt.f32.partialorder %v18595_v12, 0.0  ;;  %v9876_v52 = vsub.f32 0.0, %v17675_v57  ;;  %v18596_v10 = vld [vmem:[#allocation120_spill] sm:$0xff] }
0x1075   : > { %v9656_v40 = vmul.f32 %v18588_v19, %v9592_v49  ;;  %v9532_v34 = vmul.f32 %v18591_v7, %v9468_v23  ;;  %v9278_v42 = vmul.f32 1.0614054, %v17173_v47  ;;  %v9617_v1 = vadd.f32 -0.28449672, %v9553_v14  ;;  %v18604_v12 = vld [vmem:[#allocation108_spill] sm:$0xff] }
0x1076   : > { %10832 = vmatprep.mubr.f32.mxu0 %v10484_v16  ;;  %v9782_v55 = vmul.f32 %v18583_v22, %v9718_v58  ;;  %v9594_v26 = vadd.f32 -0.28449672, %v9530_v31  ;;  %v9280_v44 = vmul.f32 1.0614054, %v17178_v13  ;;  %13220 = vpow2.f32 %v10063_v28 }
0x1077   : > { %10833 = vmatmul.mubr.f32.gmra.mxu0 %v18596_v10  ;;  %v9720_v63 = vadd.f32 0.2548296, %v9656_v40  ;;  %v9596_v32 = vadd.f32 -0.28449672, %v9532_v34  ;;  %v9342_v46 = vadd.f32 -1.4531521, %v9278_v42  ;;  %v9940_v28 = vmul.f32 %v9876_v52, %v17675_v57 }
0x1078   : > { %vm10232_vm2 = vcmp.lt.f32.partialorder %v18597_v0, 0.0  ;;  %v9619_v49 = vadd.f32 -0.28449672, %v9555_v2  ;;  %v10102_v23 = vmul.f32 %v18598_v18, %v9782_v55  ;;  %v9658_v30 = vmul.f32 %v18590_v35, %v9594_v26  ;;  %v18599_v10 = vld [vmem:[#allocation111_spill] sm:$0xff] }
0x1079   : > { %v9344_v14 = vadd.f32 -1.4531521, %v9280_v44  ;;  %v9108_v16 = vadd.f32 1.0, %v9044_v41  ;;  %v9784_v22 = vmul.f32 %v18588_v19, %v9720_v63  ;;  %v9660_v58 = vmul.f32 %v18591_v7, %v9596_v32  ;;  %v18600_v2 = vld [vmem:[#allocation123_spill] sm:$0xff] }
0x107a   : > { %v9406_v31 = vmul.f32 %v17173_v47, %v9342_v46  ;;  %v10166_v40 = vsub.f32 1.0, %v10102_v23  ;;  %v9722_v34 = vadd.f32 0.2548296, %v9658_v30  ;;  %vm10234_vm3 = vcmp.lt.f32.partialorder %v18599_v10, 0.0  ;;  %v18601_v44 = vld [vmem:[#allocation115_spill] sm:$0xff] }
0x107b   : > { %v9408_v42 = vmul.f32 %v17178_v13, %v9344_v14  ;;  %v9681_v18 = vmul.f32 %v17644_v62, %v9617_v1  ;;  %v10104_v55 = vmul.f32 %v18600_v2, %v9784_v22  ;;  %v9724_v26 = vadd.f32 0.2548296, %v9660_v58  ;;  %v18603_v22 = vld [vmem:[#allocation49_spill] sm:$0xff] }
0x107c   : > { %v9470_v41 = vadd.f32 1.4214138, %v9406_v31  ;;  %vm10236_vm4 = vcmp.lt.f32.partialorder %v18601_v44, 0.0  ;;  %v9683_v19 = vmul.f32 %v17648_v8, %v9619_v49  ;;  %v10294_v63 = vsub.f32 0.0, %v10166_v40 }
0x107d   : > { %v9786_v32 = vmul.f32 %v18590_v35, %v9722_v34  ;;  %v9472_v57 = vadd.f32 1.4214138, %v9408_v42  ;;  %v18602_v30 = vsub.f32 1.0, %v17669_v61  ;;  %13222 = vrcp.f32 %v9108_v16 }
0x107e   : > { %v10168_v46 = vsub.f32 1.0, %v10104_v55  ;;  %v9788_v1 = vmul.f32 %v18591_v7, %v9724_v26  ;;  %v10067_v23 = vmul.f32 1.442695, %v9940_v28  ;;  %v10358_v14 = vsel %vm10230_vm1, %v10294_v63, %v10166_v40 }
0x107f   : > { %v17736_v52 = vsub.f32 0.0, %v18602_v30  ;;  %v10106_v58 = vmul.f32 %v18603_v22, %v9786_v32  ;;  %v9534_v49 = vmul.f32 %v17173_v47, %v9470_v41  ;;  %v17743_v31 = vadd.f32 0.2548296, %v9681_v18  ;;  %v17746_v2 = vpop.eup %13218  ;;  %v18605_v22 = vld [vmem:[#allocation109_spill] sm:$0xff] }
0x1080   : > { %v10422_v35 = vadd.f32 1.0, %v10358_v14  ;;  %v10296_v34 = vsub.f32 0.0, %v10168_v46  ;;  %v10108_v42 = vmul.f32 %v17087_v56, %v9788_v1  ;;  %v17748_v16 = vadd.f32 0.2548296, %v9683_v19 }
0x1081   : > { %v10170_v55 = vsub.f32 1.0, %v10106_v58  ;;  %v9598_v7 = vadd.f32 -0.28449672, %v9534_v49  ;;  %v9536_v28 = vmul.f32 %v17178_v13, %v9472_v57  ;;  %v9282_v18 = vmul.f32 1.0614054, %v17316_v11 }
0x1082   : > { %v10486_v40 = vmul.f32 %v10422_v35, %v18604_v12  ;;  %v10360_v26 = vsel %vm10232_vm2, %v10296_v34, %v10168_v46  ;;  %v10172_v41 = vsub.f32 1.0, %v10108_v42  ;;  %13224 = vpow2.f32 %v10067_v23  ;;  %v18606_v35 = vld [vmem:[#allocation124_spill] sm:$0xff] }
0x1083   : > { %v10424_v63 = vadd.f32 1.0, %v10360_v26  ;;  %v10298_v32 = vsub.f32 0.0, %v10170_v55  ;;  %v9662_v56 = vmul.f32 %v17173_v47, %v9598_v7  ;;  %v9600_v30 = vadd.f32 -0.28449672, %v9536_v28  ;;  %v17757_v57 = vpop.eup %13220  ;;  %v18609_v26 = vld [vmem:[#allocation43_spill] sm:$0xff] }
0x1084   : > { %10692 = vmatprep.mubr.f32.mxu1 %v10486_v40  ;;  %v10300_v19 = vsub.f32 0.0, %v10172_v41  ;;  %v9346_v1 = vadd.f32 -1.4531521, %v9282_v18  ;;  %v9284_v14 = vmul.f32 1.0614054, %v17329_v38  ;;  %vm10238_vm5 = vcmp.lt.f32.partialorder %v18606_v35, 0.0 }
0x1085   : > { %v10488_v58 = vmul.f32 %v10424_v63, %v18605_v22  ;;  %10693 = vmatmul.mubr.f32.gmra.mxu1 %v17101_v43  ;;  %v10362_v0 = vsel %vm10234_vm3, %v10298_v32, %v10170_v55  ;;  %v9726_v46 = vadd.f32 0.2548296, %v9662_v56  ;;  %v9664_v49 = vmul.f32 %v17178_v13, %v9600_v30  ;;  %v18607_v40 = vld [vmem:[#allocation133_spill] sm:$0xff]  ;;  %v18612_v30 = vld [vmem:[#allocation119_spill] sm:$0xff] }
0x1086   : > { %v10426_v23 = vadd.f32 1.0, %v10362_v0  ;;  %v10364_v34 = vsel %vm10236_vm4, %v10300_v19, %v10172_v41  ;;  %v9410_v42 = vmul.f32 %v17316_v11, %v9346_v1  ;;  %v9348_v7 = vadd.f32 -1.4531521, %v9284_v14  ;;  %v18608_v55 = vld [vmem:[#allocation125_spill] sm:$0xff]  ;;  %v18611_v41 = vld [vmem:[#allocation82_spill] sm:$0xff]  ;;  %v18613_v1 = vld [vmem:[#allocation52_spill] sm:$0xff] }
0x1087   : > { %10837 = vmatprep.mubr.f32.mxu0 %v10488_v58  ;;  %v10428_v28 = vadd.f32 1.0, %v10364_v34  ;;  %v9790_v12 = vmul.f32 %v17173_v47, %v9726_v46  ;;  %v9728_v43 = vadd.f32 0.2548296, %v9664_v49  ;;  %v9286_v10 = vmul.f32 1.0614054, %v18607_v40  ;;  %v18610_v18 = vld [vmem:[#allocation117_spill] sm:$0xff] }
0x1088   : > { %vm10240_vm6 = vcmp.lt.f32.partialorder %v18608_v55, 0.0  ;;  %10838 = vmatmul.mubr.f32.gmra.mxu0 %v18609_v26  ;;  %v10490_v63 = vmul.f32 %v10426_v23, %v18610_v18  ;;  %v9474_v32 = vadd.f32 1.4214138, %v9410_v42  ;;  %v9412_v44 = vmul.f32 %v17329_v38, %v9348_v7  ;;  %v18614_v34 = vld [vmem:[#allocation38_spill] sm:$0xff]  ;;  %v18615_v7 = vld [vmem:[#allocation59_spill] sm:$0xff]  ;;  %v18620_v55 = vld [vmem:[#allocation44_spill] sm:$0xff] }
0x1089   : > { %v9288_v56 = vmul.f32 1.0614054, %v18611_v41  ;;  %v10492_v19 = vmul.f32 %v10428_v28, %v18612_v30  ;;  %v10110_v14 = vmul.f32 %v18613_v1, %v9790_v12  ;;  %v9792_v47 = vmul.f32 %v17178_v13, %v9728_v43  ;;  %v18616_v43 = vld [vmem:[#allocation25_spill] sm:$0xff] }
0x108a   : > { %v9350_v22 = vadd.f32 -1.4531521, %v9286_v10  ;;  %10697 = vmatprep.mubr.f32.mxu1 %v10490_v63  ;;  %v9538_v58 = vmul.f32 %v17316_v11, %v9474_v32  ;;  %v9476_v0 = vadd.f32 1.4214138, %v9412_v44  ;;  %v9290_v49 = vmul.f32 1.0614054, %v17491_v50  ;;  %v17780_v23 = vpop.eup %13222 }
0x108b   : > { %v9352_v46 = vadd.f32 -1.4531521, %v9288_v56  ;;  %10842 = vmatprep.mubr.f32.mxu0 %v10492_v19  ;;  %10698 = vmatmul.mubr.f32.gmra.mxu1 %v18614_v34  ;;  %v10174_v42 = vsub.f32 1.0, %v10110_v14  ;;  %v10112_v28 = vmul.f32 %v18615_v7, %v9792_v47  ;;  %v9292_v13 = vmul.f32 1.0614054, %v17581_v20 }
0x108c   : > { %v9414_v12 = vmul.f32 %v18607_v40, %v9350_v22  ;;  %10843 = vmatmul.mubr.f32.gmra.mxu0 %v18616_v43  ;;  %v9602_v10 = vadd.f32 -0.28449672, %v9538_v58  ;;  %v9540_v26 = vmul.f32 %v17329_v38, %v9476_v0  ;;  %v9354_v63 = vadd.f32 -1.4531521, %v9290_v49 }
0x108d   : > { %v9416_v18 = vmul.f32 %v18611_v41, %v9352_v46  ;;  %v10302_v32 = vsub.f32 0.0, %v10174_v42  ;;  %v10176_v44 = vsub.f32 1.0, %v10112_v28  ;;  %v9356_v30 = vadd.f32 -1.4531521, %v9292_v13  ;;  %v18617_v13 = vld [vmem:[#allocation50_spill] sm:$0xff] }
0x108e   : > { %v9478_v56 = vadd.f32 1.4214138, %v9414_v12  ;;  %v9666_v19 = vmul.f32 %v17316_v11, %v9602_v10  ;;  %v9604_v1 = vadd.f32 -0.28449672, %v9540_v26  ;;  %v9418_v47 = vmul.f32 %v17491_v50, %v9354_v63  ;;  %v18618_v26 = vld [vmem:[#allocation51_spill] sm:$0xff] }
0x108f   : > { %v9480_v14 = vadd.f32 1.4214138, %v9416_v18  ;;  %v10366_v22 = vsel %vm10238_vm5, %v10302_v32, %v10174_v42  ;;  %v10304_v34 = vsub.f32 0.0, %v10176_v44  ;;  %v9420_v0 = vmul.f32 %v17581_v20, %v9356_v30  ;;  %v17797_v12 = vpop.eup %13224  ;;  %v18619_v30 = vld [vmem:[#allocation42_spill] sm:$0xff] }
0x1090   : > { %v9542_v58 = vmul.f32 %v18607_v40, %v9478_v56  ;;  %v10430_v46 = vadd.f32 1.0, %v10366_v22  ;;  %v9730_v49 = vadd.f32 0.2548296, %v9666_v19  ;;  %v9668_v7 = vmul.f32 %v17329_v38, %v9604_v1 }
0x1091   : > { %v9544_v28 = vmul.f32 %v18611_v41, %v9480_v14  ;;  %vm10242_vm7 = vcmp.lt.f32.partialorder %v18617_v13, 0.0  ;;  %v10368_v43 = vsel %vm10240_vm6, %v10304_v34, %v10176_v44  ;;  %v9482_v42 = vadd.f32 1.4214138, %v9418_v47  ;;  %v18621_v47 = vld [vmem:[#allocation63_spill] sm:$0xff] }
0x1092   : > { %v9606_v35 = vadd.f32 -0.28449672, %v9542_v58  ;;  %v9484_v10 = vadd.f32 1.4214138, %v9420_v0  ;;  %v10494_v18 = vmul.f32 %v10430_v46, %v18618_v26  ;;  %v10432_v63 = vadd.f32 1.0, %v10368_v43  ;;  %v18623_v43 = vld [vmem:[#allocation56_spill] sm:$0xff] }
0x1093   : > { %v9794_v32 = vmul.f32 %v17316_v11, %v9730_v49  ;;  %v9732_v56 = vadd.f32 0.2548296, %v9668_v7  ;;  %vm10244_vm8 = vcmp.lt.f32.partialorder %v18619_v30, 0.0  ;;  %v9608_v1 = vadd.f32 -0.28449672, %v9544_v28  ;;  %v18622_v11 = vld [vmem:[#allocation67_spill] sm:$0xff] }
0x1094   : > { %v9670_v19 = vmul.f32 %v18607_v40, %v9606_v35  ;;  %v9546_v14 = vmul.f32 %v17491_v50, %v9482_v42  ;;  %v9548_v22 = vmul.f32 %v17581_v20, %v9484_v10  ;;  %10702 = vmatprep.mubr.f32.mxu1 %v10494_v18  ;;  %v10496_v44 = vmul.f32 %v10432_v63, %v18620_v55  ;;  %v18624_v42 = vld [vmem:[#allocation132_spill] sm:$0xff]  ;;  %v18625_v63 = vld [vmem:[#allocation127_spill] sm:$0xff]  ;;  %v18631_v30 = vld [vmem:[#allocation62_spill] sm:$0xff] }
0x1095   : > { %v10114_v34 = vmul.f32 %v18621_v47, %v9794_v32  ;;  %v9796_v58 = vmul.f32 %v17329_v38, %v9732_v56  ;;  %v9294_v0 = vmul.f32 1.0614054, %v17683_v60  ;;  %10703 = vmatmul.mubr.f32.gmra.mxu1 %v18622_v11  ;;  %v9672_v49 = vmul.f32 %v18611_v41, %v9608_v1  ;;  %v18626_v1 = vld [vmem:[#allocation47_spill] sm:$0xff]  ;;  %v18627_v47 = vld [vmem:[#allocation46_spill] sm:$0xff] }
0x1096   : > { %v9734_v46 = vadd.f32 0.2548296, %v9670_v19  ;;  %v9610_v7 = vadd.f32 -0.28449672, %v9546_v14  ;;  %v9612_v28 = vadd.f32 -0.28449672, %v9548_v22  ;;  %10847 = vmatprep.mubr.f32.mxu0 %v10496_v44 }
0x1097   : > { %vm10246_vm9 = vcmp.lt.f32.partialorder %v18623_v43, 0.0  ;;  %v10178_v35 = vsub.f32 1.0, %v10114_v34  ;;  %v10116_v10 = vmul.f32 %v18624_v42, %v9796_v58  ;;  %v9358_v26 = vadd.f32 -1.4531521, %v9294_v0  ;;  %10848 = vmatmul.mubr.f32.gmra.mxu0 %v18625_v63 }
0x1098   : > { %v9296_v18 = vmul.f32 1.0614054, %v17693_v37  ;;  %v9798_v38 = vmul.f32 %v18607_v40, %v9734_v46  ;;  %v9736_v32 = vadd.f32 0.2548296, %v9672_v49  ;;  %v9674_v56 = vmul.f32 %v17491_v50, %v9610_v7 }
0x1099   : > { %v9676_v19 = vmul.f32 %v17581_v20, %v9612_v28  ;;  %vm10248_vm10 = vcmp.lt.f32.partialorder %v18626_v1, 0.0  ;;  %v10306_v14 = vsub.f32 0.0, %v10178_v35  ;;  %v10180_v22 = vsub.f32 1.0, %v10116_v10  ;;  %v18628_v28 = vld [vmem:[#allocation54_spill] sm:$0xff] }
0x109a   : > { %v9422_v55 = vmul.f32 %v17683_v60, %v9358_v26  ;;  %v9360_v44 = vadd.f32 -1.4531521, %v9296_v18  ;;  %v10118_v34 = vmul.f32 %v18627_v47, %v9798_v38  ;;  %v9800_v58 = vmul.f32 %v18611_v41, %v9736_v32  ;;  %v18629_v26 = vld [vmem:[#allocation40_spill] sm:$0xff]  ;;  %v18630_v32 = vld [vmem:[#allocation45_spill] sm:$0xff] }
0x109b   : > { %v9738_v0 = vadd.f32 0.2548296, %v9674_v56  ;;  %v9740_v11 = vadd.f32 0.2548296, %v9676_v19  ;;  %v10370_v40 = vsel %vm10242_vm7, %v10306_v14, %v10178_v35  ;;  %v10308_v46 = vsub.f32 0.0, %v10180_v22 }
0x109c   : > { %v9486_v49 = vadd.f32 1.4214138, %v9422_v55  ;;  %v9424_v7 = vmul.f32 %v17693_v37, %v9360_v44  ;;  %vm10250_vm11 = vcmp.lt.f32.partialorder %v18628_v28, 0.0  ;;  %vm10252_vm12 = vcmp.lt.f32.partialorder %v17397_v59, 0.0 }
0x109d   : > { %v10434_v42 = vadd.f32 1.0, %v10370_v40  ;;  %v10182_v10 = vsub.f32 1.0, %v10118_v34  ;;  %v10120_v18 = vmul.f32 %v18629_v26, %v9800_v58  ;;  %v9802_v63 = vmul.f32 %v17491_v50, %v9738_v0  ;;  %v18634_v26 = vld [vmem:[#allocation128_spill] sm:$0xff] }
0x109e   : > { %v10372_v41 = vsel %vm10244_vm8, %v10308_v46, %v10180_v22  ;;  %v9804_v13 = vmul.f32 %v17581_v20, %v9740_v11  ;;  %v9550_v35 = vmul.f32 %v17683_v60, %v9486_v49  ;;  %v9488_v38 = vadd.f32 1.4214138, %v9424_v7  ;;  %v18632_v11 = vld [vmem:[#allocation130_spill] sm:$0xff] }
0x109f   : > { %v10498_v56 = vmul.f32 %v10434_v42, %v18630_v32  ;;  %v10436_v19 = vadd.f32 1.0, %v10372_v41  ;;  %v10310_v14 = vsub.f32 0.0, %v10182_v10  ;;  %v10184_v55 = vsub.f32 1.0, %v10120_v18 }
0x10a0   : > { %v10122_v44 = vmul.f32 %v17571_v4, %v9802_v63  ;;  %v10124_v47 = vmul.f32 %v17591_v48, %v9804_v13  ;;  %v9614_v34 = vadd.f32 -0.28449672, %v9550_v35  ;;  %v9552_v50 = vmul.f32 %v17693_v37, %v9488_v38  ;;  %v11701_v35 = vpop.f32.mrf.mxu1 }
0x10a1   : > { %10707 = vmatprep.mubr.f32.mxu1 %v10498_v56  ;;  %v10500_v22 = vmul.f32 %v10436_v19, %v18631_v30  ;;  %v10374_v20 = vsel %vm10246_vm9, %v10310_v14, %v10182_v10  ;;  %v10312_v58 = vsub.f32 0.0, %v10184_v55  ;;  %v9298_v0 = vmul.f32 1.0614054, %v17746_v2  ;;  %v18633_v10 = vld [vmem:[#allocation73_spill] sm:$0xff] }
0x10a2   : > { %10708 = vmatmul.mubr.f32.gmra.mxu1 %v18632_v11  ;;  %v10438_v40 = vadd.f32 1.0, %v10374_v20  ;;  %v10186_v46 = vsub.f32 1.0, %v10122_v44  ;;  %v10188_v49 = vsub.f32 1.0, %v10124_v47  ;;  %v9678_v4 = vmul.f32 %v17683_v60, %v9614_v34  ;;  %v18635_v14 = vld [vmem:[#allocation129_spill] sm:$0xff]  ;;  %v11702_v34 = vpop.f32.mrf.mxu1 }
0x10a3   : > { %vm10253_vm13 = vcmp.lt.f32.partialorder %v17448_v53, 0.0  ;;  %10852 = vmatprep.mubr.f32.mxu0 %v10500_v22  ;;  %v10376_v48 = vsel %vm10248_vm10, %v10312_v58, %v10184_v55  ;;  %v9616_v7 = vadd.f32 -0.28449672, %v9552_v50  ;;  %v9362_v42 = vadd.f32 -1.4531521, %v9298_v0  ;;  %v11781_v58 = vpop.f32.mrf.mxu0 }
0x10a4   : > { %v9300_v43 = vmul.f32 1.0614054, %v17780_v23  ;;  %10853 = vmatmul.mubr.f32.gmra.mxu0 %v18633_v10  ;;  %v10502_v18 = vmul.f32 %v10438_v40, %v18634_v26  ;;  %v10440_v63 = vadd.f32 1.0, %v10376_v48  ;;  %v10314_v41 = vsub.f32 0.0, %v10186_v46 }
0x10a5   : > { %v10316_v13 = vsub.f32 0.0, %v10188_v49  ;;  %vm10255_vm14 = vcmp.lt.f32.partialorder %v17472_v54, 0.0  ;;  %v9742_v38 = vadd.f32 0.2548296, %v9678_v4  ;;  %v9680_v32 = vmul.f32 %v17693_v37, %v9616_v7  ;;  %v11782_v4 = vpop.f32.mrf.mxu0 }
0x10a6   : > { %v9426_v1 = vmul.f32 %v17746_v2, %v9362_v42  ;;  %v9364_v56 = vadd.f32 -1.4531521, %v9300_v43  ;;  %v9809_v19 = vmul.f32 %v17644_v62, %v17743_v31  ;;  %10712 = vmatprep.mubr.f32.mxu1 %v10502_v18  ;;  %v10504_v55 = vmul.f32 %v10440_v63, %v18635_v14  ;;  %v17867_v62 = vld [vmem:[%s18029_s13] ss:$0 sm:$0xff] }
0x10a7   : > { %v10378_v44 = vsel %vm10250_vm11, %v10314_v41, %v10186_v46  ;;  %v10380_v47 = vsel %vm10252_vm12, %v10316_v13, %v10188_v49  ;;  %10713 = vmatmul.mubr.f32.gmra.mxu1 %v17533_v27  ;;  %v9806_v22 = vmul.f32 %v17683_v60, %v9742_v38  ;;  %v9744_v20 = vadd.f32 0.2548296, %v9680_v32  ;;  %v18636_v27 = vld [vmem:[#allocation131_spill] sm:$0xff]  ;;  %v18637_v60 = vld [vmem:[#allocation134_spill] sm:$0xff]  ;;  %v18640_v41 = vld [vmem:[#allocation61_spill] sm:$0xff] }
0x10a8   : > { %v10442_v50 = vadd.f32 1.0, %v10378_v44  ;;  %v10444_v30 = vadd.f32 1.0, %v10380_v47  ;;  %v9811_v31 = vmul.f32 %v17648_v8, %v17748_v16  ;;  %10857 = vmatprep.mubr.f32.mxu0 %v10504_v55  ;;  %v9490_v59 = vadd.f32 1.4214138, %v9426_v1 }
0x10a9   : > { %v9428_v28 = vmul.f32 %v17780_v23, %v9364_v56  ;;  %v11703_v0 = vadd.f32 %v11702_v34, %v11701_v35  ;;  %10858 = vmatmul.mubr.f32.gmra.mxu0 %v17607_v51  ;;  %v10126_v46 = vmul.f32 %v17689_v33, %v9806_v22  ;;  %v9808_v49 = vmul.f32 %v17693_v37, %v9744_v20 }
0x10aa   : > { %v10506_v11 = vmul.f32 %v10442_v50, %v18636_v27  ;;  %v10508_v40 = vmul.f32 %v10444_v30, %v18637_v60  ;;  %v9554_v48 = vmul.f32 %v17746_v2, %v9490_v59  ;;  %v11783_v16 = vadd.f32 %v11782_v4, %v11781_v58  ;;  %v18641_v58 = vld [vmem:[#allocation58_spill] sm:$0xff]  ;;  %v18643_v27 = vld [vmem:[#allocation76_spill] sm:$0xff]  ;;  %v18646_v4 = vld [vmem:[#allocation53_spill] sm:$0xff] }
0x10ab   : > { %v9492_v7 = vadd.f32 1.4214138, %v9428_v28  ;;  %v10655_v8 = vadd.f32 %v11703_v0, %v17867_v62  ;;  %v8846_v42 = vmul.f32 0.5, %v17538_v24  ;;  %v10129_v43 = vmul.f32 %v17704_v3, %v9809_v19  ;;  %v18644_v60 = vld [vmem:[#allocation74_spill] sm:$0xff] }
0x10ac   : > { %10717 = vmatprep.mubr.f32.mxu1 %v10506_v11  ;;  %10862 = vmatprep.mubr.f32.mxu0 %v10508_v40  ;;  %v10190_v51 = vsub.f32 1.0, %v10126_v46  ;;  %v10128_v10 = vmul.f32 %v17700_v36, %v9808_v49  ;;  %v18638_v33 = vsub.f32 1.0, %v17637_v25  ;;  %v9618_v26 = vadd.f32 -0.28449672, %v9554_v48  ;;  %v18645_v46 = vld [vmem:[#allocation68_spill] sm:$0xff] }
0x10ad   : > { %10718 = vmatmul.mubr.f32.gmra.mxu1 %v17632_v29  ;;  %v9556_v18 = vmul.f32 %v17780_v23, %v9492_v7  ;;  %v10800_v63 = vadd.f32 %v11783_v16, %v10655_v8  ;;  %vm10254_vm15 = vcmp.lt.f32.partialorder %v17566_v15, 0.0  ;;  %v10131_v24 = vmul.f32 %v17706_v45, %v9811_v31  ;;  %10863 = vmatmul.mubr.f32.gmra.mxu0 %v17661_v6  ;;  %v18647_v8 = vld [vmem:[#allocation41_spill] sm:$0xff] }
0x10ae   : > { %v10381_v37 = vsel %vm10253_vm13, %v17666_v5, %v18638_v33  ;;  %v10318_v36 = vsub.f32 0.0, %v10190_v51  ;;  %v10192_v3 = vsub.f32 1.0, %v10128_v10  ;;  %v18639_v25 = vsub.f32 1.0, %v17669_v61  ;;  %v18648_v10 = vld [vmem:[#allocation57_spill] sm:$0xff] }
0x10af   : > { %v9682_v29 = vmul.f32 %v17746_v2, %v9618_v26  ;;  %v9620_v5 = vadd.f32 -0.28449672, %v9556_v18  ;;  %v10878_v13 = vadd.f32 %v10800_v63, %v18640_v41  ;;  %v10445_v35 = vadd.f32 1.0, %v10381_v37 }
0x10b0   : > { %v10383_v53 = vsel %vm10255_vm14, %v17736_v52, %v18639_v25  ;;  %v10193_v15 = vsub.f32 1.0, %v10129_v43  ;;  %v10382_v38 = vsel %vm10254_vm15, %v10318_v36, %v10190_v51  ;;  %v10320_v45 = vsub.f32 0.0, %v10192_v3 }
0x10b1   : > { %vm10256_vm0 = vcmp.lt.f32.partialorder %v17585_v21, 0.0  ;;  %v10446_v6 = vadd.f32 1.0, %v10382_v38  ;;  %v9746_v32 = vadd.f32 0.2548296, %v9682_v29  ;;  %v9684_v1 = vmul.f32 %v17780_v23, %v9620_v5  ;;  %10894 = vst [vmem:[%s17903_s20] sm:$0xff] %v10878_v13  ;;  %v18649_v5 = vld [vmem:[#allocation64_spill] sm:$0xff] }
0x10b2   : > { %v10447_v54 = vadd.f32 1.0, %v10383_v53  ;;  %v8848_v61 = vmul.f32 0.5, %v17561_v39  ;;  %v10195_v52 = vsub.f32 1.0, %v10131_v24  ;;  %v10384_v56 = vsel %vm10256_vm0, %v10320_v45, %v10192_v3 }
0x10b3   : > { %v10510_v19 = vmul.f32 %v10446_v6, %v8846_v42  ;;  %v10448_v14 = vadd.f32 1.0, %v10384_v56  ;;  %v9810_v55 = vmul.f32 %v17746_v2, %v9746_v32  ;;  %v9748_v44 = vadd.f32 0.2548296, %v9684_v1 }
0x10b4   : > { %v10509_v21 = vmul.f32 %v10445_v35, %v17627_v17  ;;  %v8847_v47 = vmul.f32 0.5, %v17454_v9  ;;  %v10321_v34 = vsub.f32 0.0, %v10193_v15  ;;  %v10323_v39 = vsub.f32 0.0, %v10195_v52  ;;  %v18642_v17 = vld [vmem:[#allocation66_spill] sm:$0xff] }
0x10b5   : > { %10722 = vmatprep.mubr.f32.mxu1 %v10510_v19  ;;  %v10512_v50 = vmul.f32 %v10448_v14, %v8848_v61  ;;  %v10130_v30 = vmul.f32 %v17757_v57, %v9810_v55  ;;  %v9812_v22 = vmul.f32 %v17780_v23, %v9748_v44  ;;  %vm10257_vm1 = vcmp.lt.f32.partialorder %v18641_v58, 0.0  ;;  %v18650_v55 = vld [vmem:[#allocation24_spill] sm:$0xff] }
0x10b6   : > { %v10511_v20 = vmul.f32 %v10447_v54, %v8847_v47  ;;  %10723 = vmatmul.mubr.f32.gmra.mxu1 %v10509_v21  ;;  %v10385_v59 = vsel %vm10257_vm1, %v10321_v34, %v10193_v15  ;;  %vm10259_vm2 = vcmp.lt.f32.partialorder %v18642_v17, 0.0  ;;  %vm10258_vm3 = vcmp.lt.f32.partialorder %v18643_v27, 0.0  ;;  %v18651_v34 = vld [vmem:[#allocation26_spill] sm:$0xff]  ;;  %v18652_v17 = vld [vmem:[#allocation31_spill] sm:$0xff] }
0x10b7   : > { %10867 = vmatprep.mubr.f32.mxu0 %v10512_v50  ;;  %v10194_v31 = vsub.f32 1.0, %v10130_v30  ;;  %v10132_v2 = vmul.f32 %v17797_v12, %v9812_v22  ;;  %v10387_v0 = vsel %vm10259_vm2, %v10323_v39, %v10195_v52  ;;  %v10449_v57 = vadd.f32 1.0, %v10385_v59 }
0x10b8   : > { %10868 = vmatmul.mubr.f32.gmra.mxu0 %v10511_v20  ;;  %v8850_v40 = vmul.f32 0.5, %v18644_v60  ;;  %vm10260_vm4 = vcmp.lt.f32.partialorder %v18645_v46, 0.0  ;;  %v8849_v48 = vmul.f32 0.5, %v18646_v4  ;;  %v10451_v12 = vadd.f32 1.0, %v10387_v0  ;;  %v18653_v46 = vld [vmem:[#allocation27_spill] sm:$0xff] }
0x10b9   : > { %v10322_v9 = vsub.f32 0.0, %v10194_v31  ;;  %v10196_v28 = vsub.f32 1.0, %v10132_v2  ;;  %v8852_v16 = vmul.f32 0.5, %v18647_v8  ;;  %v8851_v33 = vmul.f32 0.5, %v18648_v10 }
0x10ba   : > { %v10513_v51 = vmul.f32 %v10449_v57, %v8849_v48 }
0x10bb   : > { %v10386_v23 = vsel %vm10258_vm3, %v10322_v9, %v10194_v31  ;;  %v10324_v11 = vsub.f32 0.0, %v10196_v28  ;;  %v10515_v26 = vmul.f32 %v10451_v12, %v8851_v33 }
0x10bc   : > { %v10450_v49 = vadd.f32 1.0, %v10386_v23  ;;  %v11704_v18 = vpop.f32.mrf.mxu1 }
0x10bd   : > { %v10388_v7 = vsel %vm10260_vm4, %v10324_v11, %v10196_v28 }
0x10be   : > { %v10514_v42 = vmul.f32 %v10450_v49, %v8850_v40  ;;  %v10452_v43 = vadd.f32 1.0, %v10388_v7  ;;  %v11705_v24 = vpop.f32.mrf.mxu1 }
0x10bf   : > { %v11784_v63 = vpop.f32.mrf.mxu0  ;;  %v11706_v36 = vadd.f32 %v11705_v24, %v11704_v18 }
0x10c0   : > { %10727 = vmatprep.mubr.f32.mxu1 %v10514_v42  ;;  %v10516_v37 = vmul.f32 %v10452_v43, %v8852_v16 }
0x10c1   : > { %10728 = vmatmul.mubr.f32.gmra.mxu1 %v10513_v51  ;;  %v11785_v3 = vpop.f32.mrf.mxu0  ;;  %v10660_v25 = vadd.f32 %v11706_v36, %v17867_v62  ;;  %v18654_v51 = vld [vmem:[#allocation29_spill] sm:$0xff] }
0x10c2   : > { %10872 = vmatprep.mubr.f32.mxu0 %v10516_v37  ;;  %v11786_v53 = vadd.f32 %v11785_v3, %v11784_v63 }
0x10c3   : > { %10873 = vmatmul.mubr.f32.gmra.mxu0 %v10515_v26 }
0x10c4   : > { %v10805_v29 = vadd.f32 %v11786_v53, %v10660_v25  ;;  %v18655_v25 = vld [vmem:[#allocation28_spill] sm:$0xff] }
0x10c6   : > { %v10879_v41 = vadd.f32 %v10805_v29, %v18649_v5 }
0x10c8   : > { %10895 = vst [vmem:[%s17903_s20 + $0x8] sm:$0xff] %v10879_v41 }
0x10e9   : > { %v11707_v13 = vpop.f32.mrf.mxu1 }
0x10eb   : > { %v11708_v35 = vpop.f32.mrf.mxu1 }
0x10ec   : > { %v11709_v38 = vadd.f32 %v11708_v35, %v11707_v13 }
0x10ed   : > { %v11787_v15 = vpop.f32.mrf.mxu0 }
0x10ee   : > { %v11710_v45 = vpop.f32.mrf.mxu1  ;;  %v10665_v6 = vadd.f32 %v11709_v38, %v17867_v62 }
0x10ef   : > { %v11788_v32 = vpop.f32.mrf.mxu0 }
0x10f0   : > { %v11789_v1 = vadd.f32 %v11788_v32, %v11787_v15  ;;  %v11711_v54 = vpop.f32.mrf.mxu1 }
0x10f1   : > { %v11790_v61 = vpop.f32.mrf.mxu0  ;;  %v11712_v52 = vadd.f32 %v11711_v54, %v11710_v45 }
0x10f2   : > { %v10810_v56 = vadd.f32 %v11789_v1, %v10665_v6 }
0x10f3   : > { %v10670_v19 = vadd.f32 %v11712_v52, %v17867_v62  ;;  %v11791_v14 = vpop.f32.mrf.mxu0  ;;  %v18656_v52 = vld [vmem:[#allocation30_spill] sm:$0xff] }
0x10f4   : > { %v10880_v44 = vadd.f32 %v10810_v56, %v18650_v55  ;;  %v11792_v21 = vadd.f32 %v11791_v14, %v11790_v61 }
0x10f6   : > { %10896 = vst [vmem:[%s17903_s20 + $0x10] sm:$0xff] %v10880_v44  ;;  %v10815_v47 = vadd.f32 %v11792_v21, %v10670_v19  ;;  %v18657_v44 = vld [vmem:[#allocation35_spill] sm:$0xff] }
0x10f8   : > { %v10881_v50 = vadd.f32 %v10815_v47, %v18651_v34  ;;  %v11713_v30 = vpop.f32.mrf.mxu1 }
0x10fa   : > { %10897 = vst [vmem:[%s17903_s20 + $0x18] sm:$0xff] %v10881_v50  ;;  %v11714_v22 = vpop.f32.mrf.mxu1 }
0x10fb   : > { %v11715_v20 = vadd.f32 %v11714_v22, %v11713_v30 }
0x10fd   : > { %v10675_v58 = vadd.f32 %v11715_v20, %v17867_v62 }
0x10fe   : > { %v11793_v39 = vpop.f32.mrf.mxu0 }
0x1100   : > { %v11794_v31 = vpop.f32.mrf.mxu0 }
0x1101   : > { %v11795_v2 = vadd.f32 %v11794_v31, %v11793_v39  ;;  %v18658_v31 = vld [vmem:[#allocation33_spill] sm:$0xff] }
0x1103   : > { %v10820_v59 = vadd.f32 %v11795_v2, %v10675_v58 }
0x1105   : > { %v10882_v9 = vadd.f32 %v10820_v59, %v18652_v17 }
0x1107   : > { %10898 = vst [vmem:[%s17903_s20 + $0x20] sm:$0xff] %v10882_v9 }
0x110a   : > { %v11716_v28 = vpop.f32.mrf.mxu1 }
0x110b   : > { %v11796_v0 = vpop.f32.mrf.mxu0 }
0x110c   : > { %v11717_v27 = vpop.f32.mrf.mxu1 }
0x110d   : > { %v11718_v57 = vadd.f32 %v11717_v27, %v11716_v28  ;;  %v11797_v23 = vpop.f32.mrf.mxu0 }
0x110e   : > { %v11798_v60 = vadd.f32 %v11797_v23, %v11796_v0 }
0x110f   : > { %v10680_v11 = vadd.f32 %v11718_v57, %v17867_v62 }
0x1111   : > { %v10825_v40 = vadd.f32 %v11798_v60, %v10680_v11 }
0x1113   : > { %v10883_v49 = vadd.f32 %v10825_v40, %v18653_v46 }
0x1115   : > { %10899 = vst [vmem:[%s17903_s20 + $0x28] sm:$0xff] %v10883_v49  ;;  %v18659_v49 = vld [vmem:[#allocation32_spill] sm:$0xff] }
0x1118   : > { %v11719_v4 = vpop.f32.mrf.mxu1 }
0x111a   : > { %v11720_v48 = vpop.f32.mrf.mxu1 }
0x111b   : > { %v11799_v12 = vpop.f32.mrf.mxu0  ;;  %v11721_v7 = vadd.f32 %v11720_v48, %v11719_v4 }
0x111d   : > { %v10685_v8 = vadd.f32 %v11721_v7, %v17867_v62  ;;  %v11800_v16 = vpop.f32.mrf.mxu0 }
0x111e   : > { %v11801_v42 = vadd.f32 %v11800_v16, %v11799_v12 }
0x1120   : > { %v10830_v43 = vadd.f32 %v11801_v42, %v10685_v8 }
0x1122   : > { %v10884_v10 = vadd.f32 %v10830_v43, %v18654_v51 }
0x1124   : > { %10900 = vst [vmem:[%s17903_s20 + $0x30] sm:$0xff] %v10884_v10 }
0x1134   : > { %v11722_v33 = vpop.f32.mrf.mxu1 }
0x1136   : > { %v11723_v37 = vpop.f32.mrf.mxu1 }
0x1137   : > { %v11802_v26 = vpop.f32.mrf.mxu0  ;;  %v11724_v18 = vadd.f32 %v11723_v37, %v11722_v33  ;;  %v18660_v33 = vld [vmem:[#allocation34_spill] sm:$0xff] }
0x1139   : > { %v10690_v63 = vadd.f32 %v11724_v18, %v17867_v62  ;;  %v11803_v24 = vpop.f32.mrf.mxu0 }
0x113a   : > { %v11804_v36 = vadd.f32 %v11803_v24, %v11802_v26  ;;  %v18661_v24 = vld [vmem:[#allocation37_spill] sm:$0xff] }
0x113c   : > { %v10835_v3 = vadd.f32 %v11804_v36, %v10690_v63 }
0x113e   : > { %v10885_v53 = vadd.f32 %v10835_v3, %v18655_v25 }
0x1140   : > { %10901 = vst [vmem:[%s17903_s20 + $0x38] sm:$0xff] %v10885_v53 }
0x1145   : > { %v11725_v29 = vpop.f32.mrf.mxu1 }
0x1147   : > { %v11726_v5 = vpop.f32.mrf.mxu1 }
0x1148   : > { %v11805_v41 = vpop.f32.mrf.mxu0  ;;  %v11727_v13 = vadd.f32 %v11726_v5, %v11725_v29 }
0x114a   : > { %v10695_v35 = vadd.f32 %v11727_v13, %v17867_v62  ;;  %v11806_v15 = vpop.f32.mrf.mxu0 }
0x114b   : > { %v11807_v38 = vadd.f32 %v11806_v15, %v11805_v41  ;;  %v11728_v45 = vpop.f32.mrf.mxu1  ;;  %v18662_v15 = vld [vmem:[#allocation39_spill] sm:$0xff] }
0x114c   : > { %v11808_v6 = vpop.f32.mrf.mxu0 }
0x114d   : > { %v10840_v32 = vadd.f32 %v11807_v38, %v10695_v35  ;;  %v11729_v1 = vpop.f32.mrf.mxu1 }
0x114e   : > { %v11730_v54 = vadd.f32 %v11729_v1, %v11728_v45  ;;  %v11809_v61 = vpop.f32.mrf.mxu0 }
0x114f   : > { %v10886_v56 = vadd.f32 %v10840_v32, %v18656_v52  ;;  %v11810_v14 = vadd.f32 %v11809_v61, %v11808_v6 }
0x1150   : > { %v10700_v19 = vadd.f32 %v11730_v54, %v17867_v62 }
0x1151   : > { %10902 = vst [vmem:[%s17903_s20 + $0x40] sm:$0xff] %v10886_v56 }
0x1152   : > { %v10845_v55 = vadd.f32 %v11810_v14, %v10700_v19  ;;  %v18664_v19 = vld [vmem:[#allocation36_spill] sm:$0xff] }
0x1154   : > { %v10887_v21 = vadd.f32 %v10845_v55, %v18657_v44 }
0x1155   : > { %v11731_v47 = vpop.f32.mrf.mxu1 }
0x1156   : > { %10903 = vst [vmem:[%s17903_s20 + $0x48] sm:$0xff] %v10887_v21 }
0x1157   : > { %v11811_v34 = vpop.f32.mrf.mxu0  ;;  %v11732_v50 = vpop.f32.mrf.mxu1 }
0x1158   : > { %v11733_v30 = vadd.f32 %v11732_v50, %v11731_v47 }
0x1159   : > { %v11812_v22 = vpop.f32.mrf.mxu0 }
0x115a   : > { %v10705_v20 = vadd.f32 %v11733_v30, %v17867_v62  ;;  %v11813_v39 = vadd.f32 %v11812_v22, %v11811_v34 }
0x115c   : > { %v10850_v58 = vadd.f32 %v11813_v39, %v10705_v20 }
0x115e   : > { %v10888_v2 = vadd.f32 %v10850_v58, %v18658_v31 }
0x1160   : > { %10904 = vst [vmem:[%s17903_s20 + $0x50] sm:$0xff] %v10888_v2 }
0x1162   : > { %v11734_v59 = vpop.f32.mrf.mxu1 }
0x1164   : > { %v11814_v17 = vpop.f32.mrf.mxu0  ;;  %v11735_v9 = vpop.f32.mrf.mxu1 }
0x1165   : > { %v11736_v28 = vadd.f32 %v11735_v9, %v11734_v59 }
0x1166   : > { %v11815_v0 = vpop.f32.mrf.mxu0 }
0x1167   : > { %v10710_v27 = vadd.f32 %v11736_v28, %v17867_v62  ;;  %v11816_v57 = vadd.f32 %v11815_v0, %v11814_v17  ;;  %v11737_v23 = vpop.f32.mrf.mxu1 }
0x1169   : > { %v10855_v11 = vadd.f32 %v11816_v57, %v10710_v27  ;;  %v11817_v60 = vpop.f32.mrf.mxu0  ;;  %v11738_v40 = vpop.f32.mrf.mxu1 }
0x116a   : > { %v11739_v46 = vadd.f32 %v11738_v40, %v11737_v23 }
0x116b   : > { %v10889_v4 = vadd.f32 %v10855_v11, %v18659_v49  ;;  %v11818_v48 = vpop.f32.mrf.mxu0 }
0x116c   : > { %v10715_v12 = vadd.f32 %v11739_v46, %v17867_v62  ;;  %v11819_v7 = vadd.f32 %v11818_v48, %v11817_v60 }
0x116d   : > { %v11740_v8 = vpop.f32.mrf.mxu1  ;;  %10905 = vst [vmem:[%s17903_s20 + $0x58] sm:$0xff] %v10889_v4  ;;  %v11820_v16 = vpop.f32.mrf.mxu0 }
0x116e   : > { %v10860_v42 = vadd.f32 %v11819_v7, %v10715_v12 }
0x116f   : > { %v11741_v43 = vpop.f32.mrf.mxu1  ;;  %v11821_v10 = vpop.f32.mrf.mxu0 }
0x1170   : > { %v11742_v51 = vadd.f32 %v11741_v43, %v11740_v8  ;;  %v10890_v37 = vadd.f32 %v10860_v42, %v18660_v33  ;;  %v11822_v18 = vadd.f32 %v11821_v10, %v11820_v16 }
0x1172   : > { %v10720_v26 = vadd.f32 %v11742_v51, %v17867_v62  ;;  %10906 = vst [vmem:[%s17903_s20 + $0x60] sm:$0xff] %v10890_v37 }
0x1174   : > { %v10865_v63 = vadd.f32 %v11822_v18, %v10720_v26 }
0x1176   : > { %v10891_v36 = vadd.f32 %v10865_v63, %v18661_v24  ;;  %v11743_v3 = vpop.f32.mrf.mxu1 }
0x1178   : > { %10907 = vst [vmem:[%s17903_s20 + $0x68] sm:$0xff] %v10891_v36  ;;  %v11823_v25 = vpop.f32.mrf.mxu0  ;;  %v11744_v53 = vpop.f32.mrf.mxu1 }
0x1179   : > { %v11745_v29 = vadd.f32 %v11744_v53, %v11743_v3 }
0x117a   : > { %v11824_v5 = vpop.f32.mrf.mxu0 }
0x117b   : > { %v10725_v41 = vadd.f32 %v11745_v29, %v17867_v62  ;;  %v11825_v13 = vadd.f32 %v11824_v5, %v11823_v25 }
0x117d   : > { %v10870_v35 = vadd.f32 %v11825_v13, %v10725_v41 }
0x117f   : > { %v10892_v38 = vadd.f32 %v10870_v35, %v18662_v15 }
0x1181   : > { %10908 = vst [vmem:[%s17903_s20 + $0x70] sm:$0xff] %v10892_v38  ;;  %v11746_v45 = vpop.f32.mrf.mxu1 }
0x1183   : > { %v11826_v6 = vpop.f32.mrf.mxu0  ;;  %v11747_v32 = vpop.f32.mrf.mxu1 }
0x1184   : > { %v11748_v1 = vadd.f32 %v11747_v32, %v11746_v45 }
0x1185   : > { %v11827_v54 = vpop.f32.mrf.mxu0 }
0x1186   : > { %v10730_v61 = vadd.f32 %v11748_v1, %v17867_v62  ;;  %v11828_v52 = vadd.f32 %v11827_v54, %v11826_v6 }
0x1188   : > { %v10875_v56 = vadd.f32 %v11828_v52, %v10730_v61 }
0x118a   : > { %v10893_v14 = vadd.f32 %v10875_v56, %v18664_v19 }
0x118c   : > { %10909 = vst [vmem:[%s17903_s20 + $0x78] sm:$0xff] %v10893_v14 }
0x118d   : > { %13439 = shalt.err (!%p13436_p3)
}
0x118e   : > { %s13440_s4 = scalar_lea.hbm %s17969_s3, 2048  ;;  %s13444_s6 = scalar_lea.hbm %s18663_s28, 4096 }
0x118f   : > { %p13441_p4 = scmp.ne.s32.totalorder %s17969_s3, %s13440_s4  ;;  %p13445_p0 = scmp.lt.s32.totalorder %s17969_s3, %s18663_s28 }
0x1190   : > { %p13446_p7 = scmp.lt.s32.totalorder %s13444_s6, %s13440_s4 }
0x1191   : > { %p13442_p6 = pnand %p13441_p4, %p18665_p8 }
0x1192   : > { %p13447_p2 = por %p13446_p7, %p13445_p0 }
0x1193   : > { %p13443_p12 = pneg %p13442_p6 }
0x1195   : > { %p13448_p9 = pnand %p13447_p2, %p13443_p12 }
0x1197   : > { %13451 = shalt.err (!%p13448_p9)
}
0x1198   : > { %s13520_s26 = smov 128   ;;  %s13521_s27 = smov 8  }
0x1199   : > { %12559 = dma.vmem_to_hbm [thread:$0]  (%p18665_p8), %s17971_s18, 2048, %s17969_s3, %s10911_s17, %s13520_s26, %s13520_s26, %s13521_s27  }
0x119a PF: > { %s10940_s5 = sand.u32 1, %s13490_s29   ;;  %p18666_p10 = scmp.ne.s32.totalorder %s18219_s25, 0 }
0x119b   : > { %p18667_p11 = scmp.ge.s32.totalorder %s13502_s16, 2  ;;  %s10941_s23 = scalar_lea.sflag [#allocation5], %s10940_s5 }
0x119d   : > { %p12585_p13 = pnand %p18667_p11, %p18666_p10 }
0x119f   : > { %p12586_p5 = pneg %p12585_p13 }
0x11a1   : > { %13485 = dma.done.wait (%p12586_p5), %s10941_s23, 2048  }
0x11a2   : > { %13487 = vsyncadd (%p12586_p5), %s10941_s23, 4294965248  ;;  %s18668_s16 = sld [smem:[#allocation22_spill]]  ;;  %s18671_s29 = smov %s13494_s30 }
0x11a3   : > { %s18669_s19 = sld [smem:[#allocation21_spill]] }
0x11a4   : > { %s18670_s15 = sld [smem:[#allocation23_spill]] }
0x11a8   : > { %p30_p1 = scmp.ge.s32.totalorder %s18668_s16, 4  }
0x11a9   : > { %s18672_s30 = smov %s18669_s19 }
0x11aa   :  { %32 = sbr.rel (!%p30_p1) target bundleno = 16 (0x10), region = 145 }
0x11af   :  { %10946 = vsyncpa [#allocation4], 1 }
0x11b0   :  { %10948 = vsyncpa [#allocation4 + $0x1], 1 }
0x11b1   :  { %10949 = vsyncpa [#allocation7], 1 }
0x11b2   :  { %10950 = vsyncpa [#allocation10], 1 }
0x11b3   :  { %10951 = vsyncpa [#allocation13], 1 }
0x11b4   :  { %10952 = vsyncpa [#allocation5], 1 }
0x11b5   :  { %10954 = vsyncpa [#allocation5 + $0x1], 1 }

</bundles_post_ra>
